<compile_context>
chip_gen: v5e
topology: v5e:2x2
jax: 0.10.0
libtpu: 0.0.40
codegen_flags: <defaults>
</compile_context>

<pallas_src>
import jax
import jax.numpy as jnp
from jax.experimental import pallas as pl
from jax.experimental.pallas import tpu as pltpu

H = 100            # true hidden / embedding dim (module hard-codes 100)
HP = 128           # lane-padded hidden dim
VOCAB = 31000      # embedding vocab
MLM_V = 30000      # mlm output classes
MLM_VP = 30720     # padded mlm classes (multiple of the 5120 vocab tile)
NSP_C = 2
NSP_CP = 128
GATES = 4 * HP     # gate blocks are 128-aligned, PyTorch order (i, f, g, o)
TN = 5120          # MLM vocab tile (30720 / 5120 = 6 grid steps)


# ----------------------------------------------------------------------------
# Kernels
# ----------------------------------------------------------------------------
def lstm_kernel(emb_ref, w_ih_ref, w_hh_ref, b_ref, out_ref):
    """LSTM recurrence.  emb_ref/out_ref: (S, B, HP) time-major.

    The x @ W_ih projection (plus bias) is hoisted out of the recurrence and done
    as one batched matmul; the unrolled loop only carries h @ W_hh on the serial path.
    Padded lanes (>= H) of h and c stay exactly 0 because the padded gate columns of
    W_ih/W_hh and the padded bias lanes are 0.
    """
    S, B, _ = emb_ref.shape
    w_hh = w_hh_ref[...]                                            # (HP, 4*HP)

    x_all = emb_ref[...].reshape(S * B, HP)
    xg = (jnp.dot(x_all, w_ih_ref[...], preferred_element_type=jnp.float32)
          + b_ref[...]).reshape(S, B, GATES)                        # (S, B, 4*HP)

    h = jnp.zeros((B, HP), jnp.float32)
    c = jnp.zeros((B, HP), jnp.float32)
    for t in range(S):                      # S is static -> fully unrolled
        gates = xg[t] + jnp.dot(h, w_hh, preferred_element_type=jnp.float32)
        i_g = jax.nn.sigmoid(gates[:, 0 * HP:1 * HP])
        f_g = jax.nn.sigmoid(gates[:, 1 * HP:2 * HP])
        g_g = jnp.tanh(gates[:, 2 * HP:3 * HP])
        o_g = jax.nn.sigmoid(gates[:, 3 * HP:4 * HP])
        c = f_g * c + i_g * g_g             # padded lanes stay exactly 0
        h = o_g * jnp.tanh(c)
        out_ref[t] = h


def mlm_fused_kernel(x_ref, w_ref, b_ref, tgt_ref, logits_ref, loss_ref,
                     m_sc, l_sc, t_sc):
    """Fused MLM projection + cross-entropy (online logsumexp over the vocab grid axis).

    x_ref: (R, HP) f32 masked hidden rows; w_ref: (HP, TN) bf16 vocab tile;
    b_ref: (1, TN) f32 bias tile (padded vocab columns carry -1e30, so no masking
    pass is needed); tgt_ref: (R, 1) int32 targets (ignore_index == 0).
    logits_ref: (R, TN) f32 output tile; loss_ref: (1, 1) scalar mean CE.
    """
    j = pl.program_id(0)
    tile_n = logits_ref.shape[1]

    @pl.when(j == 0)
    def _init():
        m_sc[...] = jnp.full_like(m_sc, -jnp.inf)
        l_sc[...] = jnp.zeros_like(l_sc)
        t_sc[...] = jnp.zeros_like(t_sc)

    x = x_ref[...].astype(jnp.bfloat16)
    logits = (jnp.dot(x, w_ref[...], preferred_element_type=jnp.float32)
              + b_ref[...])                                          # (R, TN) f32
    logits_ref[...] = logits

    tgt = tgt_ref[...]                                               # (R, 1) int32
    rows = logits.shape[0]
    col = jax.lax.broadcasted_iota(jnp.int32, (rows, tile_n), 1) + j * tile_n
    t_sc[...] = t_sc[...] + jnp.sum(jnp.where(col == tgt, logits, 0.0),
                                    axis=-1, keepdims=True)

    m_new = jnp.maximum(m_sc[...], jnp.max(logits, axis=-1, keepdims=True))
    l_sc[...] = (l_sc[...] * jnp.exp(m_sc[...] - m_new)
                 + jnp.sum(jnp.exp(logits - m_new), axis=-1, keepdims=True))
    m_sc[...] = m_new

    @pl.when(j == pl.num_programs(0) - 1)
    def _finish():
        lse = m_sc[...] + jnp.log(l_sc[...])
        per_row = lse - t_sc[...]                                    # (R, 1)
        valid = (tgt_ref[...] != 0).astype(jnp.float32)              # ignore_index=0
        denom = jnp.maximum(jnp.sum(valid), 1.0)                     # guard 0/0
        loss_ref[...] = jnp.reshape(jnp.sum(per_row * valid) / denom, (1, 1))


def nsp_fused_kernel(h0_ref, w_ref, b_ref, tgt_ref, logits_ref, loss_ref):
    """Fused NSP head (dense on outputs[:, 0, :]) + cross-entropy (mean reduction).

    Padded class columns of b_nsp carry -1e30, so no masking pass is needed.
    """
    logits = (jnp.dot(h0_ref[...], w_ref[...], preferred_element_type=jnp.float32)
              + b_ref[...])                                          # (B, NSP_CP)
    logits_ref[...] = logits

    tgt = tgt_ref[...]                                               # (B, 1) int32
    rows, cols = logits.shape
    col = jax.lax.broadcasted_iota(jnp.int32, (rows, cols), 1)
    m = jnp.max(logits, axis=-1, keepdims=True)
    lse = m + jnp.log(jnp.sum(jnp.exp(logits - m), axis=-1, keepdims=True))
    tgt_logit = jnp.sum(jnp.where(col == tgt, logits, 0.0), axis=-1, keepdims=True)
    loss_ref[...] = jnp.reshape(jnp.mean(lse - tgt_logit), (1, 1))


# ----------------------------------------------------------------------------
# Forward pass
# ----------------------------------------------------------------------------
def pretraining_forward(params, src, masked_lm_ids, masked_lm_positions,
                        nsp_labels):
    B, S = src.shape
    P = masked_lm_positions.shape[1]
    R = B * P
    assert R % 8 == 0

    # --- embedding lookup, directly time-major (gather; plain-JAX glue) ---
    emb_t = jnp.take(params["emb"], src.T, axis=0)                   # (S, B, HP)

    # --- LSTM recurrence (Pallas) ---
    outs_t = pl.pallas_call(
        lstm_kernel,
        out_shape=jax.ShapeDtypeStruct((S, B, HP), jnp.float32),
    )(emb_t, params["w_ih"], params["w_hh"], params["b_lstm"])       # (S, B, HP)

    # --- gather ONLY the masked hidden rows before the 30k projection ---
    flat_idx = (masked_lm_positions.astype(jnp.int32) * B
                + jnp.arange(B, dtype=jnp.int32)[:, None]).reshape(-1)   # (B*P,)
    masked_h = jnp.take(outs_t.reshape(S * B, HP), flat_idx, axis=0)     # (R, HP)
    tgt_mlm = masked_lm_ids.astype(jnp.int32).reshape(R, 1)

    # --- fused MLM projection + cross-entropy (Pallas, vocab-tiled reduction) ---
    masked_logits_pad, mlm_loss = pl.pallas_call(
        mlm_fused_kernel,
        out_shape=(jax.ShapeDtypeStruct((R, MLM_VP), jnp.float32),
                   jax.ShapeDtypeStruct((1, 1), jnp.float32)),
        grid=(MLM_VP // TN,),
        in_specs=[
            pl.BlockSpec((R, HP), lambda j: (0, 0)),
            pl.BlockSpec((HP, TN), lambda j: (0, j)),
            pl.BlockSpec((1, TN), lambda j: (0, j)),
            pl.BlockSpec((R, 1), lambda j: (0, 0)),
        ],
        out_specs=[
            pl.BlockSpec((R, TN), lambda j: (0, j)),
            pl.BlockSpec((1, 1), lambda j: (0, 0)),
        ],
        scratch_shapes=[pltpu.VMEM((R, 1), jnp.float32)] * 3,
        compiler_params=pltpu.CompilerParams(
            dimension_semantics=("arbitrary",)),     # CE accumulator over vocab axis
    )(masked_h, params["w_mlm"], params["b_mlm"], tgt_mlm)

    masked_outputs = masked_logits_pad.reshape(B, P, MLM_VP)[:, :, :MLM_V]

    # --- fused NSP head + cross-entropy on outputs[:, 0, :] == outs_t[0] (Pallas) ---
    tgt_nsp = nsp_labels.astype(jnp.int32).reshape(B, 1)
    nsp_logits_pad, nsp_loss = pl.pallas_call(
        nsp_fused_kernel,
        out_shape=(jax.ShapeDtypeStruct((B, NSP_CP), jnp.float32),
                   jax.ShapeDtypeStruct((1, 1), jnp.float32)),
    )(outs_t[0], params["w_nsp"], params["b_nsp"], tgt_nsp)
    next_sentence_outputs = nsp_logits_pad[:, :NSP_C]

    return (masked_outputs, next_sentence_outputs,
            mlm_loss[0, 0], nsp_loss[0, 0])


# ----------------------------------------------------------------------------
# Deterministic parameter construction (matches nn.Module shapes)
# ----------------------------------------------------------------------------
def init_params(key):
    ks = jax.random.split(key, 9)
    lim = 1.0 / float(jnp.sqrt(jnp.float32(H)))

    emb = jnp.zeros((VOCAB, HP), jnp.float32).at[:, :H].set(
        jax.random.normal(ks[0], (VOCAB, H), jnp.float32))

    # torch LSTM params: weight_ih (4H,H), weight_hh (4H,H), biases (4H,)
    w_ih_t = jax.random.uniform(ks[1], (4 * H, H), jnp.float32, -lim, lim)
    w_hh_t = jax.random.uniform(ks[2], (4 * H, H), jnp.float32, -lim, lim)
    b_ih_t = jax.random.uniform(ks[3], (4 * H,), jnp.float32, -lim, lim)
    b_hh_t = jax.random.uniform(ks[4], (4 * H,), jnp.float32, -lim, lim)

    w_ih = jnp.zeros((HP, GATES), jnp.float32)
    w_hh = jnp.zeros((HP, GATES), jnp.float32)
    # Padded lanes of b_lstm MUST stay 0 so padded h/c lanes stay 0 (do NOT apply
    # the -1e30 padding trick here).
    b_lstm = jnp.zeros((1, GATES), jnp.float32)
    for g in range(4):      # i, f, g, o gate blocks, each 128-aligned
        w_ih = w_ih.at[:H, g * HP:g * HP + H].set(w_ih_t[g * H:(g + 1) * H, :].T)
        w_hh = w_hh.at[:H, g * HP:g * HP + H].set(w_hh_t[g * H:(g + 1) * H, :].T)
        b_lstm = b_lstm.at[0, g * HP:g * HP + H].set(
            b_ih_t[g * H:(g + 1) * H] + b_hh_t[g * H:(g + 1) * H])

    # mlm Linear(100, 30000): weight streamed as bf16 (HBM-bound projection);
    # padded vocab columns get -1e30 bias so the fused CE needs no masking pass.
    w_mlm_t = jax.random.uniform(ks[5], (MLM_V, H), jnp.float32, -lim, lim)
    b_mlm_t = jax.random.uniform(ks[6], (MLM_V,), jnp.float32, -lim, lim)
    w_mlm = (jnp.zeros((HP, MLM_VP), jnp.float32)
             .at[:H, :MLM_V].set(w_mlm_t.T)).astype(jnp.bfloat16)
    b_mlm = jnp.full((1, MLM_VP), -1e30, jnp.float32).at[0, :MLM_V].set(b_mlm_t)

    # nsp Linear(100, 2): padded class columns get -1e30 bias.
    w_nsp_t = jax.random.uniform(ks[7], (NSP_C, H), jnp.float32, -lim, lim)
    b_nsp_t = jax.random.uniform(ks[8], (NSP_C,), jnp.float32, -lim, lim)
    w_nsp = jnp.zeros((HP, NSP_CP), jnp.float32).at[:H, :NSP_C].set(w_nsp_t.T)
    b_nsp = jnp.full((1, NSP_CP), -1e30, jnp.float32).at[0, :NSP_C].set(b_nsp_t)

    return dict(emb=emb, w_ih=w_ih, w_hh=w_hh, b_lstm=b_lstm,
                w_mlm=w_mlm, b_mlm=b_mlm, w_nsp=w_nsp, b_nsp=b_nsp)


# ----------------------------------------------------------------------------
if __name__ == "__main__":
    key = jax.random.PRNGKey(0)
    kp, k1, k2, k3, k4 = jax.random.split(key, 5)

    B, S, P = 8, 8, 4   # forward() hard-codes batch=8 (range(8) stack)
    params = init_params(kp)

    src = jax.random.randint(k1, (B, S), 0, VOCAB, dtype=jnp.int32)
    masked_lm_positions = jax.random.randint(k2, (B, P), 0, S, dtype=jnp.int32)
    masked_lm_ids = jax.random.randint(k3, (B, P), 1, MLM_V, dtype=jnp.int32)
    nsp_labels = jax.random.randint(k4, (B,), 0, NSP_C, dtype=jnp.int32)

    fwd = jax.jit(pretraining_forward)
    masked_outputs, nsp_out, mlm_loss, nsp_loss = fwd(
        params, src, masked_lm_ids, masked_lm_positions, nsp_labels)
    jax.block_until_ready((masked_outputs, nsp_out, mlm_loss, nsp_loss))

    assert masked_outputs.shape == (B, P, MLM_V)
    assert nsp_out.shape == (B, NSP_C)
    assert bool(jnp.isfinite(mlm_loss)) and bool(jnp.isfinite(nsp_loss))
    print("KERNEL_OK")
</pallas_src>

<mosaic_0001>
module attributes {stable_mosaic.version = 11 : i64} {
  func.func @lstm_kernel(%arg0: memref<8x8x128xf32, #tpu.memory_space<vmem>>, %arg1: memref<128x512xf32, #tpu.memory_space<vmem>>, %arg2: memref<128x512xf32, #tpu.memory_space<vmem>>, %arg3: memref<1x512xf32, #tpu.memory_space<vmem>>, %arg4: memref<8x8x128xf32, #tpu.memory_space<vmem>>) attributes {dimension_semantics = [], scalar_prefetch = 0 : i64, scratch_operands = 0 : i64, tpu.core_type = #tpu.core_type<tc>} {
    %c0 = arith.constant 0 : index
    %c0_0 = arith.constant 0 : index
    %0 = vector.load %arg2[%c0, %c0_0] : memref<128x512xf32, #tpu.memory_space<vmem>>, vector<128x512xf32>
    %c0_1 = arith.constant 0 : index
    %c0_2 = arith.constant 0 : index
    %c0_3 = arith.constant 0 : index
    %1 = vector.load %arg0[%c0_1, %c0_2, %c0_3] : memref<8x8x128xf32, #tpu.memory_space<vmem>>, vector<8x8x128xf32>
    %2 = vector.shape_cast %1 : vector<8x8x128xf32> to vector<64x128xf32>
    %c0_4 = arith.constant 0 : index
    %c0_5 = arith.constant 0 : index
    %3 = vector.load %arg1[%c0_4, %c0_5] : memref<128x512xf32, #tpu.memory_space<vmem>>, vector<128x512xf32>
    %cst = arith.constant dense<0.000000e+00> : vector<64x512xf32>
    %4 = tpu.matmul %2, %3, %cst {dimension_numbers = #tpu.dot_dimension_numbers<[1], [0], [0], [1], [0, 0, 1, 1], [], []>} : vector<64x128xf32>, vector<128x512xf32>, vector<64x512xf32> -> vector<64x512xf32>
    %c0_6 = arith.constant 0 : index
    %c0_7 = arith.constant 0 : index
    %5 = vector.load %arg3[%c0_6, %c0_7] : memref<1x512xf32, #tpu.memory_space<vmem>>, vector<1x512xf32>
    %6 = vector.broadcast %5 : vector<1x512xf32> to vector<64x512xf32>
    %7 = arith.addf %4, %6 : vector<64x512xf32>
    %8 = vector.shape_cast %7 : vector<64x512xf32> to vector<8x8x512xf32>
    %cst_8 = arith.constant 0.000000e+00 : f32
    %9 = vector.broadcast %cst_8 : f32 to vector<8x128xf32>
    %cst_9 = arith.constant 0.000000e+00 : f32
    %10 = vector.broadcast %cst_9 : f32 to vector<8x128xf32>
    %11 = vector.extract_strided_slice %8 {offsets = [0, 0, 0], sizes = [1, 8, 512], strides = [1, 1, 1]} : vector<8x8x512xf32> to vector<1x8x512xf32>
    %12 = vector.shape_cast %11 : vector<1x8x512xf32> to vector<8x512xf32>
    %cst_10 = arith.constant dense<0.000000e+00> : vector<8x512xf32>
    %13 = tpu.matmul %9, %0, %cst_10 {dimension_numbers = #tpu.dot_dimension_numbers<[1], [0], [0], [1], [0, 0, 1, 1], [], []>} : vector<8x128xf32>, vector<128x512xf32>, vector<8x512xf32> -> vector<8x512xf32>
    %14 = arith.addf %12, %13 : vector<8x512xf32>
    %15 = vector.extract_strided_slice %14 {offsets = [0, 0], sizes = [8, 128], strides = [1, 1]} : vector<8x512xf32> to vector<8x128xf32>
    %16 = arith.negf %15 : vector<8x128xf32>
    %17 = math.exp %16 : vector<8x128xf32>
    %cst_11 = arith.constant 1.000000e+00 : f32
    %18 = vector.broadcast %cst_11 : f32 to vector<8x128xf32>
    %19 = arith.addf %18, %17 : vector<8x128xf32>
    %20 = arith.divf %18, %19 : vector<8x128xf32>
    %21 = vector.extract_strided_slice %14 {offsets = [0, 128], sizes = [8, 128], strides = [1, 1]} : vector<8x512xf32> to vector<8x128xf32>
    %22 = arith.negf %21 : vector<8x128xf32>
    %23 = math.exp %22 : vector<8x128xf32>
    %cst_12 = arith.constant 1.000000e+00 : f32
    %24 = vector.broadcast %cst_12 : f32 to vector<8x128xf32>
    %25 = arith.addf %24, %23 : vector<8x128xf32>
    %26 = arith.divf %24, %25 : vector<8x128xf32>
    %27 = vector.extract_strided_slice %14 {offsets = [0, 256], sizes = [8, 128], strides = [1, 1]} : vector<8x512xf32> to vector<8x128xf32>
    %28 = math.tanh %27 : vector<8x128xf32>
    %29 = vector.extract_strided_slice %14 {offsets = [0, 384], sizes = [8, 128], strides = [1, 1]} : vector<8x512xf32> to vector<8x128xf32>
    %30 = arith.negf %29 : vector<8x128xf32>
    %31 = math.exp %30 : vector<8x128xf32>
    %cst_13 = arith.constant 1.000000e+00 : f32
    %32 = vector.broadcast %cst_13 : f32 to vector<8x128xf32>
    %33 = arith.addf %32, %31 : vector<8x128xf32>
    %34 = arith.divf %32, %33 : vector<8x128xf32>
    %35 = arith.mulf %26, %10 : vector<8x128xf32>
    %36 = arith.mulf %20, %28 : vector<8x128xf32>
    %37 = arith.addf %35, %36 : vector<8x128xf32>
    %38 = math.tanh %37 : vector<8x128xf32>
    %39 = arith.mulf %34, %38 : vector<8x128xf32>
    %c0_14 = arith.constant 0 : index
    %c0_15 = arith.constant 0 : index
    %c0_16 = arith.constant 0 : index
    %40 = vector.load %arg4[%c0_14, %c0_15, %c0_16] : memref<8x8x128xf32, #tpu.memory_space<vmem>>, vector<1x8x128xf32>
    %41 = vector.shape_cast %40 : vector<1x8x128xf32> to vector<8x128xf32>
    %42 = vector.shape_cast %39 : vector<8x128xf32> to vector<1x8x128xf32>
    tpu.vector_store %arg4[%c0_14, %c0_15, %c0_16], %42 {strides = array<i32>} : memref<8x8x128xf32, #tpu.memory_space<vmem>>, vector<1x8x128xf32>,
    %43 = vector.extract_strided_slice %8 {offsets = [1, 0, 0], sizes = [1, 8, 512], strides = [1, 1, 1]} : vector<8x8x512xf32> to vector<1x8x512xf32>
    %44 = vector.shape_cast %43 : vector<1x8x512xf32> to vector<8x512xf32>
    %cst_17 = arith.constant dense<0.000000e+00> : vector<8x512xf32>
    %45 = tpu.matmul %39, %0, %cst_17 {dimension_numbers = #tpu.dot_dimension_numbers<[1], [0], [0], [1], [0, 0, 1, 1], [], []>} : vector<8x128xf32>, vector<128x512xf32>, vector<8x512xf32> -> vector<8x512xf32>
    %46 = arith.addf %44, %45 : vector<8x512xf32>
    %47 = vector.extract_strided_slice %46 {offsets = [0, 0], sizes = [8, 128], strides = [1, 1]} : vector<8x512xf32> to vector<8x128xf32>
    %48 = arith.negf %47 : vector<8x128xf32>
    %49 = math.exp %48 : vector<8x128xf32>
    %cst_18 = arith.constant 1.000000e+00 : f32
    %50 = vector.broadcast %cst_18 : f32 to vector<8x128xf32>
    %51 = arith.addf %50, %49 : vector<8x128xf32>
    %52 = arith.divf %50, %51 : vector<8x128xf32>
    %53 = vector.extract_strided_slice %46 {offsets = [0, 128], sizes = [8, 128], strides = [1, 1]} : vector<8x512xf32> to vector<8x128xf32>
    %54 = arith.negf %53 : vector<8x128xf32>
    %55 = math.exp %54 : vector<8x128xf32>
    %cst_19 = arith.constant 1.000000e+00 : f32
    %56 = vector.broadcast %cst_19 : f32 to vector<8x128xf32>
    %57 = arith.addf %56, %55 : vector<8x128xf32>
    %58 = arith.divf %56, %57 : vector<8x128xf32>
    %59 = vector.extract_strided_slice %46 {offsets = [0, 256], sizes = [8, 128], strides = [1, 1]} : vector<8x512xf32> to vector<8x128xf32>
    %60 = math.tanh %59 : vector<8x128xf32>
    %61 = vector.extract_strided_slice %46 {offsets = [0, 384], sizes = [8, 128], strides = [1, 1]} : vector<8x512xf32> to vector<8x128xf32>
    %62 = arith.negf %61 : vector<8x128xf32>
    %63 = math.exp %62 : vector<8x128xf32>
    %cst_20 = arith.constant 1.000000e+00 : f32
    %64 = vector.broadcast %cst_20 : f32 to vector<8x128xf32>
    %65 = arith.addf %64, %63 : vector<8x128xf32>
    %66 = arith.divf %64, %65 : vector<8x128xf32>
    %67 = arith.mulf %58, %37 : vector<8x128xf32>
    %68 = arith.mulf %52, %60 : vector<8x128xf32>
    %69 = arith.addf %67, %68 : vector<8x128xf32>
    %70 = math.tanh %69 : vector<8x128xf32>
    %71 = arith.mulf %66, %70 : vector<8x128xf32>
    %c1 = arith.constant 1 : index
    %c0_21 = arith.constant 0 : index
    %c0_22 = arith.constant 0 : index
    %72 = vector.load %arg4[%c1, %c0_21, %c0_22] : memref<8x8x128xf32, #tpu.memory_space<vmem>>, vector<1x8x128xf32>
    %73 = vector.shape_cast %72 : vector<1x8x128xf32> to vector<8x128xf32>
    %74 = vector.shape_cast %71 : vector<8x128xf32> to vector<1x8x128xf32>
    tpu.vector_store %arg4[%c1, %c0_21, %c0_22], %74 {strides = array<i32>} : memref<8x8x128xf32, #tpu.memory_space<vmem>>, vector<1x8x128xf32>,
    %75 = vector.extract_strided_slice %8 {offsets = [2, 0, 0], sizes = [1, 8, 512], strides = [1, 1, 1]} : vector<8x8x512xf32> to vector<1x8x512xf32>
    %76 = vector.shape_cast %75 : vector<1x8x512xf32> to vector<8x512xf32>
    %cst_23 = arith.constant dense<0.000000e+00> : vector<8x512xf32>
    %77 = tpu.matmul %71, %0, %cst_23 {dimension_numbers = #tpu.dot_dimension_numbers<[1], [0], [0], [1], [0, 0, 1, 1], [], []>} : vector<8x128xf32>, vector<128x512xf32>, vector<8x512xf32> -> vector<8x512xf32>
    %78 = arith.addf %76, %77 : vector<8x512xf32>
    %79 = vector.extract_strided_slice %78 {offsets = [0, 0], sizes = [8, 128], strides = [1, 1]} : vector<8x512xf32> to vector<8x128xf32>
    %80 = arith.negf %79 : vector<8x128xf32>
    %81 = math.exp %80 : vector<8x128xf32>
    %cst_24 = arith.constant 1.000000e+00 : f32
    %82 = vector.broadcast %cst_24 : f32 to vector<8x128xf32>
    %83 = arith.addf %82, %81 : vector<8x128xf32>
    %84 = arith.divf %82, %83 : vector<8x128xf32>
    %85 = vector.extract_strided_slice %78 {offsets = [0, 128], sizes = [8, 128], strides = [1, 1]} : vector<8x512xf32> to vector<8x128xf32>
    %86 = arith.negf %85 : vector<8x128xf32>
    %87 = math.exp %86 : vector<8x128xf32>
    %cst_25 = arith.constant 1.000000e+00 : f32
    %88 = vector.broadcast %cst_25 : f32 to vector<8x128xf32>
    %89 = arith.addf %88, %87 : vector<8x128xf32>
    %90 = arith.divf %88, %89 : vector<8x128xf32>
    %91 = vector.extract_strided_slice %78 {offsets = [0, 256], sizes = [8, 128], strides = [1, 1]} : vector<8x512xf32> to vector<8x128xf32>
    %92 = math.tanh %91 : vector<8x128xf32>
    %93 = vector.extract_strided_slice %78 {offsets = [0, 384], sizes = [8, 128], strides = [1, 1]} : vector<8x512xf32> to vector<8x128xf32>
    %94 = arith.negf %93 : vector<8x128xf32>
    %95 = math.exp %94 : vector<8x128xf32>
    %cst_26 = arith.constant 1.000000e+00 : f32
    %96 = vector.broadcast %cst_26 : f32 to vector<8x128xf32>
    %97 = arith.addf %96, %95 : vector<8x128xf32>
    %98 = arith.divf %96, %97 : vector<8x128xf32>
    %99 = arith.mulf %90, %69 : vector<8x128xf32>
    %100 = arith.mulf %84, %92 : vector<8x128xf32>
    %101 = arith.addf %99, %100 : vector<8x128xf32>
    %102 = math.tanh %101 : vector<8x128xf32>
    %103 = arith.mulf %98, %102 : vector<8x128xf32>
    %c2 = arith.constant 2 : index
    %c0_27 = arith.constant 0 : index
    %c0_28 = arith.constant 0 : index
    %104 = vector.load %arg4[%c2, %c0_27, %c0_28] : memref<8x8x128xf32, #tpu.memory_space<vmem>>, vector<1x8x128xf32>
    %105 = vector.shape_cast %104 : vector<1x8x128xf32> to vector<8x128xf32>
    %106 = vector.shape_cast %103 : vector<8x128xf32> to vector<1x8x128xf32>
    tpu.vector_store %arg4[%c2, %c0_27, %c0_28], %106 {strides = array<i32>} : memref<8x8x128xf32, #tpu.memory_space<vmem>>, vector<1x8x128xf32>,
    %107 = vector.extract_strided_slice %8 {offsets = [3, 0, 0], sizes = [1, 8, 512], strides = [1, 1, 1]} : vector<8x8x512xf32> to vector<1x8x512xf32>
    %108 = vector.shape_cast %107 : vector<1x8x512xf32> to vector<8x512xf32>
    %cst_29 = arith.constant dense<0.000000e+00> : vector<8x512xf32>
    %109 = tpu.matmul %103, %0, %cst_29 {dimension_numbers = #tpu.dot_dimension_numbers<[1], [0], [0], [1], [0, 0, 1, 1], [], []>} : vector<8x128xf32>, vector<128x512xf32>, vector<8x512xf32> -> vector<8x512xf32>
    %110 = arith.addf %108, %109 : vector<8x512xf32>
    %111 = vector.extract_strided_slice %110 {offsets = [0, 0], sizes = [8, 128], strides = [1, 1]} : vector<8x512xf32> to vector<8x128xf32>
    %112 = arith.negf %111 : vector<8x128xf32>
    %113 = math.exp %112 : vector<8x128xf32>
    %cst_30 = arith.constant 1.000000e+00 : f32
    %114 = vector.broadcast %cst_30 : f32 to vector<8x128xf32>
    %115 = arith.addf %114, %113 : vector<8x128xf32>
    %116 = arith.divf %114, %115 : vector<8x128xf32>
    %117 = vector.extract_strided_slice %110 {offsets = [0, 128], sizes = [8, 128], strides = [1, 1]} : vector<8x512xf32> to vector<8x128xf32>
    %118 = arith.negf %117 : vector<8x128xf32>
    %119 = math.exp %118 : vector<8x128xf32>
    %cst_31 = arith.constant 1.000000e+00 : f32
    %120 = vector.broadcast %cst_31 : f32 to vector<8x128xf32>
    %121 = arith.addf %120, %119 : vector<8x128xf32>
    %122 = arith.divf %120, %121 : vector<8x128xf32>
    %123 = vector.extract_strided_slice %110 {offsets = [0, 256], sizes = [8, 128], strides = [1, 1]} : vector<8x512xf32> to vector<8x128xf32>
    %124 = math.tanh %123 : vector<8x128xf32>
    %125 = vector.extract_strided_slice %110 {offsets = [0, 384], sizes = [8, 128], strides = [1, 1]} : vector<8x512xf32> to vector<8x128xf32>
    %126 = arith.negf %125 : vector<8x128xf32>
    %127 = math.exp %126 : vector<8x128xf32>
    %cst_32 = arith.constant 1.000000e+00 : f32
    %128 = vector.broadcast %cst_32 : f32 to vector<8x128xf32>
    %129 = arith.addf %128, %127 : vector<8x128xf32>
    %130 = arith.divf %128, %129 : vector<8x128xf32>
    %131 = arith.mulf %122, %101 : vector<8x128xf32>
    %132 = arith.mulf %116, %124 : vector<8x128xf32>
    %133 = arith.addf %131, %132 : vector<8x128xf32>
    %134 = math.tanh %133 : vector<8x128xf32>
    %135 = arith.mulf %130, %134 : vector<8x128xf32>
    %c3 = arith.constant 3 : index
    %c0_33 = arith.constant 0 : index
    %c0_34 = arith.constant 0 : index
    %136 = vector.load %arg4[%c3, %c0_33, %c0_34] : memref<8x8x128xf32, #tpu.memory_space<vmem>>, vector<1x8x128xf32>
    %137 = vector.shape_cast %136 : vector<1x8x128xf32> to vector<8x128xf32>
    %138 = vector.shape_cast %135 : vector<8x128xf32> to vector<1x8x128xf32>
    tpu.vector_store %arg4[%c3, %c0_33, %c0_34], %138 {strides = array<i32>} : memref<8x8x128xf32, #tpu.memory_space<vmem>>, vector<1x8x128xf32>,
    %139 = vector.extract_strided_slice %8 {offsets = [4, 0, 0], sizes = [1, 8, 512], strides = [1, 1, 1]} : vector<8x8x512xf32> to vector<1x8x512xf32>
    %140 = vector.shape_cast %139 : vector<1x8x512xf32> to vector<8x512xf32>
    %cst_35 = arith.constant dense<0.000000e+00> : vector<8x512xf32>
    %141 = tpu.matmul %135, %0, %cst_35 {dimension_numbers = #tpu.dot_dimension_numbers<[1], [0], [0], [1], [0, 0, 1, 1], [], []>} : vector<8x128xf32>, vector<128x512xf32>, vector<8x512xf32> -> vector<8x512xf32>
    %142 = arith.addf %140, %141 : vector<8x512xf32>
    %143 = vector.extract_strided_slice %142 {offsets = [0, 0], sizes = [8, 128], strides = [1, 1]} : vector<8x512xf32> to vector<8x128xf32>
    %144 = arith.negf %143 : vector<8x128xf32>
    %145 = math.exp %144 : vector<8x128xf32>
    %cst_36 = arith.constant 1.000000e+00 : f32
    %146 = vector.broadcast %cst_36 : f32 to vector<8x128xf32>
    %147 = arith.addf %146, %145 : vector<8x128xf32>
    %148 = arith.divf %146, %147 : vector<8x128xf32>
    %149 = vector.extract_strided_slice %142 {offsets = [0, 128], sizes = [8, 128], strides = [1, 1]} : vector<8x512xf32> to vector<8x128xf32>
    %150 = arith.negf %149 : vector<8x128xf32>
    %151 = math.exp %150 : vector<8x128xf32>
    %cst_37 = arith.constant 1.000000e+00 : f32
    %152 = vector.broadcast %cst_37 : f32 to vector<8x128xf32>
    %153 = arith.addf %152, %151 : vector<8x128xf32>
    %154 = arith.divf %152, %153 : vector<8x128xf32>
    %155 = vector.extract_strided_slice %142 {offsets = [0, 256], sizes = [8, 128], strides = [1, 1]} : vector<8x512xf32> to vector<8x128xf32>
    %156 = math.tanh %155 : vector<8x128xf32>
    %157 = vector.extract_strided_slice %142 {offsets = [0, 384], sizes = [8, 128], strides = [1, 1]} : vector<8x512xf32> to vector<8x128xf32>
    %158 = arith.negf %157 : vector<8x128xf32>
    %159 = math.exp %158 : vector<8x128xf32>
    %cst_38 = arith.constant 1.000000e+00 : f32
    %160 = vector.broadcast %cst_38 : f32 to vector<8x128xf32>
    %161 = arith.addf %160, %159 : vector<8x128xf32>
    %162 = arith.divf %160, %161 : vector<8x128xf32>
    %163 = arith.mulf %154, %133 : vector<8x128xf32>
    %164 = arith.mulf %148, %156 : vector<8x128xf32>
    %165 = arith.addf %163, %164 : vector<8x128xf32>
    %166 = math.tanh %165 : vector<8x128xf32>
    %167 = arith.mulf %162, %166 : vector<8x128xf32>
    %c4 = arith.constant 4 : index
    %c0_39 = arith.constant 0 : index
    %c0_40 = arith.constant 0 : index
    %168 = vector.load %arg4[%c4, %c0_39, %c0_40] : memref<8x8x128xf32, #tpu.memory_space<vmem>>, vector<1x8x128xf32>
    %169 = vector.shape_cast %168 : vector<1x8x128xf32> to vector<8x128xf32>
    %170 = vector.shape_cast %167 : vector<8x128xf32> to vector<1x8x128xf32>
    tpu.vector_store %arg4[%c4, %c0_39, %c0_40], %170 {strides = array<i32>} : memref<8x8x128xf32, #tpu.memory_space<vmem>>, vector<1x8x128xf32>,
    %171 = vector.extract_strided_slice %8 {offsets = [5, 0, 0], sizes = [1, 8, 512], strides = [1, 1, 1]} : vector<8x8x512xf32> to vector<1x8x512xf32>
    %172 = vector.shape_cast %171 : vector<1x8x512xf32> to vector<8x512xf32>
    %cst_41 = arith.constant dense<0.000000e+00> : vector<8x512xf32>
    %173 = tpu.matmul %167, %0, %cst_41 {dimension_numbers = #tpu.dot_dimension_numbers<[1], [0], [0], [1], [0, 0, 1, 1], [], []>} : vector<8x128xf32>, vector<128x512xf32>, vector<8x512xf32> -> vector<8x512xf32>
    %174 = arith.addf %172, %173 : vector<8x512xf32>
    %175 = vector.extract_strided_slice %174 {offsets = [0, 0], sizes = [8, 128], strides = [1, 1]} : vector<8x512xf32> to vector<8x128xf32>
    %176 = arith.negf %175 : vector<8x128xf32>
    %177 = math.exp %176 : vector<8x128xf32>
    %cst_42 = arith.constant 1.000000e+00 : f32
    %178 = vector.broadcast %cst_42 : f32 to vector<8x128xf32>
    %179 = arith.addf %178, %177 : vector<8x128xf32>
    %180 = arith.divf %178, %179 : vector<8x128xf32>
    %181 = vector.extract_strided_slice %174 {offsets = [0, 128], sizes = [8, 128], strides = [1, 1]} : vector<8x512xf32> to vector<8x128xf32>
    %182 = arith.negf %181 : vector<8x128xf32>
    %183 = math.exp %182 : vector<8x128xf32>
    %cst_43 = arith.constant 1.000000e+00 : f32
    %184 = vector.broadcast %cst_43 : f32 to vector<8x128xf32>
    %185 = arith.addf %184, %183 : vector<8x128xf32>
    %186 = arith.divf %184, %185 : vector<8x128xf32>
    %187 = vector.extract_strided_slice %174 {offsets = [0, 256], sizes = [8, 128], strides = [1, 1]} : vector<8x512xf32> to vector<8x128xf32>
    %188 = math.tanh %187 : vector<8x128xf32>
    %189 = vector.extract_strided_slice %174 {offsets = [0, 384], sizes = [8, 128], strides = [1, 1]} : vector<8x512xf32> to vector<8x128xf32>
    %190 = arith.negf %189 : vector<8x128xf32>
    %191 = math.exp %190 : vector<8x128xf32>
    %cst_44 = arith.constant 1.000000e+00 : f32
    %192 = vector.broadcast %cst_44 : f32 to vector<8x128xf32>
    %193 = arith.addf %192, %191 : vector<8x128xf32>
    %194 = arith.divf %192, %193 : vector<8x128xf32>
    %195 = arith.mulf %186, %165 : vector<8x128xf32>
    %196 = arith.mulf %180, %188 : vector<8x128xf32>
    %197 = arith.addf %195, %196 : vector<8x128xf32>
    %198 = math.tanh %197 : vector<8x128xf32>
    %199 = arith.mulf %194, %198 : vector<8x128xf32>
    %c5 = arith.constant 5 : index
    %c0_45 = arith.constant 0 : index
    %c0_46 = arith.constant 0 : index
    %200 = vector.load %arg4[%c5, %c0_45, %c0_46] : memref<8x8x128xf32, #tpu.memory_space<vmem>>, vector<1x8x128xf32>
    %201 = vector.shape_cast %200 : vector<1x8x128xf32> to vector<8x128xf32>
    %202 = vector.shape_cast %199 : vector<8x128xf32> to vector<1x8x128xf32>
    tpu.vector_store %arg4[%c5, %c0_45, %c0_46], %202 {strides = array<i32>} : memref<8x8x128xf32, #tpu.memory_space<vmem>>, vector<1x8x128xf32>,
    %203 = vector.extract_strided_slice %8 {offsets = [6, 0, 0], sizes = [1, 8, 512], strides = [1, 1, 1]} : vector<8x8x512xf32> to vector<1x8x512xf32>
    %204 = vector.shape_cast %203 : vector<1x8x512xf32> to vector<8x512xf32>
    %cst_47 = arith.constant dense<0.000000e+00> : vector<8x512xf32>
    %205 = tpu.matmul %199, %0, %cst_47 {dimension_numbers = #tpu.dot_dimension_numbers<[1], [0], [0], [1], [0, 0, 1, 1], [], []>} : vector<8x128xf32>, vector<128x512xf32>, vector<8x512xf32> -> vector<8x512xf32>
    %206 = arith.addf %204, %205 : vector<8x512xf32>
    %207 = vector.extract_strided_slice %206 {offsets = [0, 0], sizes = [8, 128], strides = [1, 1]} : vector<8x512xf32> to vector<8x128xf32>
    %208 = arith.negf %207 : vector<8x128xf32>
    %209 = math.exp %208 : vector<8x128xf32>
    %cst_48 = arith.constant 1.000000e+00 : f32
    %210 = vector.broadcast %cst_48 : f32 to vector<8x128xf32>
    %211 = arith.addf %210, %209 : vector<8x128xf32>
    %212 = arith.divf %210, %211 : vector<8x128xf32>
    %213 = vector.extract_strided_slice %206 {offsets = [0, 128], sizes = [8, 128], strides = [1, 1]} : vector<8x512xf32> to vector<8x128xf32>
    %214 = arith.negf %213 : vector<8x128xf32>
    %215 = math.exp %214 : vector<8x128xf32>
    %cst_49 = arith.constant 1.000000e+00 : f32
    %216 = vector.broadcast %cst_49 : f32 to vector<8x128xf32>
    %217 = arith.addf %216, %215 : vector<8x128xf32>
    %218 = arith.divf %216, %217 : vector<8x128xf32>
    %219 = vector.extract_strided_slice %206 {offsets = [0, 256], sizes = [8, 128], strides = [1, 1]} : vector<8x512xf32> to vector<8x128xf32>
    %220 = math.tanh %219 : vector<8x128xf32>
    %221 = vector.extract_strided_slice %206 {offsets = [0, 384], sizes = [8, 128], strides = [1, 1]} : vector<8x512xf32> to vector<8x128xf32>
    %222 = arith.negf %221 : vector<8x128xf32>
    %223 = math.exp %222 : vector<8x128xf32>
    %cst_50 = arith.constant 1.000000e+00 : f32
    %224 = vector.broadcast %cst_50 : f32 to vector<8x128xf32>
    %225 = arith.addf %224, %223 : vector<8x128xf32>
    %226 = arith.divf %224, %225 : vector<8x128xf32>
    %227 = arith.mulf %218, %197 : vector<8x128xf32>
    %228 = arith.mulf %212, %220 : vector<8x128xf32>
    %229 = arith.addf %227, %228 : vector<8x128xf32>
    %230 = math.tanh %229 : vector<8x128xf32>
    %231 = arith.mulf %226, %230 : vector<8x128xf32>
    %c6 = arith.constant 6 : index
    %c0_51 = arith.constant 0 : index
    %c0_52 = arith.constant 0 : index
    %232 = vector.load %arg4[%c6, %c0_51, %c0_52] : memref<8x8x128xf32, #tpu.memory_space<vmem>>, vector<1x8x128xf32>
    %233 = vector.shape_cast %232 : vector<1x8x128xf32> to vector<8x128xf32>
    %234 = vector.shape_cast %231 : vector<8x128xf32> to vector<1x8x128xf32>
    tpu.vector_store %arg4[%c6, %c0_51, %c0_52], %234 {strides = array<i32>} : memref<8x8x128xf32, #tpu.memory_space<vmem>>, vector<1x8x128xf32>,
    %235 = vector.extract_strided_slice %8 {offsets = [7, 0, 0], sizes = [1, 8, 512], strides = [1, 1, 1]} : vector<8x8x512xf32> to vector<1x8x512xf32>
    %236 = vector.shape_cast %235 : vector<1x8x512xf32> to vector<8x512xf32>
    %cst_53 = arith.constant dense<0.000000e+00> : vector<8x512xf32>
    %237 = tpu.matmul %231, %0, %cst_53 {dimension_numbers = #tpu.dot_dimension_numbers<[1], [0], [0], [1], [0, 0, 1, 1], [], []>} : vector<8x128xf32>, vector<128x512xf32>, vector<8x512xf32> -> vector<8x512xf32>
    %238 = arith.addf %236, %237 : vector<8x512xf32>
    %239 = vector.extract_strided_slice %238 {offsets = [0, 0], sizes = [8, 128], strides = [1, 1]} : vector<8x512xf32> to vector<8x128xf32>
    %240 = arith.negf %239 : vector<8x128xf32>
    %241 = math.exp %240 : vector<8x128xf32>
    %cst_54 = arith.constant 1.000000e+00 : f32
    %242 = vector.broadcast %cst_54 : f32 to vector<8x128xf32>
    %243 = arith.addf %242, %241 : vector<8x128xf32>
    %244 = arith.divf %242, %243 : vector<8x128xf32>
    %245 = vector.extract_strided_slice %238 {offsets = [0, 128], sizes = [8, 128], strides = [1, 1]} : vector<8x512xf32> to vector<8x128xf32>
    %246 = arith.negf %245 : vector<8x128xf32>
    %247 = math.exp %246 : vector<8x128xf32>
    %cst_55 = arith.constant 1.000000e+00 : f32
    %248 = vector.broadcast %cst_55 : f32 to vector<8x128xf32>
    %249 = arith.addf %248, %247 : vector<8x128xf32>
    %250 = arith.divf %248, %249 : vector<8x128xf32>
    %251 = vector.extract_strided_slice %238 {offsets = [0, 256], sizes = [8, 128], strides = [1, 1]} : vector<8x512xf32> to vector<8x128xf32>
    %252 = math.tanh %251 : vector<8x128xf32>
    %253 = vector.extract_strided_slice %238 {offsets = [0, 384], sizes = [8, 128], strides = [1, 1]} : vector<8x512xf32> to vector<8x128xf32>
    %254 = arith.negf %253 : vector<8x128xf32>
    %255 = math.exp %254 : vector<8x128xf32>
    %cst_56 = arith.constant 1.000000e+00 : f32
    %256 = vector.broadcast %cst_56 : f32 to vector<8x128xf32>
    %257 = arith.addf %256, %255 : vector<8x128xf32>
    %258 = arith.divf %256, %257 : vector<8x128xf32>
    %259 = arith.mulf %250, %229 : vector<8x128xf32>
    %260 = arith.mulf %244, %252 : vector<8x128xf32>
    %261 = arith.addf %259, %260 : vector<8x128xf32>
    %262 = math.tanh %261 : vector<8x128xf32>
    %263 = arith.mulf %258, %262 : vector<8x128xf32>
    %c7 = arith.constant 7 : index
    %c0_57 = arith.constant 0 : index
    %c0_58 = arith.constant 0 : index
    %264 = vector.load %arg4[%c7, %c0_57, %c0_58] : memref<8x8x128xf32, #tpu.memory_space<vmem>>, vector<1x8x128xf32>
    %265 = vector.shape_cast %264 : vector<1x8x128xf32> to vector<8x128xf32>
    %266 = vector.shape_cast %263 : vector<8x128xf32> to vector<1x8x128xf32>
    tpu.vector_store %arg4[%c7, %c0_57, %c0_58], %266 {strides = array<i32>} : memref<8x8x128xf32, #tpu.memory_space<vmem>>, vector<1x8x128xf32>,
    return
  }
}

module attributes {stable_mosaic.version = 11 : i64} {
  func.func @nsp_fused_kernel(%arg0: memref<8x128xf32, #tpu.memory_space<vmem>>, %arg1: memref<128x128xf32, #tpu.memory_space<vmem>>, %arg2: memref<1x128xf32, #tpu.memory_space<vmem>>, %arg3: memref<8x1xi32, #tpu.memory_space<vmem>>, %arg4: memref<8x128xf32, #tpu.memory_space<vmem>>, %arg5: memref<1x1xf32, #tpu.memory_space<vmem>>) attributes {dimension_semantics = [], scalar_prefetch = 0 : i64, scratch_operands = 0 : i64, tpu.core_type = #tpu.core_type<tc>} {
    %c0 = arith.constant 0 : index
    %c0_0 = arith.constant 0 : index
    %0 = vector.load %arg0[%c0, %c0_0] : memref<8x128xf32, #tpu.memory_space<vmem>>, vector<8x128xf32>
    %c0_1 = arith.constant 0 : index
    %c0_2 = arith.constant 0 : index
    %1 = vector.load %arg1[%c0_1, %c0_2] : memref<128x128xf32, #tpu.memory_space<vmem>>, vector<128x128xf32>
    %cst = arith.constant dense<0.000000e+00> : vector<8x128xf32>
    %2 = tpu.matmul %0, %1, %cst {dimension_numbers = #tpu.dot_dimension_numbers<[1], [0], [0], [1], [0, 0, 1, 1], [], []>} : vector<8x128xf32>, vector<128x128xf32>, vector<8x128xf32> -> vector<8x128xf32>
    %c0_3 = arith.constant 0 : index
    %c0_4 = arith.constant 0 : index
    %3 = vector.load %arg2[%c0_3, %c0_4] : memref<1x128xf32, #tpu.memory_space<vmem>>, vector<1x128xf32>
    %4 = vector.broadcast %3 : vector<1x128xf32> to vector<8x128xf32>
    %5 = arith.addf %2, %4 : vector<8x128xf32>
    %c0_5 = arith.constant 0 : index
    %c0_6 = arith.constant 0 : index
    %6 = vector.load %arg4[%c0_5, %c0_6] : memref<8x128xf32, #tpu.memory_space<vmem>>, vector<8x128xf32>
    tpu.vector_store %arg4[%c0_5, %c0_6], %5 {strides = array<i32>} : memref<8x128xf32, #tpu.memory_space<vmem>>, vector<8x128xf32>,
    %c0_7 = arith.constant 0 : index
    %c0_8 = arith.constant 0 : index
    %7 = vector.load %arg3[%c0_7, %c0_8] : memref<8x1xi32, #tpu.memory_space<vmem>>, vector<8x1xi32>
    %8 = tpu.iota {dimensions = array<i32: 1>} : vector<8x128xi32>
    %cst_9 = arith.constant dense<0xFF800000> : vector<8xf32>
    %9 = vector.multi_reduction <maximumf>, %5, %cst_9 [1] : vector<8x128xf32> to vector<8xf32>
    %10 = vector.shape_cast %9 : vector<8xf32> to vector<8x1xf32>
    %11 = vector.broadcast %10 : vector<8x1xf32> to vector<8x128xf32>
    %12 = arith.subf %5, %11 : vector<8x128xf32>
    %13 = math.exp %12 : vector<8x128xf32>
    %cst_10 = arith.constant dense<0.000000e+00> : vector<8xf32>
    %14 = vector.multi_reduction <add>, %13, %cst_10 [1] : vector<8x128xf32> to vector<8xf32>
    %15 = vector.shape_cast %14 : vector<8xf32> to vector<8x1xf32>
    %16 = math.log %15 : vector<8x1xf32>
    %17 = arith.addf %10, %16 : vector<8x1xf32>
    %18 = vector.broadcast %7 : vector<8x1xi32> to vector<8x128xi32>
    %19 = arith.cmpi eq, %8, %18 : vector<8x128xi32>
    %cst_11 = arith.constant 0.000000e+00 : f32
    %20 = vector.broadcast %cst_11 : f32 to vector<8x128xf32>
    %21 = arith.select %19, %5, %20 : vector<8x128xi1>, vector<8x128xf32>
    %cst_12 = arith.constant dense<0.000000e+00> : vector<8xf32>
    %22 = vector.multi_reduction <add>, %21, %cst_12 [1] : vector<8x128xf32> to vector<8xf32>
    %23 = vector.shape_cast %22 : vector<8xf32> to vector<8x1xf32>
    %24 = arith.subf %17, %23 : vector<8x1xf32>
    %25 = vector.shape_cast %24 : vector<8x1xf32> to vector<1x8x1xf32>
    %cst_13 = arith.constant dense<0.000000e+00> : vector<1xf32>
    %26 = vector.multi_reduction <add>, %25, %cst_13 [1, 2] : vector<1x8x1xf32> to vector<1xf32>
    %27 = vector.shape_cast %26 : vector<1xf32> to vector<1x1x1xf32>
    %28 = vector.extract %27[0, 0, 0] : f32 from vector<1x1x1xf32>
    %cst_14 = arith.constant 8.000000e+00 : f32
    %29 = arith.divf %28, %cst_14 : f32
    %30 = vector.broadcast %29 : f32 to vector<1x1xf32>
    %c0_15 = arith.constant 0 : index
    %c0_16 = arith.constant 0 : index
    %31 = vector.load %arg5[%c0_15, %c0_16] : memref<1x1xf32, #tpu.memory_space<vmem>>, vector<1x1xf32>
    tpu.vector_store %arg5[%c0_15, %c0_16], %30 {strides = array<i32>} : memref<1x1xf32, #tpu.memory_space<vmem>>, vector<1x1xf32>,
    return
  }
}

module attributes {stable_mosaic.version = 11 : i64} {
  func.func @mlm_fused_kernel(%arg0: i32, %arg1: memref<32x128xf32, #tpu.memory_space<vmem>>, %arg2: memref<128x5120xbf16, #tpu.memory_space<vmem>>, %arg3: memref<1x5120xf32, #tpu.memory_space<vmem>>, %arg4: memref<32x1xi32, #tpu.memory_space<vmem>>, %arg5: memref<32x5120xf32, #tpu.memory_space<vmem>>, %arg6: memref<1x1xf32, #tpu.memory_space<vmem>>, %arg7: memref<32x1xf32, #tpu.memory_space<vmem>>, %arg8: memref<32x1xf32, #tpu.memory_space<vmem>>, %arg9: memref<32x1xf32, #tpu.memory_space<vmem>>) attributes {dimension_semantics = [#tpu.dimension_semantics<arbitrary>], iteration_bounds = array<i64: 6>, scalar_prefetch = 0 : i64, scratch_operands = 3 : i64, tpu.core_type = #tpu.core_type<tc>, window_params = [{pipeline_mode = #tpu.pipeline_mode<synchronous>, transform_indices = @transform_0, window_bounds = array<i64: 32, 128>}, {transform_indices = @transform_1, window_bounds = array<i64: 128, 5120>}, {transform_indices = @transform_2, window_bounds = array<i64: 1, 5120>}, {pipeline_mode = #tpu.pipeline_mode<synchronous>, transform_indices = @transform_3, window_bounds = array<i64: 32, 1>}, {transform_indices = @transform_4, window_bounds = array<i64: 32, 5120>}, {pipeline_mode = #tpu.pipeline_mode<synchronous>, transform_indices = @transform_5, window_bounds = array<i64: 1, 1>}]} {
    %c0_i32 = arith.constant 0 : i32
    %0 = arith.cmpi eq, %arg0, %c0_i32 : i32
    %1 = arith.extui %0 : i1 to i32
    %c0_i32_0 = arith.constant 0 : i32
    %2 = arith.cmpi ne, %1, %c0_i32_0 : i32
    scf.if %2 {
      %cst_29 = arith.constant 0xFF800000 : f32
      %45 = vector.broadcast %cst_29 : f32 to vector<32x1xf32>
      %c0_30 = arith.constant 0 : index
      %c0_31 = arith.constant 0 : index
      %46 = vector.load %arg7[%c0_30, %c0_31] : memref<32x1xf32, #tpu.memory_space<vmem>>, vector<32x1xf32>
      tpu.vector_store %arg7[%c0_30, %c0_31], %45 {strides = array<i32>} : memref<32x1xf32, #tpu.memory_space<vmem>>, vector<32x1xf32>,
      %cst_32 = arith.constant 0.000000e+00 : f32
      %47 = vector.broadcast %cst_32 : f32 to vector<32x1xf32>
      %c0_33 = arith.constant 0 : index
      %c0_34 = arith.constant 0 : index
      %48 = vector.load %arg8[%c0_33, %c0_34] : memref<32x1xf32, #tpu.memory_space<vmem>>, vector<32x1xf32>
      tpu.vector_store %arg8[%c0_33, %c0_34], %47 {strides = array<i32>} : memref<32x1xf32, #tpu.memory_space<vmem>>, vector<32x1xf32>,
      %cst_35 = arith.constant 0.000000e+00 : f32
      %49 = vector.broadcast %cst_35 : f32 to vector<32x1xf32>
      %c0_36 = arith.constant 0 : index
      %c0_37 = arith.constant 0 : index
      %50 = vector.load %arg9[%c0_36, %c0_37] : memref<32x1xf32, #tpu.memory_space<vmem>>, vector<32x1xf32>
      tpu.vector_store %arg9[%c0_36, %c0_37], %49 {strides = array<i32>} : memref<32x1xf32, #tpu.memory_space<vmem>>, vector<32x1xf32>,
    } else {
    }
    %c0 = arith.constant 0 : index
    %c0_1 = arith.constant 0 : index
    %3 = vector.load %arg1[%c0, %c0_1] : memref<32x128xf32, #tpu.memory_space<vmem>>, vector<32x128xf32>
    %4 = arith.truncf %3 : vector<32x128xf32> to vector<32x128xbf16>
    %c0_2 = arith.constant 0 : index
    %c0_3 = arith.constant 0 : index
    %5 = vector.load %arg2[%c0_2, %c0_3] : memref<128x5120xbf16, #tpu.memory_space<vmem>>, vector<128x5120xbf16>
    %cst = arith.constant dense<0.000000e+00> : vector<32x5120xf32>
    %6 = tpu.matmul %4, %5, %cst {dimension_numbers = #tpu.dot_dimension_numbers<[1], [0], [0], [1], [0, 0, 1, 1], [], []>} : vector<32x128xbf16>, vector<128x5120xbf16>, vector<32x5120xf32> -> vector<32x5120xf32>
    %c0_4 = arith.constant 0 : index
    %c0_5 = arith.constant 0 : index
    %7 = vector.load %arg3[%c0_4, %c0_5] : memref<1x5120xf32, #tpu.memory_space<vmem>>, vector<1x5120xf32>
    %8 = vector.broadcast %7 : vector<1x5120xf32> to vector<32x5120xf32>
    %9 = arith.addf %6, %8 : vector<32x5120xf32>
    %c0_6 = arith.constant 0 : index
    %c0_7 = arith.constant 0 : index
    %10 = vector.load %arg5[%c0_6, %c0_7] : memref<32x5120xf32, #tpu.memory_space<vmem>>, vector<32x5120xf32>
    tpu.vector_store %arg5[%c0_6, %c0_7], %9 {strides = array<i32>} : memref<32x5120xf32, #tpu.memory_space<vmem>>, vector<32x5120xf32>,
    %c0_8 = arith.constant 0 : index
    %c0_9 = arith.constant 0 : index
    %11 = vector.load %arg4[%c0_8, %c0_9] : memref<32x1xi32, #tpu.memory_space<vmem>>, vector<32x1xi32>
    %12 = tpu.iota {dimensions = array<i32: 1>} : vector<32x5120xi32>
    %c5120_i32 = arith.constant 5120 : i32
    %13 = arith.muli %arg0, %c5120_i32 : i32
    %14 = vector.broadcast %13 : i32 to vector<32x5120xi32>
    %15 = arith.addi %12, %14 : vector<32x5120xi32>
    %c0_10 = arith.constant 0 : index
    %c0_11 = arith.constant 0 : index
    %16 = vector.load %arg9[%c0_10, %c0_11] : memref<32x1xf32, #tpu.memory_space<vmem>>, vector<32x1xf32>
    %17 = vector.broadcast %11 : vector<32x1xi32> to vector<32x5120xi32>
    %18 = arith.cmpi eq, %15, %17 : vector<32x5120xi32>
    %cst_12 = arith.constant 0.000000e+00 : f32
    %19 = vector.broadcast %cst_12 : f32 to vector<32x5120xf32>
    %20 = arith.select %18, %9, %19 : vector<32x5120xi1>, vector<32x5120xf32>
    %cst_13 = arith.constant dense<0.000000e+00> : vector<32xf32>
    %21 = vector.multi_reduction <add>, %20, %cst_13 [1] : vector<32x5120xf32> to vector<32xf32>
    %22 = vector.shape_cast %21 : vector<32xf32> to vector<32x1xf32>
    %23 = arith.addf %16, %22 : vector<32x1xf32>
    %c0_14 = arith.constant 0 : index
    %c0_15 = arith.constant 0 : index
    %24 = vector.load %arg9[%c0_14, %c0_15] : memref<32x1xf32, #tpu.memory_space<vmem>>, vector<32x1xf32>
    tpu.vector_store %arg9[%c0_14, %c0_15], %23 {strides = array<i32>} : memref<32x1xf32, #tpu.memory_space<vmem>>, vector<32x1xf32>,
    %c0_16 = arith.constant 0 : index
    %c0_17 = arith.constant 0 : index
    %25 = vector.load %arg7[%c0_16, %c0_17] : memref<32x1xf32, #tpu.memory_space<vmem>>, vector<32x1xf32>
    %cst_18 = arith.constant dense<0xFF800000> : vector<32xf32>
    %26 = vector.multi_reduction <maximumf>, %9, %cst_18 [1] : vector<32x5120xf32> to vector<32xf32>
    %27 = vector.shape_cast %26 : vector<32xf32> to vector<32x1xf32>
    %28 = arith.maximumf %25, %27 : vector<32x1xf32>
    %c0_19 = arith.constant 0 : index
    %c0_20 = arith.constant 0 : index
    %29 = vector.load %arg8[%c0_19, %c0_20] : memref<32x1xf32, #tpu.memory_space<vmem>>, vector<32x1xf32>
    %c0_21 = arith.constant 0 : index
    %c0_22 = arith.constant 0 : index
    %30 = vector.load %arg7[%c0_21, %c0_22] : memref<32x1xf32, #tpu.memory_space<vmem>>, vector<32x1xf32>
    %31 = arith.subf %30, %28 : vector<32x1xf32>
    %32 = math.exp %31 : vector<32x1xf32>
    %33 = arith.mulf %29, %32 : vector<32x1xf32>
    %34 = vector.broadcast %28 : vector<32x1xf32> to vector<32x5120xf32>
    %35 = arith.subf %9, %34 : vector<32x5120xf32>
    %36 = math.exp %35 : vector<32x5120xf32>
    %cst_23 = arith.constant dense<0.000000e+00> : vector<32xf32>
    %37 = vector.multi_reduction <add>, %36, %cst_23 [1] : vector<32x5120xf32> to vector<32xf32>
    %38 = vector.shape_cast %37 : vector<32xf32> to vector<32x1xf32>
    %39 = arith.addf %33, %38 : vector<32x1xf32>
    %c0_24 = arith.constant 0 : index
    %c0_25 = arith.constant 0 : index
    %40 = vector.load %arg8[%c0_24, %c0_25] : memref<32x1xf32, #tpu.memory_space<vmem>>, vector<32x1xf32>
    tpu.vector_store %arg8[%c0_24, %c0_25], %39 {strides = array<i32>} : memref<32x1xf32, #tpu.memory_space<vmem>>, vector<32x1xf32>,
    %c0_26 = arith.constant 0 : index
    %c0_27 = arith.constant 0 : index
    %41 = vector.load %arg7[%c0_26, %c0_27] : memref<32x1xf32, #tpu.memory_space<vmem>>, vector<32x1xf32>
    tpu.vector_store %arg7[%c0_26, %c0_27], %28 {strides = array<i32>} : memref<32x1xf32, #tpu.memory_space<vmem>>, vector<32x1xf32>,
    %c5_i32 = arith.constant 5 : i32
    %42 = arith.cmpi eq, %arg0, %c5_i32 : i32
    %43 = arith.extui %42 : i1 to i32
    %c0_i32_28 = arith.constant 0 : i32
    %44 = arith.cmpi ne, %43, %c0_i32_28 : i32
    scf.if %44 {
      %c0_29 = arith.constant 0 : index
      %c0_30 = arith.constant 0 : index
      %45 = vector.load %arg7[%c0_29, %c0_30] : memref<32x1xf32, #tpu.memory_space<vmem>>, vector<32x1xf32>
      %c0_31 = arith.constant 0 : index
      %c0_32 = arith.constant 0 : index
      %46 = vector.load %arg8[%c0_31, %c0_32] : memref<32x1xf32, #tpu.memory_space<vmem>>, vector<32x1xf32>
      %47 = math.log %46 : vector<32x1xf32>
      %48 = arith.addf %45, %47 : vector<32x1xf32>
      %c0_33 = arith.constant 0 : index
      %c0_34 = arith.constant 0 : index
      %49 = vector.load %arg9[%c0_33, %c0_34] : memref<32x1xf32, #tpu.memory_space<vmem>>, vector<32x1xf32>
      %50 = arith.subf %48, %49 : vector<32x1xf32>
      %c0_35 = arith.constant 0 : index
      %c0_36 = arith.constant 0 : index
      %51 = vector.load %arg4[%c0_35, %c0_36] : memref<32x1xi32, #tpu.memory_space<vmem>>, vector<32x1xi32>
      %c0_i32_37 = arith.constant 0 : i32
      %52 = vector.broadcast %c0_i32_37 : i32 to vector<32x1xi32>
      %53 = arith.cmpi ne, %51, %52 : vector<32x1xi32>
      %54 = arith.extui %53 : vector<32x1xi1> to vector<32x1xi32>
      %55 = arith.sitofp %54 : vector<32x1xi32> to vector<32x1xf32>
      %56 = vector.shape_cast %55 : vector<32x1xf32> to vector<1x32x1xf32>
      %cst_38 = arith.constant dense<0.000000e+00> : vector<1xf32>
      %57 = vector.multi_reduction <add>, %56, %cst_38 [1, 2] : vector<1x32x1xf32> to vector<1xf32>
      %58 = vector.shape_cast %57 : vector<1xf32> to vector<1x1x1xf32>
      %59 = vector.extract %58[0, 0, 0] : f32 from vector<1x1x1xf32>
      %cst_39 = arith.constant 1.000000e+00 : f32
      %60 = arith.maximumf %59, %cst_39 : f32
      %61 = arith.mulf %50, %55 : vector<32x1xf32>
      %62 = vector.shape_cast %61 : vector<32x1xf32> to vector<1x32x1xf32>
      %cst_40 = arith.constant dense<0.000000e+00> : vector<1xf32>
      %63 = vector.multi_reduction <add>, %62, %cst_40 [1, 2] : vector<1x32x1xf32> to vector<1xf32>
      %64 = vector.shape_cast %63 : vector<1xf32> to vector<1x1x1xf32>
      %65 = vector.extract %64[0, 0, 0] : f32 from vector<1x1x1xf32>
      %66 = arith.divf %65, %60 : f32
      %67 = vector.broadcast %66 : f32 to vector<1x1xf32>
      %c0_41 = arith.constant 0 : index
      %c0_42 = arith.constant 0 : index
      %68 = vector.load %arg6[%c0_41, %c0_42] : memref<1x1xf32, #tpu.memory_space<vmem>>, vector<1x1xf32>
      tpu.vector_store %arg6[%c0_41, %c0_42], %67 {strides = array<i32>} : memref<1x1xf32, #tpu.memory_space<vmem>>, vector<1x1xf32>,
    } else {
    }
    return
  }
  func.func @transform_0(%arg0: i32) -> (i32, i32) {
    %c0_i32 = arith.constant 0 : i32
    %c0_i32_0 = arith.constant 0 : i32
    %c0_i32_1 = arith.constant 0 : i32
    return %c0_i32, %c0_i32_0 : i32, i32
  }
  func.func @transform_1(%arg0: i32) -> (i32, i32) {
    %c0_i32 = arith.constant 0 : i32
    %c0_i32_0 = arith.constant 0 : i32
    return %c0_i32, %arg0 : i32, i32
  }
  func.func @transform_2(%arg0: i32) -> (i32, i32) {
    %c0_i32 = arith.constant 0 : i32
    %c0_i32_0 = arith.constant 0 : i32
    return %c0_i32, %arg0 : i32, i32
  }
  func.func @transform_3(%arg0: i32) -> (i32, i32) {
    %c0_i32 = arith.constant 0 : i32
    %c0_i32_0 = arith.constant 0 : i32
    %c0_i32_1 = arith.constant 0 : i32
    return %c0_i32, %c0_i32_0 : i32, i32
  }
  func.func @transform_4(%arg0: i32) -> (i32, i32) {
    %c0_i32 = arith.constant 0 : i32
    %c0_i32_0 = arith.constant 0 : i32
    return %c0_i32, %arg0 : i32, i32
  }
  func.func @transform_5(%arg0: i32) -> (i32, i32) {
    %c0_i32 = arith.constant 0 : i32
    %c0_i32_0 = arith.constant 0 : i32
    %c0_i32_1 = arith.constant 0 : i32
    return %c0_i32, %c0_i32_0 : i32, i32
  }
}

</mosaic_0001>

<bundles_post_ra>
// kernel: pretraining_forward.5
= control target key start
LH: loop header
LB: loop body
LE: loop exit
PB: predicated region body
PF: predicated region fallthrough
CT: control target
= control target key end

     0   :  { %11 = vsyncpa [#allocation3], 0  ;;  %s310_s0 = inlined_call_operand.vmem [shape: f32[8,128], index: 0, kind: input, shape index: {}]   ;;  %s311_s1 = inlined_call_operand.hbm [shape: f32[128,128], index: 1, kind: input, shape index: {}]   ;;  %s312_s2 = inlined_call_operand.hbm [shape: f32[1,128], index: 2, kind: input, shape index: {}]   ;;  %s313_s3 = inlined_call_operand.vmem [shape: s32[8,1], index: 3, kind: input, shape index: {}]   ;;  %s314_s4 = inlined_call_operand.vmem [shape: f32[8,128], index: 4, kind: output, shape index: {0}]   ;;  %s315_s5 = inlined_call_operand.hbm [shape: f32[1,1], index: 5, kind: output, shape index: {1}]  }
   0x1   :  { %12 = vsyncpa [#allocation6], 0 }
   0x2   :  { %13 = vsyncpa [#allocation4], 0  ;;  %s20_s20 = sshll.u32 %s311_s1, 4  ;;  %s255_s21 = smov [#allocation2]   ;;  %s21_s20 = int_to_ptr.hbm [resolvable:$true] %s20_s20 }
   0x3   :  { %s22_s22 = sshll.u32 %s255_s21, 4  ;;  %s34_s25 = sshll.u32 %s312_s2, 4  ;;  %s23_s22 = int_to_ptr.vmem [resolvable:$true] %s22_s22  ;;  %s35_s25 = int_to_ptr.hbm [resolvable:$true] %s34_s25 }
   0x4   :  { %s256_s26 = smov 128   ;;  %s257_s27 = smov 8  }
   0x5   :  { %28 = dma.hbm_to_vmem [thread:$0]  %s21_s20, 2048, %s23_s22, [#allocation3], %s256_s26, %s256_s26, %s257_s27  }
   0x6   :  { %s258_s28 = smov [#allocation5]  }
   0x7   :  { %s36_s29 = sshll.u32 %s258_s28, 4  ;;  %s37_s29 = int_to_ptr.vmem [resolvable:$true] %s36_s29 }
   0x8   :  { %39 = dma.hbm_to_vmem [thread:$0]  %s35_s25, 16, %s37_s29, [#allocation6]  }
   0x9   :  { %249 = dma.done.wait [#allocation3], 2048  }
   0xa   :  { %250 = vsyncadd [#allocation3], 4294965248 }
   0xb   :  { %251 = dma.done.wait [#allocation6], 16  }
   0xc   :  { %252 = vsyncadd [#allocation6], 4294967280  ;;  %v66_v0 = vld [vmem:[#allocation2 + $0x78] sm:$0xff]  ;;  %v65_v1 = vld [vmem:[#allocation2 + $0x70] sm:$0xff]  ;;  %v259_v17 = vmov 0   ;;  %v93_v26 = vlaneseq  ;;  %vm113_vm1 = vcmask 7168  }
   0xd   :  { %71 = vmatpush.msra.mxu0 %v66_v0  ;;  %v64_v2 = vld [vmem:[#allocation2 + $0x68] sm:$0xff]  ;;  %v63_v3 = vld [vmem:[#allocation2 + $0x60] sm:$0xff]  ;;  %v62_v4 = vld [vmem:[#allocation2 + $0x58] sm:$0xff]  ;;  %169 = vset.pattern.permute.xlu0 %v259_v17  ;;  %v260_v37 = vmov 8.0   ;;  %s145_s11 = sshll.u32 %s315_s5, 4  ;;  %vm134_vm3 = vcmask 0   ;;  %s146_s11 = int_to_ptr.hbm [resolvable:$true] %s145_s11 }
   0xe   :  { %v61_v5 = vld [vmem:[#allocation2 + $0x50] sm:$0xff]  ;;  %v60_v6 = vld [vmem:[#allocation2 + $0x48] sm:$0xff]  ;;  %v59_v7 = vld [vmem:[#allocation2 + $0x40] sm:$0xff]  ;;  %v94_v27 = vand.u32 127, %v93_v26 }
   0xf   :  { %72 = vmatpush.msra.mxu0 %v65_v1  ;;  %v58_v8 = vld [vmem:[#allocation2 + $0x38] sm:$0xff]  ;;  %v57_v9 = vld [vmem:[#allocation2 + $0x30] sm:$0xff]  ;;  %v56_v10 = vld [vmem:[#allocation2 + $0x28] sm:$0xff] }
  0x10   :  { %v55_v11 = vld [vmem:[#allocation2 + $0x20] sm:$0xff]  ;;  %v54_v12 = vld [vmem:[#allocation2 + $0x18] sm:$0xff]  ;;  %v53_v13 = vld [vmem:[#allocation2 + $0x10] sm:$0xff] }
  0x11   :  { %73 = vmatpush.msra.mxu0 %v64_v2  ;;  %v52_v14 = vld [vmem:[#allocation2 + $0x8] sm:$0xff]  ;;  %v51_v15 = vld [vmem:[#allocation2] sm:$0xff] }
  0x12   :  { %v50_v16 = vld [vmem:[%s310_s0] sm:$0xff]  ;;  %s261_s0 = smov [#allocation7]  }
  0x13   :  { %74 = vmatpush.msra.mxu0 %v63_v3  ;;  %v170_v18 = vld [vmem:[#allocation5] ss:$0 sm:$0xff] }
  0x14   :  { %v92_v21 = vld [vmem:[%s313_s3] sm:$0xff]  ;;  %s143_s3 = sshll.u32 %s261_s0, 4  ;;  %s144_s3 = int_to_ptr.vmem [resolvable:$true] %s143_s3 }
  0x15   :  { %75 = vmatpush.msra.mxu0 %v62_v4 }
  0x17   :  { %76 = vmatpush.msra.mxu0 %v61_v5 }
  0x19   :  { %77 = vmatpush.msra.mxu0 %v60_v6 }
  0x1b   :  { %78 = vmatpush.msra.mxu0 %v59_v7 }
  0x1d   :  { %79 = vmatpush.msra.mxu0 %v58_v8 }
  0x1f   :  { %80 = vmatpush.msra.mxu0 %v57_v9 }
  0x21   :  { %81 = vmatpush.msra.mxu0 %v56_v10 }
  0x23   :  { %82 = vmatpush.msra.mxu0 %v55_v11 }
  0x25   :  { %83 = vmatpush.msra.mxu0 %v54_v12 }
  0x27   :  { %84 = vmatpush.msra.mxu0 %v53_v13 }
  0x29   :  { %85 = vmatpush.msra.mxu0 %v52_v14 }
  0x2b   :  { %86 = vmatpush.msra.mxu0 %v51_v15 }
  0x2c   :  { %87 = vmatmul.f32.vlgmr.msra.gmra.mxu0 %v50_v16 }
  0xa9   :  { %v88_v19 = vpop.f32.mrf.mxu0 }
  0xaa   :  { %v89_v20 = vadd.f32 %v170_v18, %v88_v19 }
  0xac   :  { %91 = vst [vmem:[%s314_s4] sm:$0xff] %v89_v20  ;;  %95 = vmax.xlane.f32.xlu0 %v89_v20 }
  0xc0   :  { %106 = vperm.xlu0 %169, %v92_v21  }
 0x11f   :  { %v96_v22 = vpop.xlane.xlu0 %95 }
 0x120   :  { %v97_v23 = vsub.f32 %v89_v20, %v96_v22 }
 0x122   :  { %v98_v24 = vmul.f32 1.442695, %v97_v23 }
 0x124   :  { %171 = vpow2.f32 %v98_v24 }
 0x12a   :  { %v172_v25 = vpop.eup %171 }
 0x12b   :  { %100 = vadd.xlane.f32.xlu1 %v172_v25 }
 0x132   :  { %v107_v28 = vpop.permute.xlu0 %106 }
 0x133   :  { %vm108_vm0 = vcmp.eq.s32.totalorder %v94_v27, %v107_v28 }
 0x134   :  { %v109_v29 = vsel %vm108_vm0, %v89_v20, 0.0 }
 0x135   :  { %110 = vadd.xlane.f32.xlu1 %v109_v29 }
 0x19e   :  { %v101_v30 = vpop.xlane.xlu1 %100 }
 0x19f   :  { %173 = vlog2.f32 %v101_v30 }
 0x1a0   :  { %175 = vrcp.f32 %v260_v37 }
 0x1a5   :  { %v174_v31 = vpop.eup %173 }
 0x1a6   :  { %v103_v32 = vmul.f32 0.6931472, %v174_v31  ;;  %v176_v38 = vpop.eup %175 }
 0x1a7   :  { %v125_v39 = vmul.f32 8.0, %v176_v38  ;;  %vm129_vm2 = vweird.f32 %v176_v38 }
 0x1a8   :  { %v104_v33 = vadd.f32 %v103_v32, %v96_v22  ;;  %v111_v34 = vpop.xlane.xlu1 %110 }
 0x1a9   :  { %v126_v40 = vsub.f32 1.0, %v125_v39 }
 0x1aa   :  { %v112_v35 = vsub.f32 %v104_v33, %v111_v34 }
 0x1ab   :  { %v127_v44 = vmul.f32 %v176_v38, %v126_v40 }
 0x1ac   :  { %v114_v36 = vsel %vm113_vm1, %v112_v35, 0.0 }
 0x1ad   :  { %115 = vadd.xlane.f32.xlu2 %v114_v36  ;;  %v128_v47 = vadd.f32 %v176_v38, %v127_v44 }
 0x1af   :  { %v130_v50 = vsel %vm129_vm2, %v176_v38, %v128_v47 }
 0x220   :  { %v116_v41 = vpop.xlane.xlu2 %115 }
 0x221   :  { %v117_v42 = vrot.slane %v116_v41, 4 }
 0x223   :  { %v118_v43 = vadd.f32 %v117_v42, %v116_v41 }
 0x225   :  { %v119_v45 = vrot.slane %v118_v43, 2 }
 0x227   :  { %v120_v46 = vadd.f32 %v119_v45, %v118_v43 }
 0x229   :  { %v121_v48 = vrot.slane %v120_v46, 1 }
 0x22b   :  { %v122_v49 = vadd.f32 %v121_v48, %v120_v46 }
 0x22d   :  { %158 = vpush %v122_v49 }
 0x22e   :  { %160 = vpush %v130_v50 }
 0x25e   :  { %s159_s4 = spop %158 }
 0x25f   :  { %s161_s12 = spop %160 }
 0x260   :  { %s132_s13 = smul.f32 %s161_s12, %s159_s4 }
 0x262   :  { %v133_v51 = vstv %s132_s13 }
 0x263   :  { %135 = vst.msk [vmem:[#allocation7] sm:$0x1] %vm134_vm3, %v133_v51 }
 0x264   :  { %148 = dma.vmem_to_hbm [thread:$0]  %s144_s3, 16, %s146_s11, [#allocation4]  }
 0x265   :  { %253 = dma.done.wait [#allocation4], 16  }
 0x266   :  { %254 = vsyncadd [#allocation4], 4294967280 }
 0x267   :  { %155 = vsyncpa [#allocation3], 1 }
 0x268   :  { %156 = vsyncpa [#allocation6], 1 }
 0x269   :  { %157 = vsyncpa [#allocation4], 1 }

// kernel: pretraining_forward.3
= control target key start
LH: loop header
LB: loop body
LE: loop exit
PB: predicated region body
PF: predicated region fallthrough
CT: control target
= control target key end

     0   :  { %9 = vsyncpa [#allocation3], 0  ;;  %s2858_s0 = inlined_call_operand.vmem [shape: f32[8,8,128], index: 0, kind: input, shape index: {}]   ;;  %s2859_s1 = inlined_call_operand.hbm [shape: f32[128,512], index: 1, kind: input, shape index: {}]   ;;  %s2860_s2 = inlined_call_operand.hbm [shape: f32[128,512], index: 2, kind: input, shape index: {}]   ;;  %s2861_s3 = inlined_call_operand.hbm [shape: f32[1,512], index: 3, kind: input, shape index: {}]   ;;  %s2862_s4 = inlined_call_operand.vmem [shape: f32[8,8,128], index: 4, kind: output, shape index: {}]  }
   0x1   :  { %10 = vsyncpa [#allocation5], 0  ;;  %s30_s17 = sshll.u32 %s2860_s2, 4  ;;  %s1874_s18 = smov [#allocation4]   ;;  %s31_s17 = int_to_ptr.hbm [resolvable:$true] %s30_s17 }
   0x2   :  { %s32_s19 = sshll.u32 %s1874_s18, 4  ;;  %s17_s22 = sshll.u32 %s2859_s1, 4  ;;  %s33_s19 = int_to_ptr.vmem [resolvable:$true] %s32_s19  ;;  %s18_s22 = int_to_ptr.hbm [resolvable:$true] %s17_s22 }
   0x3   :  { %s1875_s23 = smov 512   ;;  %s1876_s24 = smov 32  }
   0x4   :  { %38 = dma.hbm_to_vmem [thread:$0]  %s31_s17, 8192, %s33_s19, [#allocation5], %s1875_s23, %s1875_s23, %s1876_s24  }
   0x5   :  { %s1877_s25 = smov [#allocation2]   ;;  %s44_s29 = sshll.u32 %s2861_s3, 4  ;;  %s45_s29 = int_to_ptr.hbm [resolvable:$true] %s44_s29 }
   0x6   :  { %s19_s26 = sshll.u32 %s1877_s25, 4  ;;  %s1878_s2 = smov [#allocation6]   ;;  %s20_s26 = int_to_ptr.vmem [resolvable:$true] %s19_s26 }
   0x7   :  { %25 = dma.hbm_to_vmem [thread:$0]  %s18_s22, 8192, %s20_s26, [#allocation3], %s1875_s23, %s1875_s23, %s1876_s24  }
   0x8   :  { %s46_s30 = sshll.u32 %s1878_s2, 4  ;;  %s47_s30 = int_to_ptr.vmem [resolvable:$true] %s46_s30 }
   0x9   :  { %49 = dma.hbm_to_vmem [thread:$0]  %s45_s29, 64, %s47_s30, [#allocation5]  }
   0xa   :  { %1870 = dma.done.wait [#allocation3], 8192  }
   0xb   :  { %1871 = vsyncadd [#allocation3], 4294959104 }
   0xc   :  { %1872 = dma.done.wait [#allocation5], 8256  }
   0xd   :  { %1873 = vsyncadd [#allocation5], 4294959040  ;;  %v194_v0 = vld [vmem:[#allocation2 + $0x1e0] sm:$0xff]  ;;  %v195_v1 = vld [vmem:[#allocation2 + $0x1e8] sm:$0xff] }
   0xe   :  { %v196_v2 = vld [vmem:[#allocation2 + $0x1f0] sm:$0xff]  ;;  %208 = vmatpush.msra.mxu0 %v194_v0  ;;  %249 = vmatpush.msra.mxu1 %v195_v1  ;;  %v197_v3 = vld [vmem:[#allocation2 + $0x1f8] sm:$0xff]  ;;  %v190_v4 = vld [vmem:[#allocation2 + $0x1c0] sm:$0xff] }
   0xf   :  { %v191_v5 = vld [vmem:[#allocation2 + $0x1c8] sm:$0xff]  ;;  %290 = vmatpush.msra.mxu2 %v196_v2  ;;  %331 = vmatpush.msra.mxu3 %v197_v3  ;;  %v192_v6 = vld [vmem:[#allocation2 + $0x1d0] sm:$0xff]  ;;  %v193_v7 = vld [vmem:[#allocation2 + $0x1d8] sm:$0xff] }
  0x10   :  { %v186_v8 = vld [vmem:[#allocation2 + $0x1a0] sm:$0xff]  ;;  %209 = vmatpush.msra.mxu0 %v190_v4  ;;  %250 = vmatpush.msra.mxu1 %v191_v5  ;;  %v187_v9 = vld [vmem:[#allocation2 + $0x1a8] sm:$0xff]  ;;  %v188_v10 = vld [vmem:[#allocation2 + $0x1b0] sm:$0xff] }
  0x11   :  { %v189_v11 = vld [vmem:[#allocation2 + $0x1b8] sm:$0xff]  ;;  %291 = vmatpush.msra.mxu2 %v192_v6  ;;  %332 = vmatpush.msra.mxu3 %v193_v7  ;;  %v182_v12 = vld [vmem:[#allocation2 + $0x180] sm:$0xff]  ;;  %v183_v13 = vld [vmem:[#allocation2 + $0x188] sm:$0xff] }
  0x12   :  { %210 = vmatpush.msra.mxu0 %v186_v8  ;;  %251 = vmatpush.msra.mxu1 %v187_v9  ;;  %v184_v14 = vld [vmem:[#allocation2 + $0x190] sm:$0xff]  ;;  %v185_v15 = vld [vmem:[#allocation2 + $0x198] sm:$0xff]  ;;  %v178_v16 = vld [vmem:[#allocation2 + $0x160] sm:$0xff] }
  0x13   :  { %292 = vmatpush.msra.mxu2 %v188_v10  ;;  %333 = vmatpush.msra.mxu3 %v189_v11  ;;  %v179_v17 = vld [vmem:[#allocation2 + $0x168] sm:$0xff]  ;;  %v180_v18 = vld [vmem:[#allocation2 + $0x170] sm:$0xff]  ;;  %v181_v19 = vld [vmem:[#allocation2 + $0x178] sm:$0xff] }
  0x14   :  { %211 = vmatpush.msra.mxu0 %v182_v12  ;;  %252 = vmatpush.msra.mxu1 %v183_v13  ;;  %v174_v20 = vld [vmem:[#allocation2 + $0x140] sm:$0xff]  ;;  %v175_v21 = vld [vmem:[#allocation2 + $0x148] sm:$0xff]  ;;  %v176_v22 = vld [vmem:[#allocation2 + $0x150] sm:$0xff] }
  0x15   :  { %293 = vmatpush.msra.mxu2 %v184_v14  ;;  %334 = vmatpush.msra.mxu3 %v185_v15  ;;  %v177_v23 = vld [vmem:[#allocation2 + $0x158] sm:$0xff]  ;;  %v170_v24 = vld [vmem:[#allocation2 + $0x120] sm:$0xff]  ;;  %v171_v25 = vld [vmem:[#allocation2 + $0x128] sm:$0xff] }
  0x16   :  { %212 = vmatpush.msra.mxu0 %v178_v16  ;;  %253 = vmatpush.msra.mxu1 %v179_v17  ;;  %v172_v26 = vld [vmem:[#allocation2 + $0x130] sm:$0xff]  ;;  %v173_v27 = vld [vmem:[#allocation2 + $0x138] sm:$0xff]  ;;  %v166_v28 = vld [vmem:[#allocation2 + $0x100] sm:$0xff] }
  0x17   :  { %294 = vmatpush.msra.mxu2 %v180_v18  ;;  %335 = vmatpush.msra.mxu3 %v181_v19  ;;  %v167_v29 = vld [vmem:[#allocation2 + $0x108] sm:$0xff]  ;;  %v168_v30 = vld [vmem:[#allocation2 + $0x110] sm:$0xff]  ;;  %v169_v31 = vld [vmem:[#allocation2 + $0x118] sm:$0xff] }
  0x18   :  { %213 = vmatpush.msra.mxu0 %v174_v20  ;;  %254 = vmatpush.msra.mxu1 %v175_v21  ;;  %v162_v32 = vld [vmem:[#allocation2 + $0xe0] sm:$0xff]  ;;  %v163_v33 = vld [vmem:[#allocation2 + $0xe8] sm:$0xff]  ;;  %v164_v34 = vld [vmem:[#allocation2 + $0xf0] sm:$0xff] }
  0x19   :  { %295 = vmatpush.msra.mxu2 %v176_v22  ;;  %336 = vmatpush.msra.mxu3 %v177_v23  ;;  %v165_v35 = vld [vmem:[#allocation2 + $0xf8] sm:$0xff]  ;;  %v158_v36 = vld [vmem:[#allocation2 + $0xc0] sm:$0xff]  ;;  %v159_v37 = vld [vmem:[#allocation2 + $0xc8] sm:$0xff] }
  0x1a   :  { %214 = vmatpush.msra.mxu0 %v170_v24  ;;  %255 = vmatpush.msra.mxu1 %v171_v25  ;;  %v160_v38 = vld [vmem:[#allocation2 + $0xd0] sm:$0xff]  ;;  %v161_v39 = vld [vmem:[#allocation2 + $0xd8] sm:$0xff]  ;;  %v154_v40 = vld [vmem:[#allocation2 + $0xa0] sm:$0xff] }
  0x1b   :  { %296 = vmatpush.msra.mxu2 %v172_v26  ;;  %337 = vmatpush.msra.mxu3 %v173_v27  ;;  %v155_v41 = vld [vmem:[#allocation2 + $0xa8] sm:$0xff]  ;;  %v156_v42 = vld [vmem:[#allocation2 + $0xb0] sm:$0xff]  ;;  %v157_v43 = vld [vmem:[#allocation2 + $0xb8] sm:$0xff] }
  0x1c   :  { %215 = vmatpush.msra.mxu0 %v166_v28  ;;  %256 = vmatpush.msra.mxu1 %v167_v29  ;;  %v150_v44 = vld [vmem:[#allocation2 + $0x80] sm:$0xff]  ;;  %v151_v45 = vld [vmem:[#allocation2 + $0x88] sm:$0xff]  ;;  %v152_v46 = vld [vmem:[#allocation2 + $0x90] sm:$0xff] }
  0x1d   :  { %297 = vmatpush.msra.mxu2 %v168_v30  ;;  %338 = vmatpush.msra.mxu3 %v169_v31  ;;  %v153_v47 = vld [vmem:[#allocation2 + $0x98] sm:$0xff]  ;;  %v146_v48 = vld [vmem:[#allocation2 + $0x60] sm:$0xff]  ;;  %v147_v49 = vld [vmem:[#allocation2 + $0x68] sm:$0xff] }
  0x1e   :  { %216 = vmatpush.msra.mxu0 %v162_v32  ;;  %257 = vmatpush.msra.mxu1 %v163_v33  ;;  %v148_v50 = vld [vmem:[#allocation2 + $0x70] sm:$0xff]  ;;  %v149_v51 = vld [vmem:[#allocation2 + $0x78] sm:$0xff]  ;;  %v142_v52 = vld [vmem:[#allocation2 + $0x40] sm:$0xff] }
  0x1f   :  { %298 = vmatpush.msra.mxu2 %v164_v34  ;;  %339 = vmatpush.msra.mxu3 %v165_v35  ;;  %v143_v53 = vld [vmem:[#allocation2 + $0x48] sm:$0xff]  ;;  %v144_v54 = vld [vmem:[#allocation2 + $0x50] sm:$0xff]  ;;  %v145_v55 = vld [vmem:[#allocation2 + $0x58] sm:$0xff] }
  0x20   :  { %217 = vmatpush.msra.mxu0 %v158_v36  ;;  %258 = vmatpush.msra.mxu1 %v159_v37  ;;  %v138_v56 = vld [vmem:[#allocation2 + $0x20] sm:$0xff]  ;;  %v139_v57 = vld [vmem:[#allocation2 + $0x28] sm:$0xff]  ;;  %v140_v58 = vld [vmem:[#allocation2 + $0x30] sm:$0xff] }
  0x21   :  { %299 = vmatpush.msra.mxu2 %v160_v38  ;;  %340 = vmatpush.msra.mxu3 %v161_v39  ;;  %v141_v59 = vld [vmem:[#allocation2 + $0x38] sm:$0xff]  ;;  %v134_v60 = vld [vmem:[#allocation2] sm:$0xff]  ;;  %v135_v61 = vld [vmem:[#allocation2 + $0x8] sm:$0xff] }
  0x22   :  { %218 = vmatpush.msra.mxu0 %v154_v40  ;;  %259 = vmatpush.msra.mxu1 %v155_v41  ;;  %v136_v62 = vld [vmem:[#allocation2 + $0x10] sm:$0xff]  ;;  %v137_v63 = vld [vmem:[#allocation2 + $0x18] sm:$0xff]  ;;  %v126_v0 = vld [vmem:[%s2858_s0] sm:$0xff] }
  0x23   :  { %300 = vmatpush.msra.mxu2 %v156_v42  ;;  %341 = vmatpush.msra.mxu3 %v157_v43  ;;  %v1917_v1 = vld [vmem:[#allocation4 + $0x1e0] sm:$0xff]  ;;  %v1919_v2 = vld [vmem:[#allocation4 + $0x1e8] sm:$0xff]  ;;  %v1921_v3 = vld [vmem:[#allocation4 + $0x1f8] sm:$0xff] }
  0x24   :  { %219 = vmatpush.msra.mxu0 %v150_v44  ;;  %260 = vmatpush.msra.mxu1 %v151_v45  ;;  %v1923_v4 = vld [vmem:[#allocation4 + $0x1f0] sm:$0xff]  ;;  %v1925_v5 = vld [vmem:[#allocation4 + $0x1c0] sm:$0xff]  ;;  %v1927_v6 = vld [vmem:[#allocation4 + $0x1c8] sm:$0xff] }
  0x25   :  { %301 = vmatpush.msra.mxu2 %v152_v46  ;;  %342 = vmatpush.msra.mxu3 %v153_v47  ;;  %v1931_v7 = vld [vmem:[#allocation4 + $0x1d8] sm:$0xff]  ;;  %v1933_v8 = vld [vmem:[#allocation4 + $0x1d0] sm:$0xff]  ;;  %v1936_v9 = vld [vmem:[#allocation4 + $0x1a0] sm:$0xff] }
  0x26   :  { %220 = vmatpush.msra.mxu0 %v146_v48  ;;  %261 = vmatpush.msra.mxu1 %v147_v49  ;;  %v1938_v10 = vld [vmem:[#allocation4 + $0x1a8] sm:$0xff]  ;;  %v1943_v11 = vld [vmem:[#allocation4 + $0x1b8] sm:$0xff]  ;;  %v1945_v12 = vld [vmem:[#allocation4 + $0x1b0] sm:$0xff] }
  0x27   :  { %302 = vmatpush.msra.mxu2 %v148_v50  ;;  %343 = vmatpush.msra.mxu3 %v149_v51  ;;  %v127_v13 = vld [vmem:[%s2858_s0 + $0x8] sm:$0xff]  ;;  %v1954_v14 = vld [vmem:[#allocation4 + $0x180] sm:$0xff]  ;;  %v1960_v16 = vld [vmem:[#allocation4 + $0x198] sm:$0xff] }
  0x28   :  { %221 = vmatpush.msra.mxu0 %v142_v52  ;;  %262 = vmatpush.msra.mxu1 %v143_v53  ;;  %v1956_v15 = vld [vmem:[#allocation4 + $0x188] sm:$0xff]  ;;  %v1962_v17 = vld [vmem:[#allocation4 + $0x190] sm:$0xff]  ;;  %v1964_v18 = vld [vmem:[#allocation4 + $0x160] sm:$0xff] }
  0x29   :  { %303 = vmatpush.msra.mxu2 %v144_v54  ;;  %344 = vmatpush.msra.mxu3 %v145_v55  ;;  %v1966_v19 = vld [vmem:[#allocation4 + $0x168] sm:$0xff]  ;;  %v1970_v20 = vld [vmem:[#allocation4 + $0x178] sm:$0xff]  ;;  %v1972_v21 = vld [vmem:[#allocation4 + $0x170] sm:$0xff] }
  0x2a   :  { %222 = vmatpush.msra.mxu0 %v138_v56  ;;  %263 = vmatpush.msra.mxu1 %v139_v57  ;;  %v1975_v22 = vld [vmem:[#allocation4 + $0x140] sm:$0xff]  ;;  %v1977_v23 = vld [vmem:[#allocation4 + $0x148] sm:$0xff]  ;;  %v1982_v24 = vld [vmem:[#allocation4 + $0x158] sm:$0xff] }
  0x2b   :  { %304 = vmatpush.msra.mxu2 %v140_v58  ;;  %345 = vmatpush.msra.mxu3 %v141_v59  ;;  %v1984_v25 = vld [vmem:[#allocation4 + $0x150] sm:$0xff]  ;;  %v1993_v27 = vld [vmem:[#allocation4 + $0x120] sm:$0xff]  ;;  %v1995_v28 = vld [vmem:[#allocation4 + $0x128] sm:$0xff] }
  0x2c   :  { %223 = vmatpush.msra.mxu0 %v134_v60  ;;  %264 = vmatpush.msra.mxu1 %v135_v61  ;;  %v128_v26 = vld [vmem:[%s2858_s0 + $0x10] sm:$0xff]  ;;  %v1999_v29 = vld [vmem:[#allocation4 + $0x138] sm:$0xff]  ;;  %v2003_v31 = vld [vmem:[#allocation4 + $0x100] sm:$0xff] }
  0x2d   :  { %305 = vmatpush.msra.mxu2 %v136_v62  ;;  %346 = vmatpush.msra.mxu3 %v137_v63  ;;  %v2001_v30 = vld [vmem:[#allocation4 + $0x130] sm:$0xff]  ;;  %v2005_v32 = vld [vmem:[#allocation4 + $0x108] sm:$0xff]  ;;  %v2009_v33 = vld [vmem:[#allocation4 + $0x118] sm:$0xff] }
  0x2e   :  { %224 = vmatmul.f32.vlgmr.msra.gmra.mxu0 %v126_v0  ;;  %265 = vmatmul.f32.vlgmr.msra.gmra.mxu1 %v126_v0  ;;  %v2011_v34 = vld [vmem:[#allocation4 + $0x110] sm:$0xff]  ;;  %v2014_v35 = vld [vmem:[#allocation4 + $0xe0] sm:$0xff]  ;;  %v2016_v36 = vld [vmem:[#allocation4 + $0xe8] sm:$0xff] }
  0x2f   :  { %306 = vmatmul.f32.vlgmr.msra.gmra.mxu2 %v126_v0  ;;  %347 = vmatmul.f32.vlgmr.msra.gmra.mxu3 %v126_v0  ;;  %v2021_v37 = vld [vmem:[#allocation4 + $0xf8] sm:$0xff]  ;;  %v2023_v38 = vld [vmem:[#allocation4 + $0xf0] sm:$0xff]  ;;  %v2032_v40 = vld [vmem:[#allocation4 + $0xc0] sm:$0xff] }
  0x30   :  { %372 = vmatpush.msrb.mxu0 %v1917_v1  ;;  %392 = vmatpush.msrb.mxu1 %v1919_v2  ;;  %v129_v39 = vld [vmem:[%s2858_s0 + $0x18] sm:$0xff]  ;;  %v2034_v41 = vld [vmem:[#allocation4 + $0xc8] sm:$0xff]  ;;  %v2040_v43 = vld [vmem:[#allocation4 + $0xd0] sm:$0xff] }
  0x31   :  { %432 = vmatpush.msrb.mxu3 %v1921_v3  ;;  %412 = vmatpush.msrb.mxu2 %v1923_v4  ;;  %v2038_v42 = vld [vmem:[#allocation4 + $0xd8] sm:$0xff]  ;;  %2951 = vst [vmem:[#allocation10_spill] sm:$0xff] %v2040_v43  ;;  %v2042_v44 = vld [vmem:[#allocation4 + $0xa0] sm:$0xff]  ;;  %v2044_v45 = vld [vmem:[#allocation4 + $0xa8] sm:$0xff] }
  0x32   :  { %373 = vmatpush.msrb.mxu0 %v1925_v5  ;;  %393 = vmatpush.msrb.mxu1 %v1927_v6  ;;  %2950 = vst [vmem:[#allocation9_spill] sm:$0xff] %v2038_v42  ;;  %v2048_v46 = vld [vmem:[#allocation4 + $0xb8] sm:$0xff]  ;;  %v2050_v47 = vld [vmem:[#allocation4 + $0xb0] sm:$0xff]  ;;  %v2053_v48 = vld [vmem:[#allocation4 + $0x80] sm:$0xff] }
  0x33   :  { %433 = vmatpush.msrb.mxu3 %v1931_v7  ;;  %413 = vmatpush.msrb.mxu2 %v1933_v8  ;;  %2952 = vst [vmem:[#allocation11_spill] sm:$0xff] %v2042_v44  ;;  %v2055_v49 = vld [vmem:[#allocation4 + $0x88] sm:$0xff]  ;;  %v2060_v50 = vld [vmem:[#allocation4 + $0x98] sm:$0xff]  ;;  %v2062_v51 = vld [vmem:[#allocation4 + $0x90] sm:$0xff] }
  0x34   :  { %374 = vmatpush.msrb.mxu0 %v1936_v9  ;;  %394 = vmatpush.msrb.mxu1 %v1938_v10  ;;  %2953 = vst [vmem:[#allocation12_spill] sm:$0xff] %v2044_v45  ;;  %v130_v52 = vld [vmem:[%s2858_s0 + $0x20] sm:$0xff]  ;;  %v2073_v54 = vld [vmem:[#allocation4 + $0x68] sm:$0xff]  ;;  %v2077_v55 = vld [vmem:[#allocation4 + $0x78] sm:$0xff] }
  0x35   :  { %434 = vmatpush.msrb.mxu3 %v1943_v11  ;;  %414 = vmatpush.msrb.mxu2 %v1945_v12  ;;  %2954 = vst [vmem:[#allocation13_spill] sm:$0xff] %v2048_v46  ;;  %v2071_v53 = vld [vmem:[#allocation4 + $0x60] sm:$0xff]  ;;  %v2079_v56 = vld [vmem:[#allocation4 + $0x70] sm:$0xff]  ;;  %v2083_v58 = vld [vmem:[#allocation4 + $0x48] sm:$0xff] }
  0x36   :  { %227 = vmatmul.f32.gmra.mxu0 %v127_v13  ;;  %268 = vmatmul.f32.gmra.mxu1 %v127_v13  ;;  %2955 = vst [vmem:[#allocation14_spill] sm:$0xff] %v2050_v47  ;;  %v2081_v57 = vld [vmem:[#allocation4 + $0x40] sm:$0xff]  ;;  %v2087_v59 = vld [vmem:[#allocation4 + $0x58] sm:$0xff]  ;;  %v2089_v60 = vld [vmem:[#allocation4 + $0x50] sm:$0xff] }
  0x37   :  { %309 = vmatmul.f32.gmra.mxu2 %v127_v13  ;;  %350 = vmatmul.f32.gmra.mxu3 %v127_v13  ;;  %2956 = vst [vmem:[#allocation15_spill] sm:$0xff] %v2053_v48  ;;  %v2092_v61 = vld [vmem:[#allocation4 + $0x20] sm:$0xff]  ;;  %v2094_v62 = vld [vmem:[#allocation4 + $0x28] sm:$0xff]  ;;  %v2099_v63 = vld [vmem:[#allocation4 + $0x30] sm:$0xff] }
  0x38   :  { %375 = vmatpush.msrb.mxu0 %v1954_v14  ;;  %395 = vmatpush.msrb.mxu1 %v1956_v15  ;;  %2957 = vst [vmem:[#allocation16_spill] sm:$0xff] %v2055_v49  ;;  %v2101_v0 = vld [vmem:[#allocation4 + $0x38] sm:$0xff]  ;;  %v131_v13 = vld [vmem:[%s2858_s0 + $0x28] sm:$0xff] }
  0x39   :  { %435 = vmatpush.msrb.mxu3 %v1960_v16  ;;  %415 = vmatpush.msrb.mxu2 %v1962_v17  ;;  %2958 = vst [vmem:[#allocation17_spill] sm:$0xff] %v2060_v50 }
  0x3a   :  { %376 = vmatpush.msrb.mxu0 %v1964_v18  ;;  %396 = vmatpush.msrb.mxu1 %v1966_v19  ;;  %2959 = vst [vmem:[#allocation18_spill] sm:$0xff] %v2062_v51 }
  0x3b   :  { %436 = vmatpush.msrb.mxu3 %v1970_v20  ;;  %416 = vmatpush.msrb.mxu2 %v1972_v21  ;;  %2960 = vst [vmem:[#allocation19_spill] sm:$0xff] %v2071_v53 }
  0x3c   :  { %377 = vmatpush.msrb.mxu0 %v1975_v22  ;;  %397 = vmatpush.msrb.mxu1 %v1977_v23  ;;  %2961 = vst [vmem:[#allocation20_spill] sm:$0xff] %v2073_v54 }
  0x3d   :  { %437 = vmatpush.msrb.mxu3 %v1982_v24  ;;  %417 = vmatpush.msrb.mxu2 %v1984_v25  ;;  %2962 = vst [vmem:[#allocation21_spill] sm:$0xff] %v2077_v55 }
  0x3e   :  { %230 = vmatmul.f32.gmra.mxu0 %v128_v26  ;;  %271 = vmatmul.f32.gmra.mxu1 %v128_v26  ;;  %2963 = vst [vmem:[#allocation22_spill] sm:$0xff] %v2079_v56 }
  0x3f   :  { %312 = vmatmul.f32.gmra.mxu2 %v128_v26  ;;  %353 = vmatmul.f32.gmra.mxu3 %v128_v26  ;;  %2964 = vst [vmem:[#allocation23_spill] sm:$0xff] %v2081_v57  ;;  %v2110_v26 = vld [vmem:[#allocation4] sm:$0xff] }
  0x40   :  { %378 = vmatpush.msrb.mxu0 %v1993_v27  ;;  %398 = vmatpush.msrb.mxu1 %v1995_v28  ;;  %2965 = vst [vmem:[#allocation24_spill] sm:$0xff] %v2083_v58 }
  0x41   :  { %438 = vmatpush.msrb.mxu3 %v1999_v29  ;;  %418 = vmatpush.msrb.mxu2 %v2001_v30  ;;  %2966 = vst [vmem:[#allocation25_spill] sm:$0xff] %v2087_v59 }
  0x42   :  { %379 = vmatpush.msrb.mxu0 %v2003_v31  ;;  %399 = vmatpush.msrb.mxu1 %v2005_v32  ;;  %2967 = vst [vmem:[#allocation26_spill] sm:$0xff] %v2089_v60 }
  0x43   :  { %439 = vmatpush.msrb.mxu3 %v2009_v33  ;;  %419 = vmatpush.msrb.mxu2 %v2011_v34  ;;  %2968 = vst [vmem:[#allocation27_spill] sm:$0xff] %v2092_v61 }
  0x44   :  { %380 = vmatpush.msrb.mxu0 %v2014_v35  ;;  %400 = vmatpush.msrb.mxu1 %v2016_v36  ;;  %2969 = vst [vmem:[#allocation28_spill] sm:$0xff] %v2094_v62 }
  0x45   :  { %440 = vmatpush.msrb.mxu3 %v2021_v37  ;;  %420 = vmatpush.msrb.mxu2 %v2023_v38  ;;  %2970 = vst [vmem:[#allocation29_spill] sm:$0xff] %v2099_v63 }
  0x46   :  { %233 = vmatmul.f32.gmra.mxu0 %v129_v39  ;;  %274 = vmatmul.f32.gmra.mxu1 %v129_v39  ;;  %2971 = vst [vmem:[#allocation30_spill] sm:$0xff] %v2101_v0 }
  0x47   :  { %315 = vmatmul.f32.gmra.mxu2 %v129_v39  ;;  %356 = vmatmul.f32.gmra.mxu3 %v129_v39  ;;  %2972 = vst [vmem:[#allocation31_spill] sm:$0xff] %v2110_v26  ;;  %v2112_v39 = vld [vmem:[#allocation4 + $0x8] sm:$0xff] }
  0x48   :  { %381 = vmatpush.msrb.mxu0 %v2032_v40  ;;  %401 = vmatpush.msrb.mxu1 %v2034_v41  ;;  %2973 = vst [vmem:[#allocation32_spill] sm:$0xff] %v2112_v39 }
  0x49   :  { %441 = vmatpush.msrb.mxu3 %v2038_v42  ;;  %421 = vmatpush.msrb.mxu2 %v2040_v43 }
  0x4a   :  { %382 = vmatpush.msrb.mxu0 %v2042_v44  ;;  %402 = vmatpush.msrb.mxu1 %v2044_v45 }
  0x4b   :  { %442 = vmatpush.msrb.mxu3 %v2048_v46  ;;  %422 = vmatpush.msrb.mxu2 %v2050_v47 }
  0x4c   :  { %383 = vmatpush.msrb.mxu0 %v2053_v48  ;;  %403 = vmatpush.msrb.mxu1 %v2055_v49 }
  0x4d   :  { %443 = vmatpush.msrb.mxu3 %v2060_v50  ;;  %423 = vmatpush.msrb.mxu2 %v2062_v51 }
  0x4e   :  { %236 = vmatmul.f32.gmra.mxu0 %v130_v52  ;;  %277 = vmatmul.f32.gmra.mxu1 %v130_v52 }
  0x4f   :  { %318 = vmatmul.f32.gmra.mxu2 %v130_v52  ;;  %359 = vmatmul.f32.gmra.mxu3 %v130_v52  ;;  %v2116_v52 = vld [vmem:[#allocation4 + $0x10] sm:$0xff] }
  0x50   :  { %384 = vmatpush.msrb.mxu0 %v2071_v53  ;;  %404 = vmatpush.msrb.mxu1 %v2073_v54  ;;  %2974 = vst [vmem:[#allocation33_spill] sm:$0xff] %v2116_v52 }
  0x51   :  { %444 = vmatpush.msrb.mxu3 %v2077_v55  ;;  %424 = vmatpush.msrb.mxu2 %v2079_v56 }
  0x52   :  { %385 = vmatpush.msrb.mxu0 %v2081_v57  ;;  %405 = vmatpush.msrb.mxu1 %v2083_v58  ;;  %v2118_v58 = vld [vmem:[#allocation4 + $0x18] sm:$0xff] }
  0x53   :  { %445 = vmatpush.msrb.mxu3 %v2087_v59  ;;  %425 = vmatpush.msrb.mxu2 %v2089_v60  ;;  %2975 = vst [vmem:[#allocation34_spill] sm:$0xff] %v2118_v58 }
  0x54   :  { %386 = vmatpush.msrb.mxu0 %v2092_v61  ;;  %406 = vmatpush.msrb.mxu1 %v2094_v62 }
  0x55   :  { %426 = vmatpush.msrb.mxu2 %v2099_v63  ;;  %446 = vmatpush.msrb.mxu3 %v2101_v0  ;;  %v132_v0 = vld [vmem:[%s2858_s0 + $0x30] sm:$0xff] }
  0x56   :  { %239 = vmatmul.f32.gmra.mxu0 %v131_v13  ;;  %280 = vmatmul.f32.gmra.mxu1 %v131_v13 }
  0x57   :  { %321 = vmatmul.f32.gmra.mxu2 %v131_v13  ;;  %362 = vmatmul.f32.gmra.mxu3 %v131_v13  ;;  %v133_v13 = vld [vmem:[%s2858_s0 + $0x38] sm:$0xff] }
  0x58   :  { %387 = vmatpush.msrb.mxu0 %v2110_v26  ;;  %407 = vmatpush.msrb.mxu1 %v2112_v39 }
  0x59   :  { %427 = vmatpush.msrb.mxu2 %v2116_v52  ;;  %447 = vmatpush.msrb.mxu3 %v2118_v58 }
  0x5a   :  { %520 = vmatpush.msra.mxu0 %v1917_v1  ;;  %540 = vmatpush.msra.mxu1 %v1919_v2 }
  0x5b   :  { %560 = vmatpush.msra.mxu2 %v1923_v4  ;;  %580 = vmatpush.msra.mxu3 %v1921_v3 }
  0x5c   :  { %521 = vmatpush.msra.mxu0 %v1925_v5  ;;  %541 = vmatpush.msra.mxu1 %v1927_v6 }
  0x5d   :  { %561 = vmatpush.msra.mxu2 %v1933_v8  ;;  %581 = vmatpush.msra.mxu3 %v1931_v7 }
  0x5e   :  { %242 = vmatmul.f32.gmra.mxu0 %v132_v0  ;;  %283 = vmatmul.f32.gmra.mxu1 %v132_v0 }
  0x5f   :  { %324 = vmatmul.f32.gmra.mxu2 %v132_v0  ;;  %365 = vmatmul.f32.gmra.mxu3 %v132_v0  ;;  %v1879_v0 = vmov 0.0  }
  0x60   :  { %522 = vmatpush.msra.mxu0 %v1936_v9  ;;  %542 = vmatpush.msra.mxu1 %v1938_v10 }
  0x61   :  { %562 = vmatpush.msra.mxu2 %v1945_v12  ;;  %582 = vmatpush.msra.mxu3 %v1943_v11 }
  0x62   :  { %523 = vmatpush.msra.mxu0 %v1954_v14  ;;  %543 = vmatpush.msra.mxu1 %v1956_v15 }
  0x63   :  { %563 = vmatpush.msra.mxu2 %v1962_v17  ;;  %583 = vmatpush.msra.mxu3 %v1960_v16 }
  0x64   :  { %524 = vmatpush.msra.mxu0 %v1964_v18  ;;  %544 = vmatpush.msra.mxu1 %v1966_v19 }
  0x65   :  { %564 = vmatpush.msra.mxu2 %v1972_v21  ;;  %584 = vmatpush.msra.mxu3 %v1970_v20 }
  0x66   :  { %245 = vmatmul.f32.gmra.mxu0 %v133_v13  ;;  %286 = vmatmul.f32.gmra.mxu1 %v133_v13 }
  0x67   :  { %327 = vmatmul.f32.gmra.mxu2 %v133_v13  ;;  %368 = vmatmul.f32.gmra.mxu3 %v133_v13  ;;  %v2976_v13 = vld [vmem:[#allocation24_spill] sm:$0xff] }
  0x68   :  { %525 = vmatpush.msra.mxu0 %v1975_v22  ;;  %545 = vmatpush.msra.mxu1 %v1977_v23 }
  0x69   :  { %565 = vmatpush.msra.mxu2 %v1984_v25  ;;  %585 = vmatpush.msra.mxu3 %v1982_v24 }
  0x6a   :  { %526 = vmatpush.msra.mxu0 %v1993_v27  ;;  %546 = vmatpush.msra.mxu1 %v1995_v28 }
  0x6b   :  { %566 = vmatpush.msra.mxu2 %v2001_v30  ;;  %586 = vmatpush.msra.mxu3 %v1999_v29 }
  0x6c   :  { %527 = vmatpush.msra.mxu0 %v2003_v31  ;;  %547 = vmatpush.msra.mxu1 %v2005_v32 }
  0x6d   :  { %567 = vmatpush.msra.mxu2 %v2011_v34  ;;  %587 = vmatpush.msra.mxu3 %v2009_v33 }
  0x6e   :  { %388 = vmatmul.f32.vlgmr.msrb.gmra.mxu0 %v1879_v0  ;;  %408 = vmatmul.f32.vlgmr.msrb.gmra.mxu1 %v1879_v0 }
  0x6f   :  { %428 = vmatmul.f32.vlgmr.msrb.gmra.mxu2 %v1879_v0  ;;  %448 = vmatmul.f32.vlgmr.msrb.gmra.mxu3 %v1879_v0  ;;  %v2977_v0 = vld [vmem:[#allocation30_spill] sm:$0xff] }
  0x70   :  { %528 = vmatpush.msra.mxu0 %v2014_v35  ;;  %548 = vmatpush.msra.mxu1 %v2016_v36 }
  0x71   :  { %568 = vmatpush.msra.mxu2 %v2023_v38  ;;  %588 = vmatpush.msra.mxu3 %v2021_v37 }
  0x72   :  { %529 = vmatpush.msra.mxu0 %v2032_v40  ;;  %549 = vmatpush.msra.mxu1 %v2034_v41 }
  0x73   :  { %569 = vmatpush.msra.mxu2 %v2040_v43  ;;  %589 = vmatpush.msra.mxu3 %v2038_v42 }
  0x74   :  { %530 = vmatpush.msra.mxu0 %v2042_v44  ;;  %550 = vmatpush.msra.mxu1 %v2044_v45 }
  0x75   :  { %570 = vmatpush.msra.mxu2 %v2050_v47  ;;  %590 = vmatpush.msra.mxu3 %v2048_v46 }
  0x76   :  { %531 = vmatpush.msra.mxu0 %v2053_v48  ;;  %551 = vmatpush.msra.mxu1 %v2055_v49 }
  0x77   :  { %571 = vmatpush.msra.mxu2 %v2062_v51  ;;  %591 = vmatpush.msra.mxu3 %v2060_v50 }
  0x78   :  { %532 = vmatpush.msra.mxu0 %v2071_v53  ;;  %552 = vmatpush.msra.mxu1 %v2073_v54 }
  0x79   :  { %572 = vmatpush.msra.mxu2 %v2079_v56  ;;  %592 = vmatpush.msra.mxu3 %v2077_v55 }
  0x7a   :  { %533 = vmatpush.msra.mxu0 %v2081_v57  ;;  %553 = vmatpush.msra.mxu1 %v2976_v13 }
  0x7b   :  { %573 = vmatpush.msra.mxu2 %v2089_v60  ;;  %593 = vmatpush.msra.mxu3 %v2087_v59 }
  0x7c   :  { %534 = vmatpush.msra.mxu0 %v2092_v61  ;;  %554 = vmatpush.msra.mxu1 %v2094_v62 }
  0x7d   :  { %574 = vmatpush.msra.mxu2 %v2099_v63  ;;  %594 = vmatpush.msra.mxu3 %v2977_v0 }
  0x7e   :  { %535 = vmatpush.msra.mxu0 %v2110_v26  ;;  %555 = vmatpush.msra.mxu1 %v2112_v39 }
  0x7f   :  { %575 = vmatpush.msra.mxu2 %v2116_v52  ;;  %595 = vmatpush.msra.mxu3 %v2118_v58 }
  0x80   :  { %669 = vmatpush.msrb.mxu0 %v1917_v1  ;;  %689 = vmatpush.msrb.mxu1 %v1919_v2 }
  0x81   :  { %709 = vmatpush.msrb.mxu2 %v1923_v4  ;;  %729 = vmatpush.msrb.mxu3 %v1921_v3 }
  0x82   :  { %670 = vmatpush.msrb.mxu0 %v1925_v5  ;;  %690 = vmatpush.msrb.mxu1 %v1927_v6 }
  0x83   :  { %710 = vmatpush.msrb.mxu2 %v1933_v8  ;;  %730 = vmatpush.msrb.mxu3 %v1931_v7 }
  0x84   :  { %671 = vmatpush.msrb.mxu0 %v1936_v9  ;;  %691 = vmatpush.msrb.mxu1 %v1938_v10 }
  0x85   :  { %711 = vmatpush.msrb.mxu2 %v1945_v12  ;;  %731 = vmatpush.msrb.mxu3 %v1943_v11 }
  0x86   :  { %672 = vmatpush.msrb.mxu0 %v1954_v14  ;;  %692 = vmatpush.msrb.mxu1 %v1956_v15 }
  0x87   :  { %712 = vmatpush.msrb.mxu2 %v1962_v17  ;;  %732 = vmatpush.msrb.mxu3 %v1960_v16 }
  0x88   :  { %673 = vmatpush.msrb.mxu0 %v1964_v18  ;;  %693 = vmatpush.msrb.mxu1 %v1966_v19 }
  0x89   :  { %713 = vmatpush.msrb.mxu2 %v1972_v21  ;;  %733 = vmatpush.msrb.mxu3 %v1970_v20 }
  0x8a   :  { %674 = vmatpush.msrb.mxu0 %v1975_v22  ;;  %694 = vmatpush.msrb.mxu1 %v1977_v23 }
  0x8b   :  { %714 = vmatpush.msrb.mxu2 %v1984_v25  ;;  %734 = vmatpush.msrb.mxu3 %v1982_v24 }
  0x8c   :  { %675 = vmatpush.msrb.mxu0 %v1993_v27  ;;  %695 = vmatpush.msrb.mxu1 %v1995_v28 }
  0x8d   :  { %715 = vmatpush.msrb.mxu2 %v2001_v30  ;;  %735 = vmatpush.msrb.mxu3 %v1999_v29 }
  0x8e   :  { %676 = vmatpush.msrb.mxu0 %v2003_v31  ;;  %696 = vmatpush.msrb.mxu1 %v2005_v32 }
  0x8f   :  { %716 = vmatpush.msrb.mxu2 %v2011_v34  ;;  %736 = vmatpush.msrb.mxu3 %v2009_v33 }
  0x90   :  { %677 = vmatpush.msrb.mxu0 %v2014_v35  ;;  %697 = vmatpush.msrb.mxu1 %v2016_v36 }
  0x91   :  { %717 = vmatpush.msrb.mxu2 %v2023_v38  ;;  %737 = vmatpush.msrb.mxu3 %v2021_v37 }
  0x92   :  { %678 = vmatpush.msrb.mxu0 %v2032_v40  ;;  %698 = vmatpush.msrb.mxu1 %v2034_v41 }
  0x93   :  { %718 = vmatpush.msrb.mxu2 %v2040_v43  ;;  %738 = vmatpush.msrb.mxu3 %v2038_v42 }
  0x94   :  { %679 = vmatpush.msrb.mxu0 %v2042_v44  ;;  %699 = vmatpush.msrb.mxu1 %v2044_v45 }
  0x95   :  { %719 = vmatpush.msrb.mxu2 %v2050_v47  ;;  %739 = vmatpush.msrb.mxu3 %v2048_v46 }
  0x96   :  { %680 = vmatpush.msrb.mxu0 %v2053_v48  ;;  %700 = vmatpush.msrb.mxu1 %v2055_v49 }
  0x97   :  { %720 = vmatpush.msrb.mxu2 %v2062_v51  ;;  %740 = vmatpush.msrb.mxu3 %v2060_v50 }
  0x98   :  { %681 = vmatpush.msrb.mxu0 %v2071_v53  ;;  %701 = vmatpush.msrb.mxu1 %v2073_v54 }
  0x99   :  { %721 = vmatpush.msrb.mxu2 %v2079_v56  ;;  %741 = vmatpush.msrb.mxu3 %v2077_v55 }
  0x9a   :  { %682 = vmatpush.msrb.mxu0 %v2081_v57  ;;  %702 = vmatpush.msrb.mxu1 %v2976_v13  ;;  %v198_v57 = vld [vmem:[#allocation6] sm:$0xf] }
  0x9b   :  { %722 = vmatpush.msrb.mxu2 %v2089_v60  ;;  %742 = vmatpush.msrb.mxu3 %v2087_v59  ;;  %v200_v59 = vperm.slane %v198_v57, 0  ;;  %v201_v55 = vperm.slane %v198_v57, 1 }
  0x9c   :  { %683 = vmatpush.msrb.mxu0 %v2092_v61  ;;  %703 = vmatpush.msrb.mxu1 %v2094_v62 }
  0x9d   :  { %723 = vmatpush.msrb.mxu2 %v2099_v63  ;;  %743 = vmatpush.msrb.mxu3 %v2977_v0 }
  0x9e   :  { %684 = vmatpush.msrb.mxu0 %v2110_v26  ;;  %704 = vmatpush.msrb.mxu1 %v2112_v39  ;;  %v2266_v39 = vperm.slane %v198_v57, 2 }
  0x9f   :  { %724 = vmatpush.msrb.mxu2 %v2116_v52  ;;  %744 = vmatpush.msrb.mxu3 %v2118_v58  ;;  %v203_v52 = vperm.slane %v198_v57, 3 }
  0xab   :  { %v225_v13 = vpop.f32.mrf.mxu0  ;;  %v266_v60 = vpop.f32.mrf.mxu1 }
  0xb2   :  { %v2258_v61 = vpop.f32.mrf.mxu2  ;;  %v2260_v62 = vpop.f32.mrf.mxu3 }
  0xb3   :  { %v228_v63 = vpop.f32.mrf.mxu0  ;;  %v269_v56 = vpop.f32.mrf.mxu1 }
  0xb4   :  { %v2262_v0 = vadd.f32 %v228_v63, %v200_v59  ;;  %v2264_v26 = vadd.f32 %v269_v56, %v201_v55 }
  0xb6   :  { %2978 = vst [vmem:[#allocation35_spill] sm:$0xff] %v2262_v0 }
  0xb7   :  { %2979 = vst [vmem:[#allocation36_spill] sm:$0xff] %v2264_v26 }
  0xba   :  { %v310_v54 = vpop.f32.mrf.mxu2  ;;  %v351_v58 = vpop.f32.mrf.mxu3 }
  0xbb   :  { %v2269_v53 = vadd.f32 %v310_v54, %v2266_v39  ;;  %v2271_v50 = vadd.f32 %v351_v58, %v203_v52  ;;  %v231_v51 = vpop.f32.mrf.mxu0  ;;  %v272_v49 = vpop.f32.mrf.mxu1 }
  0xbc   :  { %v2273_v48 = vadd.f32 %v231_v51, %v200_v59  ;;  %v2275_v46 = vadd.f32 %v272_v49, %v201_v55 }
  0xbd   :  { %2980 = vst [vmem:[#allocation37_spill] sm:$0xff] %v2269_v53 }
  0xbe   :  { %2981 = vst [vmem:[#allocation38_spill] sm:$0xff] %v2271_v50 }
  0xbf   :  { %2982 = vst [vmem:[#allocation39_spill] sm:$0xff] %v2273_v48 }
  0xc0   :  { %2983 = vst [vmem:[#allocation40_spill] sm:$0xff] %v2275_v46 }
  0xc2   :  { %v313_v63 = vpop.f32.mrf.mxu2  ;;  %v354_v0 = vpop.f32.mrf.mxu3 }
  0xc3   :  { %v2278_v56 = vadd.f32 %v313_v63, %v2266_v39  ;;  %v2280_v26 = vadd.f32 %v354_v0, %v203_v52  ;;  %v234_v57 = vpop.f32.mrf.mxu0  ;;  %v275_v47 = vpop.f32.mrf.mxu1 }
  0xc4   :  { %v2282_v45 = vadd.f32 %v234_v57, %v200_v59  ;;  %v2284_v54 = vadd.f32 %v275_v47, %v201_v55 }
  0xc5   :  { %2984 = vst [vmem:[#allocation41_spill] sm:$0xff] %v2278_v56 }
  0xc6   :  { %2985 = vst [vmem:[#allocation42_spill] sm:$0xff] %v2280_v26 }
  0xc7   :  { %2986 = vst [vmem:[#allocation43_spill] sm:$0xff] %v2282_v45 }
  0xc8   :  { %2987 = vst [vmem:[#allocation44_spill] sm:$0xff] %v2284_v54 }
  0xca   :  { %v316_v58 = vpop.f32.mrf.mxu2  ;;  %v357_v53 = vpop.f32.mrf.mxu3 }
  0xcb   :  { %v2287_v51 = vadd.f32 %v316_v58, %v2266_v39  ;;  %v2289_v49 = vadd.f32 %v357_v53, %v203_v52  ;;  %v237_v46 = vpop.f32.mrf.mxu0  ;;  %v278_v48 = vpop.f32.mrf.mxu1 }
  0xcc   :  { %v2291_v50 = vadd.f32 %v237_v46, %v200_v59  ;;  %v2293_v63 = vadd.f32 %v278_v48, %v201_v55 }
  0xcd   :  { %2988 = vst [vmem:[#allocation45_spill] sm:$0xff] %v2287_v51 }
  0xce   :  { %2989 = vst [vmem:[#allocation46_spill] sm:$0xff] %v2289_v49 }
  0xcf   :  { %2990 = vst [vmem:[#allocation47_spill] sm:$0xff] %v2291_v50 }
  0xd0   :  { %2991 = vst [vmem:[#allocation48_spill] sm:$0xff] %v2293_v63 }
  0xd2   :  { %v319_v0 = vpop.f32.mrf.mxu2  ;;  %v360_v56 = vpop.f32.mrf.mxu3 }
  0xd3   :  { %v2296_v57 = vadd.f32 %v319_v0, %v2266_v39  ;;  %v2298_v47 = vadd.f32 %v360_v56, %v203_v52  ;;  %v240_v54 = vpop.f32.mrf.mxu0  ;;  %v281_v45 = vpop.f32.mrf.mxu1 }
  0xd4   :  { %v2300_v26 = vadd.f32 %v240_v54, %v200_v59  ;;  %v2302_v58 = vadd.f32 %v281_v45, %v201_v55 }
  0xd5   :  { %2992 = vst [vmem:[#allocation49_spill] sm:$0xff] %v2296_v57 }
  0xd6   :  { %2993 = vst [vmem:[#allocation50_spill] sm:$0xff] %v2298_v47 }
  0xd7   :  { %2994 = vst [vmem:[#allocation51_spill] sm:$0xff] %v2300_v26 }
  0xd8   :  { %2995 = vst [vmem:[#allocation52_spill] sm:$0xff] %v2302_v58 }
  0xda   :  { %v322_v53 = vpop.f32.mrf.mxu2  ;;  %v363_v51 = vpop.f32.mrf.mxu3 }
  0xdb   :  { %v2305_v46 = vadd.f32 %v322_v53, %v2266_v39  ;;  %v2307_v48 = vadd.f32 %v363_v51, %v203_v52  ;;  %v243_v63 = vpop.f32.mrf.mxu0  ;;  %v284_v50 = vpop.f32.mrf.mxu1  ;;  %v226_v51 = vadd.f32 %v225_v13, %v200_v59 }
  0xdc   :  { %v2309_v49 = vadd.f32 %v243_v63, %v200_v59  ;;  %v2311_v0 = vadd.f32 %v284_v50, %v201_v55 }
  0xdd   :  { %2996 = vst [vmem:[#allocation53_spill] sm:$0xff] %v2305_v46  ;;  %v267_v46 = vadd.f32 %v266_v60, %v201_v55 }
  0xde   :  { %2997 = vst [vmem:[#allocation54_spill] sm:$0xff] %v2307_v48 }
  0xdf   :  { %2998 = vst [vmem:[#allocation55_spill] sm:$0xff] %v2309_v49 }
  0xe0   :  { %2999 = vst [vmem:[#allocation56_spill] sm:$0xff] %v2311_v0 }
  0xe2   :  { %v325_v56 = vpop.f32.mrf.mxu2  ;;  %v366_v57 = vpop.f32.mrf.mxu3 }
  0xe3   :  { %v2314_v54 = vadd.f32 %v325_v56, %v2266_v39  ;;  %v2316_v45 = vadd.f32 %v366_v57, %v203_v52  ;;  %v246_v58 = vpop.f32.mrf.mxu0  ;;  %v287_v26 = vpop.f32.mrf.mxu1 }
  0xe4   :  { %v2318_v47 = vadd.f32 %v246_v58, %v200_v59  ;;  %v2320_v53 = vadd.f32 %v287_v26, %v201_v55  ;;  %v349_v58 = vadd.f32 %v2260_v62, %v203_v52 }
  0xe5   :  { %3000 = vst [vmem:[#allocation57_spill] sm:$0xff] %v2314_v54 }
  0xe6   :  { %3001 = vst [vmem:[#allocation58_spill] sm:$0xff] %v2316_v45 }
  0xe7   :  { %3002 = vst [vmem:[#allocation59_spill] sm:$0xff] %v2318_v47 }
  0xe8   :  { %3003 = vst [vmem:[#allocation60_spill] sm:$0xff] %v2320_v53 }
  0xea   :  { %v328_v48 = vpop.f32.mrf.mxu2  ;;  %v369_v63 = vpop.f32.mrf.mxu3 }
  0xeb   :  { %v2323_v50 = vadd.f32 %v328_v48, %v2266_v39  ;;  %v2325_v0 = vadd.f32 %v369_v63, %v203_v52  ;;  %v389_v49 = vpop.f32.mrf.mxu0  ;;  %v409_v56 = vpop.f32.mrf.mxu1 }
  0xec   :  { %v452_v54 = vadd.f32 %v389_v49, %v226_v51  ;;  %v453_v57 = vadd.f32 %v409_v56, %v267_v46  ;;  %v308_v49 = vadd.f32 %v2258_v61, %v2266_v39 }
  0xed   :  { %3004 = vst [vmem:[#allocation61_spill] sm:$0xff] %v2323_v50 }
  0xee   :  { %3005 = vst [vmem:[#allocation62_spill] sm:$0xff] %v2325_v0  ;;  %v1569_v45 = vmul.f32 -1.442695, %v452_v54  ;;  %v1570_v44 = vmul.f32 -1.442695, %v453_v57 }
  0xf0   :  { %1606 = vpow2.f32 %v1569_v45 }
  0xf1   :  { %1608 = vpow2.f32 %v1570_v44 }
  0xf2   :  { %v449_v26 = vpop.f32.mrf.mxu3  ;;  %v429_v63 = vpop.f32.mrf.mxu2 }
  0xf3   :  { %v455_v59 = vadd.f32 %v449_v26, %v349_v58  ;;  %v454_v45 = vadd.f32 %v429_v63, %v308_v49 }
  0xf5   :  { %v1571_v55 = vmul.f32 -1.442695, %v455_v59 }
  0xf6   :  { %v1607_v60 = vpop.eup %1606 }
  0xf7   :  { %v1609_v13 = vpop.eup %1608  ;;  %v459_v53 = vadd.f32 1.0, %v1607_v60  ;;  %1610 = vpow2.f32 %v1571_v55 }
  0xf8   :  { %v478_v48 = vadd.f32 1.0, %v1609_v13 }
  0xf9   :  { %1612 = vrcp.f32 %v459_v53  ;;  %v471_v57 = vand.u32 2147483648, %v459_v53  ;;  %v469_v59 = vand.u32 2147483647, %v459_v53  ;;  %vm465_vm2 = vweird.f32 %v459_v53 }
  0xfa   :  { %1614 = vrcp.f32 %v478_v48  ;;  %v490_v58 = vand.u32 2147483648, %v478_v48  ;;  %v488_v60 = vand.u32 2147483647, %v478_v48  ;;  %vm484_vm3 = vweird.f32 %v478_v48 }
  0xfb   :  { %v472_v39 = vor.u32 1.1754944e-38, %v471_v57  ;;  %vm470_vm5 = vcmp.eq.f32.partialorder %v469_v59, 8.507059e+37 }
  0xfc   :  { %v491_v49 = vor.u32 1.1754944e-38, %v490_v58  ;;  %vm489_vm7 = vcmp.eq.f32.partialorder %v488_v60, 8.507059e+37 }
  0xfd   :  { %v1611_v50 = vpop.eup %1610 }
  0xfe   :  { %v498_v46 = vadd.f32 1.0, %v1611_v50 }
  0xff   :  { %v1613_v54 = vpop.eup %1612 }
 0x100   :  { %v1615_v62 = vpop.eup %1614  ;;  %v461_v44 = vmul.f32 %v1613_v54, %v459_v53  ;;  %1616 = vrcp.f32 %v498_v46  ;;  %vm466_vm0 = vweird.f32 %v1613_v54  ;;  %vm504_vm9 = vweird.f32 %v498_v46 }
 0x101   :  { %v480_v52 = vmul.f32 %v1615_v62, %v478_v48  ;;  %1618 = vtanh.f32 %v454_v45  ;;  %vm485_vm1 = vweird.f32 %v1615_v62  ;;  %vm467_vm4 = vmor %vm465_vm2, %vm466_vm0  ;;  %v510_v48 = vand.u32 2147483648, %v498_v46 }
 0x102   :  { %v462_v51 = vsub.f32 1.0, %v461_v44  ;;  %vm486_vm6 = vmor %vm484_vm3, %vm485_vm1 }
 0x103   :  { %v481_v56 = vsub.f32 1.0, %v480_v52  ;;  %v511_v58 = vor.u32 1.1754944e-38, %v510_v48 }
 0x104   :  { %v463_v26 = vmul.f32 %v1613_v54, %v462_v51 }
 0x105   :  { %v482_v55 = vmul.f32 %v1615_v62, %v481_v56 }
 0x106   :  { %v1617_v13 = vpop.eup %1616  ;;  %v464_v61 = vadd.f32 %v1613_v54, %v463_v26 }
 0x107   :  { %v483_v50 = vadd.f32 %v1615_v62, %v482_v55  ;;  %v500_v63 = vmul.f32 %v1617_v13, %v498_v46  ;;  %v1619_v45 = vpop.eup %1618  ;;  %vm505_vm8 = vweird.f32 %v1617_v13 }
 0x108   :  { %v468_v44 = vsel %vm467_vm4, %v1613_v54, %v464_v61  ;;  %v508_v54 = vand.u32 2147483647, %v498_v46  ;;  %vm506_vm10 = vmor %vm504_vm9, %vm505_vm8 }
 0x109   :  { %v473_v52 = vsel %vm470_vm5, %v472_v39, %v468_v44  ;;  %v487_v51 = vsel %vm486_vm6, %v1615_v62, %v483_v50  ;;  %v501_v0 = vsub.f32 1.0, %v500_v63  ;;  %v3035_v39 = vld [vmem:[#allocation37_spill] sm:$0xff] }
 0x10a   :  { %v492_v56 = vsel %vm489_vm7, %v491_v49, %v487_v51  ;;  %v515_v47 = vmul.f32 %v1619_v45, %v473_v52  ;;  %vm509_vm11 = vcmp.eq.f32.partialorder %v508_v54, 8.507059e+37 }
 0x10b   :  { %v514_v42 = vmul.f32 0.0, %v492_v56  ;;  %v502_v43 = vmul.f32 %v1617_v13, %v501_v0 }
 0x10d   :  { %v2330_v26 = vadd.f32 %v515_v47, %v514_v42  ;;  %v503_v53 = vadd.f32 %v1617_v13, %v502_v43 }
 0x10f   :  { %1620 = vtanh.f32 %v2330_v26  ;;  %v507_v57 = vsel %vm506_vm10, %v1617_v13, %v503_v53 }
 0x110   :  { %v512_v59 = vsel %vm509_vm11, %v511_v58, %v507_v57 }
 0x115   :  { %v1621_v62 = vpop.eup %1620 }
 0x116   :  { %v518_v55 = vmul.f32 %v1621_v62, %v512_v59 }
 0x118   :  { %519 = vst [vmem:[%s2862_s4] sm:$0xff] %v518_v55  ;;  %536 = vmatmul.f32.vlgmr.msra.gmra.mxu0 %v518_v55  ;;  %556 = vmatmul.f32.vlgmr.msra.gmra.mxu1 %v518_v55 }
 0x119   :  { %576 = vmatmul.f32.vlgmr.msra.gmra.mxu2 %v518_v55  ;;  %596 = vmatmul.f32.vlgmr.msra.gmra.mxu3 %v518_v55 }
 0x11a   :  { %818 = vmatpush.msra.mxu0 %v1917_v1  ;;  %838 = vmatpush.msra.mxu1 %v1919_v2  ;;  %v3006_v1 = vld [vmem:[#allocation10_spill] sm:$0xff]  ;;  %v3007_v2 = vld [vmem:[#allocation9_spill] sm:$0xff] }
 0x11b   :  { %858 = vmatpush.msra.mxu2 %v1923_v4  ;;  %878 = vmatpush.msra.mxu3 %v1921_v3  ;;  %v3008_v3 = vld [vmem:[#allocation11_spill] sm:$0xff]  ;;  %v3009_v4 = vld [vmem:[#allocation12_spill] sm:$0xff] }
 0x11c   :  { %819 = vmatpush.msra.mxu0 %v1925_v5  ;;  %839 = vmatpush.msra.mxu1 %v1927_v6  ;;  %v3010_v5 = vld [vmem:[#allocation14_spill] sm:$0xff]  ;;  %v3011_v6 = vld [vmem:[#allocation13_spill] sm:$0xff] }
 0x11d   :  { %859 = vmatpush.msra.mxu2 %v1933_v8  ;;  %879 = vmatpush.msra.mxu3 %v1931_v7  ;;  %v3012_v7 = vld [vmem:[#allocation15_spill] sm:$0xff]  ;;  %v3013_v8 = vld [vmem:[#allocation16_spill] sm:$0xff] }
 0x11e   :  { %820 = vmatpush.msra.mxu0 %v1936_v9  ;;  %840 = vmatpush.msra.mxu1 %v1938_v10  ;;  %v3014_v9 = vld [vmem:[#allocation18_spill] sm:$0xff]  ;;  %v3015_v10 = vld [vmem:[#allocation17_spill] sm:$0xff] }
 0x11f   :  { %860 = vmatpush.msra.mxu2 %v1945_v12  ;;  %880 = vmatpush.msra.mxu3 %v1943_v11  ;;  %v3016_v11 = vld [vmem:[#allocation19_spill] sm:$0xff]  ;;  %v3017_v12 = vld [vmem:[#allocation20_spill] sm:$0xff] }
 0x120   :  { %821 = vmatpush.msra.mxu0 %v1954_v14  ;;  %841 = vmatpush.msra.mxu1 %v1956_v15  ;;  %v3018_v14 = vld [vmem:[#allocation22_spill] sm:$0xff]  ;;  %v3019_v15 = vld [vmem:[#allocation21_spill] sm:$0xff] }
 0x121   :  { %861 = vmatpush.msra.mxu2 %v1962_v17  ;;  %881 = vmatpush.msra.mxu3 %v1960_v16  ;;  %v3020_v16 = vld [vmem:[#allocation23_spill] sm:$0xff]  ;;  %v3021_v17 = vld [vmem:[#allocation24_spill] sm:$0xff] }
 0x122   :  { %822 = vmatpush.msra.mxu0 %v1964_v18  ;;  %842 = vmatpush.msra.mxu1 %v1966_v19  ;;  %v3022_v18 = vld [vmem:[#allocation26_spill] sm:$0xff]  ;;  %v3023_v19 = vld [vmem:[#allocation25_spill] sm:$0xff] }
 0x123   :  { %862 = vmatpush.msra.mxu2 %v1972_v21  ;;  %882 = vmatpush.msra.mxu3 %v1970_v20  ;;  %v3024_v20 = vld [vmem:[#allocation27_spill] sm:$0xff]  ;;  %v3025_v21 = vld [vmem:[#allocation28_spill] sm:$0xff] }
 0x124   :  { %823 = vmatpush.msra.mxu0 %v1975_v22  ;;  %843 = vmatpush.msra.mxu1 %v1977_v23  ;;  %v3026_v22 = vld [vmem:[#allocation29_spill] sm:$0xff]  ;;  %v3027_v23 = vld [vmem:[#allocation30_spill] sm:$0xff] }
 0x125   :  { %863 = vmatpush.msra.mxu2 %v1984_v25  ;;  %883 = vmatpush.msra.mxu3 %v1982_v24  ;;  %v3028_v24 = vld [vmem:[#allocation31_spill] sm:$0xff]  ;;  %v3029_v25 = vld [vmem:[#allocation32_spill] sm:$0xff] }
 0x126   :  { %824 = vmatpush.msra.mxu0 %v1993_v27  ;;  %844 = vmatpush.msra.mxu1 %v1995_v28  ;;  %v3030_v27 = vld [vmem:[#allocation33_spill] sm:$0xff]  ;;  %v3031_v28 = vld [vmem:[#allocation34_spill] sm:$0xff] }
 0x127   :  { %864 = vmatpush.msra.mxu2 %v2001_v30  ;;  %884 = vmatpush.msra.mxu3 %v1999_v29 }
 0x128   :  { %825 = vmatpush.msra.mxu0 %v2003_v31  ;;  %845 = vmatpush.msra.mxu1 %v2005_v32  ;;  %v3032_v31 = vld [vmem:[#allocation35_spill] sm:$0xff] }
 0x129   :  { %865 = vmatpush.msra.mxu2 %v2011_v34  ;;  %885 = vmatpush.msra.mxu3 %v2009_v33  ;;  %v3033_v33 = vld [vmem:[#allocation36_spill] sm:$0xff] }
 0x12a   :  { %826 = vmatpush.msra.mxu0 %v2014_v35  ;;  %846 = vmatpush.msra.mxu1 %v2016_v36 }
 0x12b   :  { %866 = vmatpush.msra.mxu2 %v2023_v38  ;;  %886 = vmatpush.msra.mxu3 %v2021_v37  ;;  %v3034_v38 = vld [vmem:[#allocation38_spill] sm:$0xff] }
 0x12c   :  { %827 = vmatpush.msra.mxu0 %v2032_v40  ;;  %847 = vmatpush.msra.mxu1 %v2034_v41 }
 0x12d   :  { %867 = vmatpush.msra.mxu2 %v3006_v1  ;;  %887 = vmatpush.msra.mxu3 %v3007_v2 }
 0x12e   :  { %828 = vmatpush.msra.mxu0 %v3008_v3  ;;  %848 = vmatpush.msra.mxu1 %v3009_v4 }
 0x12f   :  { %868 = vmatpush.msra.mxu2 %v3010_v5  ;;  %888 = vmatpush.msra.mxu3 %v3011_v6 }
 0x130   :  { %829 = vmatpush.msra.mxu0 %v3012_v7  ;;  %849 = vmatpush.msra.mxu1 %v3013_v8 }
 0x131   :  { %869 = vmatpush.msra.mxu2 %v3014_v9  ;;  %889 = vmatpush.msra.mxu3 %v3015_v10 }
 0x132   :  { %830 = vmatpush.msra.mxu0 %v3016_v11  ;;  %850 = vmatpush.msra.mxu1 %v3017_v12 }
 0x133   :  { %870 = vmatpush.msra.mxu2 %v3018_v14  ;;  %890 = vmatpush.msra.mxu3 %v3019_v15 }
 0x134   :  { %831 = vmatpush.msra.mxu0 %v3020_v16  ;;  %851 = vmatpush.msra.mxu1 %v3021_v17 }
 0x135   :  { %871 = vmatpush.msra.mxu2 %v3022_v18  ;;  %891 = vmatpush.msra.mxu3 %v3023_v19 }
 0x136   :  { %832 = vmatpush.msra.mxu0 %v3024_v20  ;;  %852 = vmatpush.msra.mxu1 %v3025_v21 }
 0x137   :  { %872 = vmatpush.msra.mxu2 %v3026_v22  ;;  %892 = vmatpush.msra.mxu3 %v3027_v23 }
 0x138   :  { %833 = vmatpush.msra.mxu0 %v3028_v24  ;;  %853 = vmatpush.msra.mxu1 %v3029_v25 }
 0x139   :  { %873 = vmatpush.msra.mxu2 %v3030_v27  ;;  %893 = vmatpush.msra.mxu3 %v3031_v28 }
 0x195   :  { %v537_v29 = vpop.f32.mrf.mxu0  ;;  %v557_v30 = vpop.f32.mrf.mxu1 }
 0x196   :  { %v600_v32 = vadd.f32 %v537_v29, %v3032_v31  ;;  %v601_v34 = vadd.f32 %v557_v30, %v3033_v33  ;;  %v2414_v29 = vld [vmem:[#allocation4 + $0x1e8] sm:$0xff]  ;;  %v2417_v30 = vld [vmem:[#allocation4 + $0x1f0] sm:$0xff]  ;;  %v2420_v31 = vld [vmem:[#allocation4 + $0x1f8] sm:$0xff] }
 0x197   :  { %v2426_v33 = vld [vmem:[#allocation4 + $0x1c8] sm:$0xff] }
 0x198   :  { %v1572_v35 = vmul.f32 -1.442695, %v600_v32  ;;  %v1573_v36 = vmul.f32 -1.442695, %v601_v34  ;;  %v2423_v32 = vld [vmem:[#allocation4 + $0x1c0] sm:$0xff]  ;;  %v2429_v34 = vld [vmem:[#allocation4 + $0x1d0] sm:$0xff] }
 0x19a   :  { %1622 = vpow2.f32 %v1572_v35  ;;  %v2432_v35 = vld [vmem:[#allocation4 + $0x1d8] sm:$0xff] }
 0x19b   :  { %1624 = vpow2.f32 %v1573_v36  ;;  %v2435_v36 = vld [vmem:[#allocation4 + $0x1a0] sm:$0xff] }
 0x19c   :  { %v597_v37 = vpop.f32.mrf.mxu3  ;;  %v577_v46 = vpop.f32.mrf.mxu2 }
 0x19d   :  { %v603_v40 = vadd.f32 %v597_v37, %v3034_v38  ;;  %v602_v50 = vadd.f32 %v577_v46, %v3035_v39  ;;  %v2438_v37 = vld [vmem:[#allocation4 + $0x1a8] sm:$0xff]  ;;  %v2441_v38 = vld [vmem:[#allocation4 + $0x1b0] sm:$0xff] }
 0x19e   :  { %v2462_v46 = vld [vmem:[#allocation4 + $0x168] sm:$0xff] }
 0x19f   :  { %v1574_v41 = vmul.f32 -1.442695, %v603_v40  ;;  %v2444_v40 = vld [vmem:[#allocation4 + $0x1b8] sm:$0xff]  ;;  %v2474_v39 = vld [vmem:[#allocation4 + $0x148] sm:$0xff] }
 0x1a0   :  { %v1623_v42 = vpop.eup %1622 }
 0x1a1   :  { %v1625_v43 = vpop.eup %1624  ;;  %v607_v47 = vadd.f32 1.0, %v1623_v42  ;;  %1626 = vpow2.f32 %v1574_v41  ;;  %v2447_v41 = vld [vmem:[#allocation4 + $0x180] sm:$0xff]  ;;  %v2450_v42 = vld [vmem:[#allocation4 + $0x188] sm:$0xff] }
 0x1a2   :  { %v626_v0 = vadd.f32 1.0, %v1625_v43  ;;  %v2453_v43 = vld [vmem:[#allocation4 + $0x190] sm:$0xff] }
 0x1a3   :  { %1628 = vrcp.f32 %v607_v47  ;;  %v619_v51 = vand.u32 2147483648, %v607_v47  ;;  %v617_v48 = vand.u32 2147483647, %v607_v47  ;;  %vm613_vm14 = vweird.f32 %v607_v47 }
 0x1a4   :  { %1630 = vrcp.f32 %v626_v0  ;;  %v638_v56 = vand.u32 2147483648, %v626_v0  ;;  %v636_v57 = vand.u32 2147483647, %v626_v0  ;;  %vm632_vm15 = vweird.f32 %v626_v0 }
 0x1a5   :  { %v620_v59 = vor.u32 1.1754944e-38, %v619_v51  ;;  %vm618_vm2 = vcmp.eq.f32.partialorder %v617_v48, 8.507059e+37  ;;  %v2495_v51 = vld [vmem:[#allocation4 + $0x100] sm:$0xff]  ;;  %v2504_v48 = vld [vmem:[#allocation4 + $0x118] sm:$0xff] }
 0x1a6   :  { %v639_v2 = vor.u32 1.1754944e-38, %v638_v56  ;;  %vm637_vm3 = vcmp.eq.f32.partialorder %v636_v57, 8.507059e+37  ;;  %v2498_v56 = vld [vmem:[#allocation4 + $0x108] sm:$0xff] }
 0x1a7   :  { %v1627_v60 = vpop.eup %1626  ;;  %v2510_v57 = vld [vmem:[#allocation4 + $0xe8] sm:$0xff] }
 0x1a8   :  { %v646_v13 = vadd.f32 1.0, %v1627_v60  ;;  %v2465_v60 = vld [vmem:[#allocation4 + $0x170] sm:$0xff] }
 0x1a9   :  { %v1629_v61 = vpop.eup %1628 }
 0x1aa   :  { %v1631_v63 = vpop.eup %1630  ;;  %v609_v49 = vmul.f32 %v1629_v61, %v607_v47  ;;  %1632 = vrcp.f32 %v646_v13  ;;  %vm614_vm12 = vweird.f32 %v1629_v61  ;;  %v658_v15 = vand.u32 2147483648, %v646_v13  ;;  %v2456_v47 = vld [vmem:[#allocation4 + $0x198] sm:$0xff] }
 0x1ab   :  { %v628_v44 = vmul.f32 %v1631_v63, %v626_v0  ;;  %1634 = vtanh.f32 %v602_v50  ;;  %vm633_vm13 = vweird.f32 %v1631_v63  ;;  %vm615_vm0 = vmor %vm613_vm14, %vm614_vm12  ;;  %vm652_vm5 = vweird.f32 %v646_v13  ;;  %v2459_v0 = vld [vmem:[#allocation4 + $0x160] sm:$0xff]  ;;  %v2477_v50 = vld [vmem:[#allocation4 + $0x150] sm:$0xff] }
 0x1ac   :  { %v610_v45 = vsub.f32 1.0, %v609_v49  ;;  %vm634_vm1 = vmor %vm632_vm15, %vm633_vm13  ;;  %v656_v16 = vand.u32 2147483647, %v646_v13  ;;  %v659_v18 = vor.u32 1.1754944e-38, %v658_v15  ;;  %v2483_v49 = vld [vmem:[#allocation4 + $0x120] sm:$0xff]  ;;  %v2561_v15 = vld [vmem:[#allocation4 + $0x70] sm:$0xff] }
 0x1ad   :  { %v629_v52 = vsub.f32 1.0, %v628_v44  ;;  %v2486_v44 = vld [vmem:[#allocation4 + $0x128] sm:$0xff]  ;;  %3048 = vst [vmem:[#allocation22_spill] sm:$0xff] %v2561_v15 }
 0x1ae   :  { %v611_v53 = vmul.f32 %v1629_v61, %v610_v45  ;;  %vm657_vm7 = vcmp.eq.f32.partialorder %v656_v16, 8.507059e+37  ;;  %v2489_v45 = vld [vmem:[#allocation4 + $0x130] sm:$0xff]  ;;  %v2564_v16 = vld [vmem:[#allocation4 + $0x78] sm:$0xff] }
 0x1af   :  { %v630_v54 = vmul.f32 %v1631_v63, %v629_v52  ;;  %v2492_v52 = vld [vmem:[#allocation4 + $0x138] sm:$0xff]  ;;  %3049 = vst [vmem:[#allocation21_spill] sm:$0xff] %v2564_v16 }
 0x1b0   :  { %v1633_v58 = vpop.eup %1632  ;;  %v612_v62 = vadd.f32 %v1629_v61, %v611_v53  ;;  %v2501_v53 = vld [vmem:[#allocation4 + $0x110] sm:$0xff] }
 0x1b1   :  { %v631_v55 = vadd.f32 %v1631_v63, %v630_v54  ;;  %v648_v1 = vmul.f32 %v1633_v58, %v646_v13  ;;  %v1635_v4 = vpop.eup %1634  ;;  %vm653_vm4 = vweird.f32 %v1633_v58  ;;  %v2468_v13 = vld [vmem:[#allocation4 + $0x178] sm:$0xff]  ;;  %v2507_v54 = vld [vmem:[#allocation4 + $0xe0] sm:$0xff] }
 0x1b2   :  { %v616_v3 = vsel %vm615_vm0, %v1629_v61, %v612_v62  ;;  %vm654_vm6 = vmor %vm652_vm5, %vm653_vm4  ;;  %v2471_v61 = vld [vmem:[#allocation4 + $0x140] sm:$0xff]  ;;  %v2516_v62 = vld [vmem:[#allocation4 + $0xf8] sm:$0xff] }
 0x1b3   :  { %v621_v5 = vsel %vm618_vm2, %v620_v59, %v616_v3  ;;  %v635_v6 = vsel %vm634_vm1, %v1631_v63, %v631_v55  ;;  %v649_v7 = vsub.f32 1.0, %v648_v1  ;;  %v2480_v63 = vld [vmem:[#allocation4 + $0x158] sm:$0xff]  ;;  %v2519_v59 = vld [vmem:[#allocation4 + $0xc0] sm:$0xff]  ;;  %v2522_v55 = vld [vmem:[#allocation4 + $0xc8] sm:$0xff] }
 0x1b4   :  { %v640_v8 = vsel %vm637_vm3, %v639_v2, %v635_v6  ;;  %v663_v9 = vmul.f32 %v1635_v4, %v621_v5  ;;  %v2525_v1 = vld [vmem:[#allocation4 + $0xd0] sm:$0xff]  ;;  %v2528_v2 = vld [vmem:[#allocation4 + $0xd8] sm:$0xff]  ;;  %v2531_v3 = vld [vmem:[#allocation4 + $0xa0] sm:$0xff] }
 0x1b5   :  { %v662_v10 = vmul.f32 %v640_v8, %v2330_v26  ;;  %v650_v11 = vmul.f32 %v1633_v58, %v649_v7  ;;  %v2411_v26 = vld [vmem:[#allocation4 + $0x1e0] sm:$0xff]  ;;  %3036 = vst [vmem:[#allocation10_spill] sm:$0xff] %v2525_v1  ;;  %v2534_v4 = vld [vmem:[#allocation4 + $0xa8] sm:$0xff]  ;;  %v2537_v5 = vld [vmem:[#allocation4 + $0xb0] sm:$0xff] }
 0x1b6   :  { %3037 = vst [vmem:[#allocation9_spill] sm:$0xff] %v2528_v2  ;;  %v2540_v6 = vld [vmem:[#allocation4 + $0xb8] sm:$0xff]  ;;  %v2543_v7 = vld [vmem:[#allocation4 + $0x80] sm:$0xff]  ;;  %v2546_v8 = vld [vmem:[#allocation4 + $0x88] sm:$0xff] }
 0x1b7   :  { %v2405_v12 = vadd.f32 %v663_v9, %v662_v10  ;;  %v651_v14 = vadd.f32 %v1633_v58, %v650_v11  ;;  %3038 = vst [vmem:[#allocation11_spill] sm:$0xff] %v2531_v3  ;;  %v2549_v9 = vld [vmem:[#allocation4 + $0x90] sm:$0xff]  ;;  %v2552_v10 = vld [vmem:[#allocation4 + $0x98] sm:$0xff]  ;;  %v2555_v11 = vld [vmem:[#allocation4 + $0x60] sm:$0xff] }
 0x1b8   :  { %3039 = vst [vmem:[#allocation12_spill] sm:$0xff] %v2534_v4 }
 0x1b9   :  { %1636 = vtanh.f32 %v2405_v12  ;;  %v655_v17 = vsel %vm654_vm6, %v1633_v58, %v651_v14  ;;  %v2513_v58 = vld [vmem:[#allocation4 + $0xf0] sm:$0xff]  ;;  %3040 = vst [vmem:[#allocation14_spill] sm:$0xff] %v2537_v5  ;;  %v2558_v14 = vld [vmem:[#allocation4 + $0x68] sm:$0xff] }
 0x1ba   :  { %v660_v20 = vsel %vm657_vm7, %v659_v18, %v655_v17  ;;  %3041 = vst [vmem:[#allocation13_spill] sm:$0xff] %v2540_v6  ;;  %v2567_v17 = vld [vmem:[#allocation4 + $0x40] sm:$0xff]  ;;  %v2570_v18 = vld [vmem:[#allocation4 + $0x48] sm:$0xff] }
 0x1bb   :  { %3042 = vst [vmem:[#allocation15_spill] sm:$0xff] %v2543_v7 }
 0x1bc   :  { %3043 = vst [vmem:[#allocation16_spill] sm:$0xff] %v2546_v8 }
 0x1bd   :  { %3044 = vst [vmem:[#allocation18_spill] sm:$0xff] %v2549_v9 }
 0x1be   :  { %3045 = vst [vmem:[#allocation17_spill] sm:$0xff] %v2552_v10 }
 0x1bf   :  { %v1637_v19 = vpop.eup %1636  ;;  %3046 = vst [vmem:[#allocation19_spill] sm:$0xff] %v2555_v11 }
 0x1c0   :  { %v666_v21 = vmul.f32 %v1637_v19, %v660_v20  ;;  %3047 = vst [vmem:[#allocation20_spill] sm:$0xff] %v2558_v14  ;;  %v2573_v19 = vld [vmem:[#allocation4 + $0x50] sm:$0xff]  ;;  %v2576_v20 = vld [vmem:[#allocation4 + $0x58] sm:$0xff] }
 0x1c1   :  { %3050 = vst [vmem:[#allocation23_spill] sm:$0xff] %v2567_v17 }
 0x1c2   :  { %1575 = vst [vmem:[%s2862_s4 + $0x8] sm:$0xff] %v666_v21  ;;  %685 = vmatmul.f32.vlgmr.msrb.gmra.mxu0 %v666_v21  ;;  %705 = vmatmul.f32.vlgmr.msrb.gmra.mxu1 %v666_v21 }
 0x1c3   :  { %725 = vmatmul.f32.vlgmr.msrb.gmra.mxu2 %v666_v21  ;;  %745 = vmatmul.f32.vlgmr.msrb.gmra.mxu3 %v666_v21  ;;  %3051 = vst [vmem:[#allocation24_spill] sm:$0xff] %v2570_v18  ;;  %v2579_v21 = vld [vmem:[#allocation4 + $0x20] sm:$0xff] }
 0x1c4   :  { %967 = vmatpush.msrb.mxu0 %v2411_v26  ;;  %987 = vmatpush.msrb.mxu1 %v2414_v29  ;;  %3052 = vst [vmem:[#allocation26_spill] sm:$0xff] %v2573_v19 }
 0x1c5   :  { %1007 = vmatpush.msrb.mxu2 %v2417_v30  ;;  %1027 = vmatpush.msrb.mxu3 %v2420_v31  ;;  %3053 = vst [vmem:[#allocation25_spill] sm:$0xff] %v2576_v20 }
 0x1c6   :  { %968 = vmatpush.msrb.mxu0 %v2423_v32  ;;  %988 = vmatpush.msrb.mxu1 %v2426_v33  ;;  %3054 = vst [vmem:[#allocation27_spill] sm:$0xff] %v2579_v21 }
 0x1c7   :  { %1008 = vmatpush.msrb.mxu2 %v2429_v34  ;;  %1028 = vmatpush.msrb.mxu3 %v2432_v35 }
 0x1c8   :  { %969 = vmatpush.msrb.mxu0 %v2435_v36  ;;  %989 = vmatpush.msrb.mxu1 %v2438_v37 }
 0x1c9   :  { %1009 = vmatpush.msrb.mxu2 %v2441_v38  ;;  %1029 = vmatpush.msrb.mxu3 %v2444_v40 }
 0x1ca   :  { %970 = vmatpush.msrb.mxu0 %v2447_v41  ;;  %990 = vmatpush.msrb.mxu1 %v2450_v42 }
 0x1cb   :  { %1010 = vmatpush.msrb.mxu2 %v2453_v43  ;;  %1030 = vmatpush.msrb.mxu3 %v2456_v47 }
 0x1cc   :  { %971 = vmatpush.msrb.mxu0 %v2459_v0  ;;  %991 = vmatpush.msrb.mxu1 %v2462_v46 }
 0x1cd   :  { %1011 = vmatpush.msrb.mxu2 %v2465_v60  ;;  %1031 = vmatpush.msrb.mxu3 %v2468_v13 }
 0x1ce   :  { %972 = vmatpush.msrb.mxu0 %v2471_v61  ;;  %992 = vmatpush.msrb.mxu1 %v2474_v39 }
 0x1cf   :  { %1012 = vmatpush.msrb.mxu2 %v2477_v50  ;;  %1032 = vmatpush.msrb.mxu3 %v2480_v63 }
 0x1d0   :  { %973 = vmatpush.msrb.mxu0 %v2483_v49  ;;  %993 = vmatpush.msrb.mxu1 %v2486_v44 }
 0x1d1   :  { %1013 = vmatpush.msrb.mxu2 %v2489_v45  ;;  %1033 = vmatpush.msrb.mxu3 %v2492_v52 }
 0x1d2   :  { %974 = vmatpush.msrb.mxu0 %v2495_v51  ;;  %994 = vmatpush.msrb.mxu1 %v2498_v56 }
 0x1d3   :  { %1014 = vmatpush.msrb.mxu2 %v2501_v53  ;;  %1034 = vmatpush.msrb.mxu3 %v2504_v48 }
 0x1d4   :  { %975 = vmatpush.msrb.mxu0 %v2507_v54  ;;  %995 = vmatpush.msrb.mxu1 %v2510_v57 }
 0x1d5   :  { %1015 = vmatpush.msrb.mxu2 %v2513_v58  ;;  %1035 = vmatpush.msrb.mxu3 %v2516_v62 }
 0x1d6   :  { %976 = vmatpush.msrb.mxu0 %v2519_v59  ;;  %996 = vmatpush.msrb.mxu1 %v2522_v55 }
 0x1d7   :  { %1016 = vmatpush.msrb.mxu2 %v2525_v1  ;;  %1036 = vmatpush.msrb.mxu3 %v2528_v2 }
 0x1d8   :  { %977 = vmatpush.msrb.mxu0 %v2531_v3  ;;  %997 = vmatpush.msrb.mxu1 %v2534_v4 }
 0x1d9   :  { %1017 = vmatpush.msrb.mxu2 %v2537_v5  ;;  %1037 = vmatpush.msrb.mxu3 %v2540_v6 }
 0x1da   :  { %978 = vmatpush.msrb.mxu0 %v2543_v7  ;;  %998 = vmatpush.msrb.mxu1 %v2546_v8 }
 0x1db   :  { %1018 = vmatpush.msrb.mxu2 %v2549_v9  ;;  %1038 = vmatpush.msrb.mxu3 %v2552_v10 }
 0x1dc   :  { %979 = vmatpush.msrb.mxu0 %v2555_v11  ;;  %999 = vmatpush.msrb.mxu1 %v2558_v14 }
 0x1dd   :  { %1019 = vmatpush.msrb.mxu2 %v2561_v15  ;;  %1039 = vmatpush.msrb.mxu3 %v2564_v16  ;;  %v2582_v16 = vld [vmem:[#allocation4 + $0x28] sm:$0xff] }
 0x1de   :  { %980 = vmatpush.msrb.mxu0 %v2567_v17  ;;  %1000 = vmatpush.msrb.mxu1 %v2570_v18  ;;  %3055 = vst [vmem:[#allocation28_spill] sm:$0xff] %v2582_v16  ;;  %v3056_v18 = vld [vmem:[#allocation39_spill] sm:$0xff]  ;;  %v3057_v17 = vld [vmem:[#allocation40_spill] sm:$0xff] }
 0x1df   :  { %1020 = vmatpush.msrb.mxu2 %v2573_v19  ;;  %1040 = vmatpush.msrb.mxu3 %v2576_v20 }
 0x1e0   :  { %981 = vmatpush.msrb.mxu0 %v2579_v21  ;;  %1001 = vmatpush.msrb.mxu1 %v2582_v16 }
 0x1e1   :  { %1021 = vmatpush.msrb.mxu2 %v3026_v22  ;;  %1041 = vmatpush.msrb.mxu3 %v3027_v23  ;;  %v3058_v23 = vld [vmem:[#allocation42_spill] sm:$0xff] }
 0x1e2   :  { %982 = vmatpush.msrb.mxu0 %v3028_v24  ;;  %1002 = vmatpush.msrb.mxu1 %v3029_v25 }
 0x1e3   :  { %1022 = vmatpush.msrb.mxu2 %v3030_v27  ;;  %1042 = vmatpush.msrb.mxu3 %v3031_v28 }
 0x23f   :  { %v686_v20 = vpop.f32.mrf.mxu0  ;;  %v706_v19 = vpop.f32.mrf.mxu1 }
 0x240   :  { %v749_v21 = vadd.f32 %v686_v20, %v3056_v18  ;;  %v750_v15 = vadd.f32 %v706_v19, %v3057_v17  ;;  %v3059_v17 = vld [vmem:[#allocation41_spill] sm:$0xff] }
 0x242   :  { %v1576_v14 = vmul.f32 -1.442695, %v749_v21  ;;  %v1577_v16 = vmul.f32 -1.442695, %v750_v15 }
 0x244   :  { %1638 = vpow2.f32 %v1576_v14 }
 0x245   :  { %1640 = vpow2.f32 %v1577_v16 }
 0x246   :  { %v746_v22 = vpop.f32.mrf.mxu3  ;;  %v726_v28 = vpop.f32.mrf.mxu2 }
 0x247   :  { %v752_v11 = vadd.f32 %v746_v22, %v3058_v23  ;;  %v751_v19 = vadd.f32 %v726_v28, %v3059_v17 }
 0x249   :  { %v1578_v24 = vmul.f32 -1.442695, %v752_v11 }
 0x24a   :  { %v1639_v10 = vpop.eup %1638 }
 0x24b   :  { %v1641_v25 = vpop.eup %1640  ;;  %v756_v9 = vadd.f32 1.0, %v1639_v10  ;;  %1642 = vpow2.f32 %v1578_v24 }
 0x24c   :  { %v775_v27 = vadd.f32 1.0, %v1641_v25 }
 0x24d   :  { %1644 = vrcp.f32 %v756_v9  ;;  %v768_v11 = vand.u32 2147483648, %v756_v9  ;;  %v766_v24 = vand.u32 2147483647, %v756_v9  ;;  %vm762_vm10 = vweird.f32 %v756_v9 }
 0x24e   :  { %1646 = vrcp.f32 %v775_v27  ;;  %v787_v23 = vand.u32 2147483648, %v775_v27  ;;  %v785_v7 = vand.u32 2147483647, %v775_v27  ;;  %vm781_vm11 = vweird.f32 %v775_v27 }
 0x24f   :  { %v769_v28 = vor.u32 1.1754944e-38, %v768_v11  ;;  %vm767_vm14 = vcmp.eq.f32.partialorder %v766_v24, 8.507059e+37 }
 0x250   :  { %vm786_vm15 = vcmp.eq.f32.partialorder %v785_v7, 8.507059e+37 }
 0x251   :  { %v1643_v8 = vpop.eup %1642 }
 0x252   :  { %v795_v18 = vadd.f32 1.0, %v1643_v8 }
 0x253   :  { %v1645_v20 = vpop.eup %1644 }
 0x254   :  { %v1647_v15 = vpop.eup %1646  ;;  %v758_v14 = vmul.f32 %v1645_v20, %v756_v9  ;;  %1648 = vrcp.f32 %v795_v18  ;;  %vm763_vm8 = vweird.f32 %v1645_v20  ;;  %v807_v11 = vand.u32 2147483648, %v795_v18 }
 0x255   :  { %v777_v16 = vmul.f32 %v1647_v15, %v775_v27  ;;  %1650 = vtanh.f32 %v751_v19  ;;  %vm782_vm9 = vweird.f32 %v1647_v15  ;;  %vm764_vm12 = vmor %vm762_vm10, %vm763_vm8  ;;  %vm801_vm1 = vweird.f32 %v795_v18 }
 0x256   :  { %v759_v21 = vsub.f32 1.0, %v758_v14  ;;  %vm783_vm13 = vmor %vm781_vm11, %vm782_vm9  ;;  %v788_v14 = vor.u32 1.1754944e-38, %v787_v23  ;;  %v808_v24 = vor.u32 1.1754944e-38, %v807_v11  ;;  %v3078_v11 = vld [vmem:[#allocation27_spill] sm:$0xff] }
 0x257   :  { %v778_v22 = vsub.f32 1.0, %v777_v16 }
 0x258   :  { %v760_v10 = vmul.f32 %v1645_v20, %v759_v21 }
 0x259   :  { %v779_v25 = vmul.f32 %v1647_v15, %v778_v22 }
 0x25a   :  { %v1649_v6 = vpop.eup %1648  ;;  %v761_v8 = vadd.f32 %v1645_v20, %v760_v10 }
 0x25b   :  { %v780_v17 = vadd.f32 %v1647_v15, %v779_v25  ;;  %v797_v5 = vmul.f32 %v1649_v6, %v795_v18  ;;  %v1651_v19 = vpop.eup %1650  ;;  %vm802_vm0 = vweird.f32 %v1649_v6  ;;  %v3067_v25 = vld [vmem:[#allocation16_spill] sm:$0xff] }
 0x25c   :  { %v765_v16 = vsel %vm764_vm12, %v1645_v20, %v761_v8  ;;  %v805_v20 = vand.u32 2147483647, %v795_v18  ;;  %vm803_vm2 = vmor %vm801_vm1, %vm802_vm0  ;;  %v3066_v18 = vld [vmem:[#allocation15_spill] sm:$0xff]  ;;  %v3068_v8 = vld [vmem:[#allocation18_spill] sm:$0xff] }
 0x25d   :  { %v770_v4 = vsel %vm767_vm14, %v769_v28, %v765_v16  ;;  %v784_v21 = vsel %vm783_vm13, %v1647_v15, %v780_v17  ;;  %v798_v3 = vsub.f32 1.0, %v797_v5  ;;  %v3069_v28 = vld [vmem:[#allocation17_spill] sm:$0xff]  ;;  %v3070_v17 = vld [vmem:[#allocation19_spill] sm:$0xff]  ;;  %v3072_v16 = vld [vmem:[#allocation22_spill] sm:$0xff] }
 0x25e   :  { %v789_v22 = vsel %vm786_vm15, %v788_v14, %v784_v21  ;;  %v812_v2 = vmul.f32 %v1651_v19, %v770_v4  ;;  %vm806_vm3 = vcmp.eq.f32.partialorder %v805_v20, 8.507059e+37  ;;  %v3064_v4 = vld [vmem:[#allocation14_spill] sm:$0xff]  ;;  %v3071_v14 = vld [vmem:[#allocation20_spill] sm:$0xff]  ;;  %v3073_v19 = vld [vmem:[#allocation21_spill] sm:$0xff] }
 0x25f   :  { %v811_v1 = vmul.f32 %v789_v22, %v2405_v12  ;;  %v799_v10 = vmul.f32 %v1649_v6, %v798_v3  ;;  %v3060_v12 = vld [vmem:[#allocation10_spill] sm:$0xff]  ;;  %v3063_v3 = vld [vmem:[#allocation12_spill] sm:$0xff]  ;;  %v3074_v21 = vld [vmem:[#allocation23_spill] sm:$0xff] }
 0x260   :  { %v3075_v22 = vld [vmem:[#allocation24_spill] sm:$0xff] }
 0x261   :  { %v2596_v9 = vadd.f32 %v812_v2, %v811_v1  ;;  %v800_v27 = vadd.f32 %v1649_v6, %v799_v10  ;;  %v3061_v1 = vld [vmem:[#allocation9_spill] sm:$0xff]  ;;  %v3062_v2 = vld [vmem:[#allocation11_spill] sm:$0xff]  ;;  %v3076_v10 = vld [vmem:[#allocation26_spill] sm:$0xff] }
 0x262   :  { %v3079_v20 = vld [vmem:[#allocation28_spill] sm:$0xff] }
 0x263   :  { %1652 = vtanh.f32 %v2596_v9  ;;  %v804_v23 = vsel %vm803_vm2, %v1649_v6, %v800_v27  ;;  %v3065_v6 = vld [vmem:[#allocation13_spill] sm:$0xff] }
 0x264   :  { %v809_v5 = vsel %vm806_vm3, %v808_v24, %v804_v23  ;;  %v3077_v27 = vld [vmem:[#allocation25_spill] sm:$0xff]  ;;  %v2660_v23 = vld [vmem:[#allocation4 + $0x30] sm:$0xff]  ;;  %v2663_v24 = vld [vmem:[#allocation4 + $0x38] sm:$0xff] }
 0x265   :  { %3080 = vst [vmem:[#allocation29_spill] sm:$0xff] %v2660_v23 }
 0x266   :  { %3081 = vst [vmem:[#allocation30_spill] sm:$0xff] %v2663_v24 }
 0x269   :  { %v1653_v7 = vpop.eup %1652 }
 0x26a   :  { %v815_v15 = vmul.f32 %v1653_v7, %v809_v5  ;;  %v2666_v7 = vld [vmem:[#allocation4] sm:$0xff]  ;;  %v2669_v5 = vld [vmem:[#allocation4 + $0x8] sm:$0xff] }
 0x26b   :  { %3082 = vst [vmem:[#allocation31_spill] sm:$0xff] %v2666_v7 }
 0x26c   :  { %1579 = vst [vmem:[%s2862_s4 + $0x10] sm:$0xff] %v815_v15  ;;  %834 = vmatmul.f32.vlgmr.msra.gmra.mxu0 %v815_v15  ;;  %854 = vmatmul.f32.vlgmr.msra.gmra.mxu1 %v815_v15 }
 0x26d   :  { %874 = vmatmul.f32.vlgmr.msra.gmra.mxu2 %v815_v15  ;;  %894 = vmatmul.f32.vlgmr.msra.gmra.mxu3 %v815_v15  ;;  %3083 = vst [vmem:[#allocation32_spill] sm:$0xff] %v2669_v5  ;;  %v2672_v15 = vld [vmem:[#allocation4 + $0x10] sm:$0xff] }
 0x26e   :  { %1116 = vmatpush.msra.mxu0 %v2411_v26  ;;  %1136 = vmatpush.msra.mxu1 %v2414_v29  ;;  %3084 = vst [vmem:[#allocation33_spill] sm:$0xff] %v2672_v15 }
 0x26f   :  { %1156 = vmatpush.msra.mxu2 %v2417_v30  ;;  %1176 = vmatpush.msra.mxu3 %v2420_v31 }
 0x270   :  { %1117 = vmatpush.msra.mxu0 %v2423_v32  ;;  %1137 = vmatpush.msra.mxu1 %v2426_v33 }
 0x271   :  { %1157 = vmatpush.msra.mxu2 %v2429_v34  ;;  %1177 = vmatpush.msra.mxu3 %v2432_v35 }
 0x272   :  { %1118 = vmatpush.msra.mxu0 %v2435_v36  ;;  %1138 = vmatpush.msra.mxu1 %v2438_v37 }
 0x273   :  { %1158 = vmatpush.msra.mxu2 %v2441_v38  ;;  %1178 = vmatpush.msra.mxu3 %v2444_v40 }
 0x274   :  { %1119 = vmatpush.msra.mxu0 %v2447_v41  ;;  %1139 = vmatpush.msra.mxu1 %v2450_v42 }
 0x275   :  { %1159 = vmatpush.msra.mxu2 %v2453_v43  ;;  %1179 = vmatpush.msra.mxu3 %v2456_v47 }
 0x276   :  { %1120 = vmatpush.msra.mxu0 %v2459_v0  ;;  %1140 = vmatpush.msra.mxu1 %v2462_v46 }
 0x277   :  { %1160 = vmatpush.msra.mxu2 %v2465_v60  ;;  %1180 = vmatpush.msra.mxu3 %v2468_v13 }
 0x278   :  { %1121 = vmatpush.msra.mxu0 %v2471_v61  ;;  %1141 = vmatpush.msra.mxu1 %v2474_v39 }
 0x279   :  { %1161 = vmatpush.msra.mxu2 %v2477_v50  ;;  %1181 = vmatpush.msra.mxu3 %v2480_v63 }
 0x27a   :  { %1122 = vmatpush.msra.mxu0 %v2483_v49  ;;  %1142 = vmatpush.msra.mxu1 %v2486_v44 }
 0x27b   :  { %1162 = vmatpush.msra.mxu2 %v2489_v45  ;;  %1182 = vmatpush.msra.mxu3 %v2492_v52 }
 0x27c   :  { %1123 = vmatpush.msra.mxu0 %v2495_v51  ;;  %1143 = vmatpush.msra.mxu1 %v2498_v56 }
 0x27d   :  { %1163 = vmatpush.msra.mxu2 %v2501_v53  ;;  %1183 = vmatpush.msra.mxu3 %v2504_v48 }
 0x27e   :  { %1124 = vmatpush.msra.mxu0 %v2507_v54  ;;  %1144 = vmatpush.msra.mxu1 %v2510_v57 }
 0x27f   :  { %1164 = vmatpush.msra.mxu2 %v2513_v58  ;;  %1184 = vmatpush.msra.mxu3 %v2516_v62 }
 0x280   :  { %1125 = vmatpush.msra.mxu0 %v2519_v59  ;;  %1145 = vmatpush.msra.mxu1 %v2522_v55 }
 0x281   :  { %1165 = vmatpush.msra.mxu2 %v3060_v12  ;;  %1185 = vmatpush.msra.mxu3 %v3061_v1 }
 0x282   :  { %1126 = vmatpush.msra.mxu0 %v3062_v2  ;;  %1146 = vmatpush.msra.mxu1 %v3063_v3 }
 0x283   :  { %1166 = vmatpush.msra.mxu2 %v3064_v4  ;;  %1186 = vmatpush.msra.mxu3 %v3065_v6 }
 0x284   :  { %1127 = vmatpush.msra.mxu0 %v3066_v18  ;;  %1147 = vmatpush.msra.mxu1 %v3067_v25 }
 0x285   :  { %1167 = vmatpush.msra.mxu2 %v3068_v8  ;;  %1187 = vmatpush.msra.mxu3 %v3069_v28 }
 0x286   :  { %1128 = vmatpush.msra.mxu0 %v3070_v17  ;;  %1148 = vmatpush.msra.mxu1 %v3071_v14 }
 0x287   :  { %1168 = vmatpush.msra.mxu2 %v3072_v16  ;;  %1188 = vmatpush.msra.mxu3 %v3073_v19 }
 0x288   :  { %1129 = vmatpush.msra.mxu0 %v3074_v21  ;;  %1149 = vmatpush.msra.mxu1 %v3075_v22 }
 0x289   :  { %1169 = vmatpush.msra.mxu2 %v3076_v10  ;;  %1189 = vmatpush.msra.mxu3 %v3077_v27  ;;  %v3086_v27 = vld [vmem:[#allocation43_spill] sm:$0xff]  ;;  %v3087_v10 = vld [vmem:[#allocation44_spill] sm:$0xff] }
 0x28a   :  { %1130 = vmatpush.msra.mxu0 %v3078_v11  ;;  %1150 = vmatpush.msra.mxu1 %v3079_v20  ;;  %v2675_v20 = vld [vmem:[#allocation4 + $0x18] sm:$0xff] }
 0x28b   :  { %1170 = vmatpush.msra.mxu2 %v2660_v23  ;;  %1190 = vmatpush.msra.mxu3 %v2663_v24  ;;  %3085 = vst [vmem:[#allocation34_spill] sm:$0xff] %v2675_v20 }
 0x28c   :  { %1131 = vmatpush.msra.mxu0 %v2666_v7  ;;  %1151 = vmatpush.msra.mxu1 %v2669_v5  ;;  %v3088_v5 = vld [vmem:[#allocation46_spill] sm:$0xff] }
 0x28d   :  { %1171 = vmatpush.msra.mxu2 %v2672_v15  ;;  %1191 = vmatpush.msra.mxu3 %v2675_v20 }
 0x2e9   :  { %v835_v23 = vpop.f32.mrf.mxu0  ;;  %v855_v11 = vpop.f32.mrf.mxu1 }
 0x2ea   :  { %v898_v24 = vadd.f32 %v835_v23, %v3086_v27  ;;  %v899_v22 = vadd.f32 %v855_v11, %v3087_v10  ;;  %v3089_v10 = vld [vmem:[#allocation45_spill] sm:$0xff] }
 0x2ec   :  { %v1580_v21 = vmul.f32 -1.442695, %v898_v24  ;;  %v1581_v7 = vmul.f32 -1.442695, %v899_v22 }
 0x2ee   :  { %1654 = vpow2.f32 %v1580_v21 }
 0x2ef   :  { %1656 = vpow2.f32 %v1581_v7 }
 0x2f0   :  { %v895_v19 = vpop.f32.mrf.mxu3  ;;  %v875_v20 = vpop.f32.mrf.mxu2 }
 0x2f1   :  { %v901_v16 = vadd.f32 %v895_v19, %v3088_v5  ;;  %v900_v11 = vadd.f32 %v875_v20, %v3089_v10 }
 0x2f3   :  { %v1582_v14 = vmul.f32 -1.442695, %v901_v16 }
 0x2f4   :  { %v1655_v17 = vpop.eup %1654 }
 0x2f5   :  { %v1657_v15 = vpop.eup %1656  ;;  %v905_v28 = vadd.f32 1.0, %v1655_v17  ;;  %1658 = vpow2.f32 %v1582_v14 }
 0x2f6   :  { %v924_v8 = vadd.f32 1.0, %v1657_v15 }
 0x2f7   :  { %1660 = vrcp.f32 %v905_v28  ;;  %v917_v16 = vand.u32 2147483648, %v905_v28  ;;  %v915_v14 = vand.u32 2147483647, %v905_v28  ;;  %vm911_vm6 = vweird.f32 %v905_v28 }
 0x2f8   :  { %1662 = vrcp.f32 %v924_v8  ;;  %v936_v5 = vand.u32 2147483648, %v924_v8  ;;  %v934_v18 = vand.u32 2147483647, %v924_v8  ;;  %vm930_vm7 = vweird.f32 %v924_v8 }
 0x2f9   :  { %v918_v20 = vor.u32 1.1754944e-38, %v917_v16  ;;  %vm916_vm10 = vcmp.eq.f32.partialorder %v915_v14, 8.507059e+37 }
 0x2fa   :  { %vm935_vm11 = vcmp.eq.f32.partialorder %v934_v18, 8.507059e+37 }
 0x2fb   :  { %v1659_v25 = vpop.eup %1658 }
 0x2fc   :  { %v944_v27 = vadd.f32 1.0, %v1659_v25 }
 0x2fd   :  { %v1661_v23 = vpop.eup %1660 }
 0x2fe   :  { %v1663_v22 = vpop.eup %1662  ;;  %v907_v21 = vmul.f32 %v1661_v23, %v905_v28  ;;  %1664 = vrcp.f32 %v944_v27  ;;  %vm912_vm4 = vweird.f32 %v1661_v23  ;;  %v956_v16 = vand.u32 2147483648, %v944_v27 }
 0x2ff   :  { %v926_v24 = vmul.f32 %v1663_v22, %v924_v8  ;;  %1666 = vtanh.f32 %v900_v11  ;;  %vm931_vm5 = vweird.f32 %v1663_v22  ;;  %vm913_vm8 = vmor %vm911_vm6, %vm912_vm4  ;;  %vm950_vm13 = vweird.f32 %v944_v27 }
 0x300   :  { %v908_v7 = vsub.f32 1.0, %v907_v21  ;;  %vm932_vm9 = vmor %vm930_vm7, %vm931_vm5  ;;  %v937_v21 = vor.u32 1.1754944e-38, %v936_v5  ;;  %v957_v14 = vor.u32 1.1754944e-38, %v956_v16  ;;  %v3108_v16 = vld [vmem:[#allocation27_spill] sm:$0xff] }
 0x301   :  { %v927_v19 = vsub.f32 1.0, %v926_v24 }
 0x302   :  { %v909_v17 = vmul.f32 %v1661_v23, %v908_v7 }
 0x303   :  { %v928_v15 = vmul.f32 %v1663_v22, %v927_v19 }
 0x304   :  { %v1665_v6 = vpop.eup %1664  ;;  %v910_v25 = vadd.f32 %v1661_v23, %v909_v17 }
 0x305   :  { %v929_v10 = vadd.f32 %v1663_v22, %v928_v15  ;;  %v946_v4 = vmul.f32 %v1665_v6, %v944_v27  ;;  %v1667_v11 = vpop.eup %1666  ;;  %vm951_vm12 = vweird.f32 %v1665_v6  ;;  %v3097_v15 = vld [vmem:[#allocation16_spill] sm:$0xff] }
 0x306   :  { %v914_v24 = vsel %vm913_vm8, %v1661_v23, %v910_v25  ;;  %v954_v23 = vand.u32 2147483647, %v944_v27  ;;  %vm952_vm14 = vmor %vm950_vm13, %vm951_vm12  ;;  %v3096_v27 = vld [vmem:[#allocation15_spill] sm:$0xff]  ;;  %v3098_v25 = vld [vmem:[#allocation18_spill] sm:$0xff] }
 0x307   :  { %v919_v3 = vsel %vm916_vm10, %v918_v20, %v914_v24  ;;  %v933_v7 = vsel %vm932_vm9, %v1663_v22, %v929_v10  ;;  %v947_v2 = vsub.f32 1.0, %v946_v4  ;;  %v3099_v20 = vld [vmem:[#allocation17_spill] sm:$0xff]  ;;  %v3100_v10 = vld [vmem:[#allocation19_spill] sm:$0xff]  ;;  %v3102_v24 = vld [vmem:[#allocation22_spill] sm:$0xff] }
 0x308   :  { %v938_v19 = vsel %vm935_vm11, %v937_v21, %v933_v7  ;;  %v961_v1 = vmul.f32 %v1667_v11, %v919_v3  ;;  %vm955_vm15 = vcmp.eq.f32.partialorder %v954_v23, 8.507059e+37  ;;  %v3094_v3 = vld [vmem:[#allocation14_spill] sm:$0xff]  ;;  %v3101_v21 = vld [vmem:[#allocation20_spill] sm:$0xff]  ;;  %v3103_v11 = vld [vmem:[#allocation21_spill] sm:$0xff] }
 0x309   :  { %v960_v12 = vmul.f32 %v938_v19, %v2596_v9  ;;  %v948_v17 = vmul.f32 %v1665_v6, %v947_v2  ;;  %v3090_v9 = vld [vmem:[#allocation10_spill] sm:$0xff]  ;;  %v3093_v2 = vld [vmem:[#allocation12_spill] sm:$0xff]  ;;  %v3104_v7 = vld [vmem:[#allocation23_spill] sm:$0xff] }
 0x30a   :  { %v3105_v19 = vld [vmem:[#allocation24_spill] sm:$0xff] }
 0x30b   :  { %v2683_v28 = vadd.f32 %v961_v1, %v960_v12  ;;  %v949_v8 = vadd.f32 %v1665_v6, %v948_v17  ;;  %v3091_v12 = vld [vmem:[#allocation9_spill] sm:$0xff]  ;;  %v3092_v1 = vld [vmem:[#allocation11_spill] sm:$0xff]  ;;  %v3106_v17 = vld [vmem:[#allocation26_spill] sm:$0xff] }
 0x30c   :  { %v3109_v23 = vld [vmem:[#allocation28_spill] sm:$0xff] }
 0x30d   :  { %1668 = vtanh.f32 %v2683_v28  ;;  %v953_v5 = vsel %vm952_vm14, %v1665_v6, %v949_v8  ;;  %v3095_v6 = vld [vmem:[#allocation13_spill] sm:$0xff] }
 0x30e   :  { %v958_v4 = vsel %vm955_vm15, %v957_v14, %v953_v5  ;;  %v3107_v8 = vld [vmem:[#allocation25_spill] sm:$0xff]  ;;  %v3111_v14 = vld [vmem:[#allocation30_spill] sm:$0xff] }
 0x30f   :  { %v3110_v5 = vld [vmem:[#allocation29_spill] sm:$0xff] }
 0x313   :  { %v1669_v18 = vpop.eup %1668 }
 0x314   :  { %v964_v22 = vmul.f32 %v1669_v18, %v958_v4  ;;  %v3112_v18 = vld [vmem:[#allocation31_spill] sm:$0xff]  ;;  %v3113_v4 = vld [vmem:[#allocation32_spill] sm:$0xff] }
 0x316   :  { %1583 = vst [vmem:[%s2862_s4 + $0x18] sm:$0xff] %v964_v22  ;;  %983 = vmatmul.f32.vlgmr.msrb.gmra.mxu0 %v964_v22  ;;  %1003 = vmatmul.f32.vlgmr.msrb.gmra.mxu1 %v964_v22 }
 0x317   :  { %1023 = vmatmul.f32.vlgmr.msrb.gmra.mxu2 %v964_v22  ;;  %1043 = vmatmul.f32.vlgmr.msrb.gmra.mxu3 %v964_v22  ;;  %v3114_v22 = vld [vmem:[#allocation33_spill] sm:$0xff] }
 0x318   :  { %1265 = vmatpush.msrb.mxu0 %v2411_v26  ;;  %1285 = vmatpush.msrb.mxu1 %v2414_v29 }
 0x319   :  { %1305 = vmatpush.msrb.mxu2 %v2417_v30  ;;  %1325 = vmatpush.msrb.mxu3 %v2420_v31 }
 0x31a   :  { %1266 = vmatpush.msrb.mxu0 %v2423_v32  ;;  %1286 = vmatpush.msrb.mxu1 %v2426_v33 }
 0x31b   :  { %1306 = vmatpush.msrb.mxu2 %v2429_v34  ;;  %1326 = vmatpush.msrb.mxu3 %v2432_v35 }
 0x31c   :  { %1267 = vmatpush.msrb.mxu0 %v2435_v36  ;;  %1287 = vmatpush.msrb.mxu1 %v2438_v37 }
 0x31d   :  { %1307 = vmatpush.msrb.mxu2 %v2441_v38  ;;  %1327 = vmatpush.msrb.mxu3 %v2444_v40 }
 0x31e   :  { %1268 = vmatpush.msrb.mxu0 %v2447_v41  ;;  %1288 = vmatpush.msrb.mxu1 %v2450_v42 }
 0x31f   :  { %1308 = vmatpush.msrb.mxu2 %v2453_v43  ;;  %1328 = vmatpush.msrb.mxu3 %v2456_v47 }
 0x320   :  { %1269 = vmatpush.msrb.mxu0 %v2459_v0  ;;  %1289 = vmatpush.msrb.mxu1 %v2462_v46 }
 0x321   :  { %1309 = vmatpush.msrb.mxu2 %v2465_v60  ;;  %1329 = vmatpush.msrb.mxu3 %v2468_v13 }
 0x322   :  { %1270 = vmatpush.msrb.mxu0 %v2471_v61  ;;  %1290 = vmatpush.msrb.mxu1 %v2474_v39 }
 0x323   :  { %1310 = vmatpush.msrb.mxu2 %v2477_v50  ;;  %1330 = vmatpush.msrb.mxu3 %v2480_v63 }
 0x324   :  { %1271 = vmatpush.msrb.mxu0 %v2483_v49  ;;  %1291 = vmatpush.msrb.mxu1 %v2486_v44 }
 0x325   :  { %1311 = vmatpush.msrb.mxu2 %v2489_v45  ;;  %1331 = vmatpush.msrb.mxu3 %v2492_v52 }
 0x326   :  { %1272 = vmatpush.msrb.mxu0 %v2495_v51  ;;  %1292 = vmatpush.msrb.mxu1 %v2498_v56 }
 0x327   :  { %1312 = vmatpush.msrb.mxu2 %v2501_v53  ;;  %1332 = vmatpush.msrb.mxu3 %v2504_v48 }
 0x328   :  { %1273 = vmatpush.msrb.mxu0 %v2507_v54  ;;  %1293 = vmatpush.msrb.mxu1 %v2510_v57 }
 0x329   :  { %1313 = vmatpush.msrb.mxu2 %v2513_v58  ;;  %1333 = vmatpush.msrb.mxu3 %v2516_v62 }
 0x32a   :  { %1274 = vmatpush.msrb.mxu0 %v2519_v59  ;;  %1294 = vmatpush.msrb.mxu1 %v2522_v55 }
 0x32b   :  { %1314 = vmatpush.msrb.mxu2 %v3090_v9  ;;  %1334 = vmatpush.msrb.mxu3 %v3091_v12 }
 0x32c   :  { %1275 = vmatpush.msrb.mxu0 %v3092_v1  ;;  %1295 = vmatpush.msrb.mxu1 %v3093_v2 }
 0x32d   :  { %1315 = vmatpush.msrb.mxu2 %v3094_v3  ;;  %1335 = vmatpush.msrb.mxu3 %v3095_v6 }
 0x32e   :  { %1276 = vmatpush.msrb.mxu0 %v3096_v27  ;;  %1296 = vmatpush.msrb.mxu1 %v3097_v15 }
 0x32f   :  { %1316 = vmatpush.msrb.mxu2 %v3098_v25  ;;  %1336 = vmatpush.msrb.mxu3 %v3099_v20 }
 0x330   :  { %1277 = vmatpush.msrb.mxu0 %v3100_v10  ;;  %1297 = vmatpush.msrb.mxu1 %v3101_v21 }
 0x331   :  { %1317 = vmatpush.msrb.mxu2 %v3102_v24  ;;  %1337 = vmatpush.msrb.mxu3 %v3103_v11  ;;  %v3116_v11 = vld [vmem:[#allocation47_spill] sm:$0xff]  ;;  %v3117_v24 = vld [vmem:[#allocation48_spill] sm:$0xff] }
 0x332   :  { %1278 = vmatpush.msrb.mxu0 %v3104_v7  ;;  %1298 = vmatpush.msrb.mxu1 %v3105_v19  ;;  %v3115_v7 = vld [vmem:[#allocation34_spill] sm:$0xff] }
 0x333   :  { %1318 = vmatpush.msrb.mxu2 %v3106_v17  ;;  %1338 = vmatpush.msrb.mxu3 %v3107_v8 }
 0x334   :  { %1279 = vmatpush.msrb.mxu0 %v3108_v16  ;;  %1299 = vmatpush.msrb.mxu1 %v3109_v23 }
 0x335   :  { %1319 = vmatpush.msrb.mxu2 %v3110_v5  ;;  %1339 = vmatpush.msrb.mxu3 %v3111_v14  ;;  %v3118_v14 = vld [vmem:[#allocation50_spill] sm:$0xff] }
 0x336   :  { %1280 = vmatpush.msrb.mxu0 %v3112_v18  ;;  %1300 = vmatpush.msrb.mxu1 %v3113_v4 }
 0x337   :  { %1320 = vmatpush.msrb.mxu2 %v3114_v22  ;;  %1340 = vmatpush.msrb.mxu3 %v3115_v7 }
 0x393   :  { %v984_v19 = vpop.f32.mrf.mxu0  ;;  %v1004_v17 = vpop.f32.mrf.mxu1 }
 0x394   :  { %v1047_v8 = vadd.f32 %v984_v19, %v3116_v11  ;;  %v1048_v16 = vadd.f32 %v1004_v17, %v3117_v24  ;;  %v3119_v24 = vld [vmem:[#allocation49_spill] sm:$0xff] }
 0x396   :  { %v1584_v21 = vmul.f32 -1.442695, %v1047_v8  ;;  %v1585_v23 = vmul.f32 -1.442695, %v1048_v16 }
 0x398   :  { %1670 = vpow2.f32 %v1584_v21 }
 0x399   :  { %1672 = vpow2.f32 %v1585_v23 }
 0x39a   :  { %v1044_v5 = vpop.f32.mrf.mxu3  ;;  %v1024_v7 = vpop.f32.mrf.mxu2 }
 0x39b   :  { %v1050_v10 = vadd.f32 %v1044_v5, %v3118_v14  ;;  %v1049_v17 = vadd.f32 %v1024_v7, %v3119_v24 }
 0x39d   :  { %v1586_v18 = vmul.f32 -1.442695, %v1050_v10 }
 0x39e   :  { %v1671_v20 = vpop.eup %1670 }
 0x39f   :  { %v1673_v4 = vpop.eup %1672  ;;  %v1054_v25 = vadd.f32 1.0, %v1671_v20  ;;  %1674 = vpow2.f32 %v1586_v18 }
 0x3a0   :  { %v1073_v22 = vadd.f32 1.0, %v1673_v4 }
 0x3a1   :  { %1676 = vrcp.f32 %v1054_v25  ;;  %v1066_v10 = vand.u32 2147483648, %v1054_v25  ;;  %v1064_v18 = vand.u32 2147483647, %v1054_v25  ;;  %vm1060_vm2 = vweird.f32 %v1054_v25 }
 0x3a2   :  { %1678 = vrcp.f32 %v1073_v22  ;;  %v1085_v14 = vand.u32 2147483648, %v1073_v22  ;;  %v1083_v27 = vand.u32 2147483647, %v1073_v22  ;;  %vm1079_vm3 = vweird.f32 %v1073_v22 }
 0x3a3   :  { %v1067_v7 = vor.u32 1.1754944e-38, %v1066_v10  ;;  %vm1065_vm6 = vcmp.eq.f32.partialorder %v1064_v18, 8.507059e+37 }
 0x3a4   :  { %vm1084_vm7 = vcmp.eq.f32.partialorder %v1083_v27, 8.507059e+37 }
 0x3a5   :  { %v1675_v15 = vpop.eup %1674 }
 0x3a6   :  { %v1093_v11 = vadd.f32 1.0, %v1675_v15 }
 0x3a7   :  { %v1677_v19 = vpop.eup %1676 }
 0x3a8   :  { %v1679_v8 = vpop.eup %1678  ;;  %v1056_v21 = vmul.f32 %v1677_v19, %v1054_v25  ;;  %1680 = vrcp.f32 %v1093_v11  ;;  %vm1061_vm0 = vweird.f32 %v1677_v19  ;;  %v1105_v10 = vand.u32 2147483648, %v1093_v11 }
 0x3a9   :  { %v1075_v16 = vmul.f32 %v1679_v8, %v1073_v22  ;;  %1682 = vtanh.f32 %v1049_v17  ;;  %vm1080_vm1 = vweird.f32 %v1679_v8  ;;  %vm1062_vm4 = vmor %vm1060_vm2, %vm1061_vm0  ;;  %vm1099_vm9 = vweird.f32 %v1093_v11 }
 0x3aa   :  { %v1057_v23 = vsub.f32 1.0, %v1056_v21  ;;  %vm1081_vm5 = vmor %vm1079_vm3, %vm1080_vm1  ;;  %v1086_v21 = vor.u32 1.1754944e-38, %v1085_v14  ;;  %v1106_v18 = vor.u32 1.1754944e-38, %v1105_v10 }
 0x3ab   :  { %v1076_v5 = vsub.f32 1.0, %v1075_v16 }
 0x3ac   :  { %v1058_v20 = vmul.f32 %v1677_v19, %v1057_v23 }
 0x3ad   :  { %v1077_v4 = vmul.f32 %v1679_v8, %v1076_v5 }
 0x3ae   :  { %v1681_v6 = vpop.eup %1680  ;;  %v1059_v15 = vadd.f32 %v1677_v19, %v1058_v20 }
 0x3af   :  { %v1078_v24 = vadd.f32 %v1679_v8, %v1077_v4  ;;  %v1095_v3 = vmul.f32 %v1681_v6, %v1093_v11  ;;  %v1683_v17 = vpop.eup %1682  ;;  %vm1100_vm8 = vweird.f32 %v1681_v6 }
 0x3b0   :  { %v1063_v16 = vsel %vm1062_vm4, %v1677_v19, %v1059_v15  ;;  %v1103_v19 = vand.u32 2147483647, %v1093_v11  ;;  %vm1101_vm10 = vmor %vm1099_vm9, %vm1100_vm8  ;;  %v3149_v15 = vld [vmem:[#allocation53_spill] sm:$0xff] }
 0x3b1   :  { %v1068_v2 = vsel %vm1065_vm6, %v1067_v7, %v1063_v16  ;;  %v1082_v23 = vsel %vm1081_vm5, %v1679_v8, %v1078_v24  ;;  %v1096_v1 = vsub.f32 1.0, %v1095_v3 }
 0x3b2   :  { %v1087_v5 = vsel %vm1084_vm7, %v1086_v21, %v1082_v23  ;;  %v1110_v12 = vmul.f32 %v1683_v17, %v1068_v2  ;;  %vm1104_vm11 = vcmp.eq.f32.partialorder %v1103_v19, 8.507059e+37 }
 0x3b3   :  { %v1109_v9 = vmul.f32 %v1087_v5, %v2683_v28  ;;  %v1097_v20 = vmul.f32 %v1681_v6, %v1096_v1 }
 0x3b5   :  { %v2758_v25 = vadd.f32 %v1110_v12, %v1109_v9  ;;  %v1098_v22 = vadd.f32 %v1681_v6, %v1097_v20 }
 0x3b7   :  { %1684 = vtanh.f32 %v2758_v25  ;;  %v1102_v14 = vsel %vm1101_vm10, %v1681_v6, %v1098_v22 }
 0x3b8   :  { %v1107_v3 = vsel %vm1104_vm11, %v1106_v18, %v1102_v14 }
 0x3bd   :  { %v1685_v27 = vpop.eup %1684 }
 0x3be   :  { %v1113_v8 = vmul.f32 %v1685_v27, %v1107_v3 }
 0x3c0   :  { %1587 = vst [vmem:[%s2862_s4 + $0x20] sm:$0xff] %v1113_v8  ;;  %1132 = vmatmul.f32.vlgmr.msra.gmra.mxu0 %v1113_v8  ;;  %1152 = vmatmul.f32.vlgmr.msra.gmra.mxu1 %v1113_v8 }
 0x3c1   :  { %1172 = vmatmul.f32.vlgmr.msra.gmra.mxu2 %v1113_v8  ;;  %1192 = vmatmul.f32.vlgmr.msra.gmra.mxu3 %v1113_v8 }
 0x3c2   :  { %1414 = vmatpush.msra.mxu0 %v2411_v26  ;;  %1434 = vmatpush.msra.mxu1 %v2414_v29  ;;  %v3120_v26 = vld [vmem:[#allocation10_spill] sm:$0xff]  ;;  %v3121_v29 = vld [vmem:[#allocation9_spill] sm:$0xff] }
 0x3c3   :  { %1454 = vmatpush.msra.mxu2 %v2417_v30  ;;  %1474 = vmatpush.msra.mxu3 %v2420_v31  ;;  %v3122_v30 = vld [vmem:[#allocation11_spill] sm:$0xff]  ;;  %v3123_v31 = vld [vmem:[#allocation12_spill] sm:$0xff] }
 0x3c4   :  { %1415 = vmatpush.msra.mxu0 %v2423_v32  ;;  %1435 = vmatpush.msra.mxu1 %v2426_v33  ;;  %v3124_v32 = vld [vmem:[#allocation14_spill] sm:$0xff]  ;;  %v3125_v33 = vld [vmem:[#allocation13_spill] sm:$0xff] }
 0x3c5   :  { %1455 = vmatpush.msra.mxu2 %v2429_v34  ;;  %1475 = vmatpush.msra.mxu3 %v2432_v35  ;;  %v3126_v34 = vld [vmem:[#allocation15_spill] sm:$0xff]  ;;  %v3127_v35 = vld [vmem:[#allocation16_spill] sm:$0xff] }
 0x3c6   :  { %1416 = vmatpush.msra.mxu0 %v2435_v36  ;;  %1436 = vmatpush.msra.mxu1 %v2438_v37  ;;  %v3128_v36 = vld [vmem:[#allocation18_spill] sm:$0xff]  ;;  %v3129_v37 = vld [vmem:[#allocation17_spill] sm:$0xff] }
 0x3c7   :  { %1456 = vmatpush.msra.mxu2 %v2441_v38  ;;  %1476 = vmatpush.msra.mxu3 %v2444_v40  ;;  %v3130_v38 = vld [vmem:[#allocation19_spill] sm:$0xff]  ;;  %v3131_v40 = vld [vmem:[#allocation20_spill] sm:$0xff] }
 0x3c8   :  { %1417 = vmatpush.msra.mxu0 %v2447_v41  ;;  %1437 = vmatpush.msra.mxu1 %v2450_v42  ;;  %v3132_v41 = vld [vmem:[#allocation22_spill] sm:$0xff]  ;;  %v3133_v42 = vld [vmem:[#allocation21_spill] sm:$0xff] }
 0x3c9   :  { %1457 = vmatpush.msra.mxu2 %v2453_v43  ;;  %1477 = vmatpush.msra.mxu3 %v2456_v47  ;;  %v3134_v43 = vld [vmem:[#allocation23_spill] sm:$0xff]  ;;  %v3135_v47 = vld [vmem:[#allocation24_spill] sm:$0xff] }
 0x3ca   :  { %1418 = vmatpush.msra.mxu0 %v2459_v0  ;;  %1438 = vmatpush.msra.mxu1 %v2462_v46  ;;  %v3136_v0 = vld [vmem:[#allocation26_spill] sm:$0xff]  ;;  %v3137_v46 = vld [vmem:[#allocation25_spill] sm:$0xff] }
 0x3cb   :  { %1458 = vmatpush.msra.mxu2 %v2465_v60  ;;  %1478 = vmatpush.msra.mxu3 %v2468_v13  ;;  %v3138_v60 = vld [vmem:[#allocation27_spill] sm:$0xff]  ;;  %v3139_v13 = vld [vmem:[#allocation28_spill] sm:$0xff] }
 0x3cc   :  { %1419 = vmatpush.msra.mxu0 %v2471_v61  ;;  %1439 = vmatpush.msra.mxu1 %v2474_v39  ;;  %v3140_v61 = vld [vmem:[#allocation29_spill] sm:$0xff]  ;;  %v3141_v39 = vld [vmem:[#allocation30_spill] sm:$0xff] }
 0x3cd   :  { %1459 = vmatpush.msra.mxu2 %v2477_v50  ;;  %1479 = vmatpush.msra.mxu3 %v2480_v63  ;;  %v3142_v50 = vld [vmem:[#allocation31_spill] sm:$0xff]  ;;  %v3143_v63 = vld [vmem:[#allocation32_spill] sm:$0xff] }
 0x3ce   :  { %1420 = vmatpush.msra.mxu0 %v2483_v49  ;;  %1440 = vmatpush.msra.mxu1 %v2486_v44  ;;  %v3144_v49 = vld [vmem:[#allocation33_spill] sm:$0xff]  ;;  %v3145_v44 = vld [vmem:[#allocation34_spill] sm:$0xff] }
 0x3cf   :  { %1460 = vmatpush.msra.mxu2 %v2489_v45  ;;  %1480 = vmatpush.msra.mxu3 %v2492_v52 }
 0x3d0   :  { %1421 = vmatpush.msra.mxu0 %v2495_v51  ;;  %1441 = vmatpush.msra.mxu1 %v2498_v56  ;;  %v3146_v51 = vld [vmem:[#allocation51_spill] sm:$0xff] }
 0x3d1   :  { %1461 = vmatpush.msra.mxu2 %v2501_v53  ;;  %1481 = vmatpush.msra.mxu3 %v2504_v48  ;;  %v3147_v53 = vld [vmem:[#allocation52_spill] sm:$0xff] }
 0x3d2   :  { %1422 = vmatpush.msra.mxu0 %v2507_v54  ;;  %1442 = vmatpush.msra.mxu1 %v2510_v57 }
 0x3d3   :  { %1462 = vmatpush.msra.mxu2 %v2513_v58  ;;  %1482 = vmatpush.msra.mxu3 %v2516_v62  ;;  %v3148_v62 = vld [vmem:[#allocation54_spill] sm:$0xff] }
 0x3d4   :  { %1423 = vmatpush.msra.mxu0 %v2519_v59  ;;  %1443 = vmatpush.msra.mxu1 %v2522_v55 }
 0x3d5   :  { %1463 = vmatpush.msra.mxu2 %v3120_v26  ;;  %1483 = vmatpush.msra.mxu3 %v3121_v29 }
 0x3d6   :  { %1424 = vmatpush.msra.mxu0 %v3122_v30  ;;  %1444 = vmatpush.msra.mxu1 %v3123_v31 }
 0x3d7   :  { %1464 = vmatpush.msra.mxu2 %v3124_v32  ;;  %1484 = vmatpush.msra.mxu3 %v3125_v33 }
 0x3d8   :  { %1425 = vmatpush.msra.mxu0 %v3126_v34  ;;  %1445 = vmatpush.msra.mxu1 %v3127_v35 }
 0x3d9   :  { %1465 = vmatpush.msra.mxu2 %v3128_v36  ;;  %1485 = vmatpush.msra.mxu3 %v3129_v37 }
 0x3da   :  { %1426 = vmatpush.msra.mxu0 %v3130_v38  ;;  %1446 = vmatpush.msra.mxu1 %v3131_v40 }
 0x3db   :  { %1466 = vmatpush.msra.mxu2 %v3132_v41  ;;  %1486 = vmatpush.msra.mxu3 %v3133_v42 }
 0x3dc   :  { %1427 = vmatpush.msra.mxu0 %v3134_v43  ;;  %1447 = vmatpush.msra.mxu1 %v3135_v47 }
 0x3dd   :  { %1467 = vmatpush.msra.mxu2 %v3136_v0  ;;  %1487 = vmatpush.msra.mxu3 %v3137_v46 }
 0x3de   :  { %1428 = vmatpush.msra.mxu0 %v3138_v60  ;;  %1448 = vmatpush.msra.mxu1 %v3139_v13 }
 0x3df   :  { %1468 = vmatpush.msra.mxu2 %v3140_v61  ;;  %1488 = vmatpush.msra.mxu3 %v3141_v39  ;;  %v3150_v39 = vld [vmem:[#allocation55_spill] sm:$0xff] }
 0x3e0   :  { %1429 = vmatpush.msra.mxu0 %v3142_v50  ;;  %1449 = vmatpush.msra.mxu1 %v3143_v63  ;;  %v3151_v63 = vld [vmem:[#allocation56_spill] sm:$0xff] }
 0x3e1   :  { %1469 = vmatpush.msra.mxu2 %v3144_v49  ;;  %1489 = vmatpush.msra.mxu3 %v3145_v44 }
 0x43d   :  { %v1133_v45 = vpop.f32.mrf.mxu0  ;;  %v1153_v52 = vpop.f32.mrf.mxu1 }
 0x43e   :  { %v1196_v56 = vadd.f32 %v1133_v45, %v3146_v51  ;;  %v1197_v48 = vadd.f32 %v1153_v52, %v3147_v53  ;;  %v3152_v51 = vld [vmem:[#allocation58_spill] sm:$0xff] }
 0x440   :  { %v1588_v54 = vmul.f32 -1.442695, %v1196_v56  ;;  %v1589_v57 = vmul.f32 -1.442695, %v1197_v48 }
 0x442   :  { %1686 = vpow2.f32 %v1588_v54 }
 0x443   :  { %1688 = vpow2.f32 %v1589_v57 }
 0x444   :  { %v1193_v58 = vpop.f32.mrf.mxu3  ;;  %v1173_v2 = vpop.f32.mrf.mxu2 }
 0x445   :  { %v1199_v59 = vadd.f32 %v1193_v58, %v3148_v62  ;;  %v1198_v7 = vadd.f32 %v1173_v2, %v3149_v15 }
 0x447   :  { %v1590_v55 = vmul.f32 -1.442695, %v1199_v59 }
 0x448   :  { %v1687_v28 = vpop.eup %1686 }
 0x449   :  { %v1689_v9 = vpop.eup %1688  ;;  %v1203_v12 = vadd.f32 1.0, %v1687_v28  ;;  %1690 = vpow2.f32 %v1590_v55 }
 0x44a   :  { %v1222_v1 = vadd.f32 1.0, %v1689_v9  ;;  %v3153_v9 = vld [vmem:[#allocation57_spill] sm:$0xff] }
 0x44b   :  { %1692 = vrcp.f32 %v1203_v12  ;;  %v1215_v5 = vand.u32 2147483648, %v1203_v12  ;;  %v1213_v10 = vand.u32 2147483647, %v1203_v12  ;;  %vm1209_vm14 = vweird.f32 %v1203_v12 }
 0x44c   :  { %1694 = vrcp.f32 %v1222_v1  ;;  %v1234_v20 = vand.u32 2147483648, %v1222_v1  ;;  %v1232_v14 = vand.u32 2147483647, %v1222_v1  ;;  %vm1228_vm15 = vweird.f32 %v1222_v1 }
 0x44d   :  { %v1216_v3 = vor.u32 1.1754944e-38, %v1215_v5  ;;  %vm1214_vm2 = vcmp.eq.f32.partialorder %v1213_v10, 8.507059e+37 }
 0x44e   :  { %v1235_v29 = vor.u32 1.1754944e-38, %v1234_v20  ;;  %vm1233_vm3 = vcmp.eq.f32.partialorder %v1232_v14, 8.507059e+37 }
 0x44f   :  { %v1691_v6 = vpop.eup %1690 }
 0x450   :  { %v1242_v11 = vadd.f32 1.0, %v1691_v6 }
 0x451   :  { %v1693_v4 = vpop.eup %1692 }
 0x452   :  { %v1695_v24 = vpop.eup %1694  ;;  %v1205_v21 = vmul.f32 %v1693_v4, %v1203_v12  ;;  %1696 = vrcp.f32 %v1242_v11  ;;  %vm1210_vm12 = vweird.f32 %v1693_v4  ;;  %v1254_v42 = vand.u32 2147483648, %v1242_v11 }
 0x453   :  { %v1224_v16 = vmul.f32 %v1695_v24, %v1222_v1  ;;  %1698 = vtanh.f32 %v1198_v7  ;;  %vm1229_vm13 = vweird.f32 %v1695_v24  ;;  %vm1211_vm0 = vmor %vm1209_vm14, %vm1210_vm12  ;;  %vm1248_vm5 = vweird.f32 %v1242_v11 }
 0x454   :  { %v1206_v17 = vsub.f32 1.0, %v1205_v21  ;;  %vm1230_vm1 = vmor %vm1228_vm15, %vm1229_vm13  ;;  %v1252_v43 = vand.u32 2147483647, %v1242_v11  ;;  %v1255_v0 = vor.u32 1.1754944e-38, %v1254_v42 }
 0x455   :  { %v1225_v23 = vsub.f32 1.0, %v1224_v16 }
 0x456   :  { %v1207_v22 = vmul.f32 %v1693_v4, %v1206_v17  ;;  %vm1253_vm7 = vcmp.eq.f32.partialorder %v1252_v43, 8.507059e+37 }
 0x457   :  { %v1226_v19 = vmul.f32 %v1695_v24, %v1225_v23 }
 0x458   :  { %v1697_v18 = vpop.eup %1696  ;;  %v1208_v27 = vadd.f32 %v1693_v4, %v1207_v22 }
 0x459   :  { %v1227_v8 = vadd.f32 %v1695_v24, %v1226_v19  ;;  %v1244_v26 = vmul.f32 %v1697_v18, %v1242_v11  ;;  %v1699_v31 = vpop.eup %1698  ;;  %vm1249_vm4 = vweird.f32 %v1697_v18 }
 0x45a   :  { %v1212_v30 = vsel %vm1211_vm0, %v1693_v4, %v1208_v27  ;;  %vm1250_vm6 = vmor %vm1248_vm5, %vm1249_vm4 }
 0x45b   :  { %v1217_v32 = vsel %vm1214_vm2, %v1216_v3, %v1212_v30  ;;  %v1231_v33 = vsel %vm1230_vm1, %v1695_v24, %v1227_v8  ;;  %v1245_v34 = vsub.f32 1.0, %v1244_v26 }
 0x45c   :  { %v1236_v35 = vsel %vm1233_vm3, %v1235_v29, %v1231_v33  ;;  %v1259_v36 = vmul.f32 %v1699_v31, %v1217_v32 }
 0x45d   :  { %v1258_v37 = vmul.f32 %v1236_v35, %v2758_v25  ;;  %v1246_v38 = vmul.f32 %v1697_v18, %v1245_v34 }
 0x45f   :  { %v2833_v40 = vadd.f32 %v1259_v36, %v1258_v37  ;;  %v1247_v41 = vadd.f32 %v1697_v18, %v1246_v38 }
 0x461   :  { %1700 = vtanh.f32 %v2833_v40  ;;  %v1251_v47 = vsel %vm1250_vm6, %v1697_v18, %v1247_v41 }
 0x462   :  { %v1256_v60 = vsel %vm1253_vm7, %v1255_v0, %v1251_v47  ;;  %v3154_v47 = vld [vmem:[#allocation59_spill] sm:$0xff] }
 0x467   :  { %v1701_v46 = vpop.eup %1700 }
 0x468   :  { %v1262_v13 = vmul.f32 %v1701_v46, %v1256_v60  ;;  %v3155_v46 = vld [vmem:[#allocation60_spill] sm:$0xff] }
 0x46a   :  { %1591 = vst [vmem:[%s2862_s4 + $0x28] sm:$0xff] %v1262_v13  ;;  %1281 = vmatmul.f32.vlgmr.msrb.gmra.mxu0 %v1262_v13  ;;  %1301 = vmatmul.f32.vlgmr.msrb.gmra.mxu1 %v1262_v13 }
 0x46b   :  { %1321 = vmatmul.f32.vlgmr.msrb.gmra.mxu2 %v1262_v13  ;;  %1341 = vmatmul.f32.vlgmr.msrb.gmra.mxu3 %v1262_v13 }
 0x4e7   :  { %v1282_v25 = vpop.f32.mrf.mxu0  ;;  %v1302_v61 = vpop.f32.mrf.mxu1 }
 0x4e8   :  { %v1345_v50 = vadd.f32 %v1282_v25, %v3150_v39  ;;  %v1346_v49 = vadd.f32 %v1302_v61, %v3151_v63  ;;  %v3156_v39 = vld [vmem:[#allocation62_spill] sm:$0xff] }
 0x4ea   :  { %v1592_v44 = vmul.f32 -1.442695, %v1345_v50  ;;  %v1593_v45 = vmul.f32 -1.442695, %v1346_v49 }
 0x4ec   :  { %1702 = vpow2.f32 %v1592_v44 }
 0x4ed   :  { %1704 = vpow2.f32 %v1593_v45 }
 0x4ee   :  { %v1342_v52 = vpop.f32.mrf.mxu3  ;;  %v1322_v62 = vpop.f32.mrf.mxu2 }
 0x4ef   :  { %v1348_v56 = vadd.f32 %v1342_v52, %v3152_v51  ;;  %v1347_v12 = vadd.f32 %v1322_v62, %v3153_v9 }
 0x4f1   :  { %v1594_v53 = vmul.f32 -1.442695, %v1348_v56 }
 0x4f2   :  { %v1703_v48 = vpop.eup %1702 }
 0x4f3   :  { %v1705_v54 = vpop.eup %1704  ;;  %v1352_v57 = vadd.f32 1.0, %v1703_v48  ;;  %1706 = vpow2.f32 %v1594_v53 }
 0x4f4   :  { %v1371_v58 = vadd.f32 1.0, %v1705_v54  ;;  %v3157_v54 = vld [vmem:[#allocation61_spill] sm:$0xff] }
 0x4f5   :  { %1708 = vrcp.f32 %v1352_v57  ;;  %v1364_v15 = vand.u32 2147483648, %v1352_v57  ;;  %v1362_v21 = vand.u32 2147483647, %v1352_v57  ;;  %vm1358_vm10 = vweird.f32 %v1352_v57 }
 0x4f6   :  { %1710 = vrcp.f32 %v1371_v58  ;;  %v1383_v7 = vand.u32 2147483648, %v1371_v58  ;;  %v1381_v17 = vand.u32 2147483647, %v1371_v58  ;;  %vm1377_vm11 = vweird.f32 %v1371_v58 }
 0x4f7   :  { %v1365_v20 = vor.u32 1.1754944e-38, %v1364_v15  ;;  %vm1363_vm14 = vcmp.eq.f32.partialorder %v1362_v21, 8.507059e+37 }
 0x4f8   :  { %v1384_v19 = vor.u32 1.1754944e-38, %v1383_v7  ;;  %vm1382_vm15 = vcmp.eq.f32.partialorder %v1381_v17, 8.507059e+37 }
 0x4f9   :  { %v1707_v59 = vpop.eup %1706 }
 0x4fa   :  { %v1391_v55 = vadd.f32 1.0, %v1707_v59 }
 0x4fb   :  { %v1709_v28 = vpop.eup %1708 }
 0x4fc   :  { %v1711_v1 = vpop.eup %1710  ;;  %v1354_v2 = vmul.f32 %v1709_v28, %v1352_v57  ;;  %1712 = vrcp.f32 %v1391_v55  ;;  %vm1359_vm8 = vweird.f32 %v1709_v28  ;;  %v1403_v34 = vand.u32 2147483648, %v1391_v55 }
 0x4fd   :  { %v1373_v6 = vmul.f32 %v1711_v1, %v1371_v58  ;;  %1714 = vtanh.f32 %v1347_v12  ;;  %vm1378_vm9 = vweird.f32 %v1711_v1  ;;  %vm1360_vm12 = vmor %vm1358_vm10, %vm1359_vm8  ;;  %vm1397_vm1 = vweird.f32 %v1391_v55 }
 0x4fe   :  { %v1355_v11 = vsub.f32 1.0, %v1354_v2  ;;  %vm1379_vm13 = vmor %vm1377_vm11, %vm1378_vm9  ;;  %v1401_v35 = vand.u32 2147483647, %v1391_v55  ;;  %v1404_v37 = vor.u32 1.1754944e-38, %v1403_v34 }
 0x4ff   :  { %v1374_v4 = vsub.f32 1.0, %v1373_v6 }
 0x500   :  { %v1356_v24 = vmul.f32 %v1709_v28, %v1355_v11  ;;  %vm1402_vm3 = vcmp.eq.f32.partialorder %v1401_v35, 8.507059e+37 }
 0x501   :  { %v1375_v16 = vmul.f32 %v1711_v1, %v1374_v4 }
 0x502   :  { %v1713_v23 = vpop.eup %1712  ;;  %v1357_v5 = vadd.f32 %v1709_v28, %v1356_v24 }
 0x503   :  { %v1376_v22 = vadd.f32 %v1711_v1, %v1375_v16  ;;  %v1393_v10 = vmul.f32 %v1713_v23, %v1391_v55  ;;  %v1715_v18 = vpop.eup %1714  ;;  %vm1398_vm0 = vweird.f32 %v1713_v23 }
 0x504   :  { %v1361_v14 = vsel %vm1360_vm12, %v1709_v28, %v1357_v5  ;;  %vm1399_vm2 = vmor %vm1397_vm1, %vm1398_vm0 }
 0x505   :  { %v1366_v27 = vsel %vm1363_vm14, %v1365_v20, %v1361_v14  ;;  %v1380_v3 = vsel %vm1379_vm13, %v1711_v1, %v1376_v22  ;;  %v1394_v8 = vsub.f32 1.0, %v1393_v10 }
 0x506   :  { %v1385_v26 = vsel %vm1382_vm15, %v1384_v19, %v1380_v3  ;;  %v1408_v29 = vmul.f32 %v1715_v18, %v1366_v27 }
 0x507   :  { %v1407_v30 = vmul.f32 %v1385_v26, %v2833_v40  ;;  %v1395_v31 = vmul.f32 %v1713_v23, %v1394_v8 }
 0x509   :  { %v2844_v32 = vadd.f32 %v1408_v29, %v1407_v30  ;;  %v1396_v33 = vadd.f32 %v1713_v23, %v1395_v31 }
 0x50b   :  { %1716 = vtanh.f32 %v2844_v32  ;;  %v1400_v36 = vsel %vm1399_vm2, %v1713_v23, %v1396_v33 }
 0x50c   :  { %v1405_v41 = vsel %vm1402_vm3, %v1404_v37, %v1400_v36 }
 0x511   :  { %v1717_v38 = vpop.eup %1716 }
 0x512   :  { %v1411_v42 = vmul.f32 %v1717_v38, %v1405_v41 }
 0x514   :  { %1595 = vst [vmem:[%s2862_s4 + $0x30] sm:$0xff] %v1411_v42  ;;  %1430 = vmatmul.f32.vlgmr.msra.gmra.mxu0 %v1411_v42  ;;  %1450 = vmatmul.f32.vlgmr.msra.gmra.mxu1 %v1411_v42 }
 0x515   :  { %1470 = vmatmul.f32.vlgmr.msra.gmra.mxu2 %v1411_v42  ;;  %1490 = vmatmul.f32.vlgmr.msra.gmra.mxu3 %v1411_v42 }
 0x591   :  { %v1431_v40 = vpop.f32.mrf.mxu0  ;;  %v1451_v43 = vpop.f32.mrf.mxu1 }
 0x592   :  { %v1494_v0 = vadd.f32 %v1431_v40, %v3154_v47  ;;  %v1495_v60 = vadd.f32 %v1451_v43, %v3155_v46 }
 0x594   :  { %v1596_v13 = vmul.f32 -1.442695, %v1494_v0  ;;  %v1597_v25 = vmul.f32 -1.442695, %v1495_v60 }
 0x596   :  { %1718 = vpow2.f32 %v1596_v13 }
 0x597   :  { %1720 = vpow2.f32 %v1597_v25 }
 0x598   :  { %v1491_v61 = vpop.f32.mrf.mxu3  ;;  %v1471_v51 = vpop.f32.mrf.mxu2 }
 0x599   :  { %v1497_v50 = vadd.f32 %v1491_v61, %v3156_v39  ;;  %v1496_v57 = vadd.f32 %v1471_v51, %v3157_v54 }
 0x59b   :  { %v1598_v63 = vmul.f32 -1.442695, %v1497_v50 }
 0x59c   :  { %v1719_v49 = vpop.eup %1718 }
 0x59d   :  { %v1721_v44 = vpop.eup %1720  ;;  %v1501_v45 = vadd.f32 1.0, %v1719_v49  ;;  %1722 = vpow2.f32 %v1598_v63 }
 0x59e   :  { %v1520_v52 = vadd.f32 1.0, %v1721_v44 }
 0x59f   :  { %1724 = vrcp.f32 %v1501_v45  ;;  %v1513_v9 = vand.u32 2147483648, %v1501_v45  ;;  %v1511_v2 = vand.u32 2147483647, %v1501_v45  ;;  %vm1507_vm6 = vweird.f32 %v1501_v45 }
 0x5a0   :  { %1726 = vrcp.f32 %v1520_v52  ;;  %v1532_v12 = vand.u32 2147483648, %v1520_v52  ;;  %v1530_v11 = vand.u32 2147483647, %v1520_v52  ;;  %vm1526_vm7 = vweird.f32 %v1520_v52 }
 0x5a1   :  { %v1514_v7 = vor.u32 1.1754944e-38, %v1513_v9  ;;  %vm1512_vm10 = vcmp.eq.f32.partialorder %v1511_v2, 8.507059e+37 }
 0x5a2   :  { %v1533_v16 = vor.u32 1.1754944e-38, %v1532_v12  ;;  %vm1531_vm11 = vcmp.eq.f32.partialorder %v1530_v11, 8.507059e+37 }
 0x5a3   :  { %v1723_v56 = vpop.eup %1722 }
 0x5a4   :  { %v1540_v53 = vadd.f32 1.0, %v1723_v56 }
 0x5a5   :  { %v1725_v48 = vpop.eup %1724 }
 0x5a6   :  { %v1727_v58 = vpop.eup %1726  ;;  %v1503_v62 = vmul.f32 %v1725_v48, %v1501_v45  ;;  %1728 = vrcp.f32 %v1540_v53  ;;  %vm1508_vm4 = vweird.f32 %v1725_v48  ;;  %v1552_v8 = vand.u32 2147483648, %v1540_v53 }
 0x5a7   :  { %v1522_v59 = vmul.f32 %v1727_v58, %v1520_v52  ;;  %1730 = vtanh.f32 %v1496_v57  ;;  %vm1527_vm5 = vweird.f32 %v1727_v58  ;;  %vm1509_vm8 = vmor %vm1507_vm6, %vm1508_vm4  ;;  %vm1546_vm13 = vweird.f32 %v1540_v53 }
 0x5a8   :  { %v1504_v55 = vsub.f32 1.0, %v1503_v62  ;;  %vm1528_vm9 = vmor %vm1526_vm7, %vm1527_vm5  ;;  %v1550_v26 = vand.u32 2147483647, %v1540_v53  ;;  %v1553_v30 = vor.u32 1.1754944e-38, %v1552_v8 }
 0x5a9   :  { %v1523_v28 = vsub.f32 1.0, %v1522_v59 }
 0x5aa   :  { %v1505_v1 = vmul.f32 %v1725_v48, %v1504_v55  ;;  %vm1551_vm15 = vcmp.eq.f32.partialorder %v1550_v26, 8.507059e+37 }
 0x5ab   :  { %v1524_v6 = vmul.f32 %v1727_v58, %v1523_v28 }
 0x5ac   :  { %v1729_v4 = vpop.eup %1728  ;;  %v1506_v15 = vadd.f32 %v1725_v48, %v1505_v1 }
 0x5ad   :  { %v1525_v24 = vadd.f32 %v1727_v58, %v1524_v6  ;;  %v1542_v21 = vmul.f32 %v1729_v4, %v1540_v53  ;;  %v1731_v23 = vpop.eup %1730  ;;  %vm1547_vm12 = vweird.f32 %v1729_v4 }
 0x5ae   :  { %v1510_v17 = vsel %vm1509_vm8, %v1725_v48, %v1506_v15  ;;  %vm1548_vm14 = vmor %vm1546_vm13, %vm1547_vm12 }
 0x5af   :  { %v1515_v5 = vsel %vm1512_vm10, %v1514_v7, %v1510_v17  ;;  %v1529_v20 = vsel %vm1528_vm9, %v1727_v58, %v1525_v24  ;;  %v1543_v22 = vsub.f32 1.0, %v1542_v21 }
 0x5b0   :  { %v1534_v10 = vsel %vm1531_vm11, %v1533_v16, %v1529_v20  ;;  %v1557_v19 = vmul.f32 %v1731_v23, %v1515_v5 }
 0x5b1   :  { %v1556_v14 = vmul.f32 %v1534_v10, %v2844_v32  ;;  %v1544_v18 = vmul.f32 %v1729_v4, %v1543_v22 }
 0x5b3   :  { %v1558_v27 = vadd.f32 %v1557_v19, %v1556_v14  ;;  %v1545_v3 = vadd.f32 %v1729_v4, %v1544_v18 }
 0x5b5   :  { %1732 = vtanh.f32 %v1558_v27  ;;  %v1549_v29 = vsel %vm1548_vm14, %v1729_v4, %v1545_v3 }
 0x5b6   :  { %v1554_v33 = vsel %vm1551_vm15, %v1553_v30, %v1549_v29 }
 0x5bb   :  { %v1733_v31 = vpop.eup %1732 }
 0x5bc   :  { %v1560_v34 = vmul.f32 %v1733_v31, %v1554_v33 }
 0x5be   :  { %1599 = vst [vmem:[%s2862_s4 + $0x38] sm:$0xff] %v1560_v34 }
 0x5bf   :  { %1567 = vsyncpa [#allocation3], 1 }
 0x5c0   :  { %1568 = vsyncpa [#allocation5], 1 }

// kernel: pretraining_forward.4
= control target key start
LH: loop header
LB: loop body
LE: loop exit
PB: predicated region body
PF: predicated region fallthrough
CT: control target
= control target key end

     0   :  { %s11766_s0 = inlined_call_operand.vmem [shape: f32[32,128], index: 0, kind: input, shape index: {}]   ;;  %s11767_s1 = inlined_call_operand.hbm [shape: bf16[128,30720], index: 1, kind: input, shape index: {}]   ;;  %s11768_s2 = inlined_call_operand.hbm [shape: f32[1,30720], index: 2, kind: input, shape index: {}]   ;;  %s11769_s3 = inlined_call_operand.vmem [shape: s32[32,1], index: 3, kind: input, shape index: {}]   ;;  %s11770_s4 = inlined_call_operand.vmem [shape: f32[32,30720], index: 4, kind: output, shape index: {0}]   ;;  %s11771_s5 = inlined_call_operand.hbm [shape: f32[1,1], index: 5, kind: output, shape index: {1}]  }
   0x1   :  { %11970 = sst [smem:[#allocation99_spill]] %s11767_s1 }
   0x2   :  { %11 = vsyncpa [#allocation6], 0 }
   0x3   :  { %13 = vsyncpa [#allocation6 + $0x1], 0 }
   0x4   :  { %14 = vsyncpa [#allocation9], 0 }
   0x5   :  { %16 = vsyncpa [#allocation9 + $0x1], 0 }
   0x6   :  { %17 = vsyncpa [#allocation7], 0  ;;  %s7660_s18 = smov 0   ;;  %s7662_s19 = smov 0  }
   0x7   :  { %s7664_s20 = smov 0   ;;  %s7666_s21 = smov 0  }
   0x8 LB: > { %s7679_s22 = sadd.s32 4294967295, %s7619_s21   ;;  %s7682_s23 = sadd.s32 1, %s7619_s21   ;;  %s7619_s21 = sphi %s7666_s21, %s12373_s21   ;;  %s7615_s20 = sphi %s7664_s20, %s12372_s20   ;;  %s7611_s19 = sphi %s7662_s19, %s12371_s19   ;;  %s7607_s18 = sphi %s7660_s18, %s12370_s18  }
   0x9   : > { %s48_s24 = ssub.s32 %s7619_s21, %s7682_s23  ;;  %s51_s25 = sadd.s32 1, %s7615_s20 }
   0xa   : > { %p49_p0 = scmp.eq.s32.totalorder %s48_s24, 0  ;;  %p58_p1 = scmp.ne.s32.totalorder %s7615_s20, %s7611_s19 }
   0xb   : > { %p59_p2 = scmp.eq.s32.totalorder %s7619_s21, 0  ;;  %p64_p3 = scmp.ne.s32.totalorder %s7611_s19, %s7607_s18 }
   0xc   : > { %s7692_s26 = scalar_select %p49_p0, %s7615_s20, %s51_s25  }
   0xd   : > { %p60_p4 = por %p59_p2, %p58_p1  ;;  %p65_p5 = scmp.eq.s32.totalorder %s7679_s22, 0 }
   0xe   : > { %p135_p6 = scmp.eq.s32.totalorder %s7679_s22, 5  ;;  %p6904_p8 = scmp.lt.s32.totalorder %s7619_s21, 6 }
   0xf   : > { %p7696_p7 = por %p65_p5, %p64_p3  ;;  %s7708_s29 = sand.u32 1, %s7615_s20  }
  0x10   : > { %p7703_p9 = por %p135_p6, %p58_p1  ;;  %s6878_s30 = smul.u32 2560, %s7708_s29 }
  0x11   : > { %s6556_s6 = smul.u32 160, %s7619_s21  ;;  %p7712_p10 = pnand %p6904_p8, %p60_p4 }
  0x12   : > { %s11974_s1 = sld [smem:[#allocation99_spill]]  ;;  %s192_s11 = scalar_lea.vmem [#allocation5], %s6878_s30 }
  0x13   : > { %s200_s12 = sshll.u32 %s192_s11, 4  ;;  %s189_s14 = scalar_lea.sflag [#allocation6], %s7708_s29  ;;  %s201_s12 = int_to_ptr.vmem [resolvable:$true] %s200_s12 }
  0x14   : > { %p7493_p12 = pneg %p7712_p10 }
  0x18   : > { %s197_s10 = scalar_lea.hbm %s11974_s1, %s6556_s6  ;;  %s7496_s24 = scalar_lea.hbm %s11974_s1, 15360 }
  0x19   : > { %s198_s13 = sshll.u32 %s197_s10, 4  ;;  %s199_s13 = int_to_ptr.hbm [resolvable:$true] %s198_s13 }
  0x1a   : > { %s7489_s15 = sshra.s32 %s199_s13, 4  ;;  %s7490_s15 = int_to_ptr.hbm [resolvable:$true] %s7489_s15 }
  0x1b   : > { %s7491_s16 = scalar_lea.hbm %s7490_s15, 2560  ;;  %p7497_p1 = scmp.lt.s32.totalorder %s7490_s15, %s11974_s1 }
  0x1c   : > { %p7492_p11 = scmp.ne.s32.totalorder %s7490_s15, %s7491_s16  ;;  %p7498_p2 = scmp.lt.s32.totalorder %s7496_s24, %s7491_s16 }
  0x1e   : > { %p7494_p13 = pnand %p7493_p12, %p7492_p11  ;;  %p7499_p3 = por %p7498_p2, %p7497_p1 }
  0x20   : > { %p7495_p0 = pneg %p7494_p13 }
  0x22   : > { %p7500_p4 = pnand %p7499_p3, %p7495_p0 }
  0x24   : > { %7503 = shalt.err (!%p7500_p4)
}
  0x25   : > { %s7621_s6 = smov 15360   ;;  %s7622_s8 = smov 2560  }
  0x26   : > { %s7623_s9 = smov 160   ;;  %p5264_p5 = scmp.ge.s32.totalorder %s7619_s21, 1 }
  0x27   : > { %6900 = dma.hbm_to_vmem [thread:$0]  (!%p7712_p10), %s199_s13, 40960, %s201_s12, %s189_s14, %s7621_s6, %s7622_s8, %s7623_s9  }
  0x28   : > { %p227_p8 = scmp.lt.s32.totalorder %s7619_s21, 7  ;;  %s6879_s10 = smul.u32 40, %s7708_s29 }
  0x29   : > { %s215_s15 = smul.u32 40, %s7619_s21  ;;  %s211_s1 = scalar_lea.sflag [#allocation9], %s7708_s29 }
  0x2a   : > { %p7736_p11 = pnand %p5264_p5, %p227_p8  ;;  %s214_s24 = scalar_lea.vmem [#allocation8], %s6879_s10 }
  0x2b   : > { %s218_s18 = scalar_lea.hbm %s11768_s2, %s215_s15  ;;  %s222_s25 = sshll.u32 %s214_s24, 4  ;;  %s223_s25 = int_to_ptr.vmem [resolvable:$true] %s222_s25 }
  0x2c   : > { %s220_s30 = sshll.u32 %s218_s18, 4  ;;  %s7526_s6 = scalar_lea.hbm %s11768_s2, 240  ;;  %s221_s30 = int_to_ptr.hbm [resolvable:$true] %s220_s30 }
  0x2d   : > { %s7519_s12 = sshra.s32 %s221_s30, 4  ;;  %s7520_s12 = int_to_ptr.hbm [resolvable:$true] %s7519_s12 }
  0x2e   : > { %s7521_s13 = scalar_lea.hbm %s7520_s12, 40  ;;  %p7527_p2 = scmp.lt.s32.totalorder %s7520_s12, %s11768_s2 }
  0x2f   : > { %p7522_p13 = scmp.ne.s32.totalorder %s7520_s12, %s7521_s13  ;;  %p7528_p3 = scmp.lt.s32.totalorder %s7526_s6, %s7521_s13 }
  0x31   : > { %p7524_p0 = pnand %p7522_p13, %p7493_p12  ;;  %p7529_p4 = por %p7528_p3, %p7527_p2 }
  0x33   : > { %p7525_p1 = pneg %p7524_p0 }
  0x35   : > { %p7530_p5 = pnand %p7529_p4, %p7525_p1 }
  0x37   : > { %7533 = shalt.err (!%p7530_p5)
}
  0x38   : > { %6903 = dma.hbm_to_vmem [thread:$0]  (!%p7712_p10), %s221_s30, 640, %s223_s25, %s211_s1  }
  0x39   : > { %231 = sbr.rel (%p7736_p11) target bundleno = 1651 (0x673), region = 36 }
  0x3e   : > { %s233_s29 = sand.u32 1, %s7611_s19  }
  0x3f   : > { %s6880_s10 = smul.u32 2560, %s233_s29  ;;  %s234_s15 = scalar_lea.sflag [#allocation6], %s233_s29 }
  0x41   : > { %s7759_s16 = scalar_lea.vmem [#allocation5], %s6880_s10 }
  0x42   : > { %7594 = dma.done.wait (%p7696_p7), %s234_s15, 40960  }
  0x43   : > { %7596 = vsyncadd (%p7696_p7), %s234_s15, 4294926336  ;;  %s6881_s17 = smul.u32 40, %s233_s29  ;;  %s244_s18 = scalar_lea.sflag [#allocation9], %s233_s29 }
  0x45   : > { %s7765_s7 = scalar_lea.vmem [#allocation8], %s6881_s17 }
  0x46   : > { %7598 = dma.done.wait (%p7696_p7), %s244_s18, 640  }
  0x47   : > { %7600 = vsyncadd (%p7696_p7), %s244_s18, 4294966656  ;;  %s6882_s1 = smul.u32 1280, %s233_s29  ;;  %p5265_p10 = scmp.ne.s32.totalorder %s7679_s22, 0 }
  0x49   : > { %s7771_s11 = scalar_lea.vmem [#allocation10], %s6882_s1  ;;  %285 = sbr.rel (%p5265_p10) target bundleno = 91 (0x5b), region = 48 }
  0x4e   : > { %vm286_vm0 = vcmask 7168   ;;  %v7624_v0 = vmov -inf   ;;  %v7625_v1 = vmov 0.0  }
  0x4f   : > { %287 = vst.msk [vmem:[#allocation2] sm:$0xff] %vm286_vm0, %v7624_v0 }
  0x50   : > { %288 = vst.msk [vmem:[#allocation2 + $0x8] sm:$0xff] %vm286_vm0, %v7624_v0 }
  0x51   : > { %289 = vst.msk [vmem:[#allocation2 + $0x10] sm:$0xff] %vm286_vm0, %v7624_v0 }
  0x52   : > { %290 = vst.msk [vmem:[#allocation2 + $0x18] sm:$0xff] %vm286_vm0, %v7624_v0 }
  0x53   : > { %291 = vst.msk [vmem:[#allocation3] sm:$0xff] %vm286_vm0, %v7625_v1 }
  0x54   : > { %292 = vst.msk [vmem:[#allocation3 + $0x8] sm:$0xff] %vm286_vm0, %v7625_v1 }
  0x55   : > { %293 = vst.msk [vmem:[#allocation3 + $0x10] sm:$0xff] %vm286_vm0, %v7625_v1 }
  0x56   : > { %294 = vst.msk [vmem:[#allocation3 + $0x18] sm:$0xff] %vm286_vm0, %v7625_v1 }
  0x57   : > { %295 = vst.msk [vmem:[#allocation4] sm:$0xff] %vm286_vm0, %v7625_v1 }
  0x58   : > { %296 = vst.msk [vmem:[#allocation4 + $0x8] sm:$0xff] %vm286_vm0, %v7625_v1 }
  0x59   : > { %297 = vst.msk [vmem:[#allocation4 + $0x10] sm:$0xff] %vm286_vm0, %v7625_v1 }
  0x5a   : > { %298 = vst.msk [vmem:[#allocation4 + $0x18] sm:$0xff] %vm286_vm0, %v7625_v1 }
  0x5b PF: > { %v6388_v2 = vld [vmem:[%s7759_s16 + $0x8c0] sm:$0xf]  ;;  %v6837_v4 = vld [vmem:[%s7759_s16 + $0x8c4] sm:$0xf]  ;;  %v6396_v7 = vld [vmem:[%s7759_s16 + $0x8c8] sm:$0xf] }
  0x5c   : > { %v6857_v3 = vld [vmem:[%s7759_s16 + $0x95c] sm:$0xf0]  ;;  %v6390_v6 = vld [vmem:[%s7759_s16 + $0x960] sm:$0xf0]  ;;  %v6858_v8 = vld [vmem:[%s7759_s16 + $0x964] sm:$0xf0] }
  0x5d   : > { %v6389_v5 = vor.u32 %v6857_v3, %v6388_v2  ;;  %v6393_v9 = vor.u32 %v6837_v4, %v6390_v6  ;;  %v6397_v10 = vor.u32 %v6858_v8, %v6396_v7  ;;  %v6838_v11 = vld [vmem:[%s7759_s16 + $0x8cc] sm:$0xf]  ;;  %v6228_v13 = vld [vmem:[%s7759_s16 + $0x780] sm:$0xf]  ;;  %v6797_v16 = vld [vmem:[%s7759_s16 + $0x784] sm:$0xf] }
  0x5e   : > { %v6398_v12 = vld [vmem:[%s7759_s16 + $0x968] sm:$0xf0]  ;;  %v6817_v15 = vld [vmem:[%s7759_s16 + $0x81c] sm:$0xf0]  ;;  %v6230_v17 = vld [vmem:[%s7759_s16 + $0x820] sm:$0xf0] }
  0x5f   : > { %2315 = vmatpush.bf16.msra.mxu0 %v6389_v5  ;;  %v6401_v14 = vor.u32 %v6838_v11, %v6398_v12  ;;  %2334 = vmatpush.bf16.msra.mxu1 %v6393_v9  ;;  %v6229_v18 = vor.u32 %v6817_v15, %v6228_v13  ;;  %v6233_v19 = vor.u32 %v6797_v16, %v6230_v17  ;;  %v6236_v20 = vld [vmem:[%s7759_s16 + $0x788] sm:$0xf]  ;;  %v6798_v22 = vld [vmem:[%s7759_s16 + $0x78c] sm:$0xf]  ;;  %v6068_v25 = vld [vmem:[%s7759_s16 + $0x640] sm:$0xf] }
  0x60   : > { %2353 = vmatpush.bf16.msra.mxu2 %v6397_v10  ;;  %v6818_v21 = vld [vmem:[%s7759_s16 + $0x824] sm:$0xf0]  ;;  %v6238_v24 = vld [vmem:[%s7759_s16 + $0x828] sm:$0xf0]  ;;  %v6777_v26 = vld [vmem:[%s7759_s16 + $0x6dc] sm:$0xf0] }
  0x61   : > { %2372 = vmatpush.bf16.msra.mxu3 %v6401_v14  ;;  %v6237_v23 = vor.u32 %v6818_v21, %v6236_v20  ;;  %v6241_v27 = vor.u32 %v6798_v22, %v6238_v24  ;;  %v6757_v28 = vld [vmem:[%s7759_s16 + $0x644] sm:$0xf]  ;;  %v6076_v30 = vld [vmem:[%s7759_s16 + $0x648] sm:$0xf]  ;;  %v6069_v31 = vor.u32 %v6777_v26, %v6068_v25  ;;  %v6758_v33 = vld [vmem:[%s7759_s16 + $0x64c] sm:$0xf] }
  0x62   : > { %v6070_v29 = vld [vmem:[%s7759_s16 + $0x6e0] sm:$0xf0]  ;;  %v6778_v32 = vld [vmem:[%s7759_s16 + $0x6e4] sm:$0xf0]  ;;  %v6078_v34 = vld [vmem:[%s7759_s16 + $0x6e8] sm:$0xf0] }
  0x63   : > { %2316 = vmatpush.bf16.msra.mxu0 %v6229_v18  ;;  %2335 = vmatpush.bf16.msra.mxu1 %v6233_v19  ;;  %v6073_v35 = vor.u32 %v6757_v28, %v6070_v29  ;;  %v6077_v36 = vor.u32 %v6778_v32, %v6076_v30  ;;  %v5908_v37 = vld [vmem:[%s7759_s16 + $0x500] sm:$0xf]  ;;  %v6717_v39 = vld [vmem:[%s7759_s16 + $0x504] sm:$0xf]  ;;  %v6081_v40 = vor.u32 %v6758_v33, %v6078_v34  ;;  %v5916_v42 = vld [vmem:[%s7759_s16 + $0x508] sm:$0xf] }
  0x64   : > { %2354 = vmatpush.bf16.msra.mxu2 %v6237_v23  ;;  %v6737_v38 = vld [vmem:[%s7759_s16 + $0x59c] sm:$0xf0]  ;;  %v5910_v41 = vld [vmem:[%s7759_s16 + $0x5a0] sm:$0xf0]  ;;  %v6738_v43 = vld [vmem:[%s7759_s16 + $0x5a4] sm:$0xf0] }
  0x65   : > { %2373 = vmatpush.bf16.msra.mxu3 %v6241_v27  ;;  %v6718_v44 = vld [vmem:[%s7759_s16 + $0x50c] sm:$0xf]  ;;  %v5909_v46 = vor.u32 %v6737_v38, %v5908_v37  ;;  %v5913_v47 = vor.u32 %v6717_v39, %v5910_v41  ;;  %v5917_v48 = vor.u32 %v6738_v43, %v5916_v42  ;;  %v5748_v49 = vld [vmem:[%s7759_s16 + $0x3c0] sm:$0xf]  ;;  %v6677_v51 = vld [vmem:[%s7759_s16 + $0x3c4] sm:$0xf] }
  0x66   : > { %v5918_v45 = vld [vmem:[%s7759_s16 + $0x5a8] sm:$0xf0]  ;;  %v6697_v50 = vld [vmem:[%s7759_s16 + $0x45c] sm:$0xf0]  ;;  %v5750_v53 = vld [vmem:[%s7759_s16 + $0x460] sm:$0xf0] }
  0x67   : > { %2317 = vmatpush.bf16.msra.mxu0 %v6069_v31  ;;  %2336 = vmatpush.bf16.msra.mxu1 %v6073_v35  ;;  %v5921_v52 = vor.u32 %v6718_v44, %v5918_v45  ;;  %v5756_v54 = vld [vmem:[%s7759_s16 + $0x3c8] sm:$0xf]  ;;  %v6678_v56 = vld [vmem:[%s7759_s16 + $0x3cc] sm:$0xf]  ;;  %v5749_v58 = vor.u32 %v6697_v50, %v5748_v49  ;;  %v5753_v59 = vor.u32 %v6677_v51, %v5750_v53  ;;  %v5588_v61 = vld [vmem:[%s7759_s16 + $0x280] sm:$0xf] }
  0x68   : > { %2355 = vmatpush.bf16.msra.mxu2 %v6077_v36  ;;  %v6698_v55 = vld [vmem:[%s7759_s16 + $0x464] sm:$0xf0]  ;;  %v5758_v57 = vld [vmem:[%s7759_s16 + $0x468] sm:$0xf0]  ;;  %v6657_v62 = vld [vmem:[%s7759_s16 + $0x31c] sm:$0xf0] }
  0x69   : > { %2374 = vmatpush.bf16.msra.mxu3 %v6081_v40  ;;  %v5757_v60 = vor.u32 %v6698_v55, %v5756_v54  ;;  %v6637_v63 = vld [vmem:[%s7759_s16 + $0x284] sm:$0xf]  ;;  %v5761_v0 = vor.u32 %v6678_v56, %v5758_v57  ;;  %v5596_v2 = vld [vmem:[%s7759_s16 + $0x288] sm:$0xf]  ;;  %v6638_v4 = vld [vmem:[%s7759_s16 + $0x28c] sm:$0xf]  ;;  %v5589_v6 = vor.u32 %v6657_v62, %v5588_v61 }
  0x6a   : > { %v5590_v1 = vld [vmem:[%s7759_s16 + $0x320] sm:$0xf0]  ;;  %v6658_v3 = vld [vmem:[%s7759_s16 + $0x324] sm:$0xf0]  ;;  %v5598_v5 = vld [vmem:[%s7759_s16 + $0x328] sm:$0xf0] }
  0x6b   : > { %2318 = vmatpush.bf16.msra.mxu0 %v5909_v46  ;;  %2337 = vmatpush.bf16.msra.mxu1 %v5913_v47  ;;  %v5593_v7 = vor.u32 %v6637_v63, %v5590_v1  ;;  %v5597_v8 = vor.u32 %v6658_v3, %v5596_v2  ;;  %v5428_v9 = vld [vmem:[%s7759_s16 + $0x140] sm:$0xf]  ;;  %v6597_v11 = vld [vmem:[%s7759_s16 + $0x144] sm:$0xf]  ;;  %v5601_v12 = vor.u32 %v6638_v4, %v5598_v5  ;;  %v5436_v14 = vld [vmem:[%s7759_s16 + $0x148] sm:$0xf] }
  0x6c   : > { %2356 = vmatpush.bf16.msra.mxu2 %v5917_v48  ;;  %v6617_v10 = vld [vmem:[%s7759_s16 + $0x1dc] sm:$0xf0]  ;;  %v5430_v13 = vld [vmem:[%s7759_s16 + $0x1e0] sm:$0xf0]  ;;  %v6618_v15 = vld [vmem:[%s7759_s16 + $0x1e4] sm:$0xf0] }
  0x6d   : > { %2375 = vmatpush.bf16.msra.mxu3 %v5921_v52  ;;  %v6598_v16 = vld [vmem:[%s7759_s16 + $0x14c] sm:$0xf]  ;;  %v5429_v18 = vor.u32 %v6617_v10, %v5428_v9  ;;  %v5268_v19 = vld [vmem:[%s7759_s16] sm:$0xf]  ;;  %v5433_v21 = vor.u32 %v6597_v11, %v5430_v13  ;;  %v5437_v22 = vor.u32 %v6618_v15, %v5436_v14  ;;  %v6557_v23 = vld [vmem:[%s7759_s16 + $0x4] sm:$0xf] }
  0x6e   : > { %v5438_v17 = vld [vmem:[%s7759_s16 + $0x1e8] sm:$0xf0]  ;;  %v6577_v20 = vld [vmem:[%s7759_s16 + $0x9c] sm:$0xf0]  ;;  %v5270_v24 = vld [vmem:[%s7759_s16 + $0xa0] sm:$0xf0] }
  0x6f   : > { %2319 = vmatpush.bf16.msra.mxu0 %v5749_v58  ;;  %2338 = vmatpush.bf16.msra.mxu1 %v5753_v59  ;;  %v5276_v25 = vld [vmem:[%s7759_s16 + $0x8] sm:$0xf]  ;;  %v5441_v26 = vor.u32 %v6598_v16, %v5438_v17  ;;  %v6558_v28 = vld [vmem:[%s7759_s16 + $0xc] sm:$0xf]  ;;  %v299_v30 = vld [vmem:[%s11766_s0] sm:$0xff]  ;;  %v5269_v33 = vor.u32 %v6577_v20, %v5268_v19  ;;  %v5273_v37 = vor.u32 %v6557_v23, %v5270_v24  ;;  %vm11943_vm1 = vcmask 7168  }
  0x70   : > { %2357 = vmatpush.bf16.msra.mxu2 %v5757_v60  ;;  %v6578_v27 = vld [vmem:[%s7759_s16 + $0xa4] sm:$0xf0]  ;;  %v5278_v29 = vld [vmem:[%s7759_s16 + $0xa8] sm:$0xf0]  ;;  %v6412_v31 = vld [vmem:[%s7759_s16 + $0x8d8] sm:$0xf] }
  0x71   : > { %2376 = vmatpush.bf16.msra.mxu3 %v5761_v0  ;;  %v6860_v32 = vld [vmem:[%s7759_s16 + $0x974] sm:$0xf0]  ;;  %v300_v34 = vld [vmem:[%s11766_s0 + $0x8] sm:$0xff]  ;;  %v6839_v35 = vld [vmem:[%s7759_s16 + $0x8d4] sm:$0xf]  ;;  %v5277_v38 = vor.u32 %v6578_v27, %v5276_v25  ;;  %v5281_v39 = vor.u32 %v6558_v28, %v5278_v29  ;;  %s3280_s18 = smul.u32 5120, %s7679_s22 }
  0x72   : > { %v6406_v36 = vld [vmem:[%s7759_s16 + $0x970] sm:$0xf0]  ;;  %v6413_v40 = vor.u32 %v6860_v32, %v6412_v31  ;;  %v6404_v41 = vld [vmem:[%s7759_s16 + $0x8d0] sm:$0xf]  ;;  %v6840_v43 = vld [vmem:[%s7759_s16 + $0x8dc] sm:$0xf]  ;;  %v7851_v44 = vpack.c.bf16 %v300_v34, %v299_v30 }
  0x73   : > { %2320 = vmatpush.bf16.msra.mxu0 %v5589_v6  ;;  %2339 = vmatpush.bf16.msra.mxu1 %v5593_v7  ;;  %v6859_v42 = vld [vmem:[%s7759_s16 + $0x96c] sm:$0xf0]  ;;  %v6409_v45 = vor.u32 %v6839_v35, %v6406_v36  ;;  %v6414_v46 = vld [vmem:[%s7759_s16 + $0x978] sm:$0xf0]  ;;  %v6252_v47 = vld [vmem:[%s7759_s16 + $0x798] sm:$0xf] }
  0x74   : > { %2358 = vmatpush.bf16.msra.mxu2 %v5597_v8  ;;  %v6820_v48 = vld [vmem:[%s7759_s16 + $0x834] sm:$0xf0]  ;;  %v6799_v49 = vld [vmem:[%s7759_s16 + $0x794] sm:$0xf]  ;;  %v6405_v51 = vor.u32 %v6859_v42, %v6404_v41  ;;  %v6417_v52 = vor.u32 %v6840_v43, %v6414_v46  ;;  %v6244_v54 = vld [vmem:[%s7759_s16 + $0x790] sm:$0xf] }
  0x75   : > { %2377 = vmatpush.bf16.msra.mxu3 %v5601_v12  ;;  %v6246_v50 = vld [vmem:[%s7759_s16 + $0x830] sm:$0xf0]  ;;  %v6253_v53 = vor.u32 %v6820_v48, %v6252_v47  ;;  %v6819_v55 = vld [vmem:[%s7759_s16 + $0x82c] sm:$0xf0]  ;;  %v6800_v56 = vld [vmem:[%s7759_s16 + $0x79c] sm:$0xf] }
  0x76   : > { %v6249_v57 = vor.u32 %v6799_v49, %v6246_v50  ;;  %v6254_v58 = vld [vmem:[%s7759_s16 + $0x838] sm:$0xf0]  ;;  %v6092_v59 = vld [vmem:[%s7759_s16 + $0x658] sm:$0xf]  ;;  %v6759_v61 = vld [vmem:[%s7759_s16 + $0x654] sm:$0xf]  ;;  %v6245_v63 = vor.u32 %v6819_v55, %v6244_v54 }
  0x77   : > { %2321 = vmatpush.bf16.msra.mxu0 %v5429_v18  ;;  %2340 = vmatpush.bf16.msra.mxu1 %v5433_v21  ;;  %v6780_v60 = vld [vmem:[%s7759_s16 + $0x6f4] sm:$0xf0]  ;;  %v6086_v62 = vld [vmem:[%s7759_s16 + $0x6f0] sm:$0xf0]  ;;  %v6257_v0 = vor.u32 %v6800_v56, %v6254_v58  ;;  %v6084_v2 = vld [vmem:[%s7759_s16 + $0x650] sm:$0xf] }
  0x78   : > { %2359 = vmatpush.bf16.msra.mxu2 %v5437_v22  ;;  %v6093_v1 = vor.u32 %v6780_v60, %v6092_v59  ;;  %v6779_v3 = vld [vmem:[%s7759_s16 + $0x6ec] sm:$0xf0]  ;;  %v6760_v4 = vld [vmem:[%s7759_s16 + $0x65c] sm:$0xf]  ;;  %v6089_v5 = vor.u32 %v6759_v61, %v6086_v62  ;;  %v5932_v7 = vld [vmem:[%s7759_s16 + $0x518] sm:$0xf] }
  0x79   : > { %2378 = vmatpush.bf16.msra.mxu3 %v5441_v26  ;;  %v6094_v6 = vld [vmem:[%s7759_s16 + $0x6f8] sm:$0xf0]  ;;  %v6740_v8 = vld [vmem:[%s7759_s16 + $0x5b4] sm:$0xf0]  ;;  %v6719_v9 = vld [vmem:[%s7759_s16 + $0x514] sm:$0xf]  ;;  %v6085_v11 = vor.u32 %v6779_v3, %v6084_v2 }
  0x7a   : > { %v5926_v10 = vld [vmem:[%s7759_s16 + $0x5b0] sm:$0xf0]  ;;  %v5924_v12 = vld [vmem:[%s7759_s16 + $0x510] sm:$0xf]  ;;  %v6097_v13 = vor.u32 %v6760_v4, %v6094_v6  ;;  %v5933_v14 = vor.u32 %v6740_v8, %v5932_v7  ;;  %v6720_v16 = vld [vmem:[%s7759_s16 + $0x51c] sm:$0xf] }
  0x7b   : > { %2322 = vmatpush.bf16.msra.mxu0 %v5269_v33  ;;  %2341 = vmatpush.bf16.msra.mxu1 %v5273_v37  ;;  %v6739_v15 = vld [vmem:[%s7759_s16 + $0x5ac] sm:$0xf0]  ;;  %v5934_v17 = vld [vmem:[%s7759_s16 + $0x5b8] sm:$0xf0]  ;;  %v5929_v18 = vor.u32 %v6719_v9, %v5926_v10  ;;  %v5772_v20 = vld [vmem:[%s7759_s16 + $0x3d8] sm:$0xf] }
  0x7c   : > { %2360 = vmatpush.bf16.msra.mxu2 %v5277_v38  ;;  %v301_v19 = vld [vmem:[%s11766_s0 + $0x10] sm:$0xff]  ;;  %v6700_v21 = vld [vmem:[%s7759_s16 + $0x474] sm:$0xf0]  ;;  %v5925_v25 = vor.u32 %v6739_v15, %v5924_v12  ;;  %v5937_v26 = vor.u32 %v6720_v16, %v5934_v17  ;;  %v6680_v30 = vld [vmem:[%s7759_s16 + $0x3dc] sm:$0xf]  ;;  %p6546_p7 = scmp.ne.s32.totalorder %s7679_s22, 5 }
  0x7d   : > { %2379 = vmatpush.bf16.msra.mxu3 %v5281_v39  ;;  %v302_v22 = vld [vmem:[%s11766_s0 + $0x18] sm:$0xff]  ;;  %v6679_v23 = vld [vmem:[%s7759_s16 + $0x3d4] sm:$0xf]  ;;  %v5773_v27 = vor.u32 %v6700_v21, %v5772_v20  ;;  %v5764_v28 = vld [vmem:[%s7759_s16 + $0x3d0] sm:$0xf]  ;;  %s7628_s21 = smov (!%p6546_p7), 1.0  }
  0x7e   : > { %2323 = vmatmul.bf16.vlgmr.msra.gmra.mxu0 %v7851_v44  ;;  %2342 = vmatmul.bf16.vlgmr.msra.gmra.mxu1 %v7851_v44  ;;  %v5766_v24 = vld [vmem:[%s7759_s16 + $0x470] sm:$0xf0]  ;;  %v6699_v29 = vld [vmem:[%s7759_s16 + $0x46c] sm:$0xf0]  ;;  %v7895_v31 = vpack.c.bf16 %v302_v22, %v301_v19  ;;  %v5774_v33 = vld [vmem:[%s7759_s16 + $0x478] sm:$0xf0] }
  0x7f   : > { %2410 = vmatpush.bf16.msrb.mxu1 %v6409_v45  ;;  %2361 = vmatmul.bf16.vlgmr.msra.gmra.mxu2 %v7851_v44  ;;  %v5769_v32 = vor.u32 %v6679_v23, %v5766_v24  ;;  %v5612_v34 = vld [vmem:[%s7759_s16 + $0x298] sm:$0xf]  ;;  %v6639_v36 = vld [vmem:[%s7759_s16 + $0x294] sm:$0xf]  ;;  %v5765_v38 = vor.u32 %v6699_v29, %v5764_v28  ;;  %v5777_v39 = vor.u32 %v6680_v30, %v5774_v33  ;;  %v5604_v41 = vld [vmem:[%s7759_s16 + $0x290] sm:$0xf] }
  0x80   : > { %2429 = vmatpush.bf16.msrb.mxu2 %v6413_v40  ;;  %2380 = vmatmul.bf16.vlgmr.msra.gmra.mxu3 %v7851_v44  ;;  %v6660_v35 = vld [vmem:[%s7759_s16 + $0x334] sm:$0xf0]  ;;  %v5606_v37 = vld [vmem:[%s7759_s16 + $0x330] sm:$0xf0]  ;;  %v6659_v42 = vld [vmem:[%s7759_s16 + $0x32c] sm:$0xf0] }
  0x81   : > { %2391 = vmatpush.bf16.msrb.mxu0 %v6405_v51  ;;  %2448 = vmatpush.bf16.msrb.mxu3 %v6417_v52  ;;  %v5613_v40 = vor.u32 %v6660_v35, %v5612_v34  ;;  %v6640_v43 = vld [vmem:[%s7759_s16 + $0x29c] sm:$0xf]  ;;  %v5609_v45 = vor.u32 %v6639_v36, %v5606_v37  ;;  %v5452_v47 = vld [vmem:[%s7759_s16 + $0x158] sm:$0xf]  ;;  %v6599_v49 = vld [vmem:[%s7759_s16 + $0x154] sm:$0xf]  ;;  %v5605_v51 = vor.u32 %v6659_v42, %v5604_v41 }
  0x82   : > { %v5614_v46 = vld [vmem:[%s7759_s16 + $0x338] sm:$0xf0]  ;;  %v6620_v48 = vld [vmem:[%s7759_s16 + $0x1f4] sm:$0xf0]  ;;  %v5446_v50 = vld [vmem:[%s7759_s16 + $0x1f0] sm:$0xf0] }
  0x83   : > { %2411 = vmatpush.bf16.msrb.mxu1 %v6249_v57  ;;  %v5444_v52 = vld [vmem:[%s7759_s16 + $0x150] sm:$0xf]  ;;  %v5453_v54 = vor.u32 %v6620_v48, %v5452_v47  ;;  %v6600_v56 = vld [vmem:[%s7759_s16 + $0x15c] sm:$0xf]  ;;  %v5449_v58 = vor.u32 %v6599_v49, %v5446_v50  ;;  %v5292_v59 = vld [vmem:[%s7759_s16 + $0x18] sm:$0xf] }
  0x84   : > { %2430 = vmatpush.bf16.msrb.mxu2 %v6253_v53  ;;  %v5617_v53 = vor.u32 %v6640_v43, %v5614_v46  ;;  %v6619_v55 = vld [vmem:[%s7759_s16 + $0x1ec] sm:$0xf0]  ;;  %v5454_v57 = vld [vmem:[%s7759_s16 + $0x1f8] sm:$0xf0]  ;;  %v6580_v60 = vld [vmem:[%s7759_s16 + $0xb4] sm:$0xf0] }
  0x85   : > { %2392 = vmatpush.bf16.msrb.mxu0 %v6245_v63  ;;  %2449 = vmatpush.bf16.msrb.mxu3 %v6257_v0  ;;  %v6559_v61 = vld [vmem:[%s7759_s16 + $0x14] sm:$0xf]  ;;  %v6428_v63 = vld [vmem:[%s7759_s16 + $0x8e8] sm:$0xf]  ;;  %v5284_v2 = vld [vmem:[%s7759_s16 + $0x10] sm:$0xf]  ;;  %v5293_v6 = vor.u32 %v6580_v60, %v5292_v59 }
  0x86   : > { %v5286_v62 = vld [vmem:[%s7759_s16 + $0xb0] sm:$0xf0]  ;;  %v6862_v0 = vld [vmem:[%s7759_s16 + $0x984] sm:$0xf0]  ;;  %v6841_v3 = vld [vmem:[%s7759_s16 + $0x8e4] sm:$0xf] }
  0x87   : > { %2412 = vmatpush.bf16.msrb.mxu1 %v6089_v5  ;;  %v6422_v4 = vld [vmem:[%s7759_s16 + $0x980] sm:$0xf0]  ;;  %v5457_v5 = vor.u32 %v6600_v56, %v5454_v57  ;;  %v6579_v7 = vld [vmem:[%s7759_s16 + $0xac] sm:$0xf0]  ;;  %v6560_v8 = vld [vmem:[%s7759_s16 + $0x1c] sm:$0xf]  ;;  %v5289_v10 = vor.u32 %v6559_v61, %v5286_v62 }
  0x88   : > { %2431 = vmatpush.bf16.msrb.mxu2 %v6093_v1  ;;  %v5445_v1 = vor.u32 %v6619_v55, %v5444_v52  ;;  %v5294_v9 = vld [vmem:[%s7759_s16 + $0xb8] sm:$0xf0]  ;;  %v6420_v12 = vld [vmem:[%s7759_s16 + $0x8e0] sm:$0xf]  ;;  %v6425_v15 = vor.u32 %v6841_v3, %v6422_v4  ;;  %v6430_v16 = vld [vmem:[%s7759_s16 + $0x988] sm:$0xf0]  ;;  %v5285_v19 = vor.u32 %v6579_v7, %v5284_v2 }
  0x89   : > { %2393 = vmatpush.bf16.msrb.mxu0 %v6085_v11  ;;  %2450 = vmatpush.bf16.msrb.mxu3 %v6097_v13  ;;  %v6429_v11 = vor.u32 %v6862_v0, %v6428_v63  ;;  %v6861_v13 = vld [vmem:[%s7759_s16 + $0x97c] sm:$0xf0]  ;;  %v6268_v17 = vld [vmem:[%s7759_s16 + $0x7a8] sm:$0xf]  ;;  %v5297_v20 = vor.u32 %v6560_v8, %v5294_v9  ;;  %v6802_v28 = vld [vmem:[%s7759_s16 + $0x7ac] sm:$0xf] }
  0x8a   : > { %v6421_v21 = vor.u32 %v6861_v13, %v6420_v12  ;;  %v6260_v22 = vld [vmem:[%s7759_s16 + $0x7a0] sm:$0xf]  ;;  %v6270_v29 = vld [vmem:[%s7759_s16 + $0x848] sm:$0xf0]  ;;  %v6108_v30 = vld [vmem:[%s7759_s16 + $0x668] sm:$0xf] }
  0x8b   : > { %2413 = vmatpush.bf16.msrb.mxu1 %v5929_v18  ;;  %v6822_v18 = vld [vmem:[%s7759_s16 + $0x844] sm:$0xf0]  ;;  %v6821_v23 = vld [vmem:[%s7759_s16 + $0x83c] sm:$0xf0]  ;;  %v6273_v37 = vor.u32 %v6802_v28, %v6270_v29  ;;  %v6762_v41 = vld [vmem:[%s7759_s16 + $0x66c] sm:$0xf] }
  0x8c   : > { %2432 = vmatpush.bf16.msrb.mxu2 %v5933_v14  ;;  %v6842_v14 = vld [vmem:[%s7759_s16 + $0x8ec] sm:$0xf]  ;;  %v6261_v33 = vor.u32 %v6821_v23, %v6260_v22  ;;  %v6100_v35 = vld [vmem:[%s7759_s16 + $0x660] sm:$0xf]  ;;  %v5948_v43 = vld [vmem:[%s7759_s16 + $0x528] sm:$0xf] }
  0x8d   : > { %2394 = vmatpush.bf16.msrb.mxu0 %v5925_v25  ;;  %2451 = vmatpush.bf16.msrb.mxu3 %v5937_v26  ;;  %v6433_v24 = vor.u32 %v6842_v14, %v6430_v16  ;;  %v6269_v25 = vor.u32 %v6822_v18, %v6268_v17  ;;  %v6801_v26 = vld [vmem:[%s7759_s16 + $0x7a4] sm:$0xf]  ;;  %v6781_v36 = vld [vmem:[%s7759_s16 + $0x6fc] sm:$0xf0]  ;;  %v6110_v42 = vld [vmem:[%s7759_s16 + $0x708] sm:$0xf0] }
  0x8e   : > { %2328 = vmatmul.bf16.gmra.mxu0 %v7895_v31  ;;  %2347 = vmatmul.bf16.gmra.mxu1 %v7895_v31  ;;  %v6101_v46 = vor.u32 %v6781_v36, %v6100_v35  ;;  %v5940_v48 = vld [vmem:[%s7759_s16 + $0x520] sm:$0xf]  ;;  %v6113_v50 = vor.u32 %v6762_v41, %v6110_v42  ;;  %v6721_v52 = vld [vmem:[%s7759_s16 + $0x524] sm:$0xf]  ;;  %v5950_v55 = vld [vmem:[%s7759_s16 + $0x5c8] sm:$0xf0] }
  0x8f   : > { %2414 = vmatpush.bf16.msrb.mxu1 %v5769_v32  ;;  %2366 = vmatmul.bf16.gmra.mxu2 %v7895_v31  ;;  %v6782_v32 = vld [vmem:[%s7759_s16 + $0x704] sm:$0xf0]  ;;  %v6741_v49 = vld [vmem:[%s7759_s16 + $0x5bc] sm:$0xf0]  ;;  %v6681_v0 = vld [vmem:[%s7759_s16 + $0x3e4] sm:$0xf] }
  0x90   : > { %2433 = vmatpush.bf16.msrb.mxu2 %v5773_v27  ;;  %2385 = vmatmul.bf16.gmra.mxu3 %v7895_v31  ;;  %v6262_v27 = vld [vmem:[%s7759_s16 + $0x840] sm:$0xf0]  ;;  %v5788_v56 = vld [vmem:[%s7759_s16 + $0x3e8] sm:$0xf]  ;;  %v5780_v60 = vld [vmem:[%s7759_s16 + $0x3e0] sm:$0xf] }
  0x91   : > { %2395 = vmatpush.bf16.msrb.mxu0 %v5765_v38  ;;  %2452 = vmatpush.bf16.msrb.mxu3 %v5777_v39  ;;  %v6265_v34 = vor.u32 %v6801_v26, %v6262_v27  ;;  %v6109_v38 = vor.u32 %v6782_v32, %v6108_v30  ;;  %v6761_v39 = vld [vmem:[%s7759_s16 + $0x664] sm:$0xf]  ;;  %v6702_v57 = vld [vmem:[%s7759_s16 + $0x484] sm:$0xf0]  ;;  %v6701_v61 = vld [vmem:[%s7759_s16 + $0x47c] sm:$0xf0] }
  0x92   : > { %v5789_v63 = vor.u32 %v6702_v57, %v5788_v56  ;;  %v6682_v2 = vld [vmem:[%s7759_s16 + $0x3ec] sm:$0xf]  ;;  %v5628_v4 = vld [vmem:[%s7759_s16 + $0x2a8] sm:$0xf]  ;;  %v5620_v8 = vld [vmem:[%s7759_s16 + $0x2a0] sm:$0xf] }
  0x93   : > { %2415 = vmatpush.bf16.msrb.mxu1 %v5609_v45  ;;  %v6742_v45 = vld [vmem:[%s7759_s16 + $0x5c4] sm:$0xf0]  ;;  %v5790_v3 = vld [vmem:[%s7759_s16 + $0x488] sm:$0xf0]  ;;  %v6661_v9 = vld [vmem:[%s7759_s16 + $0x33c] sm:$0xf0] }
  0x94   : > { %2434 = vmatpush.bf16.msrb.mxu2 %v5613_v40  ;;  %v6102_v40 = vld [vmem:[%s7759_s16 + $0x700] sm:$0xf0]  ;;  %v6642_v14 = vld [vmem:[%s7759_s16 + $0x2ac] sm:$0xf]  ;;  %v5468_v16 = vld [vmem:[%s7759_s16 + $0x168] sm:$0xf]  ;;  %v5621_v18 = vor.u32 %v6661_v9, %v5620_v8 }
  0x95   : > { %2396 = vmatpush.bf16.msrb.mxu0 %v5605_v51  ;;  %2453 = vmatpush.bf16.msrb.mxu3 %v5617_v53  ;;  %v6105_v47 = vor.u32 %v6761_v39, %v6102_v40  ;;  %v5949_v51 = vor.u32 %v6742_v45, %v5948_v43  ;;  %v5942_v53 = vld [vmem:[%s7759_s16 + $0x5c0] sm:$0xf0]  ;;  %v6622_v17 = vld [vmem:[%s7759_s16 + $0x204] sm:$0xf0]  ;;  %v6602_v26 = vld [vmem:[%s7759_s16 + $0x16c] sm:$0xf] }
  0x96   : > { %v5945_v59 = vor.u32 %v6721_v52, %v5942_v53  ;;  %v6641_v12 = vld [vmem:[%s7759_s16 + $0x2a4] sm:$0xf]  ;;  %v5469_v23 = vor.u32 %v6622_v17, %v5468_v16  ;;  %v5470_v27 = vld [vmem:[%s7759_s16 + $0x208] sm:$0xf0]  ;;  %v5308_v28 = vld [vmem:[%s7759_s16 + $0x28] sm:$0xf] }
  0x97   : > { %2416 = vmatpush.bf16.msrb.mxu1 %v5449_v58  ;;  %v5941_v58 = vor.u32 %v6741_v49, %v5940_v48  ;;  %v5622_v13 = vld [vmem:[%s7759_s16 + $0x340] sm:$0xf0]  ;;  %v6582_v29 = vld [vmem:[%s7759_s16 + $0xc4] sm:$0xf0]  ;;  %v6444_v30 = vld [vmem:[%s7759_s16 + $0x8f8] sm:$0xf] }
  0x98   : > { %2435 = vmatpush.bf16.msrb.mxu2 %v5453_v54  ;;  %v6722_v54 = vld [vmem:[%s7759_s16 + $0x52c] sm:$0xf]  ;;  %v6864_v32 = vld [vmem:[%s7759_s16 + $0x994] sm:$0xf0]  ;;  %v5300_v35 = vld [vmem:[%s7759_s16 + $0x20] sm:$0xf]  ;;  %v5309_v39 = vor.u32 %v6582_v29, %v5308_v28 }
  0x99   : > { %2397 = vmatpush.bf16.msrb.mxu0 %v5445_v1  ;;  %2454 = vmatpush.bf16.msrb.mxu3 %v5457_v5  ;;  %v5953_v62 = vor.u32 %v6722_v54, %v5950_v55  ;;  %v5782_v1 = vld [vmem:[%s7759_s16 + $0x480] sm:$0xf0]  ;;  %v6662_v5 = vld [vmem:[%s7759_s16 + $0x344] sm:$0xf0]  ;;  %v6581_v36 = vld [vmem:[%s7759_s16 + $0xbc] sm:$0xf0]  ;;  %v6445_v43 = vor.u32 %v6864_v32, %v6444_v30 }
  0x9a   : > { %v5785_v7 = vor.u32 %v6681_v0, %v5782_v1  ;;  %v5302_v40 = vld [vmem:[%s7759_s16 + $0xc0] sm:$0xf0]  ;;  %v6562_v41 = vld [vmem:[%s7759_s16 + $0x2c] sm:$0xf]  ;;  %v6436_v45 = vld [vmem:[%s7759_s16 + $0x8f0] sm:$0xf] }
  0x9b   : > { %2417 = vmatpush.bf16.msrb.mxu1 %v5289_v10  ;;  %v5793_v10 = vor.u32 %v6682_v2, %v5790_v3  ;;  %v5310_v42 = vld [vmem:[%s7759_s16 + $0xc8] sm:$0xf0]  ;;  %v6438_v48 = vld [vmem:[%s7759_s16 + $0x990] sm:$0xf0]  ;;  %v6844_v49 = vld [vmem:[%s7759_s16 + $0x8fc] sm:$0xf] }
  0x9c   : > { %2436 = vmatpush.bf16.msrb.mxu2 %v5293_v6  ;;  %v5781_v6 = vor.u32 %v6701_v61, %v5780_v60  ;;  %v6284_v53 = vld [vmem:[%s7759_s16 + $0x7b8] sm:$0xf]  ;;  %v5313_v55 = vor.u32 %v6562_v41, %v5310_v42  ;;  %v6823_v60 = vld [vmem:[%s7759_s16 + $0x84c] sm:$0xf0]  ;;  %v6804_v1 = vld [vmem:[%s7759_s16 + $0x7bc] sm:$0xf] }
  0x9d   : > { %2398 = vmatpush.bf16.msrb.mxu0 %v5285_v19  ;;  %2455 = vmatpush.bf16.msrb.mxu3 %v5297_v20  ;;  %v5625_v19 = vor.u32 %v6641_v12, %v5622_v13  ;;  %v5460_v20 = vld [vmem:[%s7759_s16 + $0x160] sm:$0xf]  ;;  %v6824_v54 = vld [vmem:[%s7759_s16 + $0x854] sm:$0xf0]  ;;  %v6286_v2 = vld [vmem:[%s7759_s16 + $0x858] sm:$0xf0] }
  0x9e   : > { %2418 = vmatmul.bf16.vlgmr.msrb.gmra.mxu1 %v7851_v44  ;;  %v6285_v61 = vor.u32 %v6824_v54, %v6284_v53  ;;  %v6124_v3 = vld [vmem:[%s7759_s16 + $0x678] sm:$0xf]  ;;  %v6289_v8 = vor.u32 %v6804_v1, %v6286_v2  ;;  %v6763_v9 = vld [vmem:[%s7759_s16 + $0x674] sm:$0xf]  ;;  %v6764_v13 = vld [vmem:[%s7759_s16 + $0x67c] sm:$0xf] }
  0x9f   : > { %2486 = vmatpush.bf16.msra.mxu1 %v6425_v15  ;;  %2437 = vmatmul.bf16.vlgmr.msrb.gmra.mxu2 %v7851_v44  ;;  %v5630_v15 = vld [vmem:[%s7759_s16 + $0x348] sm:$0xf0]  ;;  %v6744_v16 = vld [vmem:[%s7759_s16 + $0x5d4] sm:$0xf0]  ;;  %v5956_v17 = vld [vmem:[%s7759_s16 + $0x530] sm:$0xf] }
  0xa0   : > { %2505 = vmatpush.bf16.msra.mxu2 %v6429_v11  ;;  %2399 = vmatmul.bf16.vlgmr.msrb.gmra.mxu0 %v7851_v44  ;;  %v5629_v11 = vor.u32 %v6662_v5, %v5628_v4  ;;  %v5633_v22 = vor.u32 %v6642_v14, %v5630_v15  ;;  %v6784_v4 = vld [vmem:[%s7759_s16 + $0x714] sm:$0xf0]  ;;  %v6116_v5 = vld [vmem:[%s7759_s16 + $0x670] sm:$0xf]  ;;  %v6126_v14 = vld [vmem:[%s7759_s16 + $0x718] sm:$0xf0] }
  0xa1   : > { %2467 = vmatpush.bf16.msra.mxu0 %v6421_v21  ;;  %2524 = vmatpush.bf16.msra.mxu3 %v6433_v24  ;;  %v6621_v21 = vld [vmem:[%s7759_s16 + $0x1fc] sm:$0xf0]  ;;  %v6601_v24 = vld [vmem:[%s7759_s16 + $0x164] sm:$0xf]  ;;  %v5964_v15 = vld [vmem:[%s7759_s16 + $0x538] sm:$0xf] }
  0xa2   : > { %2456 = vmatmul.bf16.vlgmr.msrb.gmra.mxu3 %v7851_v44  ;;  %v6704_v28 = vld [vmem:[%s7759_s16 + $0x494] sm:$0xf0]  ;;  %v5796_v29 = vld [vmem:[%s7759_s16 + $0x3f0] sm:$0xf] }
  0xa3   : > { %2487 = vmatpush.bf16.msra.mxu1 %v6265_v34  ;;  %v6703_v30 = vld [vmem:[%s7759_s16 + $0x48c] sm:$0xf0]  ;;  %v6664_v41 = vld [vmem:[%s7759_s16 + $0x354] sm:$0xf0] }
  0xa4   : > { %2506 = vmatpush.bf16.msra.mxu2 %v6269_v25  ;;  %v5462_v25 = vld [vmem:[%s7759_s16 + $0x200] sm:$0xf0]  ;;  %v5636_v42 = vld [vmem:[%s7759_s16 + $0x2b0] sm:$0xf]  ;;  %v5484_v53 = vld [vmem:[%s7759_s16 + $0x178] sm:$0xf] }
  0xa5   : > { %2468 = vmatpush.bf16.msra.mxu0 %v6261_v33  ;;  %2525 = vmatpush.bf16.msra.mxu3 %v6273_v37  ;;  %v5461_v33 = vor.u32 %v6621_v21, %v5460_v20  ;;  %v5465_v34 = vor.u32 %v6601_v24, %v5462_v25  ;;  %v6561_v37 = vld [vmem:[%s7759_s16 + $0x24] sm:$0xf]  ;;  %v6129_v20 = vor.u32 %v6764_v13, %v6126_v14  ;;  %v6723_v21 = vld [vmem:[%s7759_s16 + $0x534] sm:$0xf]  ;;  %v6724_v25 = vld [vmem:[%s7759_s16 + $0x53c] sm:$0xf] }
  0xa6   : > { %v5305_v52 = vor.u32 %v6561_v37, %v5302_v40  ;;  %v5797_v37 = vor.u32 %v6703_v30, %v5796_v29  ;;  %v5644_v40 = vld [vmem:[%s7759_s16 + $0x2b8] sm:$0xf]  ;;  %v6564_v13 = vld [vmem:[%s7759_s16 + $0x3c] sm:$0xf] }
  0xa7   : > { %2488 = vmatpush.bf16.msra.mxu1 %v6105_v47  ;;  %v6843_v47 = vld [vmem:[%s7759_s16 + $0x8f4] sm:$0xf]  ;;  %v6624_v54 = vld [vmem:[%s7759_s16 + $0x214] sm:$0xf0] }
  0xa8   : > { %2507 = vmatpush.bf16.msra.mxu2 %v6109_v38  ;;  %v5473_v38 = vor.u32 %v6602_v26, %v5470_v27  ;;  %v6441_v57 = vor.u32 %v6843_v47, %v6438_v48  ;;  %v5966_v26 = vld [vmem:[%s7759_s16 + $0x5d8] sm:$0xf0]  ;;  %v5804_v27 = vld [vmem:[%s7759_s16 + $0x3f8] sm:$0xf]  ;;  %v6643_v47 = vld [vmem:[%s7759_s16 + $0x2b4] sm:$0xf] }
  0xa9   : > { %2469 = vmatpush.bf16.msra.mxu0 %v6101_v46  ;;  %2526 = vmatpush.bf16.msra.mxu3 %v6113_v50  ;;  %v6863_v46 = vld [vmem:[%s7759_s16 + $0x98c] sm:$0xf0]  ;;  %v6446_v50 = vld [vmem:[%s7759_s16 + $0x998] sm:$0xf0]  ;;  %v5638_v48 = vld [vmem:[%s7759_s16 + $0x350] sm:$0xf0] }
  0xaa   : > { %v6437_v56 = vor.u32 %v6863_v46, %v6436_v45  ;;  %v5324_v1 = vld [vmem:[%s7759_s16 + $0x38] sm:$0xf] }
  0xab   : > { %2489 = vmatpush.bf16.msra.mxu1 %v5945_v59  ;;  %v6276_v59 = vld [vmem:[%s7759_s16 + $0x7b0] sm:$0xf]  ;;  %v6584_v2 = vld [vmem:[%s7759_s16 + $0xd4] sm:$0xf0] }
  0xac   : > { %2508 = vmatpush.bf16.msra.mxu2 %v5949_v51  ;;  %v5301_v51 = vor.u32 %v6581_v36, %v5300_v35  ;;  %v6277_v0 = vor.u32 %v6823_v60, %v6276_v59  ;;  %v5798_v35 = vld [vmem:[%s7759_s16 + $0x490] sm:$0xf0]  ;;  %v5805_v36 = vor.u32 %v6704_v28, %v5804_v27  ;;  %v5325_v14 = vor.u32 %v6584_v2, %v5324_v1 }
  0xad   : > { %2470 = vmatpush.bf16.msra.mxu0 %v5941_v58  ;;  %2527 = vmatpush.bf16.msra.mxu3 %v5953_v62  ;;  %v6449_v58 = vor.u32 %v6844_v49, %v6446_v50  ;;  %v6803_v62 = vld [vmem:[%s7759_s16 + $0x7b4] sm:$0xf]  ;;  %v5645_v49 = vor.u32 %v6664_v41, %v5644_v40 }
  0xae   : > { %2423 = vmatmul.bf16.gmra.mxu1 %v7895_v31  ;;  %v6603_v59 = vld [vmem:[%s7759_s16 + $0x174] sm:$0xf] }
  0xaf   : > { %2490 = vmatpush.bf16.msra.mxu1 %v5785_v7  ;;  %2442 = vmatmul.bf16.gmra.mxu2 %v7895_v31  ;;  %v5478_v60 = vld [vmem:[%s7759_s16 + $0x210] sm:$0xf0] }
  0xb0   : > { %2509 = vmatpush.bf16.msra.mxu2 %v5789_v63  ;;  %2404 = vmatmul.bf16.gmra.mxu0 %v7895_v31  ;;  %v6278_v63 = vld [vmem:[%s7759_s16 + $0x850] sm:$0xf0] }
  0xb1   : > { %2471 = vmatpush.bf16.msra.mxu0 %v5781_v6  ;;  %2528 = vmatpush.bf16.msra.mxu3 %v5793_v10  ;;  %v6783_v6 = vld [vmem:[%s7759_s16 + $0x70c] sm:$0xf0]  ;;  %v6281_v7 = vor.u32 %v6803_v62, %v6278_v63  ;;  %v6118_v10 = vld [vmem:[%s7759_s16 + $0x710] sm:$0xf0]  ;;  %v5485_v62 = vor.u32 %v6624_v54, %v5484_v53 }
  0xb2   : > { %2461 = vmatmul.bf16.gmra.mxu3 %v7895_v31  ;;  %v6117_v12 = vor.u32 %v6783_v6, %v6116_v5  ;;  %v6460_v5 = vld [vmem:[%s7759_s16 + $0x908] sm:$0xf] }
  0xb3   : > { %2491 = vmatpush.bf16.msra.mxu1 %v5625_v19  ;;  %v6121_v19 = vor.u32 %v6763_v9, %v6118_v10  ;;  %v6866_v6 = vld [vmem:[%s7759_s16 + $0x9a4] sm:$0xf0]  ;;  %v5481_v9 = vor.u32 %v6603_v59, %v5478_v60  ;;  %v6726_v59 = vld [vmem:[%s7759_s16 + $0x54c] sm:$0xf] }
  0xb4   : > { %2510 = vmatpush.bf16.msra.mxu2 %v5629_v11  ;;  %v6125_v11 = vor.u32 %v6784_v4, %v6124_v3  ;;  %v5316_v3 = vld [vmem:[%s7759_s16 + $0x30] sm:$0xf]  ;;  %v5982_v60 = vld [vmem:[%s7759_s16 + $0x5e8] sm:$0xf0] }
  0xb5   : > { %2472 = vmatpush.bf16.msra.mxu0 %v5621_v18  ;;  %2529 = vmatpush.bf16.msra.mxu3 %v5633_v22  ;;  %v6743_v18 = vld [vmem:[%s7759_s16 + $0x5cc] sm:$0xf0]  ;;  %v5958_v22 = vld [vmem:[%s7759_s16 + $0x5d0] sm:$0xf0]  ;;  %v5985_v2 = vor.u32 %v6726_v59, %v5982_v60  ;;  %v8151_v59 = vld [vmem:[%s7765_s7] sm:$0xff] }
  0xb6   : > { %v5957_v24 = vor.u32 %v6743_v18, %v5956_v17  ;;  %v5961_v32 = vor.u32 %v6723_v21, %v5958_v22  ;;  %v6583_v4 = vld [vmem:[%s7759_s16 + $0xcc] sm:$0xf0]  ;;  %v6845_v17 = vld [vmem:[%s7759_s16 + $0x904] sm:$0xf]  ;;  %v6846_v21 = vld [vmem:[%s7759_s16 + $0x90c] sm:$0xf] }
  0xb7   : > { %2492 = vmatpush.bf16.msra.mxu1 %v5465_v34  ;;  %v6683_v34 = vld [vmem:[%s7759_s16 + $0x3f4] sm:$0xf]  ;;  %v6454_v18 = vld [vmem:[%s7759_s16 + $0x9a0] sm:$0xf0]  ;;  %v6462_v22 = vld [vmem:[%s7759_s16 + $0x9a8] sm:$0xf0] }
  0xb8   : > { %2511 = vmatpush.bf16.msra.mxu2 %v5469_v23  ;;  %v5965_v23 = vor.u32 %v6744_v16, %v5964_v15  ;;  %v5801_v45 = vor.u32 %v6683_v34, %v5798_v35  ;;  %v5317_v15 = vor.u32 %v6583_v4, %v5316_v3  ;;  %v5326_v16 = vld [vmem:[%s7759_s16 + $0xd8] sm:$0xf0]  ;;  %v6457_v29 = vor.u32 %v6845_v17, %v6454_v18  ;;  %v6294_v35 = vld [vmem:[%s7759_s16 + $0x860] sm:$0xf0]  ;;  %v5812_v3 = vld [vmem:[%s7759_s16 + $0x400] sm:$0xf] }
  0xb9   : > { %2473 = vmatpush.bf16.msra.mxu0 %v5461_v33  ;;  %2530 = vmatpush.bf16.msra.mxu3 %v5473_v38  ;;  %v5969_v33 = vor.u32 %v6724_v25, %v5966_v26  ;;  %v6684_v38 = vld [vmem:[%s7759_s16 + $0x3fc] sm:$0xf]  ;;  %v6292_v25 = vld [vmem:[%s7759_s16 + $0x7c0] sm:$0xf]  ;;  %v5329_v28 = vor.u32 %v6564_v13, %v5326_v16  ;;  %v6465_v30 = vor.u32 %v6846_v21, %v6462_v22  ;;  %v6645_v17 = vld [vmem:[%s7759_s16 + $0x2c4] sm:$0xf] }
  0xba   : > { %v6825_v26 = vld [vmem:[%s7759_s16 + $0x85c] sm:$0xf0]  ;;  %v5654_v18 = vld [vmem:[%s7759_s16 + $0x360] sm:$0xf0] }
  0xbb   : > { %2493 = vmatpush.bf16.msra.mxu1 %v5305_v52  ;;  %v5646_v52 = vld [vmem:[%s7759_s16 + $0x358] sm:$0xf0]  ;;  %v6293_v34 = vor.u32 %v6825_v26, %v6292_v25  ;;  %v6705_v4 = vld [vmem:[%s7759_s16 + $0x49c] sm:$0xf0]  ;;  %v5657_v25 = vor.u32 %v6645_v17, %v5654_v18  ;;  %v6787_v17 = vld [vmem:[%s7759_s16 + $0x72c] sm:$0xf0] }
  0xbc   : > { %2512 = vmatpush.bf16.msra.mxu2 %v5309_v39  ;;  %v5806_v39 = vld [vmem:[%s7759_s16 + $0x498] sm:$0xf0]  ;;  %v6665_v16 = vld [vmem:[%s7759_s16 + $0x35c] sm:$0xf0]  ;;  %v6767_v18 = vld [vmem:[%s7759_s16 + $0x694] sm:$0xf] }
  0xbd   : > { %2474 = vmatpush.bf16.msra.mxu0 %v5301_v51  ;;  %2531 = vmatpush.bf16.msra.mxu3 %v5313_v55  ;;  %v5809_v46 = vor.u32 %v6684_v38, %v5806_v39  ;;  %v6644_v51 = vld [vmem:[%s7759_s16 + $0x2bc] sm:$0xf]  ;;  %v5476_v55 = vld [vmem:[%s7759_s16 + $0x170] sm:$0xf]  ;;  %v6140_v38 = vld [vmem:[%s7759_s16 + $0x688] sm:$0xf] }
  0xbe   : > { %2494 = vmatmul.bf16.vlgmr.msra.gmra.mxu1 %v7851_v44  ;;  %v6786_v39 = vld [vmem:[%s7759_s16 + $0x724] sm:$0xf0] }
  0xbf   : > { %2562 = vmatpush.bf16.msrb.mxu1 %v6441_v57  ;;  %2513 = vmatmul.bf16.vlgmr.msra.gmra.mxu2 %v7851_v44  ;;  %v5641_v57 = vor.u32 %v6643_v47, %v5638_v48  ;;  %v6766_v47 = vld [vmem:[%s7759_s16 + $0x68c] sm:$0xf] }
  0xc0   : > { %2581 = vmatpush.bf16.msrb.mxu2 %v6445_v43  ;;  %2475 = vmatmul.bf16.vlgmr.msra.gmra.mxu0 %v7851_v44  ;;  %v6663_v43 = vld [vmem:[%s7759_s16 + $0x34c] sm:$0xf0]  ;;  %v6142_v48 = vld [vmem:[%s7759_s16 + $0x728] sm:$0xf0] }
  0xc1   : > { %2543 = vmatpush.bf16.msrb.mxu0 %v6437_v56  ;;  %2600 = vmatpush.bf16.msrb.mxu3 %v6449_v58  ;;  %v5637_v50 = vor.u32 %v6663_v43, %v5636_v42  ;;  %v6623_v56 = vld [vmem:[%s7759_s16 + $0x20c] sm:$0xf0]  ;;  %v5649_v58 = vor.u32 %v6644_v51, %v5646_v52  ;;  %v6132_v42 = vld [vmem:[%s7759_s16 + $0x680] sm:$0xf]  ;;  %v5980_v51 = vld [vmem:[%s7759_s16 + $0x548] sm:$0xf]  ;;  %v6145_v54 = vor.u32 %v6766_v47, %v6142_v48 }
  0xc2   : > { %2532 = vmatmul.bf16.vlgmr.msra.gmra.mxu3 %v7851_v44  ;;  %v5477_v63 = vor.u32 %v6623_v56, %v5476_v55  ;;  %v6785_v43 = vld [vmem:[%s7759_s16 + $0x71c] sm:$0xf0]  ;;  %v6746_v52 = vld [vmem:[%s7759_s16 + $0x5e4] sm:$0xf0]  ;;  %v6476_v47 = vld [vmem:[%s7759_s16 + $0x918] sm:$0xf] }
  0xc3   : > { %2563 = vmatpush.bf16.msrb.mxu1 %v6281_v7  ;;  %v6452_v7 = vld [vmem:[%s7759_s16 + $0x900] sm:$0xf]  ;;  %v6868_v48 = vld [vmem:[%s7759_s16 + $0x9b4] sm:$0xf0] }
  0xc4   : > { %2582 = vmatpush.bf16.msrb.mxu2 %v6285_v61  ;;  %v6604_v61 = vld [vmem:[%s7759_s16 + $0x17c] sm:$0xf]  ;;  %v5972_v55 = vld [vmem:[%s7759_s16 + $0x540] sm:$0xf]  ;;  %v6477_v60 = vor.u32 %v6868_v48, %v6476_v47 }
  0xc5   : > { %2544 = vmatpush.bf16.msrb.mxu0 %v6277_v0  ;;  %2601 = vmatpush.bf16.msrb.mxu3 %v6289_v8  ;;  %v5486_v0 = vld [vmem:[%s7759_s16 + $0x218] sm:$0xf0]  ;;  %v6865_v8 = vld [vmem:[%s7759_s16 + $0x99c] sm:$0xf0] }
  0xc6   : > { %v5489_v10 = vor.u32 %v6604_v61, %v5486_v0  ;;  %v6745_v56 = vld [vmem:[%s7759_s16 + $0x5dc] sm:$0xf0]  ;;  %v5981_v61 = vor.u32 %v6746_v52, %v5980_v51  ;;  %v6706_v0 = vld [vmem:[%s7759_s16 + $0x4a4] sm:$0xf0]  ;;  %v6847_v51 = vld [vmem:[%s7759_s16 + $0x914] sm:$0xf] }
  0xc7   : > { %2564 = vmatpush.bf16.msrb.mxu1 %v6121_v19  ;;  %v6461_v19 = vor.u32 %v6866_v6, %v6460_v5  ;;  %v6685_v5 = vld [vmem:[%s7759_s16 + $0x404] sm:$0xf] }
  0xc8   : > { %2583 = vmatpush.bf16.msrb.mxu2 %v6125_v11  ;;  %v6563_v11 = vld [vmem:[%s7759_s16 + $0x34] sm:$0xf]  ;;  %v5814_v6 = vld [vmem:[%s7759_s16 + $0x4a0] sm:$0xf0] }
  0xc9   : > { %2545 = vmatpush.bf16.msrb.mxu0 %v6117_v12  ;;  %2602 = vmatpush.bf16.msrb.mxu3 %v6129_v20  ;;  %v5318_v12 = vld [vmem:[%s7759_s16 + $0xd0] sm:$0xf0]  ;;  %v6453_v20 = vor.u32 %v6865_v8, %v6452_v7  ;;  %v6686_v7 = vld [vmem:[%s7759_s16 + $0x40c] sm:$0xf]  ;;  %v5817_v13 = vor.u32 %v6685_v5, %v5814_v6  ;;  %v6808_v6 = vld [vmem:[%s7759_s16 + $0x7dc] sm:$0xf] }
  0xca   : > { %v5321_v27 = vor.u32 %v6563_v11, %v5318_v12  ;;  %v5822_v8 = vld [vmem:[%s7759_s16 + $0x4a8] sm:$0xf0]  ;;  %v5660_v11 = vld [vmem:[%s7759_s16 + $0x2c8] sm:$0xf]  ;;  %v6310_v5 = vld [vmem:[%s7759_s16 + $0x870] sm:$0xf0] }
  0xcb   : > { %2565 = vmatpush.bf16.msrb.mxu1 %v5961_v32  ;;  %v6805_v32 = vld [vmem:[%s7759_s16 + $0x7c4] sm:$0xf]  ;;  %v6666_v12 = vld [vmem:[%s7759_s16 + $0x364] sm:$0xf0] }
  0xcc   : > { %2584 = vmatpush.bf16.msrb.mxu2 %v5965_v23  ;;  %v6300_v23 = vld [vmem:[%s7759_s16 + $0x7c8] sm:$0xf]  ;;  %v6297_v40 = vor.u32 %v6805_v32, %v6294_v35  ;;  %v5661_v21 = vor.u32 %v6666_v12, %v5660_v11  ;;  %v6606_v32 = vld [vmem:[%s7759_s16 + $0x18c] sm:$0xf] }
  0xcd   : > { %2546 = vmatpush.bf16.msrb.mxu0 %v5957_v24  ;;  %2603 = vmatpush.bf16.msrb.mxu3 %v5969_v33  ;;  %v6826_v24 = vld [vmem:[%s7759_s16 + $0x864] sm:$0xf0] }
  0xce   : > { %2499 = vmatmul.bf16.gmra.mxu1 %v7895_v31  ;;  %v6301_v33 = vor.u32 %v6826_v24, %v6300_v23  ;;  %v5500_v23 = vld [vmem:[%s7759_s16 + $0x188] sm:$0xf] }
  0xcf   : > { %2566 = vmatpush.bf16.msrb.mxu1 %v5801_v45  ;;  %2518 = vmatmul.bf16.gmra.mxu2 %v7895_v31  ;;  %v6765_v45 = vld [vmem:[%s7759_s16 + $0x684] sm:$0xf]  ;;  %v6626_v24 = vld [vmem:[%s7759_s16 + $0x224] sm:$0xf0] }
  0xd0   : > { %2585 = vmatpush.bf16.msrb.mxu2 %v5805_v36  ;;  %2480 = vmatmul.bf16.gmra.mxu0 %v7895_v31  ;;  %v6806_v36 = vld [vmem:[%s7759_s16 + $0x7cc] sm:$0xf]  ;;  %v5501_v35 = vor.u32 %v6626_v24, %v5500_v23 }
  0xd1   : > { %2547 = vmatpush.bf16.msrb.mxu0 %v5797_v37  ;;  %2604 = vmatpush.bf16.msrb.mxu3 %v5809_v46  ;;  %v6302_v37 = vld [vmem:[%s7759_s16 + $0x868] sm:$0xf0]  ;;  %v6134_v46 = vld [vmem:[%s7759_s16 + $0x720] sm:$0xf0] }
  0xd2   : > { %2537 = vmatmul.bf16.gmra.mxu3 %v7895_v31  ;;  %v6305_v41 = vor.u32 %v6806_v36, %v6302_v37  ;;  %v6137_v53 = vor.u32 %v6765_v45, %v6134_v46  ;;  %v6586_v37 = vld [vmem:[%s7759_s16 + $0xe4] sm:$0xf0]  ;;  %v6566_v45 = vld [vmem:[%s7759_s16 + $0x4c] sm:$0xf] }
  0xd3   : > { %2567 = vmatpush.bf16.msrb.mxu1 %v5641_v57  ;;  %v6725_v57 = vld [vmem:[%s7759_s16 + $0x544] sm:$0xf]  ;;  %v5342_v46 = vld [vmem:[%s7759_s16 + $0xe8] sm:$0xf0] }
  0xd4   : > { %2586 = vmatpush.bf16.msrb.mxu2 %v5645_v49  ;;  %v6141_v49 = vor.u32 %v6786_v39, %v6140_v38  ;;  %v5332_v38 = vld [vmem:[%s7759_s16 + $0x40] sm:$0xf] }
  0xd5   : > { %2548 = vmatpush.bf16.msrb.mxu0 %v5637_v50  ;;  %2605 = vmatpush.bf16.msrb.mxu3 %v5649_v58  ;;  %v6133_v50 = vor.u32 %v6785_v43, %v6132_v42  ;;  %v5974_v58 = vld [vmem:[%s7759_s16 + $0x5e0] sm:$0xf0]  ;;  %v6585_v39 = vld [vmem:[%s7759_s16 + $0xdc] sm:$0xf0] }
  0xd6   : > { %v5977_v1 = vor.u32 %v6725_v57, %v5974_v58  ;;  %v6565_v42 = vld [vmem:[%s7759_s16 + $0x44] sm:$0xf]  ;;  %v5345_v58 = vor.u32 %v6566_v45, %v5342_v46  ;;  %v6708_v45 = vld [vmem:[%s7759_s16 + $0x4b4] sm:$0xf0] }
  0xd7   : > { %2568 = vmatpush.bf16.msrb.mxu1 %v5481_v9  ;;  %v5334_v43 = vld [vmem:[%s7759_s16 + $0xe0] sm:$0xf0] }
  0xd8   : > { %2587 = vmatpush.bf16.msrb.mxu2 %v5485_v62  ;;  %v5973_v62 = vor.u32 %v6745_v56, %v5972_v55  ;;  %v6848_v55 = vld [vmem:[%s7759_s16 + $0x91c] sm:$0xf]  ;;  %v5337_v57 = vor.u32 %v6565_v42, %v5334_v43  ;;  %v5836_v43 = vld [vmem:[%s7759_s16 + $0x418] sm:$0xf] }
  0xd9   : > { %2549 = vmatpush.bf16.msrb.mxu0 %v5477_v63  ;;  %2606 = vmatpush.bf16.msrb.mxu3 %v5489_v10  ;;  %v5820_v63 = vld [vmem:[%s7759_s16 + $0x408] sm:$0xf]  ;;  %v5813_v10 = vor.u32 %v6705_v4, %v5812_v3  ;;  %v6478_v56 = vld [vmem:[%s7759_s16 + $0x9b8] sm:$0xf0]  ;;  %v6827_v3 = vld [vmem:[%s7759_s16 + $0x86c] sm:$0xf0] }
  0xda   : > { %v5821_v9 = vor.u32 %v6706_v0, %v5820_v63  ;;  %v6828_v63 = vld [vmem:[%s7759_s16 + $0x874] sm:$0xf0]  ;;  %v6807_v4 = vld [vmem:[%s7759_s16 + $0x7d4] sm:$0xf] }
  0xdb   : > { %2569 = vmatpush.bf16.msrb.mxu1 %v5321_v27  ;;  %v5492_v27 = vld [vmem:[%s7759_s16 + $0x180] sm:$0xf]  ;;  %v6313_v11 = vor.u32 %v6807_v4, %v6310_v5  ;;  %v6667_v4 = vld [vmem:[%s7759_s16 + $0x36c] sm:$0xf0] }
  0xdc   : > { %2588 = vmatpush.bf16.msrb.mxu2 %v5325_v14  ;;  %v5825_v14 = vor.u32 %v6686_v7, %v5822_v8  ;;  %v6318_v7 = vld [vmem:[%s7759_s16 + $0x878] sm:$0xf0] }
  0xdd   : > { %2550 = vmatpush.bf16.msrb.mxu0 %v5317_v15  ;;  %2607 = vmatpush.bf16.msrb.mxu3 %v5329_v28  ;;  %v5652_v15 = vld [vmem:[%s7759_s16 + $0x2c0] sm:$0xf]  ;;  %v6321_v12 = vor.u32 %v6808_v6, %v6318_v7  ;;  %v6647_v7 = vld [vmem:[%s7759_s16 + $0x2d4] sm:$0xf] }
  0xde   : > { %2570 = vmatmul.bf16.vlgmr.msrb.gmra.mxu1 %v7851_v44  ;;  %v5653_v22 = vor.u32 %v6665_v16, %v5652_v15  ;;  %v6625_v28 = vld [vmem:[%s7759_s16 + $0x21c] sm:$0xf0]  ;;  %v6788_v15 = vld [vmem:[%s7759_s16 + $0x734] sm:$0xf0]  ;;  %v6148_v16 = vld [vmem:[%s7759_s16 + $0x690] sm:$0xf] }
  0xdf   : > { %2638 = vmatpush.bf16.msra.mxu1 %v6457_v29  ;;  %2589 = vmatmul.bf16.vlgmr.msrb.gmra.mxu2 %v7851_v44  ;;  %v6605_v29 = vld [vmem:[%s7759_s16 + $0x184] sm:$0xf]  ;;  %v5493_v36 = vor.u32 %v6625_v28, %v5492_v27  ;;  %v6149_v27 = vor.u32 %v6787_v17, %v6148_v16  ;;  %v5996_v28 = vld [vmem:[%s7759_s16 + $0x558] sm:$0xf] }
  0xe0   : > { %2657 = vmatpush.bf16.msra.mxu2 %v6461_v19  ;;  %2551 = vmatmul.bf16.vlgmr.msrb.gmra.mxu0 %v7851_v44  ;;  %v6646_v19 = vld [vmem:[%s7759_s16 + $0x2cc] sm:$0xf]  ;;  %v6628_v16 = vld [vmem:[%s7759_s16 + $0x234] sm:$0xf0] }
  0xe1   : > { %2619 = vmatpush.bf16.msra.mxu0 %v6453_v20  ;;  %2676 = vmatpush.bf16.msra.mxu3 %v6465_v30  ;;  %v5662_v20 = vld [vmem:[%s7759_s16 + $0x368] sm:$0xf0]  ;;  %v5494_v30 = vld [vmem:[%s7759_s16 + $0x220] sm:$0xf0] }
  0xe2   : > { %2608 = vmatmul.bf16.vlgmr.msrb.gmra.mxu3 %v7851_v44  ;;  %v5665_v26 = vor.u32 %v6646_v19, %v5662_v20  ;;  %v6150_v20 = vld [vmem:[%s7759_s16 + $0x730] sm:$0xf0] }
  0xe3   : > { %2639 = vmatpush.bf16.msra.mxu1 %v6297_v40  ;;  %v5497_v40 = vor.u32 %v6605_v29, %v5494_v30  ;;  %v6748_v29 = vld [vmem:[%s7759_s16 + $0x5f4] sm:$0xf0]  ;;  %v5988_v30 = vld [vmem:[%s7759_s16 + $0x550] sm:$0xf] }
  0xe4   : > { %2658 = vmatpush.bf16.msra.mxu2 %v6301_v33  ;;  %v5502_v33 = vld [vmem:[%s7759_s16 + $0x228] sm:$0xf0] }
  0xe5   : > { %2620 = vmatpush.bf16.msra.mxu0 %v6293_v34  ;;  %2677 = vmatpush.bf16.msra.mxu3 %v6305_v41  ;;  %v5340_v34 = vld [vmem:[%s7759_s16 + $0x48] sm:$0xf]  ;;  %v5505_v41 = vor.u32 %v6606_v32, %v5502_v33  ;;  %v6153_v32 = vor.u32 %v6767_v18, %v6150_v20  ;;  %v5508_v20 = vld [vmem:[%s7759_s16 + $0x190] sm:$0xf] }
  0xe6   : > { %v5341_v52 = vor.u32 %v6586_v37, %v5340_v34  ;;  %v6747_v34 = vld [vmem:[%s7759_s16 + $0x5ec] sm:$0xf0]  ;;  %v8188_v37 = vperm.slane %v8151_v59, 2 }
  0xe7   : > { %2640 = vmatpush.bf16.msra.mxu1 %v6137_v53  ;;  %v5333_v53 = vor.u32 %v6585_v39, %v5332_v38  ;;  %v6728_v38 = vld [vmem:[%s7759_s16 + $0x55c] sm:$0xf]  ;;  %v5989_v42 = vor.u32 %v6747_v34, %v5988_v30  ;;  %v6588_v34 = vld [vmem:[%s7759_s16 + $0xf4] sm:$0xf0] }
  0xe8   : > { %2659 = vmatpush.bf16.msra.mxu2 %v6141_v49  ;;  %v6468_v49 = vld [vmem:[%s7759_s16 + $0x910] sm:$0xf]  ;;  %v5998_v39 = vld [vmem:[%s7759_s16 + $0x5f8] sm:$0xf0] }
  0xe9   : > { %2621 = vmatpush.bf16.msra.mxu0 %v6133_v50  ;;  %2678 = vmatpush.bf16.msra.mxu3 %v6145_v54  ;;  %v6867_v50 = vld [vmem:[%s7759_s16 + $0x9ac] sm:$0xf0]  ;;  %v6470_v54 = vld [vmem:[%s7759_s16 + $0x9b0] sm:$0xf0]  ;;  %v6001_v48 = vor.u32 %v6728_v38, %v5998_v39 }
  0xea   : > { %v6473_v0 = vor.u32 %v6847_v51, %v6470_v54  ;;  %v6687_v51 = vld [vmem:[%s7759_s16 + $0x414] sm:$0xf] }
  0xeb   : > { %2641 = vmatpush.bf16.msra.mxu1 %v5977_v1  ;;  %v6481_v1 = vor.u32 %v6848_v55, %v6478_v56  ;;  %v5830_v55 = vld [vmem:[%s7759_s16 + $0x4b0] sm:$0xf0]  ;;  %v6688_v56 = vld [vmem:[%s7759_s16 + $0x41c] sm:$0xf] }
  0xec   : > { %2660 = vmatpush.bf16.msra.mxu2 %v5981_v61  ;;  %v6469_v61 = vor.u32 %v6867_v50, %v6468_v49  ;;  %v5828_v49 = vld [vmem:[%s7759_s16 + $0x410] sm:$0xf]  ;;  %v5833_v5 = vor.u32 %v6687_v51, %v5830_v55  ;;  %v6484_v51 = vld [vmem:[%s7759_s16 + $0x920] sm:$0xf] }
  0xed   : > { %2622 = vmatpush.bf16.msra.mxu0 %v5973_v62  ;;  %2679 = vmatpush.bf16.msra.mxu3 %v5985_v2  ;;  %v6316_v62 = vld [vmem:[%s7759_s16 + $0x7d8] sm:$0xf]  ;;  %v6308_v2 = vld [vmem:[%s7759_s16 + $0x7d0] sm:$0xf] }
  0xee   : > { %2575 = vmatmul.bf16.gmra.mxu1 %v7895_v31  ;;  %v6317_v8 = vor.u32 %v6828_v63, %v6316_v62  ;;  %v6707_v50 = vld [vmem:[%s7759_s16 + $0x4ac] sm:$0xf0]  ;;  %v5676_v62 = vld [vmem:[%s7759_s16 + $0x2d8] sm:$0xf] }
  0xef   : > { %2642 = vmatpush.bf16.msra.mxu1 %v5817_v13  ;;  %2594 = vmatmul.bf16.gmra.mxu2 %v7895_v31  ;;  %v8165_v13 = vperm.slane %v8151_v59, 1  ;;  %v6668_v63 = vld [vmem:[%s7759_s16 + $0x374] sm:$0xf0] }
  0xf0   : > { %2661 = vmatpush.bf16.msra.mxu2 %v5821_v9  ;;  %2556 = vmatmul.bf16.gmra.mxu0 %v7895_v31  ;;  %v6309_v9 = vor.u32 %v6827_v3, %v6308_v2  ;;  %v5829_v2 = vor.u32 %v6707_v50, %v5828_v49  ;;  %v5668_v3 = vld [vmem:[%s7759_s16 + $0x2d0] sm:$0xf]  ;;  %v6492_v49 = vld [vmem:[%s7759_s16 + $0x928] sm:$0xf] }
  0xf1   : > { %2623 = vmatpush.bf16.msra.mxu0 %v5813_v10  ;;  %2680 = vmatpush.bf16.msra.mxu3 %v5825_v14  ;;  %v8162_v10 = vperm.slane %v8151_v59, 0  ;;  %v6156_v14 = vld [vmem:[%s7759_s16 + $0x698] sm:$0xf]  ;;  %v6870_v50 = vld [vmem:[%s7759_s16 + $0x9c4] sm:$0xf0] }
  0xf2   : > { %2613 = vmatmul.bf16.gmra.mxu3 %v7895_v31 }
  0xf3   : > { %2643 = vmatpush.bf16.msra.mxu1 %v5657_v25 }
  0xf4   : > { %2662 = vmatpush.bf16.msra.mxu2 %v5661_v21  ;;  %v6768_v21 = vld [vmem:[%s7759_s16 + $0x69c] sm:$0xf] }
  0xf5   : > { %2624 = vmatpush.bf16.msra.mxu0 %v5653_v22  ;;  %2681 = vmatpush.bf16.msra.mxu3 %v5665_v26  ;;  %v6158_v22 = vld [vmem:[%s7759_s16 + $0x738] sm:$0xf0]  ;;  %v6157_v26 = vor.u32 %v6788_v15, %v6156_v14  ;;  %v5669_v14 = vor.u32 %v6667_v4, %v5668_v3  ;;  %v5516_v15 = vld [vmem:[%s7759_s16 + $0x198] sm:$0xf]  ;;  %v6332_v4 = vld [vmem:[%s7759_s16 + $0x7e8] sm:$0xf] }
  0xf6   : > { %v6161_v33 = vor.u32 %v6768_v21, %v6158_v22  ;;  %v6627_v21 = vld [vmem:[%s7759_s16 + $0x22c] sm:$0xf0]  ;;  %v6607_v22 = vld [vmem:[%s7759_s16 + $0x194] sm:$0xf]  ;;  %v5517_v38 = vor.u32 %v6628_v16, %v5516_v15  ;;  %v6809_v15 = vld [vmem:[%s7759_s16 + $0x7e4] sm:$0xf] }
  0xf7   : > { %2644 = vmatpush.bf16.msra.mxu1 %v5497_v40  ;;  %v8195_v40 = vperm.slane %v8151_v59, 3  ;;  %v5509_v39 = vor.u32 %v6627_v21, %v5508_v20  ;;  %v6326_v16 = vld [vmem:[%s7759_s16 + $0x880] sm:$0xf0] }
  0xf8   : > { %2663 = vmatpush.bf16.msra.mxu2 %v5501_v35  ;;  %v6727_v35 = vld [vmem:[%s7759_s16 + $0x554] sm:$0xf] }
  0xf9   : > { %2625 = vmatpush.bf16.msra.mxu0 %v5493_v36  ;;  %2682 = vmatpush.bf16.msra.mxu3 %v5505_v41  ;;  %v5990_v36 = vld [vmem:[%s7759_s16 + $0x5f0] sm:$0xf0]  ;;  %v5997_v41 = vor.u32 %v6748_v29, %v5996_v28  ;;  %v5518_v28 = vld [vmem:[%s7759_s16 + $0x238] sm:$0xf0] }
  0xfa   : > { %v5993_v47 = vor.u32 %v6727_v35, %v5990_v36  ;;  %v5348_v35 = vld [vmem:[%s7759_s16 + $0x50] sm:$0xf] }
  0xfb   : > { %2645 = vmatpush.bf16.msra.mxu1 %v5337_v57  ;;  %v2324_v19 = vpop.f32.mrf.mxu0  ;;  %v2343_v24 = vpop.f32.mrf.mxu1  ;;  %v5838_v57 = vld [vmem:[%s7759_s16 + $0x4b8] sm:$0xf0]  ;;  %v6587_v36 = vld [vmem:[%s7759_s16 + $0xec] sm:$0xf0] }
  0xfc   : > { %2664 = vmatpush.bf16.msra.mxu2 %v5341_v52  ;;  %v2325_v23 = vadd.f32 %v2324_v19, %v8162_v10  ;;  %v2344_v25 = vadd.f32 %v2343_v24, %v8165_v13  ;;  %v5841_v6 = vor.u32 %v6688_v56, %v5838_v57  ;;  %v5349_v55 = vor.u32 %v6587_v36, %v5348_v35  ;;  %v6486_v56 = vld [vmem:[%s7759_s16 + $0x9c0] sm:$0xf0]  ;;  %v6850_v57 = vld [vmem:[%s7759_s16 + $0x92c] sm:$0xf] }
  0xfd   : > { %2626 = vmatpush.bf16.msra.mxu0 %v5333_v53  ;;  %2683 = vmatpush.bf16.msra.mxu3 %v5345_v58  ;;  %v6174_v35 = vld [vmem:[%s7759_s16 + $0x748] sm:$0xf0] }
  0xfe   : > { %3075 = vst [vmem:[%s7771_s11] sm:$0xff] %v2325_v23  ;;  %2646 = vmatmul.bf16.vlgmr.msra.gmra.mxu1 %v7851_v44 }
  0xff   : > { %2714 = vmatpush.bf16.msrb.mxu1 %v6473_v0  ;;  %3076 = vst [vmem:[%s7771_s11 + $0x8] sm:$0xff] %v2344_v25  ;;  %2665 = vmatmul.bf16.vlgmr.msra.gmra.mxu2 %v7851_v44 }
 0x100   : > { %2733 = vmatpush.bf16.msrb.mxu2 %v6477_v60  ;;  %2627 = vmatmul.bf16.vlgmr.msra.gmra.mxu0 %v7851_v44 }
 0x101   : > { %2695 = vmatpush.bf16.msrb.mxu0 %v6469_v61  ;;  %2752 = vmatpush.bf16.msrb.mxu3 %v6481_v1  ;;  %v5837_v1 = vor.u32 %v6708_v45, %v5836_v43  ;;  %v6568_v43 = vld [vmem:[%s7759_s16 + $0x5c] sm:$0xf] }
 0x102   : > { %2684 = vmatmul.bf16.vlgmr.msra.gmra.mxu3 %v7851_v44  ;;  %v2362_v46 = vpop.f32.mrf.mxu2 }
 0x103   : > { %2715 = vmatpush.bf16.msrb.mxu1 %v6313_v11  ;;  %v2363_v52 = vadd.f32 %v2362_v46, %v8188_v37  ;;  %v2381_v53 = vpop.f32.mrf.mxu3  ;;  %v2326_v54 = vpop.f32.mrf.mxu0  ;;  %v5678_v11 = vld [vmem:[%s7759_s16 + $0x378] sm:$0xf0] }
 0x104   : > { %2734 = vmatpush.bf16.msrb.mxu2 %v6317_v8  ;;  %v2382_v58 = vadd.f32 %v2381_v53, %v8195_v40  ;;  %v2327_v60 = vadd.f32 %v2326_v54, %v8162_v10  ;;  %v2345_v61 = vpop.f32.mrf.mxu1  ;;  %v5670_v8 = vld [vmem:[%s7759_s16 + $0x370] sm:$0xf0]  ;;  %v6849_v53 = vld [vmem:[%s7759_s16 + $0x924] sm:$0xf] }
 0x105   : > { %2696 = vmatpush.bf16.msrb.mxu0 %v6309_v9  ;;  %2753 = vmatpush.bf16.msrb.mxu3 %v6321_v12  ;;  %3077 = vst [vmem:[%s7771_s11 + $0x10] sm:$0xff] %v2363_v52  ;;  %v2346_v0 = vadd.f32 %v2345_v61, %v8165_v13  ;;  %v6648_v9 = vld [vmem:[%s7759_s16 + $0x2dc] sm:$0xf]  ;;  %v5677_v12 = vor.u32 %v6668_v63, %v5676_v62  ;;  %v6869_v52 = vld [vmem:[%s7759_s16 + $0x9bc] sm:$0xf0] }
 0x106   : > { %3078 = vst [vmem:[%s7771_s11 + $0x18] sm:$0xff] %v2382_v58  ;;  %v5673_v18 = vor.u32 %v6647_v7, %v5670_v8  ;;  %v5681_v19 = vor.u32 %v6648_v9, %v5678_v11  ;;  %v6494_v58 = vld [vmem:[%s7759_s16 + $0x9c8] sm:$0xf0]  ;;  %v6485_v3 = vor.u32 %v6869_v52, %v6484_v51  ;;  %v6489_v11 = vor.u32 %v6849_v53, %v6486_v56  ;;  %v6006_v51 = vld [vmem:[%s7759_s16 + $0x600] sm:$0xf0] }
 0x107   : > { %2716 = vmatpush.bf16.msrb.mxu1 %v6153_v32  ;;  %3115 = vst [vmem:[%s7771_s11 + $0x140] sm:$0xff] %v2327_v60  ;;  %v6730_v52 = vld [vmem:[%s7759_s16 + $0x56c] sm:$0xf] }
 0x108   : > { %2735 = vmatpush.bf16.msrb.mxu2 %v6157_v26  ;;  %3116 = vst [vmem:[%s7771_s11 + $0x148] sm:$0xff] %v2346_v0  ;;  %v5510_v26 = vld [vmem:[%s7759_s16 + $0x230] sm:$0xf0]  ;;  %v6014_v53 = vld [vmem:[%s7759_s16 + $0x608] sm:$0xf0] }
 0x109   : > { %2697 = vmatpush.bf16.msrb.mxu0 %v6149_v27  ;;  %2754 = vmatpush.bf16.msrb.mxu3 %v6161_v33  ;;  %v6608_v27 = vld [vmem:[%s7759_s16 + $0x19c] sm:$0xf]  ;;  %v5356_v33 = vld [vmem:[%s7759_s16 + $0x58] sm:$0xf]  ;;  %v5513_v46 = vor.u32 %v6607_v22, %v5510_v26  ;;  %v8274_v22 = vperm.slane %v8151_v59, 4 }
 0x10a   : > { %v2364_v17 = vpop.f32.mrf.mxu2  ;;  %v5357_v54 = vor.u32 %v6588_v34, %v5356_v33  ;;  %v6166_v33 = vld [vmem:[%s7759_s16 + $0x740] sm:$0xf0]  ;;  %v6770_v34 = vld [vmem:[%s7759_s16 + $0x6ac] sm:$0xf] }
 0x10b   : > { %2717 = vmatpush.bf16.msrb.mxu1 %v5993_v47  ;;  %v2365_v23 = vadd.f32 %v2364_v17, %v8188_v37  ;;  %v2383_v24 = vpop.f32.mrf.mxu3  ;;  %v2329_v25 = vpop.f32.mrf.mxu0  ;;  %v5521_v47 = vor.u32 %v6608_v27, %v5518_v28  ;;  %v6164_v27 = vld [vmem:[%s7759_s16 + $0x6a0] sm:$0xf] }
 0x10c   : > { %2736 = vmatpush.bf16.msrb.mxu2 %v5997_v41  ;;  %v2384_v29 = vadd.f32 %v2383_v24, %v8195_v40  ;;  %v2330_v30 = vadd.f32 %v2329_v25, %v8162_v10  ;;  %v2348_v32 = vpop.f32.mrf.mxu1  ;;  %v6567_v41 = vld [vmem:[%s7759_s16 + $0x54] sm:$0xf]  ;;  %v6172_v24 = vld [vmem:[%s7759_s16 + $0x6a8] sm:$0xf]  ;;  %v6789_v28 = vld [vmem:[%s7759_s16 + $0x73c] sm:$0xf0] }
 0x10d   : > { %2698 = vmatpush.bf16.msrb.mxu0 %v5989_v42  ;;  %2755 = vmatpush.bf16.msrb.mxu3 %v6001_v48  ;;  %3117 = vst [vmem:[%s7771_s11 + $0x150] sm:$0xff] %v2365_v23  ;;  %v5350_v42 = vld [vmem:[%s7759_s16 + $0xf0] sm:$0xf0]  ;;  %v2349_v45 = vadd.f32 %v2348_v32, %v8165_v13  ;;  %v5358_v48 = vld [vmem:[%s7759_s16 + $0xf8] sm:$0xf0]  ;;  %v8277_v23 = vperm.slane %v8151_v59, 5 }
 0x10e   : > { %3118 = vst [vmem:[%s7771_s11 + $0x158] sm:$0xff] %v2384_v29  ;;  %2651 = vmatmul.bf16.gmra.mxu1 %v7895_v31  ;;  %v5353_v61 = vor.u32 %v6567_v41, %v5350_v42  ;;  %v5361_v62 = vor.u32 %v6568_v43, %v5358_v48  ;;  %v6790_v25 = vld [vmem:[%s7759_s16 + $0x744] sm:$0xf0]  ;;  %v6769_v29 = vld [vmem:[%s7759_s16 + $0x6a4] sm:$0xf] }
 0x10f   : > { %2718 = vmatpush.bf16.msrb.mxu1 %v5833_v5  ;;  %3155 = vst [vmem:[%s7771_s11 + $0x280] sm:$0xff] %v2330_v30  ;;  %2670 = vmatmul.bf16.gmra.mxu2 %v7895_v31  ;;  %v6830_v5 = vld [vmem:[%s7759_s16 + $0x884] sm:$0xf0]  ;;  %v6173_v43 = vor.u32 %v6790_v25, %v6172_v24  ;;  %v6169_v48 = vor.u32 %v6769_v29, %v6166_v33  ;;  %v6650_v24 = vld [vmem:[%s7759_s16 + $0x2ec] sm:$0xf] }
 0x110   : > { %2737 = vmatpush.bf16.msrb.mxu2 %v5837_v1  ;;  %2632 = vmatmul.bf16.gmra.mxu0 %v7895_v31  ;;  %3156 = vst [vmem:[%s7771_s11 + $0x288] sm:$0xff] %v2349_v45  ;;  %v6012_v41 = vld [vmem:[%s7759_s16 + $0x568] sm:$0xf]  ;;  %v6165_v45 = vor.u32 %v6789_v28, %v6164_v27  ;;  %v5694_v25 = vld [vmem:[%s7759_s16 + $0x388] sm:$0xf0] }
 0x111   : > { %2699 = vmatpush.bf16.msrb.mxu0 %v5829_v2  ;;  %2756 = vmatpush.bf16.msrb.mxu3 %v5841_v6  ;;  %v6493_v2 = vor.u32 %v6870_v50, %v6492_v49  ;;  %v6324_v6 = vld [vmem:[%s7759_s16 + $0x7e0] sm:$0xf]  ;;  %v6177_v49 = vor.u32 %v6770_v34, %v6174_v35  ;;  %v6729_v50 = vld [vmem:[%s7759_s16 + $0x564] sm:$0xf]  ;;  %v5532_v28 = vld [vmem:[%s7759_s16 + $0x1a8] sm:$0xf] }
 0x112   : > { %2689 = vmatmul.bf16.gmra.mxu3 %v7895_v31  ;;  %v2367_v60 = vpop.f32.mrf.mxu2  ;;  %v6630_v29 = vld [vmem:[%s7759_s16 + $0x244] sm:$0xf0]  ;;  %v5524_v33 = vld [vmem:[%s7759_s16 + $0x1a0] sm:$0xf]  ;;  %v6609_v35 = vld [vmem:[%s7759_s16 + $0x1a4] sm:$0xf] }
 0x113   : > { %2719 = vmatpush.bf16.msrb.mxu1 %v5673_v18  ;;  %v2368_v63 = vadd.f32 %v2367_v60, %v8188_v37  ;;  %v2386_v0 = vpop.f32.mrf.mxu3  ;;  %v2331_v1 = vpop.f32.mrf.mxu0  ;;  %v6810_v18 = vld [vmem:[%s7759_s16 + $0x7ec] sm:$0xf]  ;;  %v6710_v60 = vld [vmem:[%s7759_s16 + $0x4c4] sm:$0xf0]  ;;  %v6629_v34 = vld [vmem:[%s7759_s16 + $0x23c] sm:$0xf0] }
 0x114   : > { %2738 = vmatpush.bf16.msrb.mxu2 %v5677_v12  ;;  %v2387_v7 = vadd.f32 %v2386_v0, %v8195_v40  ;;  %v2332_v8 = vadd.f32 %v2331_v1, %v8162_v10  ;;  %v2350_v9 = vpop.f32.mrf.mxu1  ;;  %v6497_v12 = vor.u32 %v6850_v57, %v6494_v58  ;;  %v6333_v10 = vor.u32 %v6830_v5, %v6332_v4  ;;  %v5852_v58 = vld [vmem:[%s7759_s16 + $0x428] sm:$0xf]  ;;  %v6709_v0 = vld [vmem:[%s7759_s16 + $0x4bc] sm:$0xf0]  ;;  %v6689_v1 = vld [vmem:[%s7759_s16 + $0x424] sm:$0xf] }
 0x115   : > { %2700 = vmatpush.bf16.msrb.mxu0 %v5669_v14  ;;  %2757 = vmatpush.bf16.msrb.mxu3 %v5681_v19  ;;  %v6829_v14 = vld [vmem:[%s7759_s16 + $0x87c] sm:$0xf0]  ;;  %3157 = vst [vmem:[%s7771_s11 + $0x290] sm:$0xff] %v2368_v63  ;;  %v2351_v17 = vadd.f32 %v2350_v9, %v8165_v13  ;;  %v6334_v19 = vld [vmem:[%s7759_s16 + $0x888] sm:$0xf0]  ;;  %v6329_v13 = vor.u32 %v6809_v15, %v6326_v16 }
 0x116   : > { %3158 = vst [vmem:[%s7771_s11 + $0x298] sm:$0xff] %v2387_v7  ;;  %v6325_v20 = vor.u32 %v6829_v14, %v6324_v6  ;;  %v6337_v21 = vor.u32 %v6810_v18, %v6334_v19  ;;  %v5844_v63 = vld [vmem:[%s7759_s16 + $0x420] sm:$0xf]  ;;  %v6690_v4 = vld [vmem:[%s7759_s16 + $0x42c] sm:$0xf] }
 0x117   : > { %2720 = vmatpush.bf16.msrb.mxu1 %v5513_v46  ;;  %3195 = vst [vmem:[%s7771_s11 + $0x3c0] sm:$0xff] %v2332_v8  ;;  %v6004_v46 = vld [vmem:[%s7759_s16 + $0x560] sm:$0xf]  ;;  %v5854_v5 = vld [vmem:[%s7759_s16 + $0x4c8] sm:$0xf0]  ;;  %v5845_v16 = vor.u32 %v6709_v0, %v5844_v63 }
 0x118   : > { %2739 = vmatpush.bf16.msrb.mxu2 %v5517_v38  ;;  %3196 = vst [vmem:[%s7771_s11 + $0x3c8] sm:$0xff] %v2351_v17  ;;  %v6670_v17 = vld [vmem:[%s7759_s16 + $0x384] sm:$0xf0]  ;;  %v5684_v18 = vld [vmem:[%s7759_s16 + $0x2e0] sm:$0xf] }
 0x119   : > { %2701 = vmatpush.bf16.msrb.mxu0 %v5509_v39  ;;  %2758 = vmatpush.bf16.msrb.mxu3 %v5521_v47  ;;  %v6749_v47 = vld [vmem:[%s7759_s16 + $0x5fc] sm:$0xf0]  ;;  %v6872_v63 = vld [vmem:[%s7759_s16 + $0x9d4] sm:$0xf0] }
 0x11a   : > { %v2369_v26 = vpop.f32.mrf.mxu2  ;;  %v6005_v57 = vor.u32 %v6749_v47, %v6004_v46  ;;  %v6669_v19 = vld [vmem:[%s7759_s16 + $0x37c] sm:$0xf0]  ;;  %v5372_v47 = vld [vmem:[%s7759_s16 + $0x68] sm:$0xf] }
 0x11b   : > { %2721 = vmatpush.bf16.msrb.mxu1 %v5353_v61  ;;  %v2370_v30 = vadd.f32 %v2369_v26, %v8188_v37  ;;  %v2388_v32 = vpop.f32.mrf.mxu3  ;;  %v6750_v37 = vld [vmem:[%s7759_s16 + $0x604] sm:$0xf0]  ;;  %v6009_v61 = vor.u32 %v6729_v50, %v6006_v51  ;;  %v5685_v27 = vor.u32 %v6669_v19, %v5684_v18  ;;  %v5533_v50 = vor.u32 %v6630_v29, %v5532_v28  ;;  %v6832_v18 = vld [vmem:[%s7759_s16 + $0x894] sm:$0xf0] }
 0x11c   : > { %2740 = vmatpush.bf16.msrb.mxu2 %v5357_v54  ;;  %v2389_v36 = vadd.f32 %v2388_v32, %v8195_v40  ;;  %v2419_v39 = vpop.f32.mrf.mxu1  ;;  %v8308_v54 = vperm.slane %v8151_v59, 6  ;;  %v6013_v56 = vor.u32 %v6750_v37, %v6012_v41  ;;  %v5697_v32 = vor.u32 %v6650_v24, %v5694_v25  ;;  %v6610_v41 = vld [vmem:[%s7759_s16 + $0x1ac] sm:$0xf]  ;;  %v6340_v25 = vld [vmem:[%s7759_s16 + $0x7f0] sm:$0xf] }
 0x11d   : > { %2702 = vmatpush.bf16.msrb.mxu0 %v5349_v55  ;;  %2759 = vmatpush.bf16.msrb.mxu3 %v5361_v62  ;;  %v2400_v38 = vpop.f32.mrf.mxu0  ;;  %3197 = vst [vmem:[%s7771_s11 + $0x3d0] sm:$0xff] %v2370_v30  ;;  %v2420_v40 = vadd.f32 %v2419_v39, %v8277_v23  ;;  %v8311_v55 = vperm.slane %v8151_v59, 7  ;;  %v6017_v62 = vor.u32 %v6730_v52, %v6014_v53  ;;  %v5526_v39 = vld [vmem:[%s7759_s16 + $0x240] sm:$0xf0]  ;;  %v5534_v37 = vld [vmem:[%s7759_s16 + $0x248] sm:$0xf0] }
 0x11e   : > { %v2401_v42 = vadd.f32 %v2400_v38, %v8274_v22  ;;  %3198 = vst [vmem:[%s7771_s11 + $0x3d8] sm:$0xff] %v2389_v36  ;;  %2722 = vmatmul.bf16.vlgmr.msrb.gmra.mxu1 %v7851_v44  ;;  %v5525_v51 = vor.u32 %v6629_v34, %v5524_v33  ;;  %v6569_v52 = vld [vmem:[%s7759_s16 + $0x64] sm:$0xf]  ;;  %v6350_v33 = vld [vmem:[%s7759_s16 + $0x898] sm:$0xf0] }
 0x11f   : > { %2790 = vmatpush.bf16.msra.mxu1 %v6489_v11  ;;  %3080 = vst [vmem:[%s7771_s11 + $0x28] sm:$0xff] %v2420_v40  ;;  %2741 = vmatmul.bf16.vlgmr.msrb.gmra.mxu2 %v7851_v44  ;;  %v5853_v11 = vor.u32 %v6710_v60, %v5852_v58  ;;  %v6590_v40 = vld [vmem:[%s7759_s16 + $0x104] sm:$0xf0]  ;;  %v5366_v53 = vld [vmem:[%s7759_s16 + $0x100] sm:$0xf0]  ;;  %v5529_v60 = vor.u32 %v6609_v35, %v5526_v39 }
 0x120   : > { %2809 = vmatpush.bf16.msra.mxu2 %v6493_v2  ;;  %3079 = vst [vmem:[%s7771_s11 + $0x20] sm:$0xff] %v2401_v42  ;;  %2703 = vmatmul.bf16.vlgmr.msrb.gmra.mxu0 %v7851_v44  ;;  %v6188_v39 = vld [vmem:[%s7759_s16 + $0x6b8] sm:$0xf] }
 0x121   : > { %2771 = vmatpush.bf16.msra.mxu0 %v6485_v3  ;;  %2828 = vmatpush.bf16.msra.mxu3 %v6497_v12  ;;  %v5846_v3 = vld [vmem:[%s7759_s16 + $0x4c0] sm:$0xf0]  ;;  %v5692_v12 = vld [vmem:[%s7759_s16 + $0x2e8] sm:$0xf] }
 0x122   : > { %2760 = vmatmul.bf16.vlgmr.msrb.gmra.mxu3 %v7851_v44  ;;  %v2438_v2 = vpop.f32.mrf.mxu2  ;;  %v5693_v26 = vor.u32 %v6670_v17, %v5692_v12  ;;  %v6348_v17 = vld [vmem:[%s7759_s16 + $0x7f8] sm:$0xf] }
 0x123   : > { %2791 = vmatpush.bf16.msra.mxu1 %v6329_v13  ;;  %v2439_v6 = vadd.f32 %v2438_v2, %v8308_v54  ;;  %v6649_v13 = vld [vmem:[%s7759_s16 + $0x2e4] sm:$0xf]  ;;  %v6871_v2 = vld [vmem:[%s7759_s16 + $0x9cc] sm:$0xf0] }
 0x124   : > { %2810 = vmatpush.bf16.msra.mxu2 %v6333_v10  ;;  %v2421_v9 = vpop.f32.mrf.mxu1  ;;  %v5849_v10 = vor.u32 %v6689_v1, %v5846_v3  ;;  %v6500_v1 = vld [vmem:[%s7759_s16 + $0x930] sm:$0xf]  ;;  %v6502_v3 = vld [vmem:[%s7759_s16 + $0x9d0] sm:$0xf0] }
 0x125   : > { %2772 = vmatpush.bf16.msra.mxu0 %v6325_v20  ;;  %2829 = vmatpush.bf16.msra.mxu3 %v6337_v21  ;;  %v2457_v59 = vpop.f32.mrf.mxu3  ;;  %v2402_v8 = vpop.f32.mrf.mxu0  ;;  %v2422_v15 = vadd.f32 %v2421_v9, %v8277_v23  ;;  %3081 = vst [vmem:[%s7771_s11 + $0x30] sm:$0xff] %v2439_v6  ;;  %v5857_v20 = vor.u32 %v6690_v4, %v5854_v5  ;;  %v5686_v21 = vld [vmem:[%s7759_s16 + $0x380] sm:$0xf0]  ;;  %v6852_v6 = vld [vmem:[%s7759_s16 + $0x93c] sm:$0xf] }
 0x126   : > { %v2458_v7 = vadd.f32 %v2457_v59, %v8311_v55  ;;  %v2403_v14 = vadd.f32 %v2402_v8, %v8274_v22  ;;  %v5689_v30 = vor.u32 %v6649_v13, %v5686_v21  ;;  %v6851_v59 = vld [vmem:[%s7759_s16 + $0x934] sm:$0xf]  ;;  %v5373_v4 = vor.u32 %v6590_v40, %v5372_v47  ;;  %v6772_v40 = vld [vmem:[%s7759_s16 + $0x6bc] sm:$0xf] }
 0x127   : > { %2792 = vmatpush.bf16.msra.mxu1 %v6169_v48  ;;  %3120 = vst [vmem:[%s7771_s11 + $0x168] sm:$0xff] %v2422_v15  ;;  %v5364_v48 = vld [vmem:[%s7759_s16 + $0x60] sm:$0xf]  ;;  %v5369_v8 = vor.u32 %v6569_v52, %v5366_v53  ;;  %v6505_v21 = vor.u32 %v6851_v59, %v6502_v3  ;;  %v6182_v47 = vld [vmem:[%s7759_s16 + $0x750] sm:$0xf0] }
 0x128   : > { %2811 = vmatpush.bf16.msra.mxu2 %v6173_v43  ;;  %3082 = vst [vmem:[%s7771_s11 + $0x38] sm:$0xff] %v2458_v7  ;;  %v6510_v7 = vld [vmem:[%s7759_s16 + $0x9d8] sm:$0xf0]  ;;  %v6028_v53 = vld [vmem:[%s7759_s16 + $0x578] sm:$0xf] }
 0x129   : > { %2773 = vmatpush.bf16.msra.mxu0 %v6165_v45  ;;  %2830 = vmatpush.bf16.msra.mxu3 %v6177_v49  ;;  %3119 = vst [vmem:[%s7771_s11 + $0x160] sm:$0xff] %v2403_v14  ;;  %v6589_v49 = vld [vmem:[%s7759_s16 + $0xfc] sm:$0xf0]  ;;  %v8374_v14 = vld [vmem:[%s7765_s7 + $0x8] sm:$0xff]  ;;  %v6513_v24 = vor.u32 %v6852_v6, %v6510_v7  ;;  %v6030_v59 = vld [vmem:[%s7759_s16 + $0x618] sm:$0xf0] }
 0x12a   : > { %v2440_v36 = vpop.f32.mrf.mxu2  ;;  %v5365_v5 = vor.u32 %v6589_v49, %v5364_v48  ;;  %v6190_v48 = vld [vmem:[%s7759_s16 + $0x758] sm:$0xf0]  ;;  %v8426_v3 = vperm.slane %v8374_v14, 2  ;;  %v5868_v7 = vld [vmem:[%s7759_s16 + $0x438] sm:$0xf] }
 0x12b   : > { %2793 = vmatpush.bf16.msra.mxu1 %v6009_v61  ;;  %v2441_v42 = vadd.f32 %v2440_v36, %v8308_v54  ;;  %v5537_v61 = vor.u32 %v6610_v41, %v5534_v37  ;;  %v6792_v41 = vld [vmem:[%s7759_s16 + $0x754] sm:$0xf0]  ;;  %v6180_v37 = vld [vmem:[%s7759_s16 + $0x6b0] sm:$0xf] }
 0x12c   : > { %2812 = vmatpush.bf16.msra.mxu2 %v6013_v56  ;;  %v2424_v46 = vpop.f32.mrf.mxu1  ;;  %v6570_v56 = vld [vmem:[%s7759_s16 + $0x6c] sm:$0xf] }
 0x12d   : > { %2774 = vmatpush.bf16.msra.mxu0 %v6005_v57  ;;  %2831 = vmatpush.bf16.msra.mxu3 %v6017_v62  ;;  %v2459_v38 = vpop.f32.mrf.mxu3  ;;  %v2405_v45 = vpop.f32.mrf.mxu0  ;;  %v5374_v57 = vld [vmem:[%s7759_s16 + $0x108] sm:$0xf0]  ;;  %3121 = vst [vmem:[%s7771_s11 + $0x170] sm:$0xff] %v2441_v42  ;;  %v6508_v62 = vld [vmem:[%s7759_s16 + $0x938] sm:$0xf]  ;;  %v2425_v0 = vadd.f32 %v2424_v46, %v8277_v23 }
 0x12e   : > { %v2460_v43 = vadd.f32 %v2459_v38, %v8311_v55  ;;  %v2406_v58 = vadd.f32 %v2405_v45, %v8274_v22  ;;  %2727 = vmatmul.bf16.gmra.mxu1 %v7895_v31  ;;  %v5377_v9 = vor.u32 %v6570_v56, %v5374_v57  ;;  %v6509_v15 = vor.u32 %v6872_v63, %v6508_v62  ;;  %v6791_v42 = vld [vmem:[%s7759_s16 + $0x74c] sm:$0xf0]  ;;  %v6731_v63 = vld [vmem:[%s7759_s16 + $0x574] sm:$0xf] }
 0x12f   : > { %2794 = vmatpush.bf16.msra.mxu1 %v5849_v10  ;;  %2746 = vmatmul.bf16.gmra.mxu2 %v7895_v31  ;;  %3160 = vst [vmem:[%s7771_s11 + $0x2a8] sm:$0xff] %v2425_v0  ;;  %v8396_v38 = vperm.slane %v8374_v14, 1  ;;  %v6189_v56 = vor.u32 %v6792_v41, %v6188_v39  ;;  %v6181_v57 = vor.u32 %v6791_v42, %v6180_v37  ;;  %v6022_v0 = vld [vmem:[%s7759_s16 + $0x610] sm:$0xf0]  ;;  %v6652_v41 = vld [vmem:[%s7759_s16 + $0x2fc] sm:$0xf] }
 0x130   : > { %2813 = vmatpush.bf16.msra.mxu2 %v5853_v11  ;;  %3122 = vst [vmem:[%s7771_s11 + $0x178] sm:$0xff] %v2460_v43  ;;  %2708 = vmatmul.bf16.gmra.mxu0 %v7895_v31  ;;  %v6771_v43 = vld [vmem:[%s7759_s16 + $0x6b4] sm:$0xf]  ;;  %v6193_v62 = vor.u32 %v6772_v40, %v6190_v48  ;;  %v5710_v37 = vld [vmem:[%s7759_s16 + $0x398] sm:$0xf0] }
 0x131   : > { %2775 = vmatpush.bf16.msra.mxu0 %v5845_v16  ;;  %2832 = vmatpush.bf16.msra.mxu3 %v5857_v20  ;;  %3159 = vst [vmem:[%s7771_s11 + $0x2a0] sm:$0xff] %v2406_v58  ;;  %v6501_v16 = vor.u32 %v6871_v2, %v6500_v1  ;;  %v6752_v58 = vld [vmem:[%s7759_s16 + $0x614] sm:$0xf0]  ;;  %v6732_v2 = vld [vmem:[%s7759_s16 + $0x57c] sm:$0xf]  ;;  %v5713_v40 = vor.u32 %v6652_v41, %v5710_v37 }
 0x132   : > { %2765 = vmatmul.bf16.gmra.mxu3 %v7895_v31  ;;  %v2443_v11 = vpop.f32.mrf.mxu2  ;;  %v5702_v39 = vld [vmem:[%s7759_s16 + $0x390] sm:$0xf0]  ;;  %v5540_v48 = vld [vmem:[%s7759_s16 + $0x1b0] sm:$0xf]  ;;  %v6356_v37 = vld [vmem:[%s7759_s16 + $0x800] sm:$0xf] }
 0x133   : > { %2795 = vmatpush.bf16.msra.mxu1 %v5689_v30  ;;  %v2444_v19 = vadd.f32 %v2443_v11, %v8308_v54  ;;  %v6342_v30 = vld [vmem:[%s7759_s16 + $0x890] sm:$0xf0]  ;;  %v6033_v11 = vor.u32 %v6732_v2, %v6030_v59 }
 0x134   : > { %2814 = vmatpush.bf16.msra.mxu2 %v5693_v26  ;;  %v2426_v13 = vpop.f32.mrf.mxu1  ;;  %v6831_v26 = vld [vmem:[%s7759_s16 + $0x88c] sm:$0xf0]  ;;  %v6571_v59 = vld [vmem:[%s7759_s16 + $0x74] sm:$0xf] }
 0x135   : > { %2776 = vmatpush.bf16.msra.mxu0 %v5685_v27  ;;  %2833 = vmatpush.bf16.msra.mxu3 %v5697_v32  ;;  %v2462_v12 = vpop.f32.mrf.mxu3  ;;  %v2407_v20 = vpop.f32.mrf.mxu0  ;;  %v6811_v27 = vld [vmem:[%s7759_s16 + $0x7f4] sm:$0xf]  ;;  %v2427_v29 = vadd.f32 %v2426_v13, %v8277_v23  ;;  %v6812_v32 = vld [vmem:[%s7759_s16 + $0x7fc] sm:$0xf]  ;;  %3161 = vst [vmem:[%s7771_s11 + $0x2b0] sm:$0xff] %v2444_v19  ;;  %v6341_v34 = vor.u32 %v6831_v26, %v6340_v25  ;;  %v8392_v23 = vperm.slane %v8374_v14, 0 }
 0x136   : > { %v2463_v10 = vadd.f32 %v2462_v12, %v8311_v55  ;;  %v2408_v28 = vadd.f32 %v2407_v20, %v8274_v22  ;;  %v6349_v22 = vor.u32 %v6832_v18, %v6348_v17  ;;  %v6345_v35 = vor.u32 %v6811_v27, %v6342_v30  ;;  %v5860_v12 = vld [vmem:[%s7759_s16 + $0x430] sm:$0xf]  ;;  %v5862_v19 = vld [vmem:[%s7759_s16 + $0x4d0] sm:$0xf0]  ;;  %v5870_v20 = vld [vmem:[%s7759_s16 + $0x4d8] sm:$0xf0] }
 0x137   : > { %2796 = vmatpush.bf16.msra.mxu1 %v5529_v60  ;;  %v6353_v36 = vor.u32 %v6812_v32, %v6350_v33  ;;  %3200 = vst [vmem:[%s7771_s11 + $0x3e8] sm:$0xff] %v2427_v29  ;;  %v6020_v60 = vld [vmem:[%s7759_s16 + $0x570] sm:$0xf]  ;;  %v5708_v27 = vld [vmem:[%s7759_s16 + $0x2f8] sm:$0xf] }
 0x138   : > { %2815 = vmatpush.bf16.msra.mxu2 %v5533_v50  ;;  %3162 = vst [vmem:[%s7771_s11 + $0x2b8] sm:$0xff] %v2463_v10  ;;  %v6692_v10 = vld [vmem:[%s7759_s16 + $0x43c] sm:$0xf]  ;;  %v6672_v32 = vld [vmem:[%s7759_s16 + $0x394] sm:$0xf0] }
 0x139   : > { %2777 = vmatpush.bf16.msra.mxu0 %v5525_v51  ;;  %2834 = vmatpush.bf16.msra.mxu3 %v5537_v61  ;;  %3199 = vst [vmem:[%s7771_s11 + $0x3e0] sm:$0xff] %v2408_v28  ;;  %v6751_v61 = vld [vmem:[%s7759_s16 + $0x60c] sm:$0xf0]  ;;  %v5709_v42 = vor.u32 %v6672_v32, %v5708_v27  ;;  %v6364_v32 = vld [vmem:[%s7759_s16 + $0x808] sm:$0xf] }
 0x13a   : > { %v2445_v45 = vpop.f32.mrf.mxu2  ;;  %v6021_v6 = vor.u32 %v6751_v61, %v6020_v60  ;;  %v5700_v33 = vld [vmem:[%s7759_s16 + $0x2f0] sm:$0xf] }
 0x13b   : > { %2797 = vmatpush.bf16.msra.mxu1 %v5369_v8  ;;  %v2446_v49 = vadd.f32 %v2445_v45, %v8308_v54  ;;  %v6712_v8 = vld [vmem:[%s7759_s16 + $0x4d4] sm:$0xf0] }
 0x13c   : > { %2816 = vmatpush.bf16.msra.mxu2 %v5373_v4  ;;  %v2495_v52 = vpop.f32.mrf.mxu1  ;;  %v8429_v4 = vperm.slane %v8374_v14, 3  ;;  %v5869_v26 = vor.u32 %v6712_v8, %v5868_v7  ;;  %v5548_v45 = vld [vmem:[%s7759_s16 + $0x1b8] sm:$0xf]  ;;  %v5390_v7 = vld [vmem:[%s7759_s16 + $0x118] sm:$0xf0] }
 0x13d   : > { %2778 = vmatpush.bf16.msra.mxu0 %v5365_v5  ;;  %2835 = vmatpush.bf16.msra.mxu3 %v5377_v9  ;;  %v2464_v46 = vpop.f32.mrf.mxu3  ;;  %v2476_v51 = vpop.f32.mrf.mxu0  ;;  %3201 = vst [vmem:[%s7771_s11 + $0x3f0] sm:$0xff] %v2446_v49  ;;  %v2496_v1 = vadd.f32 %v2495_v52, %v8396_v38  ;;  %v6029_v5 = vor.u32 %v6752_v58, %v6028_v53  ;;  %v6631_v49 = vld [vmem:[%s7759_s16 + $0x24c] sm:$0xf0]  ;;  %v5542_v53 = vld [vmem:[%s7759_s16 + $0x250] sm:$0xf0] }
 0x13e   : > { %v2465_v50 = vadd.f32 %v2464_v46, %v8311_v55  ;;  %v2477_v54 = vadd.f32 %v2476_v51, %v8392_v23  ;;  %v6185_v55 = vor.u32 %v6771_v43, %v6182_v47  ;;  %2798 = vmatmul.bf16.vlgmr.msra.gmra.mxu1 %v7851_v44  ;;  %v6025_v9 = vor.u32 %v6731_v63, %v6022_v0  ;;  %v6632_v46 = vld [vmem:[%s7759_s16 + $0x254] sm:$0xf0]  ;;  %v5380_v63 = vld [vmem:[%s7759_s16 + $0x70] sm:$0xf] }
 0x13f   : > { %2866 = vmatpush.bf16.msrb.mxu1 %v6505_v21  ;;  %2817 = vmatmul.bf16.vlgmr.msra.gmra.mxu2 %v7851_v44  ;;  %3084 = vst [vmem:[%s7771_s11 + $0x48] sm:$0xff] %v2496_v1  ;;  %v6591_v0 = vld [vmem:[%s7759_s16 + $0x10c] sm:$0xf0]  ;;  %v5549_v1 = vor.u32 %v6632_v46, %v5548_v45  ;;  %v5541_v2 = vor.u32 %v6631_v49, %v5540_v48  ;;  %v6366_v48 = vld [vmem:[%s7759_s16 + $0x8a8] sm:$0xf0] }
 0x140   : > { %2885 = vmatpush.bf16.msrb.mxu2 %v6509_v15  ;;  %3202 = vst [vmem:[%s7771_s11 + $0x3f8] sm:$0xff] %v2465_v50  ;;  %2779 = vmatmul.bf16.vlgmr.msra.gmra.mxu0 %v7851_v44  ;;  %v6711_v15 = vld [vmem:[%s7759_s16 + $0x4cc] sm:$0xf0]  ;;  %v6611_v50 = vld [vmem:[%s7759_s16 + $0x1b4] sm:$0xf] }
 0x141   : > { %2847 = vmatpush.bf16.msrb.mxu0 %v6501_v16  ;;  %2904 = vmatpush.bf16.msrb.mxu3 %v6513_v24  ;;  %3083 = vst [vmem:[%s7771_s11 + $0x40] sm:$0xff] %v2477_v54  ;;  %v6691_v16 = vld [vmem:[%s7759_s16 + $0x434] sm:$0xf]  ;;  %v5861_v30 = vor.u32 %v6711_v15, %v5860_v12  ;;  %v6524_v12 = vld [vmem:[%s7759_s16 + $0x948] sm:$0xf] }
 0x142   : > { %2836 = vmatmul.bf16.vlgmr.msra.gmra.mxu3 %v7851_v44  ;;  %v2514_v17 = vpop.f32.mrf.mxu2  ;;  %v6874_v15 = vld [vmem:[%s7759_s16 + $0x9e4] sm:$0xf0] }
 0x143   : > { %2867 = vmatpush.bf16.msrb.mxu1 %v6345_v35  ;;  %v2515_v13 = vadd.f32 %v2514_v17, %v8426_v3  ;;  %v5873_v35 = vor.u32 %v6692_v10, %v5870_v20  ;;  %v6516_v17 = vld [vmem:[%s7759_s16 + $0x940] sm:$0xf]  ;;  %v6518_v10 = vld [vmem:[%s7759_s16 + $0x9e0] sm:$0xf0] }
 0x144   : > { %2886 = vmatpush.bf16.msrb.mxu2 %v6349_v22  ;;  %v2497_v25 = vpop.f32.mrf.mxu1  ;;  %v6671_v22 = vld [vmem:[%s7759_s16 + $0x38c] sm:$0xf0] }
 0x145   : > { %2848 = vmatpush.bf16.msrb.mxu0 %v6341_v34  ;;  %2905 = vmatpush.bf16.msrb.mxu3 %v6353_v36  ;;  %v2533_v18 = vpop.f32.mrf.mxu3  ;;  %v2478_v24 = vpop.f32.mrf.mxu0  ;;  %v2498_v29 = vadd.f32 %v2497_v25, %v8396_v38  ;;  %3085 = vst [vmem:[%s7771_s11 + $0x50] sm:$0xff] %v2515_v13  ;;  %v5865_v34 = vor.u32 %v6691_v16, %v5862_v19  ;;  %v6651_v36 = vld [vmem:[%s7759_s16 + $0x2f4] sm:$0xf]  ;;  %v6853_v19 = vld [vmem:[%s7759_s16 + $0x944] sm:$0xf] }
 0x146   : > { %v2534_v21 = vadd.f32 %v2533_v18, %v8429_v4  ;;  %v2479_v28 = vadd.f32 %v2478_v24, %v8392_v23  ;;  %v5701_v43 = vor.u32 %v6671_v22, %v5700_v33  ;;  %v5705_v47 = vor.u32 %v6651_v36, %v5702_v39  ;;  %v6873_v18 = vld [vmem:[%s7759_s16 + $0x9dc] sm:$0xf0]  ;;  %v6526_v24 = vld [vmem:[%s7759_s16 + $0x9e8] sm:$0xf0]  ;;  %v6834_v33 = vld [vmem:[%s7759_s16 + $0x8a4] sm:$0xf0] }
 0x147   : > { %2868 = vmatpush.bf16.msrb.mxu1 %v6185_v55  ;;  %3124 = vst [vmem:[%s7771_s11 + $0x188] sm:$0xff] %v2498_v29  ;;  %v5388_v55 = vld [vmem:[%s7759_s16 + $0x78] sm:$0xf]  ;;  %v5381_v13 = vor.u32 %v6591_v0, %v5380_v63  ;;  %v6525_v29 = vor.u32 %v6874_v15, %v6524_v12  ;;  %v6521_v39 = vor.u32 %v6853_v19, %v6518_v10  ;;  %v6206_v63 = vld [vmem:[%s7759_s16 + $0x768] sm:$0xf0]  ;;  %v8547_v10 = vperm.slane %v8374_v14, 6 }
 0x148   : > { %2887 = vmatpush.bf16.msrb.mxu2 %v6189_v56  ;;  %3086 = vst [vmem:[%s7771_s11 + $0x58] sm:$0xff] %v2534_v21  ;;  %v6612_v56 = vld [vmem:[%s7759_s16 + $0x1bc] sm:$0xf]  ;;  %v6854_v21 = vld [vmem:[%s7759_s16 + $0x94c] sm:$0xf] }
 0x149   : > { %2849 = vmatpush.bf16.msrb.mxu0 %v6181_v57  ;;  %2906 = vmatpush.bf16.msrb.mxu3 %v6193_v62  ;;  %3123 = vst [vmem:[%s7771_s11 + $0x180] sm:$0xff] %v2479_v28  ;;  %v5550_v57 = vld [vmem:[%s7759_s16 + $0x258] sm:$0xf0]  ;;  %v6592_v62 = vld [vmem:[%s7759_s16 + $0x114] sm:$0xf0]  ;;  %v6529_v41 = vor.u32 %v6854_v21, %v6526_v24 }
 0x14a   : > { %v2516_v51 = vpop.f32.mrf.mxu2  ;;  %v5389_v20 = vor.u32 %v6592_v62, %v5388_v55  ;;  %v6198_v55 = vld [vmem:[%s7759_s16 + $0x760] sm:$0xf0]  ;;  %v6774_v62 = vld [vmem:[%s7759_s16 + $0x6cc] sm:$0xf]  ;;  %v5884_v24 = vld [vmem:[%s7759_s16 + $0x448] sm:$0xf] }
 0x14b   : > { %2869 = vmatpush.bf16.msrb.mxu1 %v6025_v9  ;;  %v2517_v58 = vadd.f32 %v2516_v51, %v8426_v3  ;;  %v5545_v9 = vor.u32 %v6611_v50, %v5542_v53  ;;  %v6204_v53 = vld [vmem:[%s7759_s16 + $0x6c8] sm:$0xf]  ;;  %v6209_v12 = vor.u32 %v6774_v62, %v6206_v63  ;;  %v6733_v15 = vld [vmem:[%s7759_s16 + $0x584] sm:$0xf]  ;;  %v6046_v19 = vld [vmem:[%s7759_s16 + $0x628] sm:$0xf0] }
 0x14c   : > { %2888 = vmatpush.bf16.msrb.mxu2 %v6029_v5  ;;  %v2500_v54 = vpop.f32.mrf.mxu1  ;;  %v5382_v5 = vld [vmem:[%s7759_s16 + $0x110] sm:$0xf0]  ;;  %v5556_v62 = vld [vmem:[%s7759_s16 + $0x1c0] sm:$0xf] }
 0x14d   : > { %2850 = vmatpush.bf16.msrb.mxu0 %v6021_v6  ;;  %2907 = vmatpush.bf16.msrb.mxu3 %v6033_v11  ;;  %v2535_v52 = vpop.f32.mrf.mxu3  ;;  %v2481_v61 = vpop.f32.mrf.mxu0  ;;  %v6572_v6 = vld [vmem:[%s7759_s16 + $0x7c] sm:$0xf]  ;;  %3125 = vst [vmem:[%s7771_s11 + $0x190] sm:$0xff] %v2517_v58  ;;  %v5553_v11 = vor.u32 %v6612_v56, %v5550_v57  ;;  %v2501_v16 = vadd.f32 %v2500_v54, %v8396_v38  ;;  %v6794_v56 = vld [vmem:[%s7759_s16 + $0x764] sm:$0xf0] }
 0x14e   : > { %v2536_v60 = vadd.f32 %v2535_v52, %v8429_v4  ;;  %v2482_v8 = vadd.f32 %v2481_v61, %v8392_v23  ;;  %2803 = vmatmul.bf16.gmra.mxu1 %v7895_v31  ;;  %v5385_v25 = vor.u32 %v6571_v59, %v5382_v5  ;;  %v8512_v52 = vperm.slane %v8374_v14, 5  ;;  %v6196_v57 = vld [vmem:[%s7759_s16 + $0x6c0] sm:$0xf]  ;;  %v6044_v5 = vld [vmem:[%s7759_s16 + $0x588] sm:$0xf] }
 0x14f   : > { %2870 = vmatpush.bf16.msrb.mxu1 %v5865_v34  ;;  %2822 = vmatmul.bf16.gmra.mxu2 %v7895_v31  ;;  %3164 = vst [vmem:[%s7771_s11 + $0x2c8] sm:$0xff] %v2501_v16  ;;  %v6793_v58 = vld [vmem:[%s7759_s16 + $0x75c] sm:$0xf0]  ;;  %v6038_v16 = vld [vmem:[%s7759_s16 + $0x620] sm:$0xf0] }
 0x150   : > { %2889 = vmatpush.bf16.msrb.mxu2 %v5869_v26  ;;  %3126 = vst [vmem:[%s7771_s11 + $0x198] sm:$0xff] %v2536_v60  ;;  %2784 = vmatmul.bf16.gmra.mxu0 %v7895_v31  ;;  %v5393_v26 = vor.u32 %v6572_v6, %v5390_v7  ;;  %v6773_v60 = vld [vmem:[%s7759_s16 + $0x6c4] sm:$0xf]  ;;  %v6205_v6 = vor.u32 %v6794_v56, %v6204_v53  ;;  %v6654_v53 = vld [vmem:[%s7759_s16 + $0x30c] sm:$0xf] }
 0x151   : > { %2851 = vmatpush.bf16.msrb.mxu0 %v5861_v30  ;;  %2908 = vmatpush.bf16.msrb.mxu3 %v5873_v35  ;;  %3163 = vst [vmem:[%s7771_s11 + $0x2c0] sm:$0xff] %v2482_v8  ;;  %v6517_v30 = vor.u32 %v6873_v18, %v6516_v17  ;;  %v6197_v7 = vor.u32 %v6793_v58, %v6196_v57  ;;  %v6754_v8 = vld [vmem:[%s7759_s16 + $0x624] sm:$0xf0]  ;;  %v6734_v18 = vld [vmem:[%s7759_s16 + $0x58c] sm:$0xf] }
 0x152   : > { %2841 = vmatmul.bf16.gmra.mxu3 %v7895_v31  ;;  %v2519_v27 = vpop.f32.mrf.mxu2  ;;  %v5726_v56 = vld [vmem:[%s7759_s16 + $0x3a8] sm:$0xf0]  ;;  %v6633_v63 = vld [vmem:[%s7759_s16 + $0x25c] sm:$0xf0] }
 0x153   : > { %2871 = vmatpush.bf16.msrb.mxu1 %v5705_v47  ;;  %v2520_v22 = vadd.f32 %v2519_v27, %v8426_v3  ;;  %v6358_v47 = vld [vmem:[%s7759_s16 + $0x8a0] sm:$0xf0]  ;;  %v6049_v27 = vor.u32 %v6734_v18, %v6046_v19  ;;  %v5557_v19 = vor.u32 %v6633_v63, %v5556_v62  ;;  %v6835_v62 = vld [vmem:[%s7759_s16 + $0x8ac] sm:$0xf0]  ;;  %v6815_v63 = vld [vmem:[%s7759_s16 + $0x814] sm:$0xf] }
 0x154   : > { %2890 = vmatpush.bf16.msrb.mxu2 %v5709_v42  ;;  %v2502_v36 = vpop.f32.mrf.mxu1  ;;  %v6833_v42 = vld [vmem:[%s7759_s16 + $0x89c] sm:$0xf0] }
 0x155   : > { %2852 = vmatpush.bf16.msrb.mxu0 %v5701_v43  ;;  %2909 = vmatpush.bf16.msrb.mxu3 %v5713_v40  ;;  %v2538_v28 = vpop.f32.mrf.mxu3  ;;  %v2483_v35 = vpop.f32.mrf.mxu0  ;;  %v6813_v43 = vld [vmem:[%s7759_s16 + $0x804] sm:$0xf]  ;;  %v2503_v46 = vadd.f32 %v2502_v36, %v8396_v38  ;;  %v6814_v40 = vld [vmem:[%s7759_s16 + $0x80c] sm:$0xf]  ;;  %3165 = vst [vmem:[%s7771_s11 + $0x2d0] sm:$0xff] %v2520_v22  ;;  %v6357_v49 = vor.u32 %v6833_v42, %v6356_v37  ;;  %v8508_v38 = vperm.slane %v8374_v14, 4 }
 0x156   : > { %v2539_v34 = vadd.f32 %v2538_v28, %v8429_v4  ;;  %v2484_v45 = vadd.f32 %v2483_v35, %v8392_v23  ;;  %v6365_v23 = vor.u32 %v6834_v33, %v6364_v32  ;;  %v6361_v50 = vor.u32 %v6813_v43, %v6358_v47  ;;  %v5876_v28 = vld [vmem:[%s7759_s16 + $0x440] sm:$0xf]  ;;  %v5878_v33 = vld [vmem:[%s7759_s16 + $0x4e0] sm:$0xf0]  ;;  %v6694_v22 = vld [vmem:[%s7759_s16 + $0x44c] sm:$0xf] }
 0x157   : > { %2872 = vmatpush.bf16.msrb.mxu1 %v5545_v9  ;;  %v6369_v51 = vor.u32 %v6814_v40, %v6366_v48  ;;  %3204 = vst [vmem:[%s7771_s11 + $0x408] sm:$0xff] %v2503_v46  ;;  %v6036_v9 = vld [vmem:[%s7759_s16 + $0x580] sm:$0xf]  ;;  %v5724_v42 = vld [vmem:[%s7759_s16 + $0x308] sm:$0xf] }
 0x158   : > { %2891 = vmatpush.bf16.msrb.mxu2 %v5549_v1  ;;  %3166 = vst [vmem:[%s7771_s11 + $0x2d8] sm:$0xff] %v2539_v34  ;;  %v5886_v34 = vld [vmem:[%s7759_s16 + $0x4e8] sm:$0xf0]  ;;  %v6674_v47 = vld [vmem:[%s7759_s16 + $0x3a4] sm:$0xf0] }
 0x159   : > { %2853 = vmatpush.bf16.msrb.mxu0 %v5541_v2  ;;  %2910 = vmatpush.bf16.msrb.mxu3 %v5553_v11  ;;  %3203 = vst [vmem:[%s7771_s11 + $0x400] sm:$0xff] %v2484_v45  ;;  %v6753_v11 = vld [vmem:[%s7759_s16 + $0x61c] sm:$0xf0]  ;;  %v5725_v57 = vor.u32 %v6674_v47, %v5724_v42  ;;  %v6542_v42 = vld [vmem:[%s7759_s16 + $0x9f8] sm:$0xf0] }
 0x15a   : > { %v2521_v61 = vpop.f32.mrf.mxu2  ;;  %v6037_v21 = vor.u32 %v6753_v11, %v6036_v9  ;;  %v5716_v40 = vld [vmem:[%s7759_s16 + $0x300] sm:$0xf] }
 0x15b   : > { %2873 = vmatpush.bf16.msrb.mxu1 %v5385_v25  ;;  %v2522_v0 = vadd.f32 %v2521_v61, %v8426_v3  ;;  %v6714_v25 = vld [vmem:[%s7759_s16 + $0x4e4] sm:$0xf0]  ;;  %v6673_v48 = vld [vmem:[%s7759_s16 + $0x39c] sm:$0xf0] }
 0x15c   : > { %2892 = vmatpush.bf16.msrb.mxu2 %v5389_v20  ;;  %v2571_v59 = vpop.f32.mrf.mxu1  ;;  %v8550_v20 = vperm.slane %v8374_v14, 7  ;;  %v6693_v14 = vld [vmem:[%s7759_s16 + $0x444] sm:$0xf]  ;;  %v5885_v37 = vor.u32 %v6714_v25, %v5884_v24  ;;  %v5717_v58 = vor.u32 %v6673_v48, %v5716_v40  ;;  %v6634_v61 = vld [vmem:[%s7759_s16 + $0x264] sm:$0xf0] }
 0x15d   : > { %2854 = vmatpush.bf16.msrb.mxu0 %v5381_v13  ;;  %2911 = vmatpush.bf16.msrb.mxu3 %v5393_v26  ;;  %v2540_v54 = vpop.f32.mrf.mxu3  ;;  %v2552_v2 = vpop.f32.mrf.mxu0  ;;  %3205 = vst [vmem:[%s7771_s11 + $0x410] sm:$0xff] %v2522_v0  ;;  %v8536_v17 = vadd.f32 %v2571_v59, %v8512_v52  ;;  %v6045_v13 = vor.u32 %v6754_v8, %v6044_v5  ;;  %v6613_v0 = vld [vmem:[%s7759_s16 + $0x1c4] sm:$0xf]  ;;  %v6614_v5 = vld [vmem:[%s7759_s16 + $0x1cc] sm:$0xf] }
 0x15e   : > { %v2541_v1 = vadd.f32 %v2540_v54, %v8429_v4  ;;  %v8530_v3 = vadd.f32 %v2552_v2, %v8508_v38  ;;  %v6201_v4 = vor.u32 %v6773_v60, %v6198_v55  ;;  %2874 = vmatmul.bf16.vlgmr.msrb.gmra.mxu1 %v7851_v44  ;;  %v6041_v26 = vor.u32 %v6733_v15, %v6038_v16  ;;  %v5564_v60 = vld [vmem:[%s7759_s16 + $0x1c8] sm:$0xf]  ;;  %v5558_v59 = vld [vmem:[%s7759_s16 + $0x260] sm:$0xf0]  ;;  %v5396_v15 = vld [vmem:[%s7759_s16 + $0x80] sm:$0xf] }
 0x15f   : > { %2942 = vmatpush.bf16.msra.mxu1 %v6521_v39  ;;  %2893 = vmatmul.bf16.vlgmr.msrb.gmra.mxu2 %v7851_v44  ;;  %3088 = vst [vmem:[%s7771_s11 + $0x68] sm:$0xff] %v8536_v17  ;;  %v5729_v55 = vor.u32 %v6654_v53, %v5726_v56  ;;  %v6593_v16 = vld [vmem:[%s7759_s16 + $0x11c] sm:$0xf0]  ;;  %v5565_v18 = vor.u32 %v6634_v61, %v5564_v60  ;;  %v6574_v24 = vld [vmem:[%s7759_s16 + $0x8c] sm:$0xf] }
 0x160   : > { %2961 = vmatpush.bf16.msra.mxu2 %v6525_v29  ;;  %3206 = vst [vmem:[%s7771_s11 + $0x418] sm:$0xff] %v2541_v1  ;;  %2855 = vmatmul.bf16.vlgmr.msrb.gmra.mxu0 %v7851_v44  ;;  %v6713_v29 = vld [vmem:[%s7759_s16 + $0x4dc] sm:$0xf0]  ;;  %v5406_v25 = vld [vmem:[%s7759_s16 + $0x128] sm:$0xf0] }
 0x161   : > { %2923 = vmatpush.bf16.msra.mxu0 %v6517_v30  ;;  %2980 = vmatpush.bf16.msra.mxu3 %v6529_v41  ;;  %3087 = vst [vmem:[%s7771_s11 + $0x60] sm:$0xff] %v8530_v3  ;;  %v5877_v46 = vor.u32 %v6713_v29, %v5876_v28  ;;  %v6540_v29 = vld [vmem:[%s7759_s16 + $0x958] sm:$0xf]  ;;  %v5409_v47 = vor.u32 %v6574_v24, %v5406_v25  ;;  %v6214_v24 = vld [vmem:[%s7759_s16 + $0x770] sm:$0xf0] }
 0x162   : > { %2912 = vmatmul.bf16.vlgmr.msrb.gmra.mxu3 %v7851_v44  ;;  %v2590_v30 = vpop.f32.mrf.mxu2  ;;  %v6836_v53 = vld [vmem:[%s7759_s16 + $0x8b4] sm:$0xf0]  ;;  %v6776_v25 = vld [vmem:[%s7759_s16 + $0x6dc] sm:$0xf] }
 0x163   : > { %2943 = vmatpush.bf16.msra.mxu1 %v6361_v50  ;;  %v8563_v35 = vadd.f32 %v2590_v30, %v8547_v10  ;;  %v6653_v50 = vld [vmem:[%s7759_s16 + $0x304] sm:$0xf] }
 0x164   : > { %2962 = vmatpush.bf16.msra.mxu2 %v6365_v23  ;;  %v2573_v41 = vpop.f32.mrf.mxu1  ;;  %v5881_v23 = vor.u32 %v6693_v14, %v5878_v33  ;;  %v6876_v14 = vld [vmem:[%s7759_s16 + $0x9f4] sm:$0xf0]  ;;  %v6875_v33 = vld [vmem:[%s7759_s16 + $0x9ec] sm:$0xf0] }
 0x165   : > { %2924 = vmatpush.bf16.msra.mxu0 %v6357_v49  ;;  %2981 = vmatpush.bf16.msra.mxu3 %v6369_v51  ;;  %v2609_v32 = vpop.f32.mrf.mxu3  ;;  %v2554_v39 = vpop.f32.mrf.mxu0  ;;  %v8573_v45 = vadd.f32 %v2573_v41, %v8512_v52  ;;  %3089 = vst [vmem:[%s7771_s11 + $0x70] sm:$0xff] %v8563_v35  ;;  %v5889_v49 = vor.u32 %v6694_v22, %v5886_v34  ;;  %v5718_v51 = vld [vmem:[%s7759_s16 + $0x3a0] sm:$0xf0]  ;;  %v6855_v22 = vld [vmem:[%s7759_s16 + $0x954] sm:$0xf] }
 0x166   : > { %v8566_v36 = vadd.f32 %v2609_v32, %v8550_v20  ;;  %v8570_v43 = vadd.f32 %v2554_v39, %v8508_v38  ;;  %v5721_v54 = vor.u32 %v6653_v50, %v5718_v51  ;;  %v6532_v32 = vld [vmem:[%s7759_s16 + $0x950] sm:$0xf]  ;;  %v6534_v34 = vld [vmem:[%s7759_s16 + $0x9f0] sm:$0xf0]  ;;  %v5397_v41 = vor.u32 %v6593_v16, %v5396_v15  ;;  %v6380_v51 = vld [vmem:[%s7759_s16 + $0x818] sm:$0xf] }
 0x167   : > { %2944 = vmatpush.bf16.msra.mxu1 %v6201_v4  ;;  %3128 = vst [vmem:[%s7771_s11 + $0x1a8] sm:$0xff] %v8573_v45  ;;  %v5404_v4 = vld [vmem:[%s7759_s16 + $0x88] sm:$0xf]  ;;  %v6533_v50 = vor.u32 %v6875_v33, %v6532_v32  ;;  %v6537_v61 = vor.u32 %v6855_v22, %v6534_v34  ;;  %v6796_v15 = vld [vmem:[%s7759_s16 + $0x774] sm:$0xf0] }
 0x168   : > { %2963 = vmatpush.bf16.msra.mxu2 %v6205_v6  ;;  %3090 = vst [vmem:[%s7771_s11 + $0x78] sm:$0xff] %v8566_v36  ;;  %v5566_v6 = vld [vmem:[%s7759_s16 + $0x268] sm:$0xf0]  ;;  %v6212_v16 = vld [vmem:[%s7759_s16 + $0x6d0] sm:$0xf] }
 0x169   : > { %2925 = vmatpush.bf16.msra.mxu0 %v6197_v7  ;;  %2982 = vmatpush.bf16.msra.mxu3 %v6209_v12  ;;  %3127 = vst [vmem:[%s7771_s11 + $0x1a0] sm:$0xff] %v8570_v43  ;;  %v6594_v12 = vld [vmem:[%s7759_s16 + $0x124] sm:$0xf0]  ;;  %v5569_v28 = vor.u32 %v6614_v5, %v5566_v6  ;;  %v6382_v5 = vld [vmem:[%s7759_s16 + $0x8b8] sm:$0xf0] }
 0x16a   : > { %v2592_v1 = vpop.f32.mrf.mxu2  ;;  %v5405_v39 = vor.u32 %v6594_v12, %v5404_v4  ;;  %v6220_v12 = vld [vmem:[%s7759_s16 + $0x6d8] sm:$0xf] }
 0x16b   : > { %2945 = vmatpush.bf16.msra.mxu1 %v6041_v26  ;;  %v8599_v7 = vadd.f32 %v2592_v1, %v8547_v10  ;;  %v6060_v33 = vld [vmem:[%s7759_s16 + $0x598] sm:$0xf]  ;;  %v6221_v22 = vor.u32 %v6796_v15, %v6220_v12 }
 0x16c   : > { %2964 = vmatpush.bf16.msra.mxu2 %v6045_v13  ;;  %v2576_v11 = vpop.f32.mrf.mxu1  ;;  %v6573_v13 = vld [vmem:[%s7759_s16 + $0x84] sm:$0xf] }
 0x16d   : > { %2926 = vmatpush.bf16.msra.mxu0 %v6037_v21  ;;  %2983 = vmatpush.bf16.msra.mxu3 %v6049_v27  ;;  %v2611_v2 = vpop.f32.mrf.mxu3  ;;  %v2557_v9 = vpop.f32.mrf.mxu0  ;;  %v5398_v21 = vld [vmem:[%s7759_s16 + $0x120] sm:$0xf0]  ;;  %3129 = vst [vmem:[%s7771_s11 + $0x1b0] sm:$0xff] %v8599_v7  ;;  %v5561_v27 = vor.u32 %v6613_v0, %v5558_v59  ;;  %v8622_v30 = vadd.f32 %v2576_v11, %v8512_v52  ;;  %v6816_v59 = vld [vmem:[%s7759_s16 + $0x81c] sm:$0xf] }
 0x16e   : > { %v8602_v8 = vadd.f32 %v2611_v2, %v8550_v20  ;;  %v8615_v26 = vadd.f32 %v2557_v9, %v8508_v38  ;;  %2879 = vmatmul.bf16.gmra.mxu1 %v7895_v31  ;;  %v6374_v2 = vld [vmem:[%s7759_s16 + $0x8b0] sm:$0xf0]  ;;  %v6385_v11 = vor.u32 %v6816_v59, %v6382_v5 }
 0x16f   : > { %2946 = vmatpush.bf16.msra.mxu1 %v5881_v23  ;;  %2898 = vmatmul.bf16.gmra.mxu2 %v7895_v31  ;;  %3168 = vst [vmem:[%s7771_s11 + $0x2e8] sm:$0xff] %v8622_v30  ;;  %v8639_v23 = vld [vmem:[%s7765_s7 + $0x10] sm:$0xff]  ;;  %v6377_v9 = vor.u32 %v6815_v63, %v6374_v2 }
 0x170   : > { %2965 = vmatpush.bf16.msra.mxu2 %v5885_v37  ;;  %3130 = vst [vmem:[%s7771_s11 + $0x1b8] sm:$0xff] %v8602_v8  ;;  %2860 = vmatmul.bf16.gmra.mxu0 %v7895_v31  ;;  %v6856_v37 = vld [vmem:[%s7759_s16 + $0x95c] sm:$0xf]  ;;  %v8668_v6 = vperm.slane %v8639_v23, 0  ;;  %v8673_v4 = vperm.slane %v8639_v23, 1 }
 0x171   : > { %2927 = vmatpush.bf16.msra.mxu0 %v5877_v46  ;;  %2984 = vmatpush.bf16.msra.mxu3 %v5889_v49  ;;  %3167 = vst [vmem:[%s7771_s11 + $0x2e0] sm:$0xff] %v8615_v26  ;;  %v5401_v46 = vor.u32 %v6573_v13, %v5398_v21  ;;  %v6541_v49 = vor.u32 %v6876_v14, %v6540_v29  ;;  %v6715_v63 = vld [vmem:[%s7759_s16 + $0x4ec] sm:$0xf0]  ;;  %v6695_v2 = vld [vmem:[%s7759_s16 + $0x454] sm:$0xf] }
 0x172   : > { %2917 = vmatmul.bf16.gmra.mxu3 %v7895_v31  ;;  %v2595_v40 = vpop.f32.mrf.mxu2 }
 0x173   : > { %2947 = vmatpush.bf16.msra.mxu1 %v5721_v54  ;;  %v8644_v56 = vadd.f32 %v2595_v40, %v8547_v10  ;;  %v6545_v54 = vor.u32 %v6856_v37, %v6542_v42 }
 0x174   : > { %2966 = vmatpush.bf16.msra.mxu2 %v5725_v57  ;;  %v2578_v60 = vpop.f32.mrf.mxu1 }
 0x175   : > { %2928 = vmatpush.bf16.msra.mxu0 %v5717_v58  ;;  %2985 = vmatpush.bf16.msra.mxu3 %v5729_v55  ;;  %v2614_v48 = vpop.f32.mrf.mxu3  ;;  %v2559_v58 = vpop.f32.mrf.mxu0  ;;  %v6372_v55 = vld [vmem:[%s7759_s16 + $0x810] sm:$0xf]  ;;  %v8656_v1 = vadd.f32 %v2578_v60, %v8512_v52  ;;  %3169 = vst [vmem:[%s7771_s11 + $0x2f0] sm:$0xff] %v8644_v56  ;;  %v5900_v60 = vld [vmem:[%s7759_s16 + $0x458] sm:$0xf] }
 0x176   : > { %v8647_v57 = vadd.f32 %v2614_v48, %v8550_v20  ;;  %v8653_v0 = vadd.f32 %v2559_v58, %v8508_v38  ;;  %v6381_v38 = vor.u32 %v6836_v53, %v6380_v51  ;;  %v6373_v52 = vor.u32 %v6835_v62, %v6372_v55  ;;  %v6736_v48 = vld [vmem:[%s7759_s16 + $0x59c] sm:$0xf]  ;;  %v5892_v62 = vld [vmem:[%s7759_s16 + $0x450] sm:$0xf] }
 0x177   : > { %2948 = vmatpush.bf16.msra.mxu1 %v5561_v27  ;;  %3208 = vst [vmem:[%s7771_s11 + $0x428] sm:$0xff] %v8656_v1  ;;  %v6222_v27 = vld [vmem:[%s7759_s16 + $0x778] sm:$0xf0]  ;;  %v8717_v51 = vperm.slane %v8639_v23, 3 }
 0x178   : > { %2967 = vmatpush.bf16.msra.mxu2 %v5565_v18  ;;  %3170 = vst [vmem:[%s7771_s11 + $0x2f8] sm:$0xff] %v8647_v57  ;;  %v6795_v18 = vld [vmem:[%s7759_s16 + $0x76c] sm:$0xf0]  ;;  %v6225_v42 = vor.u32 %v6776_v25, %v6222_v27  ;;  %v6676_v25 = vld [vmem:[%s7759_s16 + $0x3b4] sm:$0xf0] }
 0x179   : > { %2929 = vmatpush.bf16.msra.mxu0 %v5557_v19  ;;  %2986 = vmatpush.bf16.msra.mxu3 %v5569_v28  ;;  %3207 = vst [vmem:[%s7771_s11 + $0x420] sm:$0xff] %v8653_v0  ;;  %v6775_v19 = vld [vmem:[%s7759_s16 + $0x6d4] sm:$0xf]  ;;  %v6213_v34 = vor.u32 %v6795_v18, %v6212_v16  ;;  %v5732_v27 = vld [vmem:[%s7759_s16 + $0x310] sm:$0xf] }
 0x17a   : > { %v2597_v13 = vpop.f32.mrf.mxu2  ;;  %v6217_v37 = vor.u32 %v6775_v19, %v6214_v24  ;;  %v5740_v19 = vld [vmem:[%s7759_s16 + $0x318] sm:$0xf]  ;;  %v5893_v24 = vor.u32 %v6715_v63, %v5892_v62  ;;  %v5582_v62 = vld [vmem:[%s7759_s16 + $0x278] sm:$0xf0] }
 0x17b   : > { %2949 = vmatpush.bf16.msra.mxu1 %v5401_v46  ;;  %v8684_v28 = vadd.f32 %v2597_v13, %v8547_v10  ;;  %v6755_v10 = vld [vmem:[%s7759_s16 + $0x62c] sm:$0xf0]  ;;  %v6735_v46 = vld [vmem:[%s7759_s16 + $0x594] sm:$0xf] }
 0x17c   : > { %2968 = vmatpush.bf16.msra.mxu2 %v5405_v39  ;;  %v2647_v32 = vpop.f32.mrf.mxu1  ;;  %v6756_v39 = vld [vmem:[%s7759_s16 + $0x634] sm:$0xf0] }
 0x17d   : > { %2930 = vmatpush.bf16.msra.mxu0 %v5397_v41  ;;  %2987 = vmatpush.bf16.msra.mxu3 %v5409_v47  ;;  %v2616_v21 = vpop.f32.mrf.mxu3  ;;  %v2628_v14 = vpop.f32.mrf.mxu0  ;;  %v6052_v41 = vld [vmem:[%s7759_s16 + $0x590] sm:$0xf]  ;;  %3209 = vst [vmem:[%s7771_s11 + $0x430] sm:$0xff] %v8684_v28  ;;  %v6054_v47 = vld [vmem:[%s7759_s16 + $0x630] sm:$0xf0]  ;;  %v8703_v40 = vadd.f32 %v2647_v32, %v8673_v4  ;;  %v6061_v53 = vor.u32 %v6756_v39, %v6060_v33 }
 0x17e   : > { %v8687_v29 = vadd.f32 %v2616_v21, %v8550_v20  ;;  %v8696_v20 = vadd.f32 %v2628_v14, %v8668_v6  ;;  %2950 = vmatmul.bf16.vlgmr.msra.gmra.mxu1 %v7851_v44  ;;  %v6053_v58 = vor.u32 %v6755_v10, %v6052_v41  ;;  %v6675_v14 = vld [vmem:[%s7759_s16 + $0x3ac] sm:$0xf0]  ;;  %v6656_v39 = vld [vmem:[%s7759_s16 + $0x31c] sm:$0xf]  ;;  %v5741_v10 = vor.u32 %v6676_v25, %v5740_v19 }
 0x17f   : > { %3018 = vmatpush.bf16.msrb.mxu1 %v6537_v61  ;;  %2969 = vmatmul.bf16.vlgmr.msra.gmra.mxu2 %v7851_v44  ;;  %3092 = vst [vmem:[%s7771_s11 + $0x88] sm:$0xff] %v8703_v40  ;;  %v6716_v61 = vld [vmem:[%s7759_s16 + $0x4f4] sm:$0xf0]  ;;  %v5742_v41 = vld [vmem:[%s7759_s16 + $0x3b8] sm:$0xf0] }
 0x180   : > { %3037 = vmatpush.bf16.msrb.mxu2 %v6541_v49  ;;  %3210 = vst [vmem:[%s7771_s11 + $0x438] sm:$0xff] %v8687_v29  ;;  %2931 = vmatmul.bf16.vlgmr.msra.gmra.mxu0 %v7851_v44  ;;  %v6062_v49 = vld [vmem:[%s7759_s16 + $0x638] sm:$0xf0]  ;;  %v5901_v18 = vor.u32 %v6716_v61, %v5900_v60 }
 0x181   : > { %2999 = vmatpush.bf16.msrb.mxu0 %v6533_v50  ;;  %3056 = vmatpush.bf16.msrb.mxu3 %v6545_v54  ;;  %3091 = vst [vmem:[%s7771_s11 + $0x80] sm:$0xff] %v8696_v20  ;;  %v8714_v50 = vperm.slane %v8639_v23, 2  ;;  %v6057_v54 = vor.u32 %v6735_v46, %v6054_v47  ;;  %v6065_v55 = vor.u32 %v6736_v48, %v6062_v49  ;;  %v6636_v46 = vld [vmem:[%s7759_s16 + $0x274] sm:$0xf0]  ;;  %v5572_v49 = vld [vmem:[%s7759_s16 + $0x1d0] sm:$0xf] }
 0x182   : > { %2988 = vmatmul.bf16.vlgmr.msra.gmra.mxu3 %v7851_v44  ;;  %v2666_v59 = vpop.f32.mrf.mxu2  ;;  %v5745_v48 = vor.u32 %v6656_v39, %v5742_v41 }
 0x183   : > { %3019 = vmatpush.bf16.msrb.mxu1 %v6377_v9  ;;  %v5902_v9 = vld [vmem:[%s7759_s16 + $0x4f8] sm:$0xf0] }
 0x184   : > { %3038 = vmatpush.bf16.msrb.mxu2 %v6381_v38  ;;  %v5894_v38 = vld [vmem:[%s7759_s16 + $0x4f0] sm:$0xf0]  ;;  %v2649_v16 = vpop.f32.mrf.mxu1 }
 0x185   : > { %3000 = vmatpush.bf16.msrb.mxu0 %v6373_v52  ;;  %3057 = vmatpush.bf16.msrb.mxu3 %v6385_v11  ;;  %v2685_v5 = vpop.f32.mrf.mxu3  ;;  %v6696_v52 = vld [vmem:[%s7759_s16 + $0x45c] sm:$0xf]  ;;  %v8730_v11 = vadd.f32 %v2666_v59, %v8714_v50  ;;  %v2630_v15 = vpop.f32.mrf.mxu0  ;;  %v8740_v21 = vadd.f32 %v2649_v16, %v8673_v4  ;;  %v5897_v32 = vor.u32 %v6695_v2, %v5894_v38  ;;  %v5420_v38 = vld [vmem:[%s7759_s16 + $0x98] sm:$0xf]  ;;  %v5412_v16 = vld [vmem:[%s7759_s16 + $0x90] sm:$0xf] }
 0x186   : > { %v8733_v12 = vadd.f32 %v2685_v5, %v8717_v51  ;;  %v8737_v13 = vadd.f32 %v2630_v15, %v8668_v6  ;;  %v5905_v33 = vor.u32 %v6696_v52, %v5902_v9  ;;  %v6596_v15 = vld [vmem:[%s7759_s16 + $0x134] sm:$0xf0] }
 0x187   : > { %3020 = vmatpush.bf16.msrb.mxu1 %v6217_v37  ;;  %3093 = vst [vmem:[%s7771_s11 + $0x90] sm:$0xff] %v8730_v11  ;;  %v5733_v37 = vor.u32 %v6675_v14, %v5732_v27  ;;  %v6575_v27 = vld [vmem:[%s7759_s16 + $0x94] sm:$0xf] }
 0x188   : > { %3039 = vmatpush.bf16.msrb.mxu2 %v6221_v22  ;;  %v6655_v22 = vld [vmem:[%s7759_s16 + $0x314] sm:$0xf]  ;;  %3094 = vst [vmem:[%s7771_s11 + $0x98] sm:$0xff] %v8733_v12 }
 0x189   : > { %3001 = vmatpush.bf16.msrb.mxu0 %v6213_v34  ;;  %3058 = vmatpush.bf16.msrb.mxu3 %v6225_v42  ;;  %v5734_v34 = vld [vmem:[%s7759_s16 + $0x3b0] sm:$0xf0]  ;;  %3131 = vst [vmem:[%s7771_s11 + $0x1c0] sm:$0xff] %v8737_v13  ;;  %v5580_v42 = vld [vmem:[%s7759_s16 + $0x1d8] sm:$0xf] }
 0x18a   : > { %3132 = vst [vmem:[%s7771_s11 + $0x1c8] sm:$0xff] %v8740_v21  ;;  %v5737_v47 = vor.u32 %v6655_v22, %v5734_v34  ;;  %v2668_v60 = vpop.f32.mrf.mxu2  ;;  %v5581_v52 = vor.u32 %v6636_v46, %v5580_v42  ;;  %v5414_v14 = vld [vmem:[%s7759_s16 + $0x130] sm:$0xf0]  ;;  %v5422_v22 = vld [vmem:[%s7759_s16 + $0x138] sm:$0xf0]  ;;  %v5421_v34 = vor.u32 %v6596_v15, %v5420_v38 }
 0x18b   : > { %3021 = vmatpush.bf16.msrb.mxu1 %v6057_v54  ;;  %v5574_v54 = vld [vmem:[%s7759_s16 + $0x270] sm:$0xf0]  ;;  %v8766_v63 = vadd.f32 %v2668_v60, %v8714_v50  ;;  %v5417_v41 = vor.u32 %v6575_v27, %v5414_v14 }
 0x18c   : > { %3040 = vmatpush.bf16.msrb.mxu2 %v6061_v53  ;;  %v6635_v53 = vld [vmem:[%s7759_s16 + $0x26c] sm:$0xf0]  ;;  %v2652_v5 = vpop.f32.mrf.mxu1 }
 0x18d   : > { %3002 = vmatpush.bf16.msrb.mxu0 %v6053_v58  ;;  %3059 = vmatpush.bf16.msrb.mxu3 %v6065_v55  ;;  %v6615_v58 = vld [vmem:[%s7759_s16 + $0x1d4] sm:$0xf]  ;;  %v2687_v61 = vpop.f32.mrf.mxu3  ;;  %v6616_v55 = vld [vmem:[%s7759_s16 + $0x1dc] sm:$0xf]  ;;  %v2633_v59 = vpop.f32.mrf.mxu0  ;;  %v5573_v9 = vor.u32 %v6635_v53, %v5572_v49  ;;  %3133 = vst [vmem:[%s7771_s11 + $0x1d0] sm:$0xff] %v8766_v63 }
 0x18e   : > { %v8769_v2 = vadd.f32 %v2687_v61, %v8717_v51  ;;  %v8778_v19 = vadd.f32 %v2633_v59, %v8668_v6  ;;  %v5585_v25 = vor.u32 %v6616_v55, %v5582_v62  ;;  %2955 = vmatmul.bf16.gmra.mxu1 %v7895_v31  ;;  %v656_v61 = vperm.slane %v8639_v23, 5 }
 0x18f   : > { %3022 = vmatpush.bf16.msrb.mxu1 %v5897_v32  ;;  %v8785_v32 = vadd.f32 %v2652_v5, %v8673_v4  ;;  %2974 = vmatmul.bf16.gmra.mxu2 %v7895_v31 }
 0x190   : > { %3041 = vmatpush.bf16.msrb.mxu2 %v5901_v18  ;;  %v6595_v18 = vld [vmem:[%s7759_s16 + $0x12c] sm:$0xf0]  ;;  %3134 = vst [vmem:[%s7771_s11 + $0x1d8] sm:$0xff] %v8769_v2  ;;  %2936 = vmatmul.bf16.gmra.mxu0 %v7895_v31 }
 0x191   : > { %3003 = vmatpush.bf16.msrb.mxu0 %v5893_v24  ;;  %3060 = vmatpush.bf16.msrb.mxu3 %v5905_v33  ;;  %v5577_v24 = vor.u32 %v6615_v58, %v5574_v54  ;;  %v6576_v33 = vld [vmem:[%s7759_s16 + $0x9c] sm:$0xf]  ;;  %3171 = vst [vmem:[%s7771_s11 + $0x300] sm:$0xff] %v8778_v19  ;;  %v5413_v39 = vor.u32 %v6595_v18, %v5412_v16 }
 0x192   : > { %2993 = vmatmul.bf16.gmra.mxu3 %v7895_v31  ;;  %3172 = vst [vmem:[%s7771_s11 + $0x308] sm:$0xff] %v8785_v32 }
 0x193   : > { %3023 = vmatpush.bf16.msrb.mxu1 %v5737_v47 }
 0x194   : > { %3042 = vmatpush.bf16.msrb.mxu2 %v5741_v10  ;;  %v5425_v10 = vor.u32 %v6576_v33, %v5422_v22  ;;  %v2654_v49 = vpop.f32.mrf.mxu1 }
 0x195   : > { %3004 = vmatpush.bf16.msrb.mxu0 %v5733_v37  ;;  %3061 = vmatpush.bf16.msrb.mxu3 %v5745_v48  ;;  %v2671_v37 = vpop.f32.mrf.mxu2  ;;  %v2690_v42 = vpop.f32.mrf.mxu3  ;;  %v8807_v58 = vadd.f32 %v2654_v49, %v8673_v4 }
 0x196   : > { %v8798_v46 = vadd.f32 %v2671_v37, %v8714_v50  ;;  %v8801_v47 = vadd.f32 %v2690_v42, %v8717_v51  ;;  %v2635_v48 = vpop.f32.mrf.mxu0 }
 0x197   : > { %3024 = vmatpush.bf16.msrb.mxu1 %v5577_v24  ;;  %v8804_v53 = vadd.f32 %v2635_v48, %v8668_v6  ;;  %3212 = vst [vmem:[%s7771_s11 + $0x448] sm:$0xff] %v8807_v58  ;;  %v655_v6 = vperm.slane %v8639_v23, 4 }
 0x198   : > { %3043 = vmatpush.bf16.msrb.mxu2 %v5581_v52  ;;  %3173 = vst [vmem:[%s7771_s11 + $0x310] sm:$0xff] %v8798_v46 }
 0x199   : > { %3005 = vmatpush.bf16.msrb.mxu0 %v5573_v9  ;;  %3062 = vmatpush.bf16.msrb.mxu3 %v5585_v25  ;;  %3174 = vst [vmem:[%s7771_s11 + $0x318] sm:$0xff] %v8801_v47 }
 0x19a   : > { %3211 = vst [vmem:[%s7771_s11 + $0x440] sm:$0xff] %v8804_v53 }
 0x19b   : > { %3025 = vmatpush.bf16.msrb.mxu1 %v5417_v41 }
 0x19c   : > { %3044 = vmatpush.bf16.msrb.mxu2 %v5421_v34  ;;  %v2723_v59 = vpop.f32.mrf.mxu1 }
 0x19d   : > { %3006 = vmatpush.bf16.msrb.mxu0 %v5413_v39  ;;  %3063 = vmatpush.bf16.msrb.mxu3 %v5425_v10  ;;  %v2673_v60 = vpop.f32.mrf.mxu2  ;;  %v2692_v4 = vpop.f32.mrf.mxu3  ;;  %v8831_v38 = vadd.f32 %v2723_v59, %v656_v61  ;;  %v8895_v59 = vld [vmem:[%s7771_s11] sm:$0xff] }
 0x19e   : > { %v8820_v54 = vadd.f32 %v2673_v60, %v8714_v50  ;;  %v8823_v55 = vadd.f32 %v2692_v4, %v8717_v51  ;;  %v2704_v62 = vpop.f32.mrf.mxu0  ;;  %3026 = vmatmul.bf16.vlgmr.msrb.gmra.mxu1 %v7851_v44  ;;  %v657_v50 = vperm.slane %v8639_v23, 6  ;;  %v658_v51 = vperm.slane %v8639_v23, 7  ;;  %11983 = vst [vmem:[#allocation22_spill] sm:$0xff] %v8895_v59 }
 0x19f   : > { %v8827_v5 = vadd.f32 %v2704_v62, %v655_v6  ;;  %3045 = vmatmul.bf16.vlgmr.msrb.gmra.mxu2 %v7851_v44  ;;  %3096 = vst [vmem:[%s7771_s11 + $0xa8] sm:$0xff] %v8831_v38 }
 0x1a0   : > { %11976 = vst [vmem:[#allocation15_spill] sm:$0xff] %v8823_v55  ;;  %3007 = vmatmul.bf16.vlgmr.msrb.gmra.mxu0 %v7851_v44 }
 0x1a1   : > { %3213 = vst [vmem:[%s7771_s11 + $0x450] sm:$0xff] %v8820_v54 }
 0x1a2   : > { %3214 = vst [vmem:[%s7771_s11 + $0x458] sm:$0xff] %v8823_v55  ;;  %3064 = vmatmul.bf16.vlgmr.msrb.gmra.mxu3 %v7851_v44 }
 0x1a3   : > { %3095 = vst [vmem:[%s7771_s11 + $0xa0] sm:$0xff] %v8827_v5 }
 0x1a4   : > { %v2725_v24 = vpop.f32.mrf.mxu1 }
 0x1a5   : > { %v2742_v52 = vpop.f32.mrf.mxu2  ;;  %v2761_v9 = vpop.f32.mrf.mxu3  ;;  %v8849_v27 = vadd.f32 %v2725_v24, %v656_v61 }
 0x1a6   : > { %v8843_v15 = vadd.f32 %v2742_v52, %v657_v50  ;;  %v8845_v16 = vadd.f32 %v2761_v9, %v658_v51  ;;  %v2706_v18 = vpop.f32.mrf.mxu0  ;;  %v8898_v52 = vld [vmem:[%s7771_s11 + $0x8] sm:$0xff] }
 0x1a7   : > { %v8847_v25 = vadd.f32 %v2706_v18, %v655_v6  ;;  %3136 = vst [vmem:[%s7771_s11 + $0x1e8] sm:$0xff] %v8849_v27  ;;  %v3835_v9 = vmax.f32 %v8895_v59, %v8898_v52 }
 0x1a8   : > { %3097 = vst [vmem:[%s7771_s11 + $0xb0] sm:$0xff] %v8843_v15 }
 0x1a9   : > { %3098 = vst [vmem:[%s7771_s11 + $0xb8] sm:$0xff] %v8845_v16 }
 0x1aa   : > { %3135 = vst [vmem:[%s7771_s11 + $0x1e0] sm:$0xff] %v8847_v25 }
 0x1ab   : > { %11984 = vst [vmem:[#allocation23_spill] sm:$0xff] %v8898_v52 }
 0x1ac   : > { %v2728_v34 = vpop.f32.mrf.mxu1 }
 0x1ad   : > { %v2744_v44 = vpop.f32.mrf.mxu2  ;;  %v2763_v23 = vpop.f32.mrf.mxu3  ;;  %v8869_v41 = vadd.f32 %v2728_v34, %v656_v61 }
 0x1ae   : > { %v8859_v14 = vadd.f32 %v2744_v44, %v657_v50  ;;  %v8861_v33 = vadd.f32 %v2763_v23, %v658_v51  ;;  %v2709_v22 = vpop.f32.mrf.mxu0  ;;  %3031 = vmatmul.bf16.gmra.mxu1 %v7895_v31 }
 0x1af   : > { %v8865_v39 = vadd.f32 %v2709_v22, %v655_v6  ;;  %11978 = vst [vmem:[#allocation17_spill] sm:$0xff] %v8869_v41  ;;  %3050 = vmatmul.bf16.gmra.mxu2 %v7895_v31 }
 0x1b0   : > { %11977 = vst [vmem:[#allocation16_spill] sm:$0xff] %v8861_v33  ;;  %3012 = vmatmul.bf16.gmra.mxu0 %v7895_v31 }
 0x1b1   : > { %3137 = vst [vmem:[%s7771_s11 + $0x1f0] sm:$0xff] %v8859_v14 }
 0x1b2   : > { %3138 = vst [vmem:[%s7771_s11 + $0x1f8] sm:$0xff] %v8861_v33  ;;  %3069 = vmatmul.bf16.gmra.mxu3 %v7895_v31  ;;  %v8892_v31 = vld [vmem:[%s7765_s7 + $0x18] sm:$0xff] }
 0x1b3   : > { %3175 = vst [vmem:[%s7771_s11 + $0x320] sm:$0xff] %v8865_v39  ;;  %v8911_v18 = vperm.slane %v8892_v31, 0  ;;  %v8914_v23 = vperm.slane %v8892_v31, 1 }
 0x1b4   : > { %3176 = vst [vmem:[%s7771_s11 + $0x328] sm:$0xff] %v8869_v41  ;;  %v2730_v60 = vpop.f32.mrf.mxu1 }
 0x1b5   : > { %v2747_v10 = vpop.f32.mrf.mxu2  ;;  %v2766_v37 = vpop.f32.mrf.mxu3  ;;  %v8885_v62 = vadd.f32 %v2730_v60, %v656_v61 }
 0x1b6   : > { %v8879_v42 = vadd.f32 %v2747_v10, %v657_v50  ;;  %v8881_v48 = vadd.f32 %v2766_v37, %v658_v51  ;;  %v2711_v49 = vpop.f32.mrf.mxu0 }
 0x1b7   : > { %v8883_v4 = vadd.f32 %v2711_v49, %v655_v6  ;;  %11982 = vst [vmem:[#allocation21_spill] sm:$0xff] %v8885_v62  ;;  %v8907_v6 = vld [vmem:[%s7771_s11 + $0x10] sm:$0xff]  ;;  %v8921_v49 = vld [vmem:[%s7771_s11 + $0x18] sm:$0xff] }
 0x1b8   : > { %11979 = vst [vmem:[#allocation18_spill] sm:$0xff] %v8879_v42  ;;  %v3836_v61 = vmax.f32 %v3835_v9, %v8907_v6 }
 0x1b9   : > { %11980 = vst [vmem:[#allocation19_spill] sm:$0xff] %v8881_v48 }
 0x1ba   : > { %11981 = vst [vmem:[#allocation20_spill] sm:$0xff] %v8883_v4  ;;  %v3837_v60 = vmax.f32 %v3836_v61, %v8921_v49  ;;  %v8943_v61 = vperm.slane %v8892_v31, 2 }
 0x1bb   : > { %3177 = vst [vmem:[%s7771_s11 + $0x330] sm:$0xff] %v8879_v42  ;;  %v7292_v42 = vld [vmem:[%s7771_s11 + $0x160] sm:$0xff] }
 0x1bc   : > { %3178 = vst [vmem:[%s7771_s11 + $0x338] sm:$0xff] %v8881_v48  ;;  %v2799_v37 = vpop.f32.mrf.mxu1  ;;  %v8969_v48 = vld [vmem:[%s7771_s11 + $0x30] sm:$0xff] }
 0x1bd   : > { %3215 = vst [vmem:[%s7771_s11 + $0x460] sm:$0xff] %v8883_v4  ;;  %v2749_v24 = vpop.f32.mrf.mxu2  ;;  %v2768_v44 = vpop.f32.mrf.mxu3  ;;  %v7291_v4 = vld [vmem:[%s7771_s11 + $0x288] sm:$0xff] }
 0x1be   : > { %3216 = vst [vmem:[%s7771_s11 + $0x468] sm:$0xff] %v8885_v62  ;;  %v8916_v22 = vadd.f32 %v2749_v24, %v657_v50  ;;  %v8918_v34 = vadd.f32 %v2768_v44, %v658_v51  ;;  %v2780_v10 = vpop.f32.mrf.mxu0  ;;  %v8932_v50 = vadd.f32 %v2799_v37, %v8914_v23  ;;  %v7283_v51 = vld [vmem:[%s7771_s11 + $0x140] sm:$0xff]  ;;  %v7284_v24 = vld [vmem:[%s7771_s11 + $0x148] sm:$0xff]  ;;  %v7286_v37 = vld [vmem:[%s7771_s11 + $0x150] sm:$0xff] }
 0x1bf   : > { %11985 = vst [vmem:[#allocation24_spill] sm:$0xff] %v8907_v6  ;;  %v8927_v9 = vadd.f32 %v2780_v10, %v8911_v18  ;;  %v3876_v44 = vmax.f32 %v7283_v51, %v7284_v24  ;;  %v8937_v6 = vld [vmem:[%s7771_s11 + $0x20] sm:$0xff]  ;;  %v8946_v10 = vperm.slane %v8892_v31, 3 }
 0x1c0   : > { %11986 = vst [vmem:[#allocation25_spill] sm:$0xff] %v8916_v22  ;;  %v3838_v52 = vmax.f32 %v3837_v60, %v8937_v6  ;;  %v8952_v60 = vld [vmem:[%s7771_s11 + $0x28] sm:$0xff] }
 0x1c1   : > { %11987 = vst [vmem:[#allocation26_spill] sm:$0xff] %v8918_v34 }
 0x1c2   : > { %11988 = vst [vmem:[#allocation27_spill] sm:$0xff] %v8921_v49  ;;  %v3877_v49 = vmax.f32 %v3876_v44, %v7286_v37 }
 0x1c3   : > { %3217 = vst [vmem:[%s7771_s11 + $0x470] sm:$0xff] %v8916_v22 }
 0x1c4   : > { %3218 = vst [vmem:[%s7771_s11 + $0x478] sm:$0xff] %v8918_v34  ;;  %v2801_v44 = vpop.f32.mrf.mxu1 }
 0x1c5   : > { %11989 = vst [vmem:[#allocation28_spill] sm:$0xff] %v8937_v6  ;;  %v2818_v51 = vpop.f32.mrf.mxu2  ;;  %v2837_v24 = vpop.f32.mrf.mxu3  ;;  %v3839_v6 = vmax.f32 %v3838_v52, %v8952_v60  ;;  %v8965_v62 = vadd.f32 %v2801_v44, %v8914_v23  ;;  %v7288_v52 = vld [vmem:[%s7771_s11 + $0x158] sm:$0xff] }
 0x1c6   : > { %3099 = vst [vmem:[%s7771_s11 + $0xc0] sm:$0xff] %v8927_v9  ;;  %v8956_v59 = vadd.f32 %v2818_v51, %v8943_v61  ;;  %v8959_v34 = vadd.f32 %v2837_v24, %v8946_v10  ;;  %v2782_v22 = vpop.f32.mrf.mxu0  ;;  %v7290_v24 = vld [vmem:[%s7771_s11 + $0x280] sm:$0xff] }
 0x1c7   : > { %3100 = vst [vmem:[%s7771_s11 + $0xc8] sm:$0xff] %v8932_v50  ;;  %v8962_v37 = vadd.f32 %v2782_v22, %v8911_v18  ;;  %v3840_v51 = vmax.f32 %v3839_v6, %v8969_v48  ;;  %v3917_v22 = vmax.f32 %v7290_v24, %v7291_v4  ;;  %v8985_v6 = vld [vmem:[%s7771_s11 + $0x38] sm:$0xff]  ;;  %v7295_v4 = vld [vmem:[%s7771_s11 + $0x168] sm:$0xff] }
 0x1c8   : > { %11990 = vst [vmem:[#allocation29_spill] sm:$0xff] %v8952_v60  ;;  %v3878_v60 = vmax.f32 %v3877_v49, %v7288_v52  ;;  %v7293_v49 = vld [vmem:[%s7771_s11 + $0x290] sm:$0xff] }
 0x1c9   : > { %11991 = vst [vmem:[#allocation30_spill] sm:$0xff] %v8956_v59  ;;  %v3918_v44 = vmax.f32 %v3917_v22, %v7293_v49  ;;  %v3841_v52 = vmax.f32 %v3840_v51, %v8985_v6 }
 0x1ca   : > { %11992 = vst [vmem:[#allocation31_spill] sm:$0xff] %v8959_v34  ;;  %v3879_v55 = vmax.f32 %v3878_v60, %v7292_v42  ;;  %v8990_v42 = vld [vmem:[%s7771_s11 + $0x40] sm:$0xff] }
 0x1cb   : > { %11993 = vst [vmem:[#allocation32_spill] sm:$0xff] %v8962_v37  ;;  %v3842_v60 = vmax.f32 %v3841_v52, %v8990_v42 }
 0x1cc   : > { %11994 = vst [vmem:[#allocation33_spill] sm:$0xff] %v8965_v62  ;;  %v3880_v24 = vmax.f32 %v3879_v55, %v7295_v4  ;;  %v2804_v49 = vpop.f32.mrf.mxu1  ;;  %v7298_v55 = vld [vmem:[%s7771_s11 + $0x170] sm:$0xff] }
 0x1cd   : > { %11995 = vst [vmem:[#allocation34_spill] sm:$0xff] %v8969_v48  ;;  %v2820_v48 = vpop.f32.mrf.mxu2  ;;  %v9011_v41 = vadd.f32 %v2804_v49, %v8914_v23 }
 0x1ce   : > { %3101 = vst [vmem:[%s7771_s11 + $0xd0] sm:$0xff] %v8956_v59  ;;  %v2785_v51 = vpop.f32.mrf.mxu0  ;;  %v3881_v4 = vmax.f32 %v3880_v24, %v7298_v55  ;;  %v9015_v24 = vld [vmem:[%s7771_s11 + $0x48] sm:$0xff] }
 0x1cf   : > { %3102 = vst [vmem:[%s7771_s11 + $0xd8] sm:$0xff] %v8959_v34  ;;  %v2839_v34 = vpop.f32.mrf.mxu3  ;;  %v9004_v52 = vadd.f32 %v2785_v51, %v8911_v18  ;;  %v3843_v55 = vmax.f32 %v3842_v60, %v9015_v24  ;;  %v7303_v51 = vld [vmem:[%s7771_s11 + $0x3d0] sm:$0xff] }
 0x1d0   : > { %3139 = vst [vmem:[%s7771_s11 + $0x200] sm:$0xff] %v8962_v37  ;;  %v8997_v22 = vadd.f32 %v2839_v34, %v8946_v10  ;;  %v7300_v34 = vld [vmem:[%s7771_s11 + $0x3c8] sm:$0xff] }
 0x1d1   : > { %3140 = vst [vmem:[%s7771_s11 + $0x208] sm:$0xff] %v8965_v62  ;;  %v8994_v62 = vadd.f32 %v2820_v48, %v8943_v61  ;;  %v7299_v48 = vld [vmem:[%s7771_s11 + $0x3c0] sm:$0xff] }
 0x1d2   : > { %11996 = vst [vmem:[#allocation35_spill] sm:$0xff] %v8985_v6  ;;  %v7297_v6 = vld [vmem:[%s7771_s11 + $0x298] sm:$0xff] }
 0x1d3   : > { %11997 = vst [vmem:[#allocation36_spill] sm:$0xff] %v8990_v42  ;;  %v3919_v37 = vmax.f32 %v3918_v44, %v7297_v6  ;;  %v3958_v42 = vmax.f32 %v7299_v48, %v7300_v34  ;;  %v7301_v44 = vld [vmem:[%s7771_s11 + $0x2a0] sm:$0xff]  ;;  %v7304_v48 = vld [vmem:[%s7771_s11 + $0x178] sm:$0xff] }
 0x1d4   : > { %11998 = vst [vmem:[#allocation37_spill] sm:$0xff] %v8994_v62  ;;  %v3882_v34 = vmax.f32 %v3881_v4, %v7304_v48  ;;  %v2806_v48 = vpop.f32.mrf.mxu1 }
 0x1d5   : > { %11999 = vst [vmem:[#allocation38_spill] sm:$0xff] %v8997_v22  ;;  %v3920_v6 = vmax.f32 %v3919_v37, %v7301_v44  ;;  %v2823_v59 = vpop.f32.mrf.mxu2  ;;  %v7306_v44 = vld [vmem:[%s7771_s11 + $0x2a8] sm:$0xff] }
 0x1d6   : > { %3141 = vst [vmem:[%s7771_s11 + $0x210] sm:$0xff] %v8994_v62  ;;  %v3959_v62 = vmax.f32 %v3958_v42, %v7303_v51  ;;  %v9031_v42 = vadd.f32 %v2823_v59, %v8943_v61  ;;  %v2787_v51 = vpop.f32.mrf.mxu0  ;;  %v7309_v59 = vld [vmem:[%s7771_s11 + $0x2b0] sm:$0xff] }
 0x1d7   : > { %12000 = vst [vmem:[#allocation39_spill] sm:$0xff] %v9004_v52  ;;  %v2842_v37 = vpop.f32.mrf.mxu3  ;;  %v3921_v60 = vmax.f32 %v3920_v6, %v7306_v44  ;;  %v9038_v6 = vadd.f32 %v2787_v51, %v8911_v18  ;;  %v9045_v44 = vld [vmem:[%s7771_s11 + $0x58] sm:$0xff] }
 0x1d8   : > { %3142 = vst [vmem:[%s7771_s11 + $0x218] sm:$0xff] %v8997_v22  ;;  %v9025_v22 = vld [vmem:[%s7771_s11 + $0x50] sm:$0xff]  ;;  %v9034_v4 = vadd.f32 %v2842_v37, %v8946_v10 }
 0x1d9   : > { %12001 = vst [vmem:[#allocation40_spill] sm:$0xff] %v9011_v41  ;;  %v3844_v49 = vmax.f32 %v3843_v55, %v9025_v22  ;;  %v7308_v55 = vld [vmem:[%s7771_s11 + $0x3d8] sm:$0xff] }
 0x1da   : > { %12002 = vst [vmem:[#allocation41_spill] sm:$0xff] %v9015_v24  ;;  %v7307_v24 = vld [vmem:[%s7771_s11 + $0x180] sm:$0xff] }
 0x1db   : > { %3179 = vst [vmem:[%s7771_s11 + $0x340] sm:$0xff] %v9004_v52  ;;  %v3883_v52 = vmax.f32 %v3882_v34, %v7307_v24  ;;  %v9041_v24 = vadd.f32 %v2806_v48, %v8914_v23  ;;  %v3922_v34 = vmax.f32 %v3921_v60, %v7309_v59  ;;  %v3845_v37 = vmax.f32 %v3844_v49, %v9045_v44  ;;  %v7313_v60 = vld [vmem:[%s7771_s11 + $0x2b8] sm:$0xff]  ;;  %v7314_v48 = vld [vmem:[%s7771_s11 + $0x190] sm:$0xff] }
 0x1dc   : > { %3180 = vst [vmem:[%s7771_s11 + $0x348] sm:$0xff] %v9011_v41  ;;  %v7311_v41 = vld [vmem:[%s7771_s11 + $0x3e0] sm:$0xff] }
 0x1dd   : > { %12003 = vst [vmem:[#allocation42_spill] sm:$0xff] %v9025_v22  ;;  %v3960_v22 = vmax.f32 %v3959_v62, %v7308_v55  ;;  %v7312_v62 = vld [vmem:[%s7771_s11 + $0x188] sm:$0xff]  ;;  %v3846_v23 = vmax.f32 %v3845_v37, %v8530_v3  ;;  %v3923_v51 = vmax.f32 %v3922_v34, %v7313_v60  ;;  %v9062_v55 = vperm.slane %v8892_v31, 4  ;;  %v2825_v59 = vpop.f32.mrf.mxu2  ;;  %v7316_v37 = vld [vmem:[%s7771_s11 + $0x2c0] sm:$0xff] }
 0x1de   : > { %12004 = vst [vmem:[#allocation43_spill] sm:$0xff] %v9034_v4  ;;  %v3884_v18 = vmax.f32 %v3883_v52, %v7312_v62  ;;  %v9066_v3 = vperm.slane %v8892_v31, 5 }
 0x1df   : > { %12005 = vst [vmem:[#allocation44_spill] sm:$0xff] %v9041_v24  ;;  %v3961_v33 = vmax.f32 %v3960_v22, %v7311_v41  ;;  %v7315_v41 = vld [vmem:[%s7771_s11 + $0x3e8] sm:$0xff]  ;;  %v2844_v52 = vpop.f32.mrf.mxu3  ;;  %v3924_v62 = vmax.f32 %v3923_v51, %v7316_v37  ;;  %v3847_v34 = vmax.f32 %v3846_v23, %v8536_v17 }
 0x1e0   : > { %12006 = vst [vmem:[#allocation45_spill] sm:$0xff] %v9045_v44  ;;  %v3885_v49 = vmax.f32 %v3884_v18, %v7314_v48  ;;  %v9071_v18 = vadd.f32 %v2825_v59, %v8943_v61  ;;  %v9074_v60 = vadd.f32 %v2844_v52, %v8946_v10  ;;  %v2875_v48 = vpop.f32.mrf.mxu1  ;;  %v7319_v10 = vld [vmem:[%s7771_s11 + $0x2c8] sm:$0xff]  ;;  %v7321_v52 = vld [vmem:[%s7771_s11 + $0x2d0] sm:$0xff] }
 0x1e1   : > { %3181 = vst [vmem:[%s7771_s11 + $0x350] sm:$0xff] %v9031_v42  ;;  %v3962_v22 = vmax.f32 %v3961_v33, %v7315_v41  ;;  %v2856_v33 = vpop.f32.mrf.mxu0  ;;  %v7317_v41 = vld [vmem:[%s7771_s11 + $0x3f0] sm:$0xff]  ;;  %v3848_v51 = vmax.f32 %v3847_v34, %v8563_v35  ;;  %v9087_v61 = vadd.f32 %v2875_v48, %v9066_v3  ;;  %v3925_v23 = vmax.f32 %v3924_v62, %v7319_v10  ;;  %v7322_v62 = vld [vmem:[%s7771_s11 + $0x400] sm:$0xff] }
 0x1e2   : > { %3182 = vst [vmem:[%s7771_s11 + $0x358] sm:$0xff] %v9034_v4  ;;  %v9082_v17 = vadd.f32 %v2856_v33, %v9062_v55  ;;  %v9097_v35 = vperm.slane %v8892_v31, 7 }
 0x1e3   : > { %3219 = vst [vmem:[%s7771_s11 + $0x480] sm:$0xff] %v9038_v6  ;;  %v3963_v44 = vmax.f32 %v3962_v22, %v7317_v41  ;;  %v3926_v37 = vmax.f32 %v3925_v23, %v7321_v52  ;;  %v3849_v34 = vmax.f32 %v3848_v51, %v8566_v36 }
 0x1e4   : > { %3220 = vst [vmem:[%s7771_s11 + $0x488] sm:$0xff] %v9041_v24  ;;  %v7318_v24 = vld [vmem:[%s7771_s11 + $0x198] sm:$0xff] }
 0x1e5   : > { %v3886_v4 = vmax.f32 %v3885_v49, %v7318_v24  ;;  %3221 = vst [vmem:[%s7771_s11 + $0x490] sm:$0xff] %v9071_v18  ;;  %v9094_v24 = vperm.slane %v8892_v31, 6  ;;  %v7320_v49 = vld [vmem:[%s7771_s11 + $0x3f8] sm:$0xff]  ;;  %v3850_v31 = vmax.f32 %v3849_v34, %v8696_v20 }
 0x1e6   : > { %12007 = vst [vmem:[#allocation46_spill] sm:$0xff] %v9082_v17  ;;  %v3964_v59 = vmax.f32 %v3963_v44, %v7320_v49  ;;  %v7324_v49 = vld [vmem:[%s7771_s11 + $0x408] sm:$0xff] }
 0x1e7   : > { %3222 = vst [vmem:[%s7771_s11 + $0x498] sm:$0xff] %v9074_v60  ;;  %v3887_v22 = vmax.f32 %v3886_v4, %v8570_v43  ;;  %v2894_v4 = vpop.f32.mrf.mxu2  ;;  %v2913_v33 = vpop.f32.mrf.mxu3  ;;  %v3851_v34 = vmax.f32 %v3850_v31, %v8703_v40 }
 0x1e8   : > { %3103 = vst [vmem:[%s7771_s11 + $0xe0] sm:$0xff] %v9082_v17  ;;  %v3965_v43 = vmax.f32 %v3964_v59, %v7322_v62  ;;  %v9108_v44 = vadd.f32 %v2894_v4, %v9094_v24  ;;  %v9111_v41 = vadd.f32 %v2913_v33, %v9097_v35  ;;  %v2877_v51 = vpop.f32.mrf.mxu1  ;;  %v7325_v62 = vld [vmem:[%s7771_s11 + $0x410] sm:$0xff] }
 0x1e9   : > { %3104 = vst [vmem:[%s7771_s11 + $0xe8] sm:$0xff] %v9087_v61  ;;  %v3888_v48 = vmax.f32 %v3887_v22, %v8573_v45  ;;  %v2858_v36 = vpop.f32.mrf.mxu0  ;;  %v9117_v23 = vadd.f32 %v2877_v51, %v9066_v3  ;;  %v7323_v45 = vld [vmem:[%s7771_s11 + $0x2d8] sm:$0xff] }
 0x1ea   : > { %12008 = vst [vmem:[#allocation47_spill] sm:$0xff] %v9111_v41  ;;  %v9114_v10 = vadd.f32 %v2858_v36, %v9062_v55  ;;  %v3927_v22 = vmax.f32 %v3926_v37, %v7323_v45  ;;  %v3966_v59 = vmax.f32 %v3965_v43, %v7324_v49  ;;  %v3852_v37 = vmax.f32 %v3851_v34, %v8730_v11 }
 0x1eb   : > { %v3889_v20 = vmax.f32 %v3888_v48, %v8599_v7  ;;  %3105 = vst [vmem:[%s7771_s11 + $0xf0] sm:$0xff] %v9108_v44 }
 0x1ec   : > { %3106 = vst [vmem:[%s7771_s11 + $0xf8] sm:$0xff] %v9111_v41  ;;  %v3928_v52 = vmax.f32 %v3927_v22, %v8615_v26  ;;  %v3967_v4 = vmax.f32 %v3966_v59, %v7325_v62  ;;  %v3853_v22 = vmax.f32 %v3852_v37, %v8733_v12 }
 0x1ed   : > { %3143 = vst [vmem:[%s7771_s11 + $0x220] sm:$0xff] %v9114_v10  ;;  %v3890_v7 = vmax.f32 %v3889_v20, %v8602_v8  ;;  %v7326_v8 = vld [vmem:[%s7771_s11 + $0x418] sm:$0xff] }
 0x1ee   : > { %3144 = vst [vmem:[%s7771_s11 + $0x228] sm:$0xff] %v9117_v23  ;;  %v3929_v48 = vmax.f32 %v3928_v52, %v8622_v30  ;;  %v3968_v45 = vmax.f32 %v3967_v4, %v7326_v8  ;;  %v3854_v59 = vmax.f32 %v3853_v22, %v8827_v5 }
 0x1ef   : > { %v2896_v43 = vpop.f32.mrf.mxu2  ;;  %v2915_v33 = vpop.f32.mrf.mxu3  ;;  %v3891_v26 = vmax.f32 %v3890_v7, %v8737_v13 }
 0x1f0   : > { %v9138_v40 = vadd.f32 %v2896_v43, %v9094_v24  ;;  %v9141_v31 = vadd.f32 %v2915_v33, %v9097_v35  ;;  %v2880_v51 = vpop.f32.mrf.mxu1  ;;  %v3930_v11 = vmax.f32 %v3929_v48, %v8644_v56  ;;  %v3969_v13 = vmax.f32 %v3968_v45, %v8653_v0  ;;  %v9188_v43 = vld [vmem:[%s7765_s7 + $0x20] sm:$0xff] }
 0x1f1   : > { %v2861_v36 = vpop.f32.mrf.mxu0  ;;  %v9155_v20 = vadd.f32 %v2880_v51, %v9066_v3  ;;  %v3892_v49 = vmax.f32 %v3891_v26, %v8740_v21  ;;  %v3855_v21 = vmax.f32 %v3854_v59, %v8831_v38 }
 0x1f2   : > { %3145 = vst [vmem:[%s7771_s11 + $0x230] sm:$0xff] %v9138_v40  ;;  %v9149_v30 = vadd.f32 %v2861_v36, %v9062_v55  ;;  %v3931_v56 = vmax.f32 %v3930_v11, %v8647_v57  ;;  %v3970_v0 = vmax.f32 %v3969_v13, %v8656_v1 }
 0x1f3   : > { %3146 = vst [vmem:[%s7771_s11 + $0x238] sm:$0xff] %v9141_v31  ;;  %v3893_v12 = vmax.f32 %v3892_v49, %v8766_v63  ;;  %v3856_v38 = vmax.f32 %v3855_v21, %v8843_v15  ;;  %v12011_v49 = vld [vmem:[#allocation30_spill] sm:$0xff] }
 0x1f4   : > { %3183 = vst [vmem:[%s7771_s11 + $0x360] sm:$0xff] %v9149_v30  ;;  %v3932_v62 = vmax.f32 %v3931_v56, %v8778_v19  ;;  %v3971_v7 = vmax.f32 %v3970_v0, %v8684_v28  ;;  %v12012_v56 = vld [vmem:[#allocation17_spill] sm:$0xff]  ;;  %v12013_v0 = vld [vmem:[#allocation32_spill] sm:$0xff] }
 0x1f5   : > { %3184 = vst [vmem:[%s7771_s11 + $0x368] sm:$0xff] %v9155_v20  ;;  %v3894_v19 = vmax.f32 %v3893_v12, %v8769_v2  ;;  %v3857_v15 = vmax.f32 %v3856_v38, %v8845_v16  ;;  %v12017_v38 = vld [vmem:[#allocation18_spill] sm:$0xff] }
 0x1f6   : > { %v3933_v33 = vmax.f32 %v3932_v62, %v8785_v32 }
 0x1f7   : > { %v2899_v52 = vpop.f32.mrf.mxu2  ;;  %v2918_v34 = vpop.f32.mrf.mxu3  ;;  %v3895_v28 = vmax.f32 %v3894_v19, %v8847_v25  ;;  %v9204_v25 = vperm.slane %v9188_v43, 1  ;;  %v3858_v36 = vmax.f32 %v3857_v15, %v8927_v9 }
 0x1f8   : > { %v9169_v5 = vadd.f32 %v2899_v52, %v9094_v24  ;;  %v9172_v57 = vadd.f32 %v2918_v34, %v9097_v35  ;;  %v2882_v63 = vpop.f32.mrf.mxu1  ;;  %v3934_v2 = vmax.f32 %v3933_v33, %v8798_v46 }
 0x1f9   : > { %v2863_v4 = vpop.f32.mrf.mxu0  ;;  %v9179_v37 = vadd.f32 %v2882_v63, %v9066_v3  ;;  %v9200_v3 = vperm.slane %v9188_v43, 0 }
 0x1fa   : > { %v9176_v1 = vadd.f32 %v2863_v4, %v9062_v55  ;;  %3185 = vst [vmem:[%s7771_s11 + $0x370] sm:$0xff] %v9169_v5  ;;  %v3972_v55 = vmax.f32 %v3971_v7, %v8687_v29  ;;  %v3896_v29 = vmax.f32 %v3895_v28, %v8849_v27  ;;  %v12016_v4 = vld [vmem:[#allocation15_spill] sm:$0xff] }
 0x1fb   : > { %3186 = vst [vmem:[%s7771_s11 + $0x378] sm:$0xff] %v9172_v57  ;;  %v12018_v28 = vld [vmem:[#allocation31_spill] sm:$0xff] }
 0x1fc   : > { %3223 = vst [vmem:[%s7771_s11 + $0x4a0] sm:$0xff] %v9176_v1  ;;  %v3973_v48 = vmax.f32 %v3972_v55, %v8804_v53  ;;  %v3935_v53 = vmax.f32 %v3934_v2, %v8801_v47  ;;  %v3897_v45 = vmax.f32 %v3896_v29, %v8859_v14  ;;  %v9232_v47 = vperm.slane %v9188_v43, 2  ;;  %v12019_v2 = vld [vmem:[#allocation20_spill] sm:$0xff]  ;;  %v12021_v29 = vld [vmem:[#allocation19_spill] sm:$0xff] }
 0x1fd   : > { %3224 = vst [vmem:[%s7771_s11 + $0x4a8] sm:$0xff] %v9179_v37  ;;  %v9235_v14 = vperm.slane %v9188_v43, 3 }
 0x1fe   : > { %v3974_v27 = vmax.f32 %v3973_v48, %v8807_v58  ;;  %v12010_v58 = vld [vmem:[#allocation16_spill] sm:$0xff]  ;;  %v12020_v48 = vld [vmem:[#allocation33_spill] sm:$0xff] }
 0x1ff   : > { %v2901_v32 = vpop.f32.mrf.mxu2  ;;  %v2920_v26 = vpop.f32.mrf.mxu3  ;;  %v3898_v13 = vmax.f32 %v3897_v45, %v12010_v58 }
 0x200   : > { %v9209_v46 = vadd.f32 %v2901_v32, %v9094_v24  ;;  %v9212_v16 = vadd.f32 %v2920_v26, %v9097_v35  ;;  %v2951_v8 = vpop.f32.mrf.mxu1  ;;  %v3936_v24 = vmax.f32 %v3935_v53, %v8865_v39  ;;  %v3859_v35 = vmax.f32 %v3858_v36, %v8932_v50  ;;  %v12023_v53 = vld [vmem:[#allocation21_spill] sm:$0xff] }
 0x201   : > { %v2932_v51 = vpop.f32.mrf.mxu0  ;;  %v9225_v9 = vadd.f32 %v2951_v8, %v9204_v25  ;;  %v3975_v22 = vmax.f32 %v3974_v27, %v8820_v54  ;;  %v3899_v52 = vmax.f32 %v3898_v13, %v12013_v0 }
 0x202   : > { %3225 = vst [vmem:[%s7771_s11 + $0x4b0] sm:$0xff] %v9209_v46  ;;  %v9219_v11 = vadd.f32 %v2932_v51, %v9200_v3  ;;  %v3860_v59 = vmax.f32 %v3859_v35, %v12011_v49  ;;  %v3937_v12 = vmax.f32 %v3936_v24, %v12012_v56  ;;  %v12022_v51 = vld [vmem:[#allocation37_spill] sm:$0xff]  ;;  %v12024_v35 = vld [vmem:[#allocation39_spill] sm:$0xff] }
 0x203   : > { %3226 = vst [vmem:[%s7771_s11 + $0x4b8] sm:$0xff] %v9212_v16  ;;  %v3976_v63 = vmax.f32 %v3975_v22, %v12016_v4  ;;  %v3900_v32 = vmax.f32 %v3899_v52, %v12020_v48  ;;  %v12027_v4 = vld [vmem:[#allocation40_spill] sm:$0xff] }
 0x204   : > { %12009 = vst [vmem:[#allocation48_spill] sm:$0xff] %v9225_v9  ;;  %v3938_v33 = vmax.f32 %v3937_v12, %v12017_v38  ;;  %v3861_v55 = vmax.f32 %v3860_v59, %v12018_v28  ;;  %v12026_v12 = vld [vmem:[#allocation38_spill] sm:$0xff] }
 0x205   : > { %3107 = vst [vmem:[%s7771_s11 + $0x100] sm:$0xff] %v9219_v11  ;;  %v3977_v15 = vmax.f32 %v3976_v63, %v12019_v2  ;;  %v3901_v8 = vmax.f32 %v3900_v32, %v12022_v51 }
 0x206   : > { %3108 = vst [vmem:[%s7771_s11 + $0x108] sm:$0xff] %v9225_v9  ;;  %v3862_v26 = vmax.f32 %v3861_v55, %v9082_v17  ;;  %v3939_v36 = vmax.f32 %v3938_v33, %v12021_v29  ;;  %v12028_v33 = vld [vmem:[#allocation26_spill] sm:$0xff]  ;;  %v9789_v17 = vld [vmem:[%s7771_s11 + $0x148] sm:$0xff] }
 0x207   : > { %v2970_v39 = vpop.f32.mrf.mxu2  ;;  %v2989_v50 = vpop.f32.mrf.mxu3  ;;  %v3978_v45 = vmax.f32 %v3977_v15, %v12023_v53  ;;  %v3902_v0 = vmax.f32 %v3901_v8, %v12026_v12  ;;  %v12029_v53 = vld [vmem:[#allocation43_spill] sm:$0xff]  ;;  %12084 = vst [vmem:[#allocation67_spill] sm:$0xff] %v9789_v17 }
 0x208   : > { %v9245_v34 = vadd.f32 %v2970_v39, %v9232_v47  ;;  %v9248_v54 = vadd.f32 %v2989_v50, %v9235_v14  ;;  %v2953_v21 = vpop.f32.mrf.mxu1  ;;  %v3940_v22 = vmax.f32 %v3939_v36, %v12024_v35  ;;  %v3863_v58 = vmax.f32 %v3862_v26, %v9087_v61  ;;  %v12025_v50 = vld [vmem:[#allocation25_spill] sm:$0xff] }
 0x209   : > { %v2934_v62 = vpop.f32.mrf.mxu0  ;;  %v9255_v19 = vadd.f32 %v2953_v21, %v9204_v25  ;;  %v3979_v56 = vmax.f32 %v3978_v45, %v12025_v50  ;;  %v3903_v38 = vmax.f32 %v3902_v0, %v9114_v10 }
 0x20a   : > { %12014 = vst [vmem:[#allocation16_spill] sm:$0xff] %v9245_v34  ;;  %v9252_v7 = vadd.f32 %v2934_v62, %v9200_v3  ;;  %v3864_v52 = vmax.f32 %v3863_v58, %v9108_v44  ;;  %v3941_v63 = vmax.f32 %v3940_v22, %v12027_v4 }
 0x20b   : > { %12015 = vst [vmem:[#allocation30_spill] sm:$0xff] %v9248_v54  ;;  %v3980_v28 = vmax.f32 %v3979_v56, %v12028_v33  ;;  %v3904_v26 = vmax.f32 %v3903_v38, %v9117_v23 }
 0x20c   : > { %3109 = vst [vmem:[%s7771_s11 + $0x110] sm:$0xff] %v9245_v34  ;;  %v3942_v55 = vmax.f32 %v3941_v63, %v9031_v42  ;;  %v3865_v2 = vmax.f32 %v3864_v52, %v9111_v41 }
 0x20d   : > { %3110 = vst [vmem:[%s7771_s11 + $0x118] sm:$0xff] %v9248_v54  ;;  %v3981_v15 = vmax.f32 %v3980_v28, %v9038_v6  ;;  %v3905_v23 = vmax.f32 %v3904_v26, %v9138_v40 }
 0x20e   : > { %3147 = vst [vmem:[%s7771_s11 + $0x240] sm:$0xff] %v9252_v7  ;;  %v3866_v10 = vmax.f32 %v3865_v2, %v9219_v11  ;;  %v3943_v45 = vmax.f32 %v3942_v55, %v12029_v53 }
 0x20f   : > { %3148 = vst [vmem:[%s7771_s11 + $0x248] sm:$0xff] %v9255_v19  ;;  %v2972_v27 = vpop.f32.mrf.mxu2  ;;  %v2991_v24 = vpop.f32.mrf.mxu3  ;;  %v3906_v40 = vmax.f32 %v3905_v23, %v9141_v31 }
 0x210   : > { %v9276_v13 = vadd.f32 %v2972_v27, %v9232_v47  ;;  %v9279_v49 = vadd.f32 %v2991_v24, %v9235_v14  ;;  %v2956_v39 = vpop.f32.mrf.mxu1  ;;  %v12030_v27 = vld [vmem:[#allocation44_spill] sm:$0xff]  ;;  %v3944_v35 = vmax.f32 %v3943_v45, %v9149_v30  ;;  %v3867_v22 = vmax.f32 %v3866_v10, %v9225_v9 }
 0x211   : > { %v2937_v59 = vpop.f32.mrf.mxu0  ;;  %v9290_v21 = vadd.f32 %v2956_v39, %v9204_v25  ;;  %v3982_v24 = vmax.f32 %v3981_v15, %v12030_v27  ;;  %v9335_v30 = vperm.slane %v9188_v43, 5 }
 0x212   : > { %3149 = vst [vmem:[%s7771_s11 + $0x250] sm:$0xff] %v9276_v13  ;;  %v2938_v62 = vadd.f32 %v2937_v59, %v9200_v3  ;;  %v3868_v58 = vmax.f32 %v3867_v22, %v9245_v34  ;;  %v3945_v50 = vmax.f32 %v3944_v35, %v9155_v20 }
 0x213   : > { %3150 = vst [vmem:[%s7771_s11 + $0x258] sm:$0xff] %v9279_v49 }
 0x214   : > { %3187 = vst [vmem:[%s7771_s11 + $0x380] sm:$0xff] %v2938_v62  ;;  %v3946_v63 = vmax.f32 %v3945_v50, %v9169_v5  ;;  %v3869_v20 = vmax.f32 %v3868_v58, %v9248_v54  ;;  %v9366_v5 = vperm.slane %v9188_v43, 7 }
 0x215   : > { %3188 = vst [vmem:[%s7771_s11 + $0x388] sm:$0xff] %v9290_v21 }
 0x217   : > { %v2975_v48 = vpop.f32.mrf.mxu2  ;;  %v2994_v32 = vpop.f32.mrf.mxu3 }
 0x218   : > { %v9304_v29 = vadd.f32 %v2975_v48, %v9232_v47  ;;  %v9307_v36 = vadd.f32 %v2994_v32, %v9235_v14  ;;  %v2958_v51 = vpop.f32.mrf.mxu1 }
 0x219   : > { %v2939_v42 = vpop.f32.mrf.mxu0  ;;  %v9313_v6 = vadd.f32 %v2958_v51, %v9204_v25  ;;  %v9330_v25 = vperm.slane %v9188_v43, 4 }
 0x21a   : > { %v9310_v8 = vadd.f32 %v2939_v42, %v9200_v3  ;;  %3189 = vst [vmem:[%s7771_s11 + $0x390] sm:$0xff] %v9304_v29  ;;  %v3983_v3 = vmax.f32 %v3982_v24, %v9071_v18  ;;  %v3907_v18 = vmax.f32 %v3906_v40, %v9252_v7 }
 0x21b   : > { %3190 = vst [vmem:[%s7771_s11 + $0x398] sm:$0xff] %v9307_v36 }
 0x21c   : > { %3227 = vst [vmem:[%s7771_s11 + $0x4c0] sm:$0xff] %v9310_v8  ;;  %v3984_v52 = vmax.f32 %v3983_v3, %v9074_v60  ;;  %v3908_v7 = vmax.f32 %v3907_v18, %v9255_v19  ;;  %v9363_v60 = vperm.slane %v9188_v43, 6 }
 0x21d   : > { %3228 = vst [vmem:[%s7771_s11 + $0x4c8] sm:$0xff] %v9313_v6 }
 0x21e   : > { %v3909_v33 = vmax.f32 %v3908_v7, %v9276_v13 }
 0x21f   : > { %v2977_v59 = vpop.f32.mrf.mxu2  ;;  %v2996_v39 = vpop.f32.mrf.mxu3 }
 0x220   : > { %v9340_v56 = vadd.f32 %v2977_v59, %v9232_v47  ;;  %v9343_v12 = vadd.f32 %v2996_v39, %v9235_v14  ;;  %v3027_v0 = vpop.f32.mrf.mxu1  ;;  %v3985_v47 = vmax.f32 %v3984_v52, %v9176_v1  ;;  %v3947_v1 = vmax.f32 %v3946_v63, %v9172_v57 }
 0x221   : > { %v3008_v31 = vpop.f32.mrf.mxu0  ;;  %v9357_v14 = vadd.f32 %v3027_v0, %v9335_v30  ;;  %v3910_v10 = vmax.f32 %v3909_v33, %v9279_v49 }
 0x222   : > { %v9347_v4 = vadd.f32 %v3008_v31, %v9330_v25  ;;  %3229 = vst [vmem:[%s7771_s11 + $0x4d0] sm:$0xff] %v9340_v56  ;;  %v3986_v19 = vmax.f32 %v3985_v47, %v9179_v37  ;;  %v3948_v2 = vmax.f32 %v3947_v1, %v2938_v62 }
 0x223   : > { %3230 = vst [vmem:[%s7771_s11 + $0x4d8] sm:$0xff] %v9343_v12 }
 0x224   : > { %12031 = vst [vmem:[#allocation17_spill] sm:$0xff] %v9357_v14  ;;  %v3870_v38 = vmax.f32 %v3869_v20, %v9347_v4  ;;  %v3987_v37 = vmax.f32 %v3986_v19, %v9209_v46  ;;  %v3949_v42 = vmax.f32 %v3948_v2, %v9290_v21  ;;  %v7626_v2 = vmov 0  }
 0x225   : > { %3111 = vst [vmem:[%s7771_s11 + $0x120] sm:$0xff] %v9347_v4  ;;  %6948 = vset.pattern.permute.xlu2 %v7626_v2  ;;  %6949 = vset.pattern.permute.xlu0 %v7626_v2 }
 0x226   : > { %3112 = vst [vmem:[%s7771_s11 + $0x128] sm:$0xff] %v9357_v14  ;;  %v3871_v57 = vmax.f32 %v3870_v38, %v9357_v14  ;;  %v3988_v45 = vmax.f32 %v3987_v37, %v9212_v16  ;;  %v3950_v46 = vmax.f32 %v3949_v42, %v9304_v29  ;;  %6950 = vset.pattern.permute.xlu1 %v7626_v2  ;;  %v3235_v42 = vld [vmem:[%s11769_s3] sm:$0xff]  ;;  %v9622_v14 = vld [vmem:[%s7771_s11] sm:$0xff] }
 0x227   : > { %v3046_v28 = vpop.f32.mrf.mxu2  ;;  %v3065_v55 = vpop.f32.mrf.mxu3 }
 0x228   : > { %v9375_v15 = vadd.f32 %v3046_v28, %v9363_v60  ;;  %v9378_v43 = vadd.f32 %v3065_v55, %v9366_v5  ;;  %v3029_v32 = vpop.f32.mrf.mxu1  ;;  %v3989_v27 = vmax.f32 %v3988_v45, %v9310_v8  ;;  %v3951_v29 = vmax.f32 %v3950_v46, %v9307_v36  ;;  %v9454_v45 = vld [vmem:[#allocation2 + $0x18] sm:$0xff] }
 0x229   : > { %v3010_v48 = vpop.f32.mrf.mxu0  ;;  %v3030_v26 = vadd.f32 %v3029_v32, %v9335_v30  ;;  %12040 = vst [vmem:[#allocation21_spill] sm:$0xff] %v9454_v45 }
 0x22a   : > { %12032 = vst [vmem:[#allocation32_spill] sm:$0xff] %v9375_v15  ;;  %v3011_v13 = vadd.f32 %v3010_v48, %v9330_v25  ;;  %v3872_v62 = vmax.f32 %v3871_v57, %v9375_v15  ;;  %v3990_v59 = vmax.f32 %v3989_v27, %v9313_v6  ;;  %v9421_v48 = vld [vmem:[#allocation2] sm:$0xff] }
 0x22b   : > { %12033 = vst [vmem:[#allocation15_spill] sm:$0xff] %v9378_v43 }
 0x22c   : > { %3113 = vst [vmem:[%s7771_s11 + $0x130] sm:$0xff] %v9375_v15  ;;  %v3873_v51 = vmax.f32 %v3872_v62, %v9378_v43  ;;  %v3911_v53 = vmax.f32 %v3910_v10, %v3011_v13  ;;  %v3991_v50 = vmax.f32 %v3990_v59, %v9340_v56  ;;  %v9441_v10 = vld [vmem:[#allocation2 + $0x10] sm:$0xff] }
 0x22d   : > { %3114 = vst [vmem:[%s7771_s11 + $0x138] sm:$0xff] %v9378_v43 }
 0x22e   : > { %3151 = vst [vmem:[%s7771_s11 + $0x260] sm:$0xff] %v3011_v13  ;;  %3874 = vmax.xlane.f32.xlu0 %v3873_v51  ;;  %v3912_v3 = vmax.f32 %v3911_v53, %v3030_v26  ;;  %v3992_v7 = vmax.f32 %v3991_v50, %v9343_v12 }
 0x22f   : > { %3152 = vst [vmem:[%s7771_s11 + $0x268] sm:$0xff] %v3030_v26  ;;  %v3048_v49 = vpop.f32.mrf.mxu2  ;;  %v3067_v23 = vpop.f32.mrf.mxu3 }
 0x230   : > { %v3049_v21 = vadd.f32 %v3048_v49, %v9363_v60  ;;  %v3068_v24 = vadd.f32 %v3067_v23, %v9366_v5  ;;  %v3032_v22 = vpop.f32.mrf.mxu1  ;;  %12034 = vst [vmem:[#allocation18_spill] sm:$0xff] %v9421_v48  ;;  %v3236_v49 = vld [vmem:[%s11769_s3 + $0x8] sm:$0xff] }
 0x231   : > { %v3013_v35 = vpop.f32.mrf.mxu0  ;;  %v3033_v58 = vadd.f32 %v3032_v22, %v9335_v30  ;;  %12038 = vst [vmem:[#allocation19_spill] sm:$0xff] %v9441_v10 }
 0x232   : > { %v3014_v40 = vadd.f32 %v3013_v35, %v9330_v25  ;;  %3153 = vst [vmem:[%s7771_s11 + $0x270] sm:$0xff] %v3049_v21  ;;  %v3913_v16 = vmax.f32 %v3912_v3, %v3049_v21  ;;  %v3237_v21 = vld [vmem:[%s11769_s3 + $0x10] sm:$0xff]  ;;  %v3239_v35 = vlaneseq }
 0x233   : > { %3154 = vst [vmem:[%s7771_s11 + $0x278] sm:$0xff] %v3068_v24 }
 0x234   : > { %3191 = vst [vmem:[%s7771_s11 + $0x3a0] sm:$0xff] %v3014_v40  ;;  %v3914_v8 = vmax.f32 %v3913_v16, %v3068_v24  ;;  %v3952_v39 = vmax.f32 %v3951_v29, %v3014_v40  ;;  %v3238_v24 = vld [vmem:[%s11769_s3 + $0x18] sm:$0xff]  ;;  %v3240_v22 = vand.u32 127, %v3239_v35 }
 0x235   : > { %3192 = vst [vmem:[%s7771_s11 + $0x3a8] sm:$0xff] %v3033_v58 }
 0x236   : > { %3915 = vmax.xlane.f32.xlu0 %v3914_v8  ;;  %v3953_v6 = vmax.f32 %v3952_v39, %v3033_v58  ;;  %v3273_v3 = vadd.s32 4224, %v3240_v22  ;;  %v3274_v40 = vadd.s32 4352, %v3240_v22  ;;  %v3275_v16 = vadd.s32 4480, %v3240_v22 }
 0x237   : > { %v3051_v18 = vpop.f32.mrf.mxu2  ;;  %v3070_v31 = vpop.f32.mrf.mxu3  ;;  %v3276_v29 = vadd.s32 4608, %v3240_v22  ;;  %v3277_v58 = vadd.s32 4736, %v3240_v22  ;;  %v3278_v59 = vadd.s32 4864, %v3240_v22  ;;  %v3279_v8 = vadd.s32 4992, %v3240_v22 }
 0x238   : > { %v3052_v36 = vadd.f32 %v3051_v18, %v9363_v60  ;;  %v3071_v0 = vadd.f32 %v3070_v31, %v9366_v5  ;;  %v3034_v63 = vpop.f32.mrf.mxu1  ;;  %v9474_v39 = vstv %s3280_s18  ;;  %v3253_v2 = vadd.s32 1664, %v3240_v22 }
 0x239   : > { %v3015_v52 = vpop.f32.mrf.mxu0  ;;  %v3035_v47 = vadd.f32 %v3034_v63, %v9335_v30  ;;  %v9477_v50 = vadd.s32 %v9474_v39, %v3273_v3  ;;  %v9480_v18 = vadd.s32 %v9474_v39, %v3274_v40  ;;  %v9483_v31 = vadd.s32 %v9474_v39, %v3275_v16 }
 0x23a   : > { %v3016_v20 = vadd.f32 %v3015_v52, %v9330_v25  ;;  %3193 = vst [vmem:[%s7771_s11 + $0x3b0] sm:$0xff] %v3052_v36  ;;  %v3954_v56 = vmax.f32 %v3953_v6, %v3052_v36  ;;  %v9486_v36 = vadd.s32 %v9474_v39, %v3276_v29  ;;  %v9492_v52 = vadd.s32 %v9474_v39, %v3278_v59 }
 0x23b   : > { %3194 = vst [vmem:[%s7771_s11 + $0x3b8] sm:$0xff] %v3071_v0  ;;  %v9495_v63 = vadd.s32 %v9474_v39, %v3279_v8  ;;  %v3259_v35 = vadd.s32 2432, %v3240_v22  ;;  %v3260_v3 = vadd.s32 2560, %v3240_v22  ;;  %v3261_v40 = vadd.s32 2688, %v3240_v22 }
 0x23c   : > { %3231 = vst [vmem:[%s7771_s11 + $0x4e0] sm:$0xff] %v3016_v20  ;;  %v3955_v38 = vmax.f32 %v3954_v56, %v3071_v0  ;;  %v3993_v1 = vmax.f32 %v3992_v7, %v3016_v20  ;;  %v9489_v0 = vadd.s32 %v9474_v39, %v3277_v58  ;;  %v3242_v7 = vadd.s32 256, %v3240_v22 }
 0x23d   : > { %3232 = vst [vmem:[%s7771_s11 + $0x4e8] sm:$0xff] %v3035_v47  ;;  %v3243_v56 = vadd.s32 384, %v3240_v22  ;;  %v3262_v16 = vadd.s32 2816, %v3240_v22  ;;  %v3263_v29 = vadd.s32 2944, %v3240_v22  ;;  %v3264_v58 = vadd.s32 3072, %v3240_v22 }
 0x23e   : > { %3956 = vmax.xlane.f32.xlu1 %v3955_v38  ;;  %v3994_v55 = vmax.f32 %v3993_v1, %v3035_v47  ;;  %12042 = vst [vmem:[#allocation25_spill] sm:$0xff] %v9477_v50  ;;  %v3241_v47 = vadd.s32 128, %v3240_v22  ;;  %v3244_v38 = vadd.s32 512, %v3240_v22  ;;  %v3245_v1 = vadd.s32 640, %v3240_v22  ;;  %v9782_v50 = vld [vmem:[%s7771_s11 + $0x140] sm:$0xff] }
 0x23f   : > { %v3053_v33 = vpop.f32.mrf.mxu2  ;;  %v3072_v19 = vpop.f32.mrf.mxu3  ;;  %12043 = vst [vmem:[#allocation38_spill] sm:$0xff] %v9480_v18  ;;  %v3265_v59 = vadd.s32 3200, %v3240_v22  ;;  %v3266_v8 = vadd.s32 3328, %v3240_v22  ;;  %v3267_v27 = vadd.s32 3456, %v3240_v22  ;;  %v3268_v53 = vadd.s32 3584, %v3240_v22 }
 0x240   : > { %v3054_v28 = vadd.f32 %v3053_v33, %v9363_v60  ;;  %v3073_v25 = vadd.f32 %v3072_v19, %v9366_v5  ;;  %v9431_v5 = vld [vmem:[#allocation2 + $0x8] sm:$0xff]  ;;  %12044 = vst [vmem:[#allocation40_spill] sm:$0xff] %v9483_v31  ;;  %v3246_v33 = vadd.s32 768, %v3240_v22  ;;  %v3247_v19 = vadd.s32 896, %v3240_v22 }
 0x241   : > { %12036 = vst [vmem:[#allocation20_spill] sm:$0xff] %v9431_v5  ;;  %v3269_v37 = vadd.s32 3712, %v3240_v22  ;;  %v9510_v60 = vadd.s32 %v9474_v39, %v3242_v7 }
 0x242   : > { %3233 = vst [vmem:[%s7771_s11 + $0x4f0] sm:$0xff] %v3054_v28  ;;  %v3995_v30 = vmax.f32 %v3994_v55, %v3054_v28  ;;  %v3248_v28 = vadd.s32 1024, %v3240_v22  ;;  %v3250_v55 = vadd.s32 1280, %v3240_v22  ;;  %v9526_v7 = vadd.s32 %v9474_v39, %v3246_v33 }
 0x243   : > { %3234 = vst [vmem:[%s7771_s11 + $0x4f8] sm:$0xff] %v3073_v25 }
 0x244   : > { %v3996_v12 = vmax.f32 %v3995_v30, %v3073_v25  ;;  %12045 = vst [vmem:[#allocation26_spill] sm:$0xff] %v9486_v36  ;;  %v3249_v25 = vadd.s32 1152, %v3240_v22  ;;  %v3251_v30 = vadd.s32 1408, %v3240_v22  ;;  %v9540_v43 = vadd.s32 %v9474_v39, %v3250_v55  ;;  %v12075_v36 = vld [vmem:[#allocation36_spill] sm:$0xff] }
 0x245   : > { %12046 = vst [vmem:[#allocation43_spill] sm:$0xff] %v9489_v0  ;;  %v12074_v0 = vld [vmem:[#allocation35_spill] sm:$0xff] }
 0x246   : > { %3997 = vmax.xlane.f32.xlu1 %v3996_v12  ;;  %12047 = vst [vmem:[#allocation44_spill] sm:$0xff] %v9492_v52  ;;  %v3252_v12 = vadd.s32 1536, %v3240_v22 }
 0x247   : > { %12048 = vst [vmem:[#allocation49_spill] sm:$0xff] %v9495_v63  ;;  %v9633_v63 = vld [vmem:[%s7771_s11 + $0x10] sm:$0xff] }
 0x248   : > { %12050 = vst [vmem:[#allocation51_spill] sm:$0xff] %v9526_v7  ;;  %v9546_v33 = vadd.s32 %v9474_v39, %v3252_v12 }
 0x249   : > { %12083 = vst [vmem:[#allocation66_spill] sm:$0xff] %v9782_v50 }
 0x24a   : > { %12058 = vst [vmem:[#allocation55_spill] sm:$0xff] %v9546_v33 }
 0x2a1   : > { %v3875_v32 = vpop.xlane.xlu0 %3874 }
 0x2a2   : > { %v9424_v57 = vmax.f32 %v9421_v48, %v3875_v32  ;;  %v3254_v32 = vadd.s32 1792, %v3240_v22 }
 0x2a4   : > { %12035 = vst [vmem:[#allocation31_spill] sm:$0xff] %v9424_v57  ;;  %4025 = vperm.xlu2 %6948, %v9424_v57  }
 0x2a5   : > { %4695 = vst.msk [vmem:[#allocation2] sm:$0xff] %vm11943_vm1, %v9424_v57  ;;  %v9532_v57 = vadd.s32 %v9474_v39, %v3248_v28  ;;  %v9554_v28 = vadd.s32 %v9474_v39, %v3254_v32  ;;  %v9574_v32 = vadd.s32 %v9474_v39, %v3260_v3  ;;  %v9592_v3 = vadd.s32 %v9474_v39, %v3265_v59 }
 0x2a6   : > { %v9607_v59 = vadd.s32 %v9474_v39, %v3269_v37  ;;  %v12073_v37 = vld [vmem:[#allocation34_spill] sm:$0xff] }
 0x2a7   : > { %12052 = vst [vmem:[#allocation53_spill] sm:$0xff] %v9532_v57 }
 0x2a8   : > { %12067 = vst [vmem:[#allocation60_spill] sm:$0xff] %v9607_v59  ;;  %v9698_v59 = vld [vmem:[%s7771_s11 + $0x90] sm:$0xff] }
 0x2a9   : > { %v3916_v13 = vpop.xlane.xlu0 %3915 }
 0x2aa   : > { %v9434_v26 = vmax.f32 %v9431_v5, %v3916_v13  ;;  %v3255_v13 = vadd.s32 1920, %v3240_v22  ;;  %v9529_v5 = vadd.s32 %v9474_v39, %v3247_v19  ;;  %v9551_v19 = vadd.s32 %v9474_v39, %v3253_v2 }
 0x2ab   : > { %v9571_v2 = vadd.s32 %v9474_v39, %v3259_v35  ;;  %v9589_v35 = vadd.s32 %v9474_v39, %v3264_v58 }
 0x2ac   : > { %12037 = vst [vmem:[#allocation33_spill] sm:$0xff] %v9434_v26  ;;  %4030 = vperm.xlu2 %6948, %v9434_v26  }
 0x2ad   : > { %4696 = vst.msk [vmem:[#allocation2 + $0x8] sm:$0xff] %vm11943_vm1, %v9434_v26  ;;  %v9523_v26 = vadd.s32 %v9474_v39, %v3245_v1  ;;  %v9543_v1 = vadd.s32 %v9474_v39, %v3251_v30 }
 0x2ae   : > { %12051 = vst [vmem:[#allocation52_spill] sm:$0xff] %v9529_v5 }
 0x2af   : > { %12059 = vst [vmem:[#allocation56_spill] sm:$0xff] %v9551_v19 }
 0x2b1   : > { %v3957_v62 = vpop.xlane.xlu1 %3956 }
 0x2b2   : > { %v9447_v51 = vmax.f32 %v9441_v10, %v3957_v62  ;;  %v3256_v62 = vadd.s32 2048, %v3240_v22  ;;  %v9520_v10 = vadd.s32 %v9474_v39, %v3244_v38 }
 0x2b4   : > { %12039 = vst [vmem:[#allocation37_spill] sm:$0xff] %v9447_v51  ;;  %4035 = vperm.xlu0 %6949, %v9447_v51   ;;  %3327 = vperm.xlu2 %6948, %v3235_v42   ;;  %v9502_v42 = vadd.s32 %v9474_v39, %v3240_v22 }
 0x2b5   : > { %4697 = vst.msk [vmem:[#allocation2 + $0x10] sm:$0xff] %vm11943_vm1, %v9447_v51  ;;  %v9517_v51 = vadd.s32 %v9474_v39, %v3243_v56  ;;  %v12054_v56 = vld [vmem:[#allocation22_spill] sm:$0xff] }
 0x2b6   : > { %12056 = vst [vmem:[#allocation22_spill] sm:$0xff] %v9540_v43 }
 0x2b9   : > { %v3998_v46 = vpop.xlane.xlu1 %3997 }
 0x2ba   : > { %v9460_v23 = vmax.f32 %v9454_v45, %v3998_v46  ;;  %v9505_v46 = vadd.s32 %v9474_v39, %v3241_v47  ;;  %v3270_v47 = vadd.s32 3840, %v3240_v22  ;;  %v3272_v45 = vadd.s32 4096, %v3240_v22 }
 0x2bc   : > { %12041 = vst [vmem:[#allocation39_spill] sm:$0xff] %v9460_v23  ;;  %4040 = vperm.xlu1 %6950, %v9460_v23   ;;  %3330 = vperm.xlu2 %6948, %v3236_v49   ;;  %v9617_v15 = vadd.s32 %v9474_v39, %v3272_v45 }
 0x2bd   : > { %4698 = vst.msk [vmem:[#allocation2 + $0x18] sm:$0xff] %vm11943_vm1, %v9460_v23  ;;  %v3271_v23 = vadd.s32 3968, %v3240_v22 }
 0x2c4   : > { %3333 = vperm.xlu2 %6948, %v3237_v21   ;;  %v3257_v21 = vadd.s32 2176, %v3240_v22 }
 0x2c6   : > { %v9563_v55 = vadd.s32 %v9474_v39, %v3257_v21  ;;  %v9581_v21 = vadd.s32 %v9474_v39, %v3262_v16 }
 0x2cc   : > { %3336 = vperm.xlu2 %6948, %v3238_v24   ;;  %v3258_v24 = vadd.s32 2304, %v3240_v22  ;;  %v9535_v22 = vadd.s32 %v9474_v39, %v3249_v25  ;;  %v9560_v25 = vadd.s32 %v9474_v39, %v3256_v62  ;;  %v12061_v62 = vld [vmem:[#allocation24_spill] sm:$0xff] }
 0x2cd   : > { %12062 = vst [vmem:[#allocation24_spill] sm:$0xff] %v9581_v21 }
 0x2ce   : > { %12053 = vst [vmem:[#allocation54_spill] sm:$0xff] %v9535_v22  ;;  %v9566_v30 = vadd.s32 %v9474_v39, %v3258_v24  ;;  %v9584_v24 = vadd.s32 %v9474_v39, %v3263_v29  ;;  %v9599_v29 = vadd.s32 %v9474_v39, %v3267_v27 }
 0x2fe   : > { %v9497_v6 = vpop.permute.xlu2 %4025 }
 0x306   : > { %v9499_v20 = vpop.permute.xlu2 %4030 }
 0x307   : > { %12049 = vst [vmem:[#allocation50_spill] sm:$0xff] %v9499_v20  ;;  %v12055_v20 = vld [vmem:[#allocation23_spill] sm:$0xff] }
 0x308   : > { %12057 = vst [vmem:[#allocation23_spill] sm:$0xff] %v9543_v1 }
 0x30e   : > { %v9507_v49 = vpop.permute.xlu2 %3327 }
 0x30f   : > { %vm3338_vm2 = vcmp.eq.s32.totalorder %v9502_v42, %v9507_v49  ;;  %vm3339_vm3 = vcmp.eq.s32.totalorder %v9505_v46, %v9507_v49  ;;  %vm3340_vm4 = vcmp.eq.s32.totalorder %v9510_v60, %v9507_v49  ;;  %vm3341_vm5 = vcmp.eq.s32.totalorder %v9517_v51, %v9507_v49 }
 0x310   : > { %v3498_v48 = vsel %vm3338_vm2, %v12054_v56, 0.0  ;;  %v3499_v38 = vsel %vm3339_vm3, %v12055_v20, 0.0  ;;  %v9557_v20 = vadd.s32 %v9474_v39, %v3255_v13  ;;  %v9577_v13 = vadd.s32 %v9474_v39, %v3261_v40 }
 0x311   : > { %v3658_v12 = vadd.f32 %v3499_v38, %v3498_v48  ;;  %v3500_v56 = vsel %vm3340_vm4, %v12061_v62, 0.0  ;;  %vm3342_vm6 = vcmp.eq.s32.totalorder %v9520_v10, %v9507_v49  ;;  %v9595_v40 = vadd.s32 %v9474_v39, %v3266_v8  ;;  %v12064_v38 = vld [vmem:[#allocation27_spill] sm:$0xff] }
 0x312   : > { %12060 = vst [vmem:[#allocation57_spill] sm:$0xff] %v9557_v20  ;;  %v3501_v16 = vsel %vm3341_vm5, %v12064_v38, 0.0  ;;  %v9602_v62 = vadd.s32 %v9474_v39, %v3268_v53  ;;  %vm3343_vm7 = vcmp.eq.s32.totalorder %v9523_v26, %v9507_v49  ;;  %v9610_v8 = vadd.s32 %v9474_v39, %v3270_v47 }
 0x313   : > { %v3659_v48 = vadd.f32 %v3658_v12, %v3500_v56  ;;  %12063 = vst [vmem:[#allocation58_spill] sm:$0xff] %v9595_v40  ;;  %v9613_v12 = vadd.s32 %v9474_v39, %v3271_v23  ;;  %v12070_v56 = vld [vmem:[#allocation28_spill] sm:$0xff]  ;;  %vm3344_vm8 = vcmp.eq.s32.totalorder %v9526_v7, %v9507_v49  ;;  %vm3345_vm9 = vcmp.eq.s32.totalorder %v9529_v5, %v9507_v49  ;;  %v12078_v39 = vld [vmem:[#allocation45_spill] sm:$0xff] }
 0x314   : > { %12065 = vst [vmem:[#allocation27_spill] sm:$0xff] %v9599_v29  ;;  %v3502_v27 = vsel %vm3342_vm6, %v12070_v56, 0.0  ;;  %v3504_v52 = vsel %vm3344_vm8, %v12073_v37, 0.0  ;;  %vm3346_vm10 = vcmp.eq.s32.totalorder %v9532_v57, %v9507_v49  ;;  %v3505_v45 = vsel %vm3345_vm9, %v12074_v0, 0.0  ;;  %v9674_v23 = vld [vmem:[%s7771_s11 + $0x70] sm:$0xff]  ;;  %v9712_v37 = vld [vmem:[%s7771_s11 + $0xa0] sm:$0xff] }
 0x315   : > { %12066 = vst [vmem:[#allocation59_spill] sm:$0xff] %v9602_v62  ;;  %v3660_v58 = vadd.f32 %v3659_v48, %v3501_v16  ;;  %v12072_v48 = vld [vmem:[#allocation29_spill] sm:$0xff]  ;;  %v9628_v16 = vld [vmem:[%s7771_s11 + $0x8] sm:$0xff]  ;;  %vm3347_vm11 = vcmp.eq.s32.totalorder %v9535_v22, %v9507_v49  ;;  %vm3348_vm12 = vcmp.eq.s32.totalorder %v9540_v43, %v9507_v49  ;;  %vm3349_vm13 = vcmp.eq.s32.totalorder %v9543_v1, %v9507_v49 }
 0x316   : > { %12068 = vst [vmem:[#allocation61_spill] sm:$0xff] %v9610_v8  ;;  %v3503_v47 = vsel %vm3343_vm7, %v12072_v48, 0.0  ;;  %v9688_v8 = vld [vmem:[%s7771_s11 + $0x80] sm:$0xff]  ;;  %v9702_v0 = vpop.permute.xlu2 %3330  ;;  %v9721_v29 = vld [vmem:[%s7771_s11 + $0xa8] sm:$0xff]  ;;  %v9731_v40 = vld [vmem:[%s7771_s11 + $0xb8] sm:$0xff]  ;;  %vm3350_vm0 = vcmp.eq.s32.totalorder %v9546_v33, %v9507_v49  ;;  %vm3351_vm2 = vcmp.eq.s32.totalorder %v9551_v19, %v9507_v49  ;;  %vm3352_vm4 = vcmp.eq.s32.totalorder %v9554_v28, %v9507_v49 }
 0x317   : > { %12069 = vst [vmem:[#allocation62_spill] sm:$0xff] %v9613_v12  ;;  %v3661_v53 = vadd.f32 %v3660_v58, %v3502_v27  ;;  %v12077_v27 = vld [vmem:[#allocation42_spill] sm:$0xff]  ;;  %vm3378_vm14 = vcmp.eq.s32.totalorder %v9502_v42, %v9702_v0  ;;  %vm3379_vm15 = vcmp.eq.s32.totalorder %v9505_v46, %v9702_v0  ;;  %vm3380_vm3 = vcmp.eq.s32.totalorder %v9510_v60, %v9702_v0 }
 0x318   : > { %12071 = vst [vmem:[#allocation28_spill] sm:$0xff] %v9617_v15  ;;  %v9662_v15 = vld [vmem:[%s7771_s11 + $0x60] sm:$0xff]  ;;  %v9679_v12 = vld [vmem:[%s7771_s11 + $0x78] sm:$0xff]  ;;  %vm3381_vm5 = vcmp.eq.s32.totalorder %v9517_v51, %v9702_v0  ;;  %vm3353_vm6 = vcmp.eq.s32.totalorder %v9557_v20, %v9507_v49  ;;  %v3512_v34 = vsel %vm3352_vm4, %v9674_v23, 0.0  ;;  %vm3382_vm7 = vcmp.eq.s32.totalorder %v9520_v10, %v9702_v0 }
 0x319   : > { %v3662_v58 = vadd.f32 %v3661_v53, %v3503_v47  ;;  %v12076_v47 = vld [vmem:[#allocation41_spill] sm:$0xff]  ;;  %12079 = vst [vmem:[#allocation45_spill] sm:$0xff] %v9721_v29  ;;  %v9738_v48 = vld [vmem:[%s7771_s11 + $0xc0] sm:$0xff]  ;;  %v9743_v29 = vld [vmem:[%s7771_s11 + $0xc8] sm:$0xff]  ;;  %vm3354_vm8 = vcmp.eq.s32.totalorder %v9560_v25, %v9507_v49  ;;  %v3513_v9 = vsel %vm3353_vm6, %v9679_v12, 0.0  ;;  %vm3383_vm9 = vcmp.eq.s32.totalorder %v9523_v26, %v9702_v0 }
 0x31a   : > { %v3507_v31 = vsel %vm3347_vm11, %v12076_v47, 0.0  ;;  %12081 = vst [vmem:[#allocation64_spill] sm:$0xff] %v9743_v29  ;;  %v3509_v29 = vsel %vm3349_vm13, %v12078_v39, 0.0  ;;  %vm3384_vm11 = vcmp.eq.s32.totalorder %v9526_v7, %v9702_v0  ;;  %vm3357_vm13 = vcmp.eq.s32.totalorder %v9571_v2, %v9507_v49 }
 0x31b   : > { %v3663_v53 = vadd.f32 %v3662_v58, %v3504_v52  ;;  %v9667_v52 = vld [vmem:[%s7771_s11 + $0x68] sm:$0xff]  ;;  %v3506_v58 = vsel %vm3346_vm10, %v12075_v36, 0.0  ;;  %vm3355_vm10 = vcmp.eq.s32.totalorder %v9563_v55, %v9507_v49  ;;  %vm3361_vm4 = vcmp.eq.s32.totalorder %v9584_v24, %v9507_v49 }
 0x31c   : > { %v3511_v41 = vsel %vm3351_vm2, %v9667_v52, 0.0  ;;  %vm3360_vm2 = vcmp.eq.s32.totalorder %v9581_v21, %v9507_v49  ;;  %vm3387_vm6 = vcmp.eq.s32.totalorder %v9535_v22, %v9702_v0 }
 0x31d   : > { %v3664_v18 = vadd.f32 %v3663_v53, %v3505_v45  ;;  %v9693_v53 = vld [vmem:[%s7771_s11 + $0x88] sm:$0xff]  ;;  %v9707_v45 = vld [vmem:[%s7771_s11 + $0x98] sm:$0xff] }
 0x31f   : > { %v3665_v36 = vadd.f32 %v3664_v18, %v3506_v58  ;;  %v9726_v58 = vld [vmem:[%s7771_s11 + $0xb0] sm:$0xff]  ;;  %v9763_v18 = vld [vmem:[%s7771_s11 + $0xd8] sm:$0xff] }
 0x320   : > { %12080 = vst [vmem:[#allocation63_spill] sm:$0xff] %v9726_v58  ;;  %v3508_v58 = vsel %vm3348_vm12, %v12077_v27, 0.0  ;;  %v3538_v27 = vsel %vm3378_vm14, %v9782_v50, 0.0  ;;  %vm3356_vm12 = vcmp.eq.s32.totalorder %v9566_v30, %v9507_v49  ;;  %vm3385_vm14 = vcmp.eq.s32.totalorder %v9529_v5, %v9702_v0 }
 0x321   : > { %v3666_v47 = vadd.f32 %v3665_v36, %v3507_v31  ;;  %v9756_v31 = vld [vmem:[%s7771_s11 + $0xd0] sm:$0xff] }
 0x322   : > { %12082 = vst [vmem:[#allocation65_spill] sm:$0xff] %v9756_v31  ;;  %v3539_v31 = vsel %vm3379_vm15, %v9789_v17, 0.0  ;;  %v12086_v17 = vsub.f32 %v9622_v14, %v9497_v6  ;;  %vm3358_vm15 = vcmp.eq.s32.totalorder %v9574_v32, %v9507_v49 }
 0x323   : > { %v3667_v62 = vadd.f32 %v3666_v47, %v3508_v58  ;;  %v3510_v47 = vsel %vm3350_vm0, %v9662_v15, 0.0  ;;  %vm3359_vm0 = vcmp.eq.s32.totalorder %v9577_v13, %v9507_v49 }
 0x324   : > { %v4203_v54 = vmul.f32 1.442695, %v12086_v17  ;;  %v12089_v17 = vsub.f32 %v9633_v63, %v9497_v6 }
 0x325   : > { %v3668_v58 = vadd.f32 %v3667_v62, %v3509_v29  ;;  %v3699_v29 = vadd.f32 %v3539_v31, %v3538_v27  ;;  %v12087_v31 = vsub.f32 %v9628_v16, %v9497_v6  ;;  %v12090_v16 = vsub.f32 %v12064_v38, %v9497_v6 }
 0x326   : > { %6951 = vpow2.f32 %v4203_v54  ;;  %v3515_v54 = vsel %vm3355_vm10, %v9693_v53, 0.0 }
 0x327   : > { %v3669_v36 = vadd.f32 %v3668_v58, %v3510_v47  ;;  %v9816_v58 = vld [vmem:[%s7771_s11 + $0x150] sm:$0xff]  ;;  %v4205_v62 = vmul.f32 1.442695, %v12087_v31  ;;  %v3514_v31 = vsel %vm3354_vm8, %v9688_v8, 0.0  ;;  %vm3388_vm8 = vcmp.eq.s32.totalorder %v9540_v43, %v9702_v0 }
 0x328   : > { %12085 = vst [vmem:[#allocation68_spill] sm:$0xff] %v9816_v58  ;;  %v3540_v50 = vsel %vm3380_vm3, %v9816_v58, 0.0  ;;  %v4207_v58 = vmul.f32 1.442695, %v12089_v17  ;;  %v9868_v17 = vld [vmem:[%s7771_s11 + $0x170] sm:$0xff]  ;;  %vm3386_vm3 = vcmp.eq.s32.totalorder %v9532_v57, %v9702_v0 }
 0x329   : > { %v3670_v47 = vadd.f32 %v3669_v36, %v3511_v41  ;;  %v3700_v27 = vadd.f32 %v3699_v29, %v3540_v50  ;;  %v9831_v36 = vld [vmem:[%s7771_s11 + $0x158] sm:$0xff]  ;;  %v4209_v29 = vmul.f32 1.442695, %v12090_v16  ;;  %6953 = vpow2.f32 %v4205_v62  ;;  %12093 = vst [vmem:[#allocation72_spill] sm:$0xff] %v9868_v17 }
 0x32a   : > { %12088 = vst [vmem:[#allocation69_spill] sm:$0xff] %v9831_v36  ;;  %v3541_v14 = vsel %vm3381_vm5, %v9831_v36, 0.0  ;;  %6955 = vpow2.f32 %v4207_v58  ;;  %v3544_v58 = vsel %vm3384_vm11, %v9868_v17, 0.0  ;;  %vm3362_vm5 = vcmp.eq.s32.totalorder %v9589_v35, %v9507_v49  ;;  %v9906_v17 = vld [vmem:[%s7771_s11 + $0x180] sm:$0xff]  ;;  %v12123_v43 = vld [vmem:[#allocation65_spill] sm:$0xff] }
 0x32b   : > { %v3671_v41 = vadd.f32 %v3670_v47, %v3512_v34  ;;  %v3701_v50 = vadd.f32 %v3700_v27, %v3541_v14  ;;  %v9846_v47 = vld [vmem:[%s7771_s11 + $0x160] sm:$0xff]  ;;  %v9855_v14 = vld [vmem:[%s7771_s11 + $0x168] sm:$0xff]  ;;  %12096 = vst [vmem:[#allocation74_spill] sm:$0xff] %v9906_v17  ;;  %6957 = vpow2.f32 %v4209_v29  ;;  %vm3389_vm11 = vcmp.eq.s32.totalorder %v9543_v1, %v9702_v0 }
 0x32c   : > { %12091 = vst [vmem:[#allocation70_spill] sm:$0xff] %v9846_v47  ;;  %v3542_v63 = vsel %vm3382_vm7, %v9846_v47, 0.0  ;;  %vm3363_vm7 = vcmp.eq.s32.totalorder %v9592_v3, %v9507_v49  ;;  %v12099_v47 = vld [vmem:[#allocation58_spill] sm:$0xff]  ;;  %v12118_v1 = vld [vmem:[#allocation64_spill] sm:$0xff] }
 0x32d   : > { %v3672_v34 = vadd.f32 %v3671_v41, %v3513_v9  ;;  %v3702_v27 = vadd.f32 %v3701_v50, %v3542_v63  ;;  %12092 = vst [vmem:[#allocation71_spill] sm:$0xff] %v9855_v14  ;;  %v3543_v9 = vsel %vm3383_vm9, %v9855_v14, 0.0  ;;  %v3516_v50 = vsel %vm3356_vm12, %v9698_v59, 0.0 }
 0x32e   : > { %vm3364_vm9 = vcmp.eq.s32.totalorder %v12099_v47, %v9507_v49 }
 0x32f   : > { %v3673_v38 = vadd.f32 %v3672_v34, %v3514_v31  ;;  %v3703_v41 = vadd.f32 %v3702_v27, %v3543_v9  ;;  %v6952_v34 = vpop.eup %6951  ;;  %v9884_v31 = vld [vmem:[%s7771_s11 + $0x178] sm:$0xff]  ;;  %v3517_v9 = vsel %vm3357_vm13, %v9707_v45, 0.0  ;;  %vm3390_vm13 = vcmp.eq.s32.totalorder %v9546_v33, %v9702_v0 }
 0x330   : > { %12094 = vst [vmem:[#allocation73_spill] sm:$0xff] %v9884_v31  ;;  %v3545_v27 = vsel %vm3385_vm14, %v9884_v31, 0.0 }
 0x331   : > { %v3674_v62 = vadd.f32 %v3673_v38, %v3515_v54  ;;  %v3704_v16 = vadd.f32 %v3703_v41, %v3544_v58  ;;  %v6954_v38 = vpop.eup %6953  ;;  %v12095_v41 = vsub.f32 %v12070_v56, %v9497_v6 }
 0x332   : > { %v6956_v58 = vpop.eup %6955  ;;  %v4523_v7 = vadd.f32 %v6954_v38, %v6952_v34  ;;  %v9960_v34 = vld [vmem:[%s7771_s11 + $0x198] sm:$0xff] }
 0x333   : > { %v3675_v63 = vadd.f32 %v3674_v62, %v3516_v50  ;;  %v3705_v54 = vadd.f32 %v3704_v16, %v3545_v27  ;;  %v4211_v62 = vmul.f32 1.442695, %v12095_v41  ;;  %v3518_v50 = vsel %vm3358_vm15, %v9712_v37, 0.0  ;;  %v12097_v27 = vld [vmem:[#allocation29_spill] sm:$0xff] }
 0x334   : > { %v3546_v16 = vsel %vm3386_vm3, %v9906_v17, 0.0  ;;  %v12098_v41 = vsub.f32 %v12097_v27, %v9497_v6  ;;  %v9924_v17 = vld [vmem:[%s7771_s11 + $0x188] sm:$0xff]  ;;  %v12103_v27 = vld [vmem:[#allocation34_spill] sm:$0xff]  ;;  %v3549_v38 = vsel %vm3389_vm11, %v9960_v34, 0.0  ;;  %vm3391_vm15 = vcmp.eq.s32.totalorder %v9551_v19, %v9702_v0 }
 0x335   : > { %v3676_v31 = vadd.f32 %v3675_v63, %v3517_v9  ;;  %v3706_v56 = vadd.f32 %v3705_v54, %v3546_v16  ;;  %v12100_v63 = vld [vmem:[#allocation45_spill] sm:$0xff]  ;;  %12101 = vst [vmem:[#allocation29_spill] sm:$0xff] %v9924_v17  ;;  %v3547_v29 = vsel %vm3387_vm6, %v9924_v17, 0.0  ;;  %v12102_v54 = vld [vmem:[#allocation27_spill] sm:$0xff]  ;;  %6959 = vpow2.f32 %v4211_v62 }
 0x336   : > { %v4213_v14 = vmul.f32 1.442695, %v12098_v41  ;;  %v3519_v9 = vsel %vm3359_vm0, %v12100_v63, 0.0  ;;  %vm3365_vm10 = vcmp.eq.s32.totalorder %v12102_v54, %v9507_v49  ;;  %v12104_v41 = vsub.f32 %v12103_v27, %v9497_v6  ;;  %v9942_v17 = vld [vmem:[%s7771_s11 + $0x190] sm:$0xff]  ;;  %v12107_v62 = vld [vmem:[#allocation59_spill] sm:$0xff]  ;;  %12110 = vst [vmem:[#allocation45_spill] sm:$0xff] %v9960_v34 }
 0x337   : > { %v3677_v36 = vadd.f32 %v3676_v31, %v3518_v50  ;;  %v3707_v16 = vadd.f32 %v3706_v56, %v3547_v29  ;;  %v12105_v50 = vld [vmem:[#allocation63_spill] sm:$0xff]  ;;  %12106 = vst [vmem:[#allocation58_spill] sm:$0xff] %v9942_v17  ;;  %v3548_v5 = vsel %vm3388_vm8, %v9942_v17, 0.0  ;;  %vm3366_vm12 = vcmp.eq.s32.totalorder %v12107_v62, %v9507_v49 }
 0x338   : > { %v4215_v31 = vmul.f32 1.442695, %v12104_v41  ;;  %v3520_v57 = vsel %vm3360_vm2, %v12105_v50, 0.0  ;;  %6961 = vpow2.f32 %v4213_v14  ;;  %v12108_v29 = vld [vmem:[#allocation35_spill] sm:$0xff]  ;;  %v3521_v27 = vsel %vm3361_vm4, %v9731_v40, 0.0  ;;  %v12111_v14 = vld [vmem:[#allocation60_spill] sm:$0xff] }
 0x339   : > { %v3678_v22 = vadd.f32 %v3677_v36, %v3519_v9  ;;  %v3708_v56 = vadd.f32 %v3707_v16, %v3548_v5  ;;  %v12109_v36 = vsub.f32 %v12108_v29, %v9497_v6  ;;  %v4524_v5 = vadd.f32 %v6956_v58, %v4523_v7  ;;  %v6958_v16 = vpop.eup %6957  ;;  %v9978_v58 = vld [vmem:[%s7771_s11 + $0x1a0] sm:$0xff] }
 0x33a   : > { %vm3367_vm14 = vcmp.eq.s32.totalorder %v12111_v14, %v9507_v49  ;;  %6963 = vpow2.f32 %v4215_v31  ;;  %v3522_v34 = vsel %vm3362_vm5, %v9738_v48, 0.0  ;;  %12114 = vst [vmem:[#allocation27_spill] sm:$0xff] %v9978_v58  ;;  %v3550_v17 = vsel %vm3390_vm13, %v9978_v58, 0.0  ;;  %v12115_v31 = vld [vmem:[#allocation61_spill] sm:$0xff] }
 0x33b   : > { %v4217_v9 = vmul.f32 1.442695, %v12109_v36  ;;  %v3679_v41 = vadd.f32 %v3678_v22, %v3520_v57  ;;  %v3709_v29 = vadd.f32 %v3708_v56, %v3549_v38  ;;  %v12112_v36 = vld [vmem:[#allocation36_spill] sm:$0xff]  ;;  %v4525_v56 = vadd.f32 %v6958_v16, %v4524_v5  ;;  %v6960_v38 = vpop.eup %6959 }
 0x33c   : > { %v12113_v57 = vsub.f32 %v12112_v36, %v9497_v6  ;;  %vm3368_vm0 = vcmp.eq.s32.totalorder %v12115_v31, %v9507_v49  ;;  %vm3392_vm2 = vcmp.eq.s32.totalorder %v9554_v28, %v9702_v0  ;;  %v3523_v58 = vsel %vm3363_vm7, %v12118_v1, 0.0  ;;  %v9996_v16 = vld [vmem:[%s7771_s11 + $0x1a8] sm:$0xff] }
 0x33d   : > { %v3680_v7 = vadd.f32 %v3679_v41, %v3521_v27  ;;  %v3710_v36 = vadd.f32 %v3709_v29, %v3550_v17  ;;  %6965 = vpow2.f32 %v4217_v9  ;;  %12119 = vst [vmem:[#allocation34_spill] sm:$0xff] %v9996_v16  ;;  %v3551_v33 = vsel %vm3391_vm15, %v9996_v16, 0.0  ;;  %v12120_v9 = vld [vmem:[#allocation62_spill] sm:$0xff] }
 0x33e   : > { %v4219_v22 = vmul.f32 1.442695, %v12113_v57  ;;  %v12116_v57 = vld [vmem:[#allocation41_spill] sm:$0xff]  ;;  %v4526_v17 = vadd.f32 %v6960_v38, %v4525_v56  ;;  %v6962_v29 = vpop.eup %6961  ;;  %vm3369_vm3 = vcmp.eq.s32.totalorder %v12120_v9, %v9507_v49  ;;  %vm3393_vm4 = vcmp.eq.s32.totalorder %v9557_v20, %v9702_v0 }
 0x33f   : > { %v12117_v27 = vsub.f32 %v12116_v57, %v9497_v6  ;;  %v3681_v5 = vadd.f32 %v3680_v7, %v3522_v34  ;;  %v3711_v57 = vadd.f32 %v3710_v36, %v3551_v33  ;;  %v3524_v16 = vsel %vm3364_vm9, %v12123_v43, 0.0  ;;  %v10014_v38 = vld [vmem:[%s7771_s11 + $0x1b0] sm:$0xff] }
 0x340   : > { %6967 = vpow2.f32 %v4219_v22  ;;  %12124 = vst [vmem:[#allocation63_spill] sm:$0xff] %v10014_v38  ;;  %v3552_v19 = vsel %vm3392_vm2, %v10014_v38, 0.0  ;;  %v4527_v33 = vadd.f32 %v6962_v29, %v4526_v17  ;;  %v6964_v36 = vpop.eup %6963  ;;  %v12125_v22 = vld [vmem:[#allocation28_spill] sm:$0xff]  ;;  %vm3394_vm6 = vcmp.eq.s32.totalorder %v9560_v25, %v9702_v0 }
 0x341   : > { %v4221_v41 = vmul.f32 1.442695, %v12117_v27  ;;  %v12121_v27 = vld [vmem:[#allocation42_spill] sm:$0xff]  ;;  %v3682_v56 = vadd.f32 %v3681_v5, %v3523_v58  ;;  %vm3370_vm5 = vcmp.eq.s32.totalorder %v12125_v22, %v9507_v49  ;;  %v12126_v58 = vsub.f32 %v12078_v39, %v9497_v6 }
 0x342   : > { %v12122_v34 = vsub.f32 %v12121_v27, %v9497_v6  ;;  %v3712_v27 = vadd.f32 %v3711_v57, %v3552_v19  ;;  %v3525_v17 = vsel %vm3365_vm10, %v9763_v18, 0.0  ;;  %v4528_v19 = vadd.f32 %v6964_v36, %v4527_v33  ;;  %v12128_v57 = vld [vmem:[#allocation25_spill] sm:$0xff] }
 0x343   : > { %6969 = vpow2.f32 %v4221_v41  ;;  %v4225_v5 = vmul.f32 1.442695, %v12126_v58  ;;  %v3683_v29 = vadd.f32 %v3682_v56, %v3524_v16  ;;  %v6966_v41 = vpop.eup %6965  ;;  %vm3371_vm7 = vcmp.eq.s32.totalorder %v12128_v57, %v9507_v49  ;;  %v7362_v58 = vld [vmem:[%s7771_s11 + $0xe0] sm:$0xff] }
 0x344   : > { %v4223_v7 = vmul.f32 1.442695, %v12122_v34  ;;  %v10032_v34 = vld [vmem:[%s7771_s11 + $0x1b8] sm:$0xff]  ;;  %vm3395_vm8 = vcmp.eq.s32.totalorder %v9563_v55, %v9702_v0  ;;  %v12129_v16 = vsub.f32 %v9662_v15, %v9497_v6  ;;  %v3526_v33 = vsel %vm3366_vm12, %v7362_v58, 0.0  ;;  %v10068_v58 = vld [vmem:[%s7771_s11 + $0x1c8] sm:$0xff] }
 0x345   : > { %12127 = vst [vmem:[#allocation59_spill] sm:$0xff] %v10032_v34  ;;  %v3553_v38 = vsel %vm3393_vm4, %v10032_v34, 0.0  ;;  %v3684_v36 = vadd.f32 %v3683_v29, %v3525_v17  ;;  %v10050_v34 = vld [vmem:[%s7771_s11 + $0x1c0] sm:$0xff]  ;;  %vm3396_vm10 = vcmp.eq.s32.totalorder %v9566_v30, %v9702_v0  ;;  %v12132_v17 = vsub.f32 %v9667_v52, %v9497_v6 }
 0x346   : > { %v3713_v39 = vadd.f32 %v3712_v27, %v3553_v38  ;;  %6971 = vpow2.f32 %v4223_v7  ;;  %v4227_v56 = vmul.f32 1.442695, %v12129_v16  ;;  %12130 = vst [vmem:[#allocation35_spill] sm:$0xff] %v10050_v34  ;;  %v3554_v20 = vsel %vm3394_vm6, %v10050_v34, 0.0  ;;  %v6968_v7 = vpop.eup %6967  ;;  %v12131_v27 = vld [vmem:[#allocation38_spill] sm:$0xff]  ;;  %v7364_v16 = vld [vmem:[%s7771_s11 + $0xe8] sm:$0xff] }
 0x347   : > { %v4529_v38 = vadd.f32 %v6966_v41, %v4528_v19  ;;  %vm3372_vm9 = vcmp.eq.s32.totalorder %v12131_v27, %v9507_v49  ;;  %6973 = vpow2.f32 %v4225_v5  ;;  %v4229_v29 = vmul.f32 1.442695, %v12132_v17  ;;  %12133 = vst [vmem:[#allocation60_spill] sm:$0xff] %v10068_v58  ;;  %v7366_v17 = vld [vmem:[%s7771_s11 + $0xf0] sm:$0xff] }
 0x348   : > { %v3714_v15 = vadd.f32 %v3713_v39, %v3554_v20  ;;  %v3527_v19 = vsel %vm3367_vm14, %v7364_v16, 0.0  ;;  %v3685_v41 = vadd.f32 %v3684_v36, %v3526_v33  ;;  %v3555_v34 = vsel %vm3395_vm8, %v10068_v58, 0.0  ;;  %v12134_v39 = vld [vmem:[#allocation40_spill] sm:$0xff] }
 0x349   : > { %v4530_v20 = vadd.f32 %v6968_v7, %v4529_v38  ;;  %v6970_v5 = vpop.eup %6969  ;;  %vm3373_vm11 = vcmp.eq.s32.totalorder %v12134_v39, %v9507_v49  ;;  %vm3397_vm12 = vcmp.eq.s32.totalorder %v9571_v2, %v9702_v0  ;;  %6975 = vpow2.f32 %v4227_v56  ;;  %v10086_v16 = vld [vmem:[%s7771_s11 + $0x1d0] sm:$0xff] }
 0x34a   : > { %v3715_v52 = vadd.f32 %v3714_v15, %v3555_v34  ;;  %v12135_v33 = vsub.f32 %v9674_v23, %v9497_v6  ;;  %v3528_v38 = vsel %vm3368_vm0, %v7366_v17, 0.0  ;;  %v3686_v7 = vadd.f32 %v3685_v41, %v3527_v19  ;;  %12136 = vst [vmem:[#allocation36_spill] sm:$0xff] %v10086_v16  ;;  %v12137_v15 = vld [vmem:[#allocation26_spill] sm:$0xff] }
 0x34b   : > { %v3556_v58 = vsel %vm3396_vm10, %v10086_v16, 0.0  ;;  %v4531_v34 = vadd.f32 %v6970_v5, %v4530_v20  ;;  %vm3374_vm13 = vcmp.eq.s32.totalorder %v12137_v15, %v9507_v49  ;;  %vm3398_vm14 = vcmp.eq.s32.totalorder %v9574_v32, %v9702_v0  ;;  %v10104_v17 = vld [vmem:[%s7771_s11 + $0x1d8] sm:$0xff] }
 0x34c   : > { %v4231_v36 = vmul.f32 1.442695, %v12135_v33  ;;  %v6972_v56 = vpop.eup %6971  ;;  %v3716_v23 = vadd.f32 %v3715_v52, %v3556_v58  ;;  %6977 = vpow2.f32 %v4229_v29  ;;  %v12138_v19 = vsub.f32 %v9679_v12, %v9497_v6  ;;  %v7368_v33 = vld [vmem:[%s7771_s11 + $0xf8] sm:$0xff]  ;;  %12139 = vst [vmem:[#allocation61_spill] sm:$0xff] %v10104_v17  ;;  %v12140_v52 = vld [vmem:[#allocation43_spill] sm:$0xff] }
 0x34d   : > { %v3529_v20 = vsel %vm3369_vm3, %v7368_v33, 0.0  ;;  %v3687_v5 = vadd.f32 %v3686_v7, %v3528_v38  ;;  %v3557_v16 = vsel %vm3397_vm12, %v10104_v17, 0.0  ;;  %v4532_v58 = vadd.f32 %v6972_v56, %v4531_v34  ;;  %v6974_v29 = vpop.eup %6973  ;;  %v10122_v33 = vld [vmem:[%s7771_s11 + $0x1e0] sm:$0xff] }
 0x34e   : > { %v4233_v41 = vmul.f32 1.442695, %v12138_v19  ;;  %vm3375_vm15 = vcmp.eq.s32.totalorder %v12140_v52, %v9507_v49  ;;  %vm3399_vm0 = vcmp.eq.s32.totalorder %v9577_v13, %v9702_v0  ;;  %v3717_v12 = vadd.f32 %v3716_v23, %v3557_v16  ;;  %v7370_v19 = vld [vmem:[%s7771_s11 + $0x100] sm:$0xff]  ;;  %12142 = vst [vmem:[#allocation41_spill] sm:$0xff] %v10122_v33  ;;  %v12143_v23 = vld [vmem:[#allocation44_spill] sm:$0xff] }
 0x34f   : > { %6979 = vpow2.f32 %v4231_v36  ;;  %v12141_v38 = vsub.f32 %v9688_v8, %v9497_v6  ;;  %v3530_v34 = vsel %vm3370_vm5, %v7370_v19, 0.0  ;;  %v3688_v56 = vadd.f32 %v3687_v5, %v3529_v20  ;;  %v6976_v36 = vpop.eup %6975  ;;  %v10140_v19 = vld [vmem:[%s7771_s11 + $0x1e8] sm:$0xff] }
 0x350   : > { %v3558_v17 = vsel %vm3398_vm14, %v10122_v33, 0.0  ;;  %v4533_v16 = vadd.f32 %v6974_v29, %v4532_v58  ;;  %vm3376_vm2 = vcmp.eq.s32.totalorder %v12143_v23, %v9507_v49  ;;  %vm3400_vm3 = vcmp.eq.s32.totalorder %v9581_v21, %v9702_v0  ;;  %12145 = vst [vmem:[#allocation64_spill] sm:$0xff] %v10140_v19  ;;  %v10174_v21 = vld [vmem:[%s7771_s11 + $0x1f8] sm:$0xff] }
 0x351   : > { %v4235_v7 = vmul.f32 1.442695, %v12141_v38  ;;  %v3718_v8 = vadd.f32 %v3717_v12, %v3558_v17  ;;  %6981 = vpow2.f32 %v4233_v41  ;;  %v12144_v20 = vsub.f32 %v9693_v53, %v9497_v6  ;;  %v7372_v38 = vld [vmem:[%s7771_s11 + $0x108] sm:$0xff]  ;;  %v12146_v12 = vld [vmem:[#allocation49_spill] sm:$0xff] }
 0x352   : > { %v3531_v58 = vsel %vm3371_vm7, %v7372_v38, 0.0  ;;  %v3689_v29 = vadd.f32 %v3688_v56, %v3530_v34  ;;  %v3559_v33 = vsel %vm3399_vm0, %v10140_v19, 0.0  ;;  %v4534_v17 = vadd.f32 %v6976_v36, %v4533_v16  ;;  %v6978_v41 = vpop.eup %6977  ;;  %v10158_v38 = vld [vmem:[%s7771_s11 + $0x1f0] sm:$0xff] }
 0x353   : > { %v4237_v5 = vmul.f32 1.442695, %v12144_v20  ;;  %vm3377_vm4 = vcmp.eq.s32.totalorder %v12146_v12, %v9507_v49  ;;  %vm3401_vm5 = vcmp.eq.s32.totalorder %v9584_v24, %v9702_v0  ;;  %v3719_v53 = vadd.f32 %v3718_v8, %v3559_v33  ;;  %v7374_v20 = vld [vmem:[%s7771_s11 + $0x110] sm:$0xff] }
 0x354   : > { %6983 = vpow2.f32 %v4235_v7  ;;  %v12147_v34 = vsub.f32 %v9698_v59, %v9497_v6  ;;  %v3532_v16 = vsel %vm3372_vm9, %v7374_v20, 0.0  ;;  %v3690_v36 = vadd.f32 %v3689_v29, %v3531_v58  ;;  %v7376_v58 = vld [vmem:[%s7771_s11 + $0x118] sm:$0xff] }
 0x355   : > { %v3560_v19 = vsel %vm3400_vm3, %v10158_v38, 0.0  ;;  %v4535_v33 = vadd.f32 %v6978_v41, %v4534_v17  ;;  %v6980_v7 = vpop.eup %6979  ;;  %vm3402_vm6 = vcmp.eq.s32.totalorder %v9589_v35, %v9702_v0  ;;  %6985 = vpow2.f32 %v4237_v5 }
 0x356   : > { %v4239_v56 = vmul.f32 1.442695, %v12147_v34  ;;  %v3720_v59 = vadd.f32 %v3719_v53, %v3560_v19  ;;  %v12148_v8 = vsub.f32 %v9707_v45, %v9497_v6  ;;  %v3533_v29 = vsel %vm3373_vm11, %v7376_v58, 0.0 }
 0x357   : > { %v3691_v20 = vadd.f32 %v3690_v36, %v3532_v16  ;;  %v3561_v17 = vsel %vm3401_vm5, %v10174_v21, 0.0  ;;  %v4536_v19 = vadd.f32 %v6980_v7, %v4535_v33  ;;  %v6982_v41 = vpop.eup %6981  ;;  %vm3403_vm7 = vcmp.eq.s32.totalorder %v9592_v3, %v9702_v0 }
 0x358   : > { %v4241_v34 = vmul.f32 1.442695, %v12148_v8  ;;  %v3721_v45 = vadd.f32 %v3720_v59, %v3561_v17  ;;  %6987 = vpow2.f32 %v4239_v56  ;;  %v12149_v5 = vsub.f32 %v9712_v37, %v9497_v6  ;;  %v10190_v8 = vld [vmem:[%s7771_s11 + $0x200] sm:$0xff] }
 0x359   : > { %v3534_v16 = vsel %vm3374_vm13, %v9347_v4, 0.0  ;;  %v3692_v36 = vadd.f32 %v3691_v20, %v3533_v29  ;;  %v3562_v33 = vsel %vm3402_vm6, %v10190_v8, 0.0  ;;  %v4537_v7 = vadd.f32 %v6982_v41, %v4536_v19  ;;  %v12151_v29 = vld [vmem:[#allocation17_spill] sm:$0xff] }
 0x35a   : > { %v4243_v53 = vmul.f32 1.442695, %v12149_v5  ;;  %v6984_v59 = vpop.eup %6983  ;;  %vm3404_vm8 = vcmp.eq.s32.totalorder %v12099_v47, %v9702_v0  ;;  %v3722_v37 = vadd.f32 %v3721_v45, %v3562_v33  ;;  %6989 = vpow2.f32 %v4241_v34  ;;  %v10206_v5 = vld [vmem:[%s7771_s11 + $0x208] sm:$0xff] }
 0x35b   : > { %v12150_v56 = vsub.f32 %v12100_v63, %v9497_v6  ;;  %v3535_v20 = vsel %vm3375_vm15, %v12151_v29, 0.0  ;;  %v3693_v17 = vadd.f32 %v3692_v36, %v3534_v16  ;;  %v3563_v19 = vsel %vm3403_vm7, %v10206_v5, 0.0  ;;  %v6986_v45 = vpop.eup %6985  ;;  %v12153_v16 = vld [vmem:[#allocation32_spill] sm:$0xff] }
 0x35c   : > { %v4538_v41 = vadd.f32 %v6984_v59, %v4537_v7  ;;  %vm3405_vm9 = vcmp.eq.s32.totalorder %v12102_v54, %v9702_v0  ;;  %v3723_v63 = vadd.f32 %v3722_v37, %v3563_v19  ;;  %6991 = vpow2.f32 %v4243_v53  ;;  %v10222_v29 = vld [vmem:[%s7771_s11 + $0x210] sm:$0xff] }
 0x35d   : > { %v4245_v58 = vmul.f32 1.442695, %v12150_v56  ;;  %v12152_v34 = vsub.f32 %v12105_v50, %v9497_v6  ;;  %v3536_v36 = vsel %vm3376_vm2, %v12153_v16, 0.0  ;;  %v3694_v56 = vadd.f32 %v3693_v17, %v3535_v20  ;;  %v12155_v17 = vld [vmem:[#allocation15_spill] sm:$0xff]  ;;  %v10238_v16 = vld [vmem:[%s7771_s11 + $0x218] sm:$0xff] }
 0x35e   : > { %v3564_v7 = vsel %vm3404_vm8, %v10222_v29, 0.0  ;;  %v4539_v59 = vadd.f32 %v6986_v45, %v4538_v41  ;;  %v6988_v37 = vpop.eup %6987  ;;  %vm3406_vm10 = vcmp.eq.s32.totalorder %v12107_v62, %v9702_v0  ;;  %v12154_v53 = vsub.f32 %v9731_v40, %v9497_v6  ;;  %12156 = vst [vmem:[#allocation62_spill] sm:$0xff] %v10238_v16 }
 0x35f   : > { %v4247_v33 = vmul.f32 1.442695, %v12152_v34  ;;  %v3724_v50 = vadd.f32 %v3723_v63, %v3564_v7  ;;  %6993 = vpow2.f32 %v4245_v58  ;;  %v3537_v19 = vsel %vm3377_vm4, %v12155_v17, 0.0 }
 0x360   : > { %v4249_v20 = vmul.f32 1.442695, %v12154_v53  ;;  %v3695_v34 = vadd.f32 %v3694_v56, %v3536_v36  ;;  %v3565_v41 = vsel %vm3405_vm9, %v10238_v16, 0.0  ;;  %v4540_v45 = vadd.f32 %v6988_v37, %v4539_v59  ;;  %v6990_v63 = vpop.eup %6989  ;;  %v10250_v56 = vld [vmem:[%s7771_s11 + $0x220] sm:$0xff]  ;;  %v10257_v59 = vld [vmem:[%s7771_s11 + $0x128] sm:$0xff] }
 0x361   : > { %vm3407_vm11 = vcmp.eq.s32.totalorder %v12111_v14, %v9702_v0  ;;  %v3725_v40 = vadd.f32 %v3724_v50, %v3565_v41  ;;  %6995 = vpow2.f32 %v4247_v33  ;;  %v12157_v49 = vsub.f32 %v9738_v48, %v9497_v6  ;;  %12158 = vst [vmem:[#allocation42_spill] sm:$0xff] %v10250_v56  ;;  %v10276_v41 = vld [vmem:[%s7771_s11 + $0x130] sm:$0xff]  ;;  %v10339_v37 = vld [vmem:[%s7771_s11 + $0x288] sm:$0xff] }
 0x362   : > { %v3696_v36 = vadd.f32 %v3695_v34, %v3537_v19  ;;  %v3566_v7 = vsel %vm3406_vm10, %v10250_v56, 0.0  ;;  %v4541_v50 = vadd.f32 %v6990_v63, %v4540_v45  ;;  %v6992_v33 = vpop.eup %6991  ;;  %vm3408_vm12 = vcmp.eq.s32.totalorder %v12115_v31, %v9702_v0  ;;  %v10269_v19 = vld [vmem:[%s7771_s11 + $0x228] sm:$0xff]  ;;  %v10280_v63 = vpop.permute.xlu2 %3333  ;;  %v10450_v56 = vld [vmem:[%s7771_s11 + $0x2b0] sm:$0xff] }
 0x363   : > { %v4251_v58 = vmul.f32 1.442695, %v12157_v49  ;;  %v3726_v48 = vadd.f32 %v3725_v40, %v3566_v7  ;;  %6997 = vpow2.f32 %v4249_v20  ;;  %v12159_v53 = vsub.f32 %v12118_v1, %v9497_v6  ;;  %12160 = vst [vmem:[#allocation65_spill] sm:$0xff] %v10269_v19  ;;  %v10292_v7 = vld [vmem:[%s7771_s11 + $0x230] sm:$0xff] }
 0x364   : > { %3697 = vadd.xlane.f32.xlu1 %v3696_v36  ;;  %vm3409_vm13 = vcmp.eq.s32.totalorder %v12120_v9, %v9702_v0  ;;  %v3567_v34 = vsel %vm3407_vm11, %v10269_v19, 0.0  ;;  %v4542_v45 = vadd.f32 %v6992_v33, %v4541_v50  ;;  %vm3410_vm14 = vcmp.eq.s32.totalorder %v12125_v22, %v9702_v0  ;;  %12162 = vst [vmem:[#allocation28_spill] sm:$0xff] %v10292_v7  ;;  %v10412_v19 = vld [vmem:[%s7771_s11 + $0x2a0] sm:$0xff] }
 0x365   : > { %v4253_v17 = vmul.f32 1.442695, %v12159_v53  ;;  %v6994_v1 = vpop.eup %6993  ;;  %v3727_v40 = vadd.f32 %v3726_v48, %v3567_v34  ;;  %6999 = vpow2.f32 %v4251_v58  ;;  %v12161_v49 = vsub.f32 %v12123_v43, %v9497_v6  ;;  %v10304_v34 = vld [vmem:[%s7771_s11 + $0x238] sm:$0xff]  ;;  %12181 = vst [vmem:[#allocation32_spill] sm:$0xff] %v10412_v19 }
 0x366   : > { %vm3411_vm15 = vcmp.eq.s32.totalorder %v12128_v57, %v9702_v0  ;;  %vm3412_vm0 = vcmp.eq.s32.totalorder %v12131_v27, %v9702_v0  ;;  %v3568_v50 = vsel %vm3408_vm12, %v10292_v7, 0.0  ;;  %v4543_v33 = vadd.f32 %v6994_v1, %v4542_v45  ;;  %12164 = vst [vmem:[#allocation25_spill] sm:$0xff] %v10304_v34  ;;  %v12165_v45 = vld [vmem:[#allocation46_spill] sm:$0xff] }
 0x367   : > { %v4255_v36 = vmul.f32 1.442695, %v12161_v49  ;;  %v6996_v48 = vpop.eup %6995  ;;  %vm3413_vm2 = vcmp.eq.s32.totalorder %v12134_v39, %v9702_v0  ;;  %v3728_v43 = vadd.f32 %v3727_v40, %v3568_v50  ;;  %7001 = vpow2.f32 %v4253_v17  ;;  %v10322_v50 = vld [vmem:[%s7771_s11 + $0x240] sm:$0xff] }
 0x368   : > { %v12163_v58 = vsub.f32 %v9763_v18, %v9497_v6  ;;  %v3569_v49 = vsel %vm3409_vm13, %v10304_v34, 0.0  ;;  %v4544_v20 = vadd.f32 %v6996_v48, %v4543_v33  ;;  %vm3418_vm3 = vcmp.eq.s32.totalorder %v9502_v42, %v10280_v63  ;;  %12167 = vst [vmem:[#allocation38_spill] sm:$0xff] %v10322_v50  ;;  %v10362_v34 = vld [vmem:[%s7771_s11 + $0x250] sm:$0xff] }
 0x369   : > { %vm3419_vm4 = vcmp.eq.s32.totalorder %v9505_v46, %v10280_v63  ;;  %v6998_v17 = vpop.eup %6997  ;;  %vm3414_vm5 = vcmp.eq.s32.totalorder %v12137_v15, %v9702_v0  ;;  %v3729_v18 = vadd.f32 %v3728_v43, %v3569_v49  ;;  %7003 = vpow2.f32 %v4255_v36  ;;  %12171 = vst [vmem:[#allocation26_spill] sm:$0xff] %v10362_v34 }
 0x36a   : > { %v4257_v53 = vmul.f32 1.442695, %v12163_v58  ;;  %v12166_v1 = vsub.f32 %v12165_v45, %v9497_v6  ;;  %vm3415_vm6 = vcmp.eq.s32.totalorder %v12140_v52, %v9702_v0  ;;  %v3570_v33 = vsel %vm3410_vm14, %v10322_v50, 0.0  ;;  %v10332_v45 = vld [vmem:[%s7771_s11 + $0x280] sm:$0xff] }
 0x36b   : > { %v12168_v48 = vsub.f32 %v9087_v61, %v9497_v6  ;;  %v4545_v58 = vadd.f32 %v6998_v17, %v4544_v20  ;;  %v7000_v36 = vpop.eup %6999  ;;  %v3730_v49 = vadd.f32 %v3729_v18, %v3570_v33  ;;  %v3579_v61 = vsel %vm3419_vm4, %v10339_v37, 0.0  ;;  %v10348_v20 = vld [vmem:[%s7771_s11 + $0x248] sm:$0xff] }
 0x36c   : > { %v4259_v40 = vmul.f32 1.442695, %v12166_v1  ;;  %7005 = vpow2.f32 %v4257_v53  ;;  %v3578_v1 = vsel %vm3418_vm3, %v10332_v45, 0.0  ;;  %vm3416_vm7 = vcmp.eq.s32.totalorder %v12143_v23, %v9702_v0  ;;  %12169 = vst [vmem:[#allocation40_spill] sm:$0xff] %v10348_v20 }
 0x36d   : > { %v4261_v43 = vmul.f32 1.442695, %v12168_v48  ;;  %v3571_v53 = vsel %vm3411_vm15, %v10348_v20, 0.0  ;;  %v4546_v17 = vadd.f32 %v7000_v36, %v4545_v58  ;;  %vm3420_vm8 = vcmp.eq.s32.totalorder %v9510_v60, %v10280_v63  ;;  %v7002_v18 = vpop.eup %7001 }
 0x36e   : > { %vm3417_vm9 = vcmp.eq.s32.totalorder %v12146_v12, %v9702_v0  ;;  %v3731_v33 = vadd.f32 %v3730_v49, %v3571_v53  ;;  %7007 = vpow2.f32 %v4259_v40  ;;  %v12170_v48 = vsub.f32 %v9108_v44, %v9497_v6  ;;  %v12172_v40 = vld [vmem:[#allocation47_spill] sm:$0xff] }
 0x36f   : > { %v3572_v58 = vsel %vm3412_vm0, %v10362_v34, 0.0  ;;  %v4547_v36 = vadd.f32 %v7002_v18, %v4546_v17  ;;  %vm3421_vm10 = vcmp.eq.s32.totalorder %v9517_v51, %v10280_v63  ;;  %v3740_v20 = vadd.f32 %v3579_v61, %v3578_v1  ;;  %v7004_v7 = vpop.eup %7003  ;;  %v10381_v18 = vld [vmem:[%s7771_s11 + $0x258] sm:$0xff] }
 0x370   : > { %v4263_v50 = vmul.f32 1.442695, %v12170_v48  ;;  %v3732_v49 = vadd.f32 %v3731_v33, %v3572_v58  ;;  %7009 = vpow2.f32 %v4261_v43  ;;  %v12173_v44 = vsub.f32 %v12172_v40, %v9497_v6  ;;  %v10374_v48 = vld [vmem:[%s7771_s11 + $0x290] sm:$0xff]  ;;  %12175 = vst [vmem:[#allocation44_spill] sm:$0xff] %v10381_v18  ;;  %v10393_v34 = vld [vmem:[%s7771_s11 + $0x298] sm:$0xff] }
 0x371   : > { %12174 = vst [vmem:[#allocation43_spill] sm:$0xff] %v10374_v48  ;;  %v3580_v17 = vsel %vm3420_vm8, %v10374_v48, 0.0  ;;  %v3573_v1 = vsel %vm3413_vm2, %v10381_v18, 0.0  ;;  %v4548_v61 = vadd.f32 %v7004_v7, %v4547_v36  ;;  %vm3422_vm11 = vcmp.eq.s32.totalorder %v9520_v10, %v10280_v63  ;;  %v10400_v36 = vld [vmem:[%s7771_s11 + $0x260] sm:$0xff] }
 0x372   : > { %v4265_v53 = vmul.f32 1.442695, %v12173_v44  ;;  %v3741_v43 = vadd.f32 %v3740_v20, %v3580_v17  ;;  %v7006_v33 = vpop.eup %7005  ;;  %v3733_v58 = vadd.f32 %v3732_v49, %v3573_v1  ;;  %7011 = vpow2.f32 %v4263_v50  ;;  %12177 = vst [vmem:[#allocation49_spill] sm:$0xff] %v10393_v34  ;;  %v12179_v1 = vld [vmem:[#allocation48_spill] sm:$0xff] }
 0x373   : > { %v12176_v40 = vsub.f32 %v9219_v11, %v9497_v6  ;;  %v3581_v7 = vsel %vm3421_vm10, %v10393_v34, 0.0  ;;  %12178 = vst [vmem:[#allocation17_spill] sm:$0xff] %v10400_v36  ;;  %v3574_v20 = vsel %vm3414_vm5, %v10400_v36, 0.0  ;;  %v4549_v49 = vadd.f32 %v7006_v33, %v4548_v61  ;;  %v10419_v33 = vld [vmem:[%s7771_s11 + $0x268] sm:$0xff] }
 0x374   : > { %vm3423_vm12 = vcmp.eq.s32.totalorder %v9523_v26, %v10280_v63  ;;  %v3742_v11 = vadd.f32 %v3741_v43, %v3581_v7  ;;  %v7008_v50 = vpop.eup %7007  ;;  %v3734_v17 = vadd.f32 %v3733_v58, %v3574_v20  ;;  %7013 = vpow2.f32 %v4265_v53  ;;  %12182 = vst [vmem:[#allocation15_spill] sm:$0xff] %v10419_v33  ;;  %v12183_v53 = vld [vmem:[#allocation51_spill] sm:$0xff] }
 0x375   : > { %v4267_v44 = vmul.f32 1.442695, %v12176_v40  ;;  %v12180_v40 = vsub.f32 %v12179_v1, %v9497_v6  ;;  %v3582_v61 = vsel %vm3422_vm11, %v10412_v19, 0.0  ;;  %v3575_v43 = vsel %vm3415_vm6, %v10419_v33, 0.0  ;;  %v10431_v34 = vld [vmem:[%s7771_s11 + $0x2a8] sm:$0xff]  ;;  %12191 = vst [vmem:[#allocation48_spill] sm:$0xff] %v10450_v56 }
 0x376   : > { %v4550_v58 = vadd.f32 %v7008_v50, %v4549_v49  ;;  %vm3424_vm13 = vcmp.eq.s32.totalorder %v12183_v53, %v10280_v63  ;;  %v3743_v7 = vadd.f32 %v3742_v11, %v3582_v61  ;;  %v7010_v20 = vpop.eup %7009  ;;  %v3735_v1 = vadd.f32 %v3734_v17, %v3575_v43  ;;  %12186 = vst [vmem:[#allocation46_spill] sm:$0xff] %v10431_v34  ;;  %v10438_v50 = vld [vmem:[%s7771_s11 + $0x270] sm:$0xff] }
 0x377   : > { %v4269_v18 = vmul.f32 1.442695, %v12180_v40  ;;  %7015 = vpow2.f32 %v4267_v44  ;;  %v12184_v40 = vld [vmem:[#allocation16_spill] sm:$0xff]  ;;  %v3583_v49 = vsel %vm3423_vm12, %v10431_v34, 0.0  ;;  %12187 = vst [vmem:[#allocation47_spill] sm:$0xff] %v10438_v50  ;;  %v3576_v11 = vsel %vm3416_vm7, %v10438_v50, 0.0 }
 0x378   : > { %v12185_v36 = vsub.f32 %v12184_v40, %v9497_v6  ;;  %v4551_v17 = vadd.f32 %v7010_v20, %v4550_v58  ;;  %v12188_v44 = vld [vmem:[#allocation52_spill] sm:$0xff]  ;;  %v3744_v61 = vadd.f32 %v3743_v7, %v3583_v49  ;;  %v3736_v43 = vadd.f32 %v3735_v1, %v3576_v11  ;;  %v12189_v40 = vld [vmem:[#allocation30_spill] sm:$0xff]  ;;  %v12193_v20 = vld [vmem:[#allocation53_spill] sm:$0xff] }
 0x379   : > { %vm3425_vm14 = vcmp.eq.s32.totalorder %v12188_v44, %v10280_v63  ;;  %7017 = vpow2.f32 %v4269_v18  ;;  %v12190_v33 = vsub.f32 %v12189_v40, %v9497_v6  ;;  %v3584_v50 = vsel %vm3424_vm13, %v10450_v56, 0.0  ;;  %v10457_v58 = vld [vmem:[%s7771_s11 + $0x278] sm:$0xff] }
 0x37a   : > { %v4271_v19 = vmul.f32 1.442695, %v12185_v36  ;;  %v7012_v36 = vpop.eup %7011  ;;  %12192 = vst [vmem:[#allocation51_spill] sm:$0xff] %v10457_v58  ;;  %v3577_v7 = vsel %vm3417_vm9, %v10457_v58, 0.0  ;;  %vm3426_vm15 = vcmp.eq.s32.totalorder %v12193_v20, %v10280_v63  ;;  %v12194_v11 = vsub.f32 %v9347_v4, %v9497_v6  ;;  %v10469_v56 = vld [vmem:[%s7771_s11 + $0x2b8] sm:$0xff] }
 0x37b   : > { %v4273_v34 = vmul.f32 1.442695, %v12190_v33  ;;  %v4552_v18 = vadd.f32 %v7012_v36, %v4551_v17  ;;  %v3745_v33 = vadd.f32 %v3744_v61, %v3584_v50  ;;  %v7014_v1 = vpop.eup %7013  ;;  %v3737_v49 = vadd.f32 %v3736_v43, %v3577_v7  ;;  %12195 = vst [vmem:[#allocation16_spill] sm:$0xff] %v10469_v56  ;;  %v12196_v36 = vld [vmem:[#allocation54_spill] sm:$0xff] }
 0x37c   : > { %7019 = vpow2.f32 %v4271_v19  ;;  %v4275_v40 = vmul.f32 1.442695, %v12194_v11  ;;  %v3585_v0 = vsel %vm3425_vm14, %v10469_v56, 0.0  ;;  %vm3427_vm0 = vcmp.eq.s32.totalorder %v12196_v36, %v10280_v63  ;;  %v7404_v19 = vld [vmem:[%s7771_s11 + $0x138] sm:$0xff]  ;;  %v10483_v11 = vld [vmem:[%s7771_s11 + $0x2c0] sm:$0xff] }
 0x37d   : > { %v4553_v17 = vadd.f32 %v7014_v1, %v4552_v18  ;;  %v3746_v50 = vadd.f32 %v3745_v33, %v3585_v0  ;;  %v7016_v61 = vpop.eup %7015  ;;  %3738 = vadd.xlane.f32.xlu2 %v3737_v49  ;;  %v4082_v43 = vsub.f32 %v7404_v19, %v9497_v6  ;;  %7021 = vpow2.f32 %v4273_v34  ;;  %12198 = vst [vmem:[#allocation52_spill] sm:$0xff] %v10483_v11  ;;  %v12199_v33 = vld [vmem:[#allocation22_spill] sm:$0xff]  ;;  %v10495_v19 = vld [vmem:[%s7771_s11 + $0x2c8] sm:$0xff] }
 0x37e   : > { %v12197_v4 = vsub.f32 %v10257_v59, %v9497_v6  ;;  %v3586_v18 = vsel %vm3426_vm15, %v10483_v11, 0.0  ;;  %vm3428_vm2 = vcmp.eq.s32.totalorder %v12199_v33, %v10280_v63  ;;  %7023 = vpow2.f32 %v4275_v40  ;;  %12201 = vst [vmem:[#allocation30_spill] sm:$0xff] %v10495_v19 }
 0x37f   : > { %v4554_v1 = vadd.f32 %v7016_v61, %v4553_v17  ;;  %v3747_v49 = vadd.f32 %v3746_v50, %v3586_v18  ;;  %v7018_v0 = vpop.eup %7017  ;;  %v12200_v34 = vsub.f32 %v10276_v41, %v9497_v6  ;;  %v12202_v17 = vld [vmem:[#allocation23_spill] sm:$0xff]  ;;  %v4281_v40 = vmul.f32 1.442695, %v4082_v43  ;;  %v10504_v18 = vld [vmem:[%s7771_s11 + $0x2d0] sm:$0xff] }
 0x380   : > { %v4277_v7 = vmul.f32 1.442695, %v12197_v4  ;;  %v3587_v4 = vsel %vm3427_vm0, %v10495_v19, 0.0  ;;  %vm3429_vm3 = vcmp.eq.s32.totalorder %v12202_v17, %v10280_v63  ;;  %12203 = vst [vmem:[#allocation53_spill] sm:$0xff] %v10504_v18  ;;  %v3588_v6 = vsel %vm3428_vm2, %v10504_v18, 0.0  ;;  %v10550_v19 = vld [vmem:[%s7771_s11 + $0x2f8] sm:$0xff] }
 0x381   : > { %v4279_v59 = vmul.f32 1.442695, %v12200_v34  ;;  %v4555_v58 = vadd.f32 %v7018_v0, %v4554_v1  ;;  %v3748_v61 = vadd.f32 %v3747_v49, %v3587_v4  ;;  %v12204_v34 = vld [vmem:[#allocation55_spill] sm:$0xff]  ;;  %v10510_v1 = vld [vmem:[%s7771_s11 + $0x2d8] sm:$0xff]  ;;  %v10513_v0 = vpop.permute.xlu2 %3336  ;;  %vm3432_vm6 = vcmp.eq.s32.totalorder %v9554_v28, %v10280_v63 }
 0x382   : > { %v7020_v50 = vpop.eup %7019  ;;  %7025 = vpow2.f32 %v4277_v7  ;;  %vm3430_vm4 = vcmp.eq.s32.totalorder %v12204_v34, %v10280_v63  ;;  %12205 = vst [vmem:[#allocation54_spill] sm:$0xff] %v10510_v1  ;;  %v3589_v49 = vsel %vm3429_vm3, %v10510_v1, 0.0  ;;  %v12206_v7 = vld [vmem:[#allocation56_spill] sm:$0xff]  ;;  %vm3458_vm7 = vcmp.eq.s32.totalorder %v9502_v42, %v10513_v0 }
 0x383   : > { %v4556_v41 = vadd.f32 %v7020_v50, %v4555_v58  ;;  %v3749_v11 = vadd.f32 %v3748_v61, %v3588_v6  ;;  %v7022_v56 = vpop.eup %7021  ;;  %7027 = vpow2.f32 %v4279_v59  ;;  %vm3431_vm5 = vcmp.eq.s32.totalorder %v12206_v7, %v10280_v63  ;;  %v10518_v58 = vld [vmem:[%s7771_s11 + $0x2e0] sm:$0xff]  ;;  %v10524_v1 = vld [vmem:[%s7771_s11 + $0x2e8] sm:$0xff] }
 0x384   : > { %v7024_v18 = vpop.eup %7023  ;;  %7029 = vpow2.f32 %v4281_v40  ;;  %12207 = vst [vmem:[#allocation22_spill] sm:$0xff] %v10518_v58  ;;  %v3590_v61 = vsel %vm3430_vm4, %v10518_v58, 0.0  ;;  %vm3459_vm8 = vcmp.eq.s32.totalorder %v9505_v46, %v10513_v0  ;;  %v12209_v40 = vld [vmem:[#allocation57_spill] sm:$0xff]  ;;  %vm3434_vm10 = vcmp.eq.s32.totalorder %v9560_v25, %v10280_v63  ;;  %v10542_v58 = vld [vmem:[%s7771_s11 + $0x3c0] sm:$0xff] }
 0x385   : > { %v4557_v43 = vadd.f32 %v7022_v56, %v4556_v41  ;;  %v3750_v4 = vadd.f32 %v3749_v11, %v3589_v49  ;;  %12208 = vst [vmem:[#allocation23_spill] sm:$0xff] %v10524_v1  ;;  %v3591_v56 = vsel %vm3431_vm5, %v10524_v1, 0.0  ;;  %vm3433_vm9 = vcmp.eq.s32.totalorder %v12209_v40, %v10280_v63  ;;  %v10536_v49 = vld [vmem:[%s7771_s11 + $0x2f0] sm:$0xff] }
 0x386   : > { %12210 = vst [vmem:[#allocation55_spill] sm:$0xff] %v10536_v49  ;;  %v3593_v48 = vsel %vm3433_vm9, %v10550_v19, 0.0  ;;  %vm3460_vm11 = vcmp.eq.s32.totalorder %v9510_v60, %v10513_v0  ;;  %vm3435_vm12 = vcmp.eq.s32.totalorder %v9563_v55, %v10280_v63  ;;  %vm3461_vm13 = vcmp.eq.s32.totalorder %v9517_v51, %v10513_v0  ;;  %v12227_v51 = vld [vmem:[#allocation24_spill] sm:$0xff] }
 0x387   : > { %v4558_v50 = vadd.f32 %v7024_v18, %v4557_v43  ;;  %v3751_v59 = vadd.f32 %v3750_v4, %v3590_v61  ;;  %v3592_v43 = vsel %vm3432_vm6, %v10536_v49, 0.0  ;;  %v12211_v4 = vld [vmem:[#allocation50_spill] sm:$0xff]  ;;  %12213 = vst [vmem:[#allocation56_spill] sm:$0xff] %v10542_v58  ;;  %vm3436_vm14 = vcmp.eq.s32.totalorder %v9566_v30, %v10280_v63 }
 0x388   : > { %v7026_v6 = vpop.eup %7025  ;;  %v12212_v61 = vld [vmem:[#allocation66_spill] sm:$0xff]  ;;  %12215 = vst [vmem:[#allocation50_spill] sm:$0xff] %v10550_v19  ;;  %vm3462_vm15 = vcmp.eq.s32.totalorder %v9520_v10, %v10513_v0  ;;  %vm3437_vm0 = vcmp.eq.s32.totalorder %v9571_v2, %v10280_v63  ;;  %vm3438_vm2 = vcmp.eq.s32.totalorder %v9574_v32, %v10280_v63  ;;  %vm3463_vm3 = vcmp.eq.s32.totalorder %v9523_v26, %v10513_v0 }
 0x389   : > { %v4559_v11 = vadd.f32 %v7026_v6, %v4558_v50  ;;  %v3752_v18 = vadd.f32 %v3751_v59, %v3591_v56  ;;  %v7028_v41 = vpop.eup %7027  ;;  %v3618_v50 = vsel %vm3458_vm7, %v10542_v58, 0.0  ;;  %v10546_v6 = vld [vmem:[%s7771_s11 + $0x3c8] sm:$0xff]  ;;  %v12218_v58 = vld [vmem:[#allocation69_spill] sm:$0xff]  ;;  %v10564_v19 = vld [vmem:[%s7771_s11 + $0x300] sm:$0xff]  ;;  %vm3439_vm4 = vcmp.eq.s32.totalorder %v9577_v13, %v10280_v63 }
 0x38a   : > { %12214 = vst [vmem:[#allocation57_spill] sm:$0xff] %v10546_v6  ;;  %v3619_v59 = vsel %vm3459_vm8, %v10546_v6, 0.0  ;;  %v7030_v56 = vpop.eup %7029  ;;  %v3594_v16 = vsel %vm3434_vm10, %v10564_v19, 0.0  ;;  %vm3440_vm5 = vcmp.eq.s32.totalorder %v12227_v51, %v10280_v63  ;;  %vm3441_vm6 = vcmp.eq.s32.totalorder %v9584_v24, %v10280_v63 }
 0x38b   : > { %v4560_v1 = vadd.f32 %v7028_v41, %v4559_v11  ;;  %v3753_v46 = vadd.f32 %v3752_v18, %v3592_v43  ;;  %v12216_v11 = vld [vmem:[#allocation67_spill] sm:$0xff]  ;;  %v12217_v41 = vld [vmem:[#allocation68_spill] sm:$0xff]  ;;  %12219 = vst [vmem:[#allocation66_spill] sm:$0xff] %v10564_v19  ;;  %v3781_v43 = vadd.f32 %v3619_v59, %v3618_v50  ;;  %vm3464_vm7 = vcmp.eq.s32.totalorder %v12183_v53, %v10513_v0 }
 0x38c   : > { %v12222_v18 = vld [vmem:[#allocation71_spill] sm:$0xff]  ;;  %vm3442_vm8 = vcmp.eq.s32.totalorder %v9589_v35, %v10280_v63  ;;  %vm3443_vm9 = vcmp.eq.s32.totalorder %v9592_v3, %v10280_v63  ;;  %vm3444_vm10 = vcmp.eq.s32.totalorder %v12099_v47, %v10280_v63  ;;  %vm3468_vm1 = vcmp.eq.s32.totalorder %v12199_v33, %v10513_v0 }
 0x38d   : > { %v4561_v42 = vadd.f32 %v7030_v56, %v4560_v1  ;;  %v3754_v6 = vadd.f32 %v3753_v46, %v3593_v48  ;;  %v12220_v1 = vld [vmem:[#allocation70_spill] sm:$0xff]  ;;  %v10577_v46 = vld [vmem:[%s7771_s11 + $0x3d0] sm:$0xff]  ;;  %v10586_v50 = vld [vmem:[%s7771_s11 + $0x308] sm:$0xff] }
 0x38e   : > { %12221 = vst [vmem:[#allocation67_spill] sm:$0xff] %v10577_v46  ;;  %v3620_v49 = vsel %vm3460_vm11, %v10577_v46, 0.0  ;;  %v3595_v59 = vsel %vm3435_vm12, %v10586_v50, 0.0  ;;  %v10596_v56 = vld [vmem:[%s7771_s11 + $0x3d8] sm:$0xff]  ;;  %vm3465_vm11 = vcmp.eq.s32.totalorder %v12188_v44, %v10513_v0  ;;  %vm3445_vm12 = vcmp.eq.s32.totalorder %v12102_v54, %v10280_v63 }
 0x38f   : > { %4562 = vadd.xlane.f32.xlu2 %v4561_v42  ;;  %v3755_v48 = vadd.f32 %v3754_v6, %v3594_v16  ;;  %12223 = vst [vmem:[#allocation68_spill] sm:$0xff] %v10586_v50  ;;  %v3782_v42 = vadd.f32 %v3781_v43, %v3620_v49  ;;  %v12224_v16 = vld [vmem:[#allocation72_spill] sm:$0xff]  ;;  %v3621_v19 = vsel %vm3461_vm13, %v10596_v56, 0.0  ;;  %v12226_v46 = vld [vmem:[#allocation73_spill] sm:$0xff]  ;;  %v10620_v50 = vld [vmem:[%s7771_s11 + $0x3e0] sm:$0xff]  ;;  %vm3446_vm13 = vcmp.eq.s32.totalorder %v12107_v62, %v10280_v63 }
 0x390   : > { %12225 = vst [vmem:[#allocation69_spill] sm:$0xff] %v10596_v56  ;;  %v10607_v49 = vld [vmem:[%s7771_s11 + $0x310] sm:$0xff]  ;;  %v3622_v6 = vsel %vm3462_vm15, %v10620_v50, 0.0  ;;  %v10629_v56 = vld [vmem:[%s7771_s11 + $0x318] sm:$0xff]  ;;  %vm3466_vm15 = vcmp.eq.s32.totalorder %v12193_v20, %v10513_v0  ;;  %v10730_v20 = vld [vmem:[%s7771_s11 + $0x340] sm:$0xff] }
 0x391   : > { %v3756_v60 = vadd.f32 %v3755_v48, %v3595_v59  ;;  %v3596_v43 = vsel %vm3436_vm14, %v10607_v49, 0.0  ;;  %v3783_v48 = vadd.f32 %v3782_v42, %v3621_v19  ;;  %12228 = vst [vmem:[#allocation70_spill] sm:$0xff] %v10620_v50  ;;  %v3597_v19 = vsel %vm3437_vm0, %v10629_v56, 0.0  ;;  %v10651_v50 = vld [vmem:[%s7771_s11 + $0x320] sm:$0xff] }
 0x392   : > { %12230 = vst [vmem:[#allocation72_spill] sm:$0xff] %v10651_v50  ;;  %vm3447_vm14 = vcmp.eq.s32.totalorder %v12111_v14, %v10280_v63  ;;  %vm3448_vm0 = vcmp.eq.s32.totalorder %v12115_v31, %v10280_v63 }
 0x393   : > { %v3757_v59 = vadd.f32 %v3756_v60, %v3596_v43  ;;  %v3784_v42 = vadd.f32 %v3783_v48, %v3622_v6  ;;  %v10642_v60 = vld [vmem:[%s7771_s11 + $0x3e8] sm:$0xff]  ;;  %v3598_v6 = vsel %vm3438_vm2, %v10651_v50, 0.0  ;;  %vm3449_vm2 = vcmp.eq.s32.totalorder %v12120_v9, %v10280_v63  ;;  %12237 = vst [vmem:[#allocation79_spill] sm:$0xff] %v10730_v20  ;;  %v10831_v50 = vld [vmem:[%s7771_s11 + $0x380] sm:$0xff] }
 0x394   : > { %12229 = vst [vmem:[#allocation71_spill] sm:$0xff] %v10642_v60  ;;  %v3623_v43 = vsel %vm3463_vm3, %v10642_v60, 0.0  ;;  %v10673_v60 = vld [vmem:[%s7771_s11 + $0x328] sm:$0xff]  ;;  %vm3450_vm3 = vcmp.eq.s32.totalorder %v12125_v22, %v10280_v63 }
 0x395   : > { %v3758_v10 = vadd.f32 %v3757_v59, %v3597_v19  ;;  %v3785_v48 = vadd.f32 %v3784_v42, %v3623_v43  ;;  %v10664_v59 = vld [vmem:[%s7771_s11 + $0x3f0] sm:$0xff]  ;;  %12232 = vst [vmem:[#allocation24_spill] sm:$0xff] %v10673_v60  ;;  %v3599_v42 = vsel %vm3439_vm4, %v10673_v60, 0.0  ;;  %v10686_v43 = vld [vmem:[%s7771_s11 + $0x3f8] sm:$0xff]  ;;  %vm3467_vm4 = vcmp.eq.s32.totalorder %v12196_v36, %v10513_v0 }
 0x396   : > { %12231 = vst [vmem:[#allocation73_spill] sm:$0xff] %v10664_v59  ;;  %v3624_v19 = vsel %vm3464_vm7, %v10664_v59, 0.0  ;;  %v10695_v59 = vld [vmem:[%s7771_s11 + $0x330] sm:$0xff]  ;;  %vm3451_vm7 = vcmp.eq.s32.totalorder %v12128_v57, %v10280_v63  ;;  %v10805_v60 = vld [vmem:[%s7771_s11 + $0x418] sm:$0xff] }
 0x397   : > { %v3759_v26 = vadd.f32 %v3758_v10, %v3598_v6  ;;  %v3786_v10 = vadd.f32 %v3785_v48, %v3624_v19  ;;  %12233 = vst [vmem:[#allocation75_spill] sm:$0xff] %v10686_v43  ;;  %v3625_v6 = vsel %vm3465_vm11, %v10686_v43, 0.0  ;;  %v3600_v48 = vsel %vm3440_vm5, %v10695_v59, 0.0  ;;  %v10708_v19 = vld [vmem:[%s7771_s11 + $0x400] sm:$0xff]  ;;  %v10737_v43 = vld [vmem:[%s7771_s11 + $0x408] sm:$0xff]  ;;  %v10758_v36 = vld [vmem:[%s7771_s11 + $0x350] sm:$0xff] }
 0x398   : > { %12234 = vst [vmem:[#allocation76_spill] sm:$0xff] %v10695_v59  ;;  %vm3453_vm5 = vcmp.eq.s32.totalorder %v12134_v39, %v10280_v63  ;;  %vm3454_vm11 = vcmp.eq.s32.totalorder %v12137_v15, %v10280_v63  ;;  %v10765_v59 = vld [vmem:[%s7771_s11 + $0x410] sm:$0xff] }
 0x399   : > { %v3760_v53 = vadd.f32 %v3759_v26, %v3599_v42  ;;  %v3787_v26 = vadd.f32 %v3786_v10, %v3625_v6  ;;  %12235 = vst [vmem:[#allocation77_spill] sm:$0xff] %v10708_v19  ;;  %v3626_v42 = vsel %vm3466_vm15, %v10708_v19, 0.0  ;;  %v10717_v10 = vld [vmem:[%s7771_s11 + $0x338] sm:$0xff]  ;;  %vm3455_vm15 = vcmp.eq.s32.totalorder %v12140_v52, %v10280_v63 }
 0x39a   : > { %12236 = vst [vmem:[#allocation78_spill] sm:$0xff] %v10717_v10  ;;  %v3601_v6 = vsel %vm3441_vm6, %v10717_v10, 0.0  ;;  %vm3469_vm6 = vcmp.eq.s32.totalorder %v12202_v17, %v10513_v0 }
 0x39b   : > { %v3761_v44 = vadd.f32 %v3760_v53, %v3600_v48  ;;  %v3788_v53 = vadd.f32 %v3787_v26, %v3626_v42  ;;  %v3602_v48 = vsel %vm3442_vm8, %v10730_v20, 0.0  ;;  %12238 = vst [vmem:[#allocation80_spill] sm:$0xff] %v10737_v43  ;;  %v3627_v26 = vsel %vm3467_vm4, %v10737_v43, 0.0  ;;  %v10744_v42 = vld [vmem:[%s7771_s11 + $0x348] sm:$0xff] }
 0x39c   : > { %12239 = vst [vmem:[#allocation81_spill] sm:$0xff] %v10744_v42  ;;  %v3603_v10 = vsel %vm3443_vm9, %v10744_v42, 0.0  ;;  %vm3456_vm8 = vcmp.eq.s32.totalorder %v12143_v23, %v10280_v63  ;;  %v3604_v43 = vsel %vm3444_vm10, %v10758_v36, 0.0  ;;  %vm3471_vm9 = vcmp.eq.s32.totalorder %v12206_v7, %v10513_v0 }
 0x39d   : > { %v3762_v19 = vadd.f32 %v3761_v44, %v3601_v6  ;;  %v3789_v44 = vadd.f32 %v3788_v53, %v3627_v26  ;;  %v12240_v6 = vsub.f32 %v12212_v61, %v12211_v4  ;;  %12241 = vst [vmem:[#allocation82_spill] sm:$0xff] %v10758_v36  ;;  %v3628_v61 = vsel %vm3468_vm1, %v10765_v59, 0.0 }
 0x39e   : > { %12242 = vst [vmem:[#allocation83_spill] sm:$0xff] %v10765_v59  ;;  %v12243_v53 = vsub.f32 %v12216_v11, %v12211_v4  ;;  %vm3470_vm1 = vcmp.eq.s32.totalorder %v12204_v34, %v10513_v0  ;;  %v10798_v59 = vld [vmem:[%s7771_s11 + $0x370] sm:$0xff]  ;;  %vm3472_vm10 = vcmp.eq.s32.totalorder %v9554_v28, %v10513_v0  ;;  %v12256_v28 = vsub.f32 %v12218_v58, %v12211_v4 }
 0x39f   : > { %v4283_v20 = vmul.f32 1.442695, %v12240_v6  ;;  %v3763_v42 = vadd.f32 %v3762_v19, %v3602_v48  ;;  %v10775_v6 = vld [vmem:[%s7771_s11 + $0x358] sm:$0xff]  ;;  %v10782_v19 = vld [vmem:[%s7771_s11 + $0x360] sm:$0xff]  ;;  %v3790_v11 = vadd.f32 %v3789_v44, %v3628_v61  ;;  %v10791_v48 = vld [vmem:[%s7771_s11 + $0x368] sm:$0xff]  ;;  %12247 = vst [vmem:[#allocation87_spill] sm:$0xff] %v10798_v59  ;;  %vm3478_vm4 = vcmp.eq.s32.totalorder %v9574_v32, %v10513_v0 }
 0x3a0   : > { %v4285_v26 = vmul.f32 1.442695, %v12243_v53  ;;  %12244 = vst [vmem:[#allocation84_spill] sm:$0xff] %v10775_v6  ;;  %v3605_v36 = vsel %vm3445_vm12, %v10775_v6, 0.0  ;;  %v3606_v33 = vsel %vm3446_vm13, %v10782_v19, 0.0  ;;  %v3607_v53 = vsel %vm3447_vm14, %v10791_v48, 0.0 }
 0x3a1   : > { %12245 = vst [vmem:[#allocation85_spill] sm:$0xff] %v10782_v19  ;;  %v3608_v19 = vsel %vm3448_vm0, %v10798_v59, 0.0  ;;  %v3764_v6 = vadd.f32 %v3763_v42, %v3603_v10  ;;  %v3629_v44 = vsel %vm3469_vm6, %v10805_v60, 0.0  ;;  %v10812_v61 = vld [vmem:[%s7771_s11 + $0x378] sm:$0xff]  ;;  %7031 = vpow2.f32 %v4283_v20  ;;  %v10821_v42 = vld [vmem:[%s7771_s11 + $0x420] sm:$0xff]  ;;  %v10838_v20 = vld [vmem:[%s7771_s11 + $0x388] sm:$0xff] }
 0x3a2   : > { %12246 = vst [vmem:[#allocation86_spill] sm:$0xff] %v10791_v48  ;;  %v3609_v48 = vsel %vm3449_vm2, %v10812_v61, 0.0  ;;  %v3791_v59 = vadd.f32 %v3790_v11, %v3629_v44  ;;  %v3630_v17 = vsel %vm3470_vm1, %v10821_v42, 0.0  ;;  %7033 = vpow2.f32 %v4285_v26  ;;  %v10858_v11 = vld [vmem:[%s7771_s11 + $0x428] sm:$0xff] }
 0x3a3   : > { %12248 = vst [vmem:[#allocation88_spill] sm:$0xff] %v10805_v60  ;;  %v3765_v10 = vadd.f32 %v3764_v6, %v3604_v43  ;;  %v12250_v60 = vsub.f32 %v12217_v41, %v12211_v4  ;;  %v3610_v43 = vsel %vm3450_vm3, %v10831_v50, 0.0  ;;  %v10844_v34 = vsel %vm3451_vm7, %v10838_v20, 0.0 }
 0x3a4   : > { %12249 = vst [vmem:[#allocation89_spill] sm:$0xff] %v10812_v61  ;;  %v3792_v41 = vadd.f32 %v3791_v59, %v3630_v17  ;;  %vm12254_vm12 = vcmp.eq.s32.totalorder %v12131_v27, %v10280_v63  ;;  %v3631_v44 = vsel %vm3471_vm9, %v10858_v11, 0.0  ;;  %v4289_v59 = vmul.f32 1.442695, %v12256_v28  ;;  %v10868_v17 = vld [vmem:[%s7771_s11 + $0x398] sm:$0xff] }
 0x3a5   : > { %v4287_v61 = vmul.f32 1.442695, %v12250_v60  ;;  %12251 = vst [vmem:[#allocation90_spill] sm:$0xff] %v10831_v50  ;;  %v10849_v60 = vld [vmem:[%s7771_s11 + $0x390] sm:$0xff]  ;;  %v3766_v6 = vadd.f32 %v3765_v10, %v3605_v36  ;;  %vm3473_vm13 = vcmp.eq.s32.totalorder %v12209_v40, %v10513_v0  ;;  %vm3474_vm14 = vcmp.eq.s32.totalorder %v9560_v25, %v10513_v0  ;;  %v10888_v50 = vld [vmem:[%s7771_s11 + $0x3a0] sm:$0xff] }
 0x3a6   : > { %12252 = vst [vmem:[#allocation91_spill] sm:$0xff] %v10838_v20  ;;  %v10855_v26 = vsel %vm12254_vm12, %v10849_v60, 0.0  ;;  %v3793_v7 = vadd.f32 %v3792_v41, %v3631_v44  ;;  %v10881_v10 = vld [vmem:[%s7771_s11 + $0x430] sm:$0xff]  ;;  %v12259_v28 = vsub.f32 %v12220_v1, %v12211_v4  ;;  %v10894_v41 = vsel %vm3454_vm11, %v10888_v50, 0.0 }
 0x3a7   : > { %12253 = vst [vmem:[#allocation92_spill] sm:$0xff] %v10849_v60  ;;  %v10874_v60 = vsel %vm3453_vm5, %v10868_v17, 0.0  ;;  %v3767_v36 = vadd.f32 %v3766_v6, %v3606_v33  ;;  %v3632_v58 = vsel %vm3472_vm10, %v10881_v10, 0.0  ;;  %7035 = vpow2.f32 %v4287_v61  ;;  %v7032_v20 = vpop.eup %7031  ;;  %v7449_v33 = vld [vmem:[%s7771_s11 + $0x3a8] sm:$0xff] }
 0x3a8   : > { %12255 = vst [vmem:[#allocation93_spill] sm:$0xff] %v10858_v11  ;;  %v10900_v6 = vsel %vm3455_vm15, %v7449_v33, 0.0  ;;  %vm3475_vm0 = vcmp.eq.s32.totalorder %v9563_v55, %v10513_v0  ;;  %v3794_v1 = vadd.f32 %v3793_v7, %v3632_v58  ;;  %v7034_v61 = vpop.eup %7033  ;;  %7037 = vpow2.f32 %v4289_v59  ;;  %v7451_v11 = vld [vmem:[%s7771_s11 + $0x3b0] sm:$0xff] }
 0x3a9   : > { %12257 = vst [vmem:[#allocation94_spill] sm:$0xff] %v10868_v17  ;;  %v4291_v17 = vmul.f32 1.442695, %v12259_v28  ;;  %v3768_v44 = vadd.f32 %v3767_v36, %v3607_v53  ;;  %v10905_v28 = vld [vmem:[%s7771_s11 + $0x438] sm:$0xff]  ;;  %v10918_v7 = vsel %vm3456_vm8, %v7451_v11, 0.0  ;;  %vm3476_vm2 = vcmp.eq.s32.totalorder %v9566_v30, %v10513_v0  ;;  %v10923_v53 = vld [vmem:[%s7771_s11 + $0x440] sm:$0xff] }
 0x3aa   : > { %12258 = vst [vmem:[#allocation95_spill] sm:$0xff] %v10881_v10  ;;  %v12262_v10 = vsub.f32 %v12222_v18, %v12211_v4  ;;  %v3634_v40 = vsel %vm3474_vm14, %v10923_v53, 0.0  ;;  %v12264_v36 = vld [vmem:[#allocation74_spill] sm:$0xff]  ;;  %v12265_v11 = vsub.f32 %v12224_v16, %v12211_v4  ;;  %vm3477_vm3 = vcmp.eq.s32.totalorder %v9571_v2, %v10513_v0 }
 0x3ab   : > { %12260 = vst [vmem:[#allocation96_spill] sm:$0xff] %v10888_v50  ;;  %v3633_v50 = vsel %vm3473_vm13, %v10905_v28, 0.0  ;;  %v3769_v18 = vadd.f32 %v3768_v44, %v3608_v19  ;;  %7039 = vpow2.f32 %v4291_v17  ;;  %v4564_v19 = vadd.f32 %v7034_v61, %v7032_v20  ;;  %v12266_v17 = vld [vmem:[#allocation29_spill] sm:$0xff] }
 0x3ac   : > { %12261 = vst [vmem:[#allocation97_spill] sm:$0xff] %v10905_v28  ;;  %v4293_v33 = vmul.f32 1.442695, %v12262_v10  ;;  %v3795_v59 = vadd.f32 %v3794_v1, %v3633_v50  ;;  %v4091_v10 = vsub.f32 %v12264_v36, %v12211_v4  ;;  %v4295_v58 = vmul.f32 1.442695, %v12265_v11  ;;  %v10937_v28 = vld [vmem:[%s7771_s11 + $0x448] sm:$0xff] }
 0x3ad   : > { %12263 = vst [vmem:[#allocation98_spill] sm:$0xff] %v10923_v53  ;;  %v3635_v25 = vsel %vm3475_vm0, %v10937_v28, 0.0  ;;  %v7036_v1 = vpop.eup %7035  ;;  %v3770_v44 = vadd.f32 %v3769_v18, %v3609_v48  ;;  %v4092_v36 = vsub.f32 %v12266_v17, %v12211_v4  ;;  %v12267_v16 = vsub.f32 %v12226_v46, %v12211_v4  ;;  %v10951_v53 = vld [vmem:[%s7771_s11 + $0x450] sm:$0xff]  ;;  %v12268_v46 = vld [vmem:[#allocation58_spill] sm:$0xff] }
 0x3ae   : > { %v3796_v50 = vadd.f32 %v3795_v59, %v3634_v40  ;;  %7041 = vpow2.f32 %v4293_v33  ;;  %v3636_v55 = vsel %vm3476_vm2, %v10951_v53, 0.0  ;;  %v4565_v20 = vadd.f32 %v7036_v1, %v4564_v19  ;;  %v7038_v61 = vpop.eup %7037  ;;  %v10964_v18 = vld [vmem:[%s7771_s11 + $0x458] sm:$0xff] }
 0x3af   : > { %v4297_v11 = vmul.f32 1.442695, %v12267_v16  ;;  %vm3457_vm7 = vcmp.eq.s32.totalorder %v12146_v12, %v10280_v63  ;;  %v3771_v33 = vadd.f32 %v3770_v44, %v3610_v43  ;;  %v4093_v40 = vsub.f32 %v12268_v46, %v12211_v4  ;;  %v12269_v1 = vld [vmem:[#allocation45_spill] sm:$0xff]  ;;  %v10976_v44 = vld [vmem:[%s7771_s11 + $0x460] sm:$0xff]  ;;  %v11041_v63 = vld [vmem:[%s7771_s11 + $0x488] sm:$0xff] }
 0x3b0   : > { %v3797_v48 = vadd.f32 %v3796_v50, %v3635_v25  ;;  %7043 = vpow2.f32 %v4295_v58  ;;  %v4299_v59 = vmul.f32 1.442695, %v4091_v10  ;;  %vm3479_vm11 = vcmp.eq.s32.totalorder %v9577_v13, %v10513_v0 }
 0x3b1   : > { %v3637_v30 = vsel %vm3477_vm3, %v10964_v18, 0.0  ;;  %v4566_v50 = vadd.f32 %v7038_v61, %v4565_v20  ;;  %v7040_v19 = vpop.eup %7039  ;;  %v3772_v43 = vadd.f32 %v3771_v33, %v10844_v34  ;;  %v4094_v58 = vsub.f32 %v12269_v1, %v12211_v4  ;;  %v10988_v20 = vld [vmem:[%s7771_s11 + $0x468] sm:$0xff] }
 0x3b2   : > { %v3798_v25 = vadd.f32 %v3797_v48, %v3636_v55  ;;  %7045 = vpow2.f32 %v4297_v11  ;;  %v4301_v10 = vmul.f32 1.442695, %v4092_v36  ;;  %vm3480_vm5 = vcmp.eq.s32.totalorder %v12227_v51, %v10513_v0  ;;  %v12270_v48 = vld [vmem:[#allocation27_spill] sm:$0xff] }
 0x3b3   : > { %v3638_v2 = vsel %vm3478_vm4, %v10976_v44, 0.0  ;;  %v4567_v16 = vadd.f32 %v7040_v19, %v4566_v50  ;;  %v3773_v34 = vadd.f32 %v3772_v43, %v10855_v26  ;;  %v4095_v11 = vsub.f32 %v12270_v48, %v12211_v4  ;;  %v12272_v1 = vld [vmem:[#allocation63_spill] sm:$0xff] }
 0x3b4   : > { %v3799_v17 = vadd.f32 %v3798_v25, %v3637_v30  ;;  %v7042_v55 = vpop.eup %7041  ;;  %7047 = vpow2.f32 %v4299_v59  ;;  %v4303_v36 = vmul.f32 1.442695, %v4093_v40  ;;  %vm3481_vm15 = vcmp.eq.s32.totalorder %v9584_v24, %v10513_v0  ;;  %v12271_v30 = vld [vmem:[#allocation34_spill] sm:$0xff]  ;;  %v11000_v25 = vld [vmem:[%s7771_s11 + $0x470] sm:$0xff] }
 0x3b5   : > { %v3639_v32 = vsel %vm3479_vm11, %v10988_v20, 0.0  ;;  %v4568_v33 = vadd.f32 %v7042_v55, %v4567_v16  ;;  %v3774_v26 = vadd.f32 %v3773_v34, %v10874_v60  ;;  %v4096_v59 = vsub.f32 %v12271_v30, %v12211_v4  ;;  %v12273_v34 = vld [vmem:[#allocation59_spill] sm:$0xff] }
 0x3b6   : > { %v3800_v61 = vadd.f32 %v3799_v17, %v3638_v2  ;;  %v7044_v46 = vpop.eup %7043  ;;  %7049 = vpow2.f32 %v4301_v10  ;;  %v4305_v40 = vmul.f32 1.442695, %v4094_v58  ;;  %vm3482_vm6 = vcmp.eq.s32.totalorder %v9589_v35, %v10513_v0  ;;  %v11012_v2 = vld [vmem:[%s7771_s11 + $0x478] sm:$0xff]  ;;  %v11029_v24 = vld [vmem:[%s7771_s11 + $0x480] sm:$0xff] }
 0x3b7   : > { %v3640_v13 = vsel %vm3480_vm5, %v11000_v25, 0.0  ;;  %v4569_v19 = vadd.f32 %v7044_v46, %v4568_v33  ;;  %v3775_v60 = vadd.f32 %v3774_v26, %v10894_v41  ;;  %v4097_v58 = vsub.f32 %v12272_v1, %v12211_v4  ;;  %v12274_v30 = vld [vmem:[#allocation35_spill] sm:$0xff] }
 0x3b8   : > { %v3801_v50 = vadd.f32 %v3800_v61, %v3639_v32  ;;  %v7046_v43 = vpop.eup %7045  ;;  %7051 = vpow2.f32 %v4303_v36  ;;  %v4307_v10 = vmul.f32 1.442695, %v4095_v11  ;;  %vm3483_vm8 = vcmp.eq.s32.totalorder %v9592_v3, %v10513_v0  ;;  %v11022_v36 = vld [vmem:[%s7771_s11 + $0x3b8] sm:$0xff] }
 0x3b9   : > { %v3641_v51 = vsel %vm3481_vm15, %v11012_v2, 0.0  ;;  %v4570_v16 = vadd.f32 %v7046_v43, %v4569_v19  ;;  %v3776_v41 = vadd.f32 %v3775_v60, %v10900_v6  ;;  %v4098_v48 = vsub.f32 %v12273_v34, %v12211_v4  ;;  %v12275_v43 = vld [vmem:[#allocation60_spill] sm:$0xff] }
 0x3ba   : > { %v3802_v17 = vadd.f32 %v3801_v50, %v3640_v13  ;;  %v7048_v55 = vpop.eup %7047  ;;  %7053 = vpow2.f32 %v4305_v40  ;;  %v4309_v11 = vmul.f32 1.442695, %v4096_v59  ;;  %v3617_v32 = vsel %vm3457_vm7, %v11022_v36, 0.0 }
 0x3bb   : > { %v3642_v6 = vsel %vm3482_vm6, %v11029_v24, 0.0  ;;  %v4571_v33 = vadd.f32 %v7048_v55, %v4570_v16  ;;  %v3777_v26 = vadd.f32 %v3776_v41, %v10918_v7  ;;  %v4099_v59 = vsub.f32 %v12274_v30, %v12211_v4  ;;  %v12276_v16 = vld [vmem:[#allocation36_spill] sm:$0xff] }
 0x3bc   : > { %v3803_v61 = vadd.f32 %v3802_v17, %v3641_v51  ;;  %v7050_v46 = vpop.eup %7049  ;;  %7055 = vpow2.f32 %v4307_v10  ;;  %v4311_v40 = vmul.f32 1.442695, %v4097_v58  ;;  %vm3484_vm1 = vcmp.eq.s32.totalorder %v12099_v47, %v10513_v0  ;;  %v11052_v17 = vld [vmem:[%s7771_s11 + $0x490] sm:$0xff] }
 0x3bd   : > { %v3643_v35 = vsel %vm3483_vm8, %v11041_v63, 0.0  ;;  %v4572_v50 = vadd.f32 %v7050_v46, %v4571_v33  ;;  %v3778_v7 = vadd.f32 %v3777_v26, %v3617_v32  ;;  %v4100_v60 = vsub.f32 %v12275_v43, %v12211_v4  ;;  %v11073_v26 = vld [vmem:[%s7771_s11 + $0x4a0] sm:$0xff] }
 0x3be   : > { %v3804_v13 = vadd.f32 %v3803_v61, %v3642_v6  ;;  %v7052_v19 = vpop.eup %7051  ;;  %7057 = vpow2.f32 %v4309_v11  ;;  %v4313_v1 = vmul.f32 1.442695, %v4098_v48  ;;  %vm3485_vm9 = vcmp.eq.s32.totalorder %v12102_v54, %v10513_v0  ;;  %v11063_v11 = vld [vmem:[%s7771_s11 + $0x498] sm:$0xff] }
 0x3bf   : > { %v4573_v10 = vadd.f32 %v7052_v19, %v4572_v50  ;;  %3779 = vadd.xlane.f32.xlu0 %v3778_v7  ;;  %v3644_v3 = vsel %vm3484_vm1, %v11052_v17, 0.0  ;;  %v4101_v55 = vsub.f32 %v12276_v16, %v12211_v4  ;;  %7059 = vpow2.f32 %v4311_v40  ;;  %v12277_v6 = vld [vmem:[#allocation61_spill] sm:$0xff]  ;;  %v11083_v7 = vld [vmem:[%s7771_s11 + $0x4a8] sm:$0xff] }
 0x3c0   : > { %v3805_v58 = vadd.f32 %v3804_v13, %v3643_v35  ;;  %v7054_v51 = vpop.eup %7053  ;;  %v4315_v41 = vmul.f32 1.442695, %v4099_v59  ;;  %vm3486_vm10 = vcmp.eq.s32.totalorder %v12107_v62, %v10513_v0  ;;  %v3645_v32 = vsel %vm3485_vm9, %v11063_v11, 0.0  ;;  %v12278_v59 = vld [vmem:[#allocation41_spill] sm:$0xff] }
 0x3c1   : > { %v4574_v34 = vadd.f32 %v7054_v51, %v4573_v10  ;;  %v4102_v47 = vsub.f32 %v12277_v6, %v12211_v4  ;;  %7061 = vpow2.f32 %v4313_v1  ;;  %v4317_v61 = vmul.f32 1.442695, %v4100_v60  ;;  %v12279_v60 = vld [vmem:[#allocation64_spill] sm:$0xff] }
 0x3c2   : > { %v3806_v54 = vadd.f32 %v3805_v58, %v3644_v3  ;;  %v7056_v48 = vpop.eup %7055  ;;  %vm3487_vm12 = vcmp.eq.s32.totalorder %v12111_v14, %v10513_v0  ;;  %vm3488_vm13 = vcmp.eq.s32.totalorder %v12115_v31, %v10513_v0  ;;  %v3646_v30 = vsel %vm3486_vm10, %v11073_v26, 0.0  ;;  %v11096_v16 = vld [vmem:[%s7771_s11 + $0x4b0] sm:$0xff] }
 0x3c3   : > { %v4575_v33 = vadd.f32 %v7056_v48, %v4574_v34  ;;  %v4103_v40 = vsub.f32 %v12278_v59, %v12211_v4  ;;  %7063 = vpow2.f32 %v4315_v41  ;;  %v4319_v35 = vmul.f32 1.442695, %v4101_v55 }
 0x3c4   : > { %v3807_v62 = vadd.f32 %v3806_v54, %v3645_v32  ;;  %v7058_v46 = vpop.eup %7057  ;;  %vm3489_vm14 = vcmp.eq.s32.totalorder %v12120_v9, %v10513_v0  ;;  %vm3490_vm0 = vcmp.eq.s32.totalorder %v12125_v22, %v10513_v0  ;;  %v3647_v43 = vsel %vm3487_vm12, %v11083_v7, 0.0  ;;  %v11109_v32 = vld [vmem:[%s7771_s11 + $0x4b8] sm:$0xff]  ;;  %v11124_v9 = vld [vmem:[%s7771_s11 + $0x4c0] sm:$0xff] }
 0x3c5   : > { %v4576_v50 = vadd.f32 %v7058_v46, %v4575_v33  ;;  %v7060_v19 = vpop.eup %7059  ;;  %v4104_v1 = vsub.f32 %v12279_v60, %v12211_v4  ;;  %7065 = vpow2.f32 %v4317_v61  ;;  %v4321_v58 = vmul.f32 1.442695, %v4102_v47  ;;  %v11117_v47 = vpop.permute.xlu0 %4035 }
 0x3c6   : > { %v3808_v13 = vadd.f32 %v3807_v62, %v3646_v30  ;;  %vm3491_vm2 = vcmp.eq.s32.totalorder %v12128_v57, %v10513_v0  ;;  %vm3492_vm3 = vcmp.eq.s32.totalorder %v12131_v27, %v10513_v0  ;;  %v3648_v14 = vsel %vm3488_vm13, %v11096_v16, 0.0 }
 0x3c7   : > { %v4577_v51 = vadd.f32 %v7060_v19, %v4576_v50  ;;  %v7062_v3 = vpop.eup %7061  ;;  %v4105_v55 = vsub.f32 %v10158_v38, %v12211_v4  ;;  %7067 = vpow2.f32 %v4319_v35  ;;  %v4323_v41 = vmul.f32 1.442695, %v4103_v40  ;;  %v11137_v50 = vld [vmem:[%s7771_s11 + $0x4c8] sm:$0xff] }
 0x3c8   : > { %v3809_v10 = vadd.f32 %v3808_v13, %v3647_v43  ;;  %vm3493_vm4 = vcmp.eq.s32.totalorder %v12134_v39, %v10513_v0  ;;  %vm3494_vm7 = vcmp.eq.s32.totalorder %v12137_v15, %v10513_v0  ;;  %v3649_v31 = vsel %vm3489_vm14, %v11109_v32, 0.0  ;;  %v11146_v43 = vld [vmem:[%s7771_s11 + $0x4d0] sm:$0xff] }
 0x3c9   : > { %v4578_v34 = vadd.f32 %v7062_v3, %v4577_v51  ;;  %v7064_v48 = vpop.eup %7063  ;;  %v4106_v38 = vsub.f32 %v10174_v21, %v12211_v4  ;;  %7069 = vpow2.f32 %v4321_v58  ;;  %v4325_v6 = vmul.f32 1.442695, %v4104_v1  ;;  %v11164_v3 = vld [vmem:[%s7771_s11 + $0x4e0] sm:$0xff] }
 0x3ca   : > { %v3810_v54 = vadd.f32 %v3809_v10, %v3648_v14  ;;  %vm3495_vm11 = vcmp.eq.s32.totalorder %v12140_v52, %v10513_v0  ;;  %vm3496_vm5 = vcmp.eq.s32.totalorder %v12143_v23, %v10513_v0  ;;  %v3650_v21 = vsel %vm3490_vm0, %v11124_v9, 0.0  ;;  %v11155_v10 = vld [vmem:[%s7771_s11 + $0x4d8] sm:$0xff]  ;;  %v12285_v23 = vld [vmem:[#allocation32_spill] sm:$0xff] }
 0x3cb   : > { %v4579_v62 = vadd.f32 %v7064_v48, %v4578_v34  ;;  %v7066_v33 = vpop.eup %7065  ;;  %v4107_v46 = vsub.f32 %v10190_v8, %v12211_v4  ;;  %7071 = vpow2.f32 %v4323_v41  ;;  %v4327_v30 = vmul.f32 1.442695, %v4105_v55  ;;  %v11171_v34 = vld [vmem:[%s7771_s11 + $0x4e8] sm:$0xff] }
 0x3cc   : > { %v3811_v61 = vadd.f32 %v3810_v54, %v3649_v31  ;;  %vm3497_vm15 = vcmp.eq.s32.totalorder %v12146_v12, %v10513_v0  ;;  %v4108_v40 = vsub.f32 %v10206_v5, %v12211_v4  ;;  %v3651_v22 = vsel %vm3491_vm2, %v11137_v50, 0.0  ;;  %v12289_v12 = vld [vmem:[#allocation48_spill] sm:$0xff] }
 0x3cd   : > { %v4580_v35 = vadd.f32 %v7066_v33, %v4579_v62  ;;  %v7068_v13 = vpop.eup %7067  ;;  %7073 = vpow2.f32 %v4325_v6  ;;  %v4329_v8 = vmul.f32 1.442695, %v4106_v38  ;;  %v4123_v19 = vsub.f32 %v10332_v45, %v11117_v47  ;;  %v12281_v6 = vld [vmem:[#allocation43_spill] sm:$0xff] }
 0x3ce   : > { %v3812_v59 = vadd.f32 %v3811_v61, %v3650_v21  ;;  %v3652_v5 = vsel %vm3492_vm3, %v11146_v43, 0.0  ;;  %v4124_v57 = vsub.f32 %v10339_v37, %v11117_v47  ;;  %v3653_v45 = vsel %vm3493_vm4, %v11155_v10, 0.0  ;;  %v11182_v21 = vld [vmem:[%s7771_s11 + $0x4f0] sm:$0xff] }
 0x3cf   : > { %v4581_v1 = vadd.f32 %v7068_v13, %v4580_v35  ;;  %v7070_v58 = vpop.eup %7069  ;;  %v4109_v51 = vsub.f32 %v10222_v29, %v12211_v4  ;;  %7075 = vpow2.f32 %v4327_v30  ;;  %v4331_v27 = vmul.f32 1.442695, %v4107_v46  ;;  %v12280_v29 = vld [vmem:[#allocation62_spill] sm:$0xff]  ;;  %v12283_v13 = vld [vmem:[#allocation49_spill] sm:$0xff] }
 0x3d0   : > { %v3813_v60 = vadd.f32 %v3812_v59, %v3651_v22  ;;  %v3654_v37 = vsel %vm3494_vm7, %v11164_v3, 0.0  ;;  %v4333_v55 = vmul.f32 1.442695, %v4108_v40  ;;  %v3655_v39 = vsel %vm3495_vm11, %v11171_v34, 0.0  ;;  %v12282_v46 = vld [vmem:[#allocation42_spill] sm:$0xff] }
 0x3d1   : > { %v4582_v41 = vadd.f32 %v7070_v58, %v4581_v1  ;;  %v7072_v54 = vpop.eup %7071  ;;  %v4110_v48 = vsub.f32 %v12280_v29, %v12211_v4  ;;  %7077 = vpow2.f32 %v4329_v8  ;;  %v4363_v31 = vmul.f32 1.442695, %v4123_v19  ;;  %v12284_v19 = vld [vmem:[#allocation65_spill] sm:$0xff] }
 0x3d2   : > { %v3814_v14 = vadd.f32 %v3813_v60, %v3652_v5  ;;  %v4125_v61 = vsub.f32 %v12281_v6, %v11117_v47  ;;  %v4365_v62 = vmul.f32 1.442695, %v4124_v57  ;;  %v3656_v52 = vsel %vm3496_vm5, %v11182_v21, 0.0 }
 0x3d3   : > { %v4583_v15 = vadd.f32 %v7072_v54, %v4582_v41  ;;  %v7074_v33 = vpop.eup %7073  ;;  %v4111_v30 = vsub.f32 %v12282_v46, %v12211_v4  ;;  %7079 = vpow2.f32 %v4331_v27  ;;  %v4335_v59 = vmul.f32 1.442695, %v4109_v51  ;;  %v11197_v27 = vld [vmem:[%s7771_s11 + $0x4f8] sm:$0xff] }
 0x3d4   : > { %v3815_v38 = vadd.f32 %v3814_v14, %v3653_v45  ;;  %7081 = vpow2.f32 %v4333_v55  ;;  %v4126_v22 = vsub.f32 %v12283_v13, %v11117_v47  ;;  %v4112_v5 = vsub.f32 %v12284_v19, %v12211_v4  ;;  %v12286_v14 = vld [vmem:[#allocation28_spill] sm:$0xff] }
 0x3d5   : > { %v4584_v35 = vadd.f32 %v7074_v33, %v4583_v15  ;;  %v7076_v8 = vpop.eup %7075  ;;  %v4337_v60 = vmul.f32 1.442695, %v4110_v48  ;;  %v4127_v1 = vsub.f32 %v12285_v23, %v11117_v47  ;;  %7083 = vpow2.f32 %v4363_v31  ;;  %v12288_v15 = vld [vmem:[#allocation25_spill] sm:$0xff]  ;;  %v12292_v23 = vld [vmem:[#allocation40_spill] sm:$0xff] }
 0x3d6   : > { %v3816_v40 = vadd.f32 %v3815_v38, %v3654_v37  ;;  %7085 = vpow2.f32 %v4365_v62  ;;  %v4367_v45 = vmul.f32 1.442695, %v4125_v61  ;;  %v3657_v37 = vsel %vm3497_vm15, %v11197_v27, 0.0 }
 0x3d7   : > { %v4585_v58 = vadd.f32 %v7076_v8, %v4584_v35  ;;  %v7078_v51 = vpop.eup %7077  ;;  %v4113_v55 = vsub.f32 %v12286_v14, %v12211_v4  ;;  %7087 = vpow2.f32 %v4335_v59  ;;  %v4339_v41 = vmul.f32 1.442695, %v4111_v30  ;;  %v12290_v59 = vld [vmem:[#allocation38_spill] sm:$0xff]  ;;  %v12291_v8 = vld [vmem:[#allocation16_spill] sm:$0xff] }
 0x3d8   : > { %v3817_v57 = vadd.f32 %v3816_v40, %v3655_v39  ;;  %v12287_v39 = vld [vmem:[#allocation46_spill] sm:$0xff]  ;;  %v4369_v31 = vmul.f32 1.442695, %v4126_v22  ;;  %v4114_v6 = vsub.f32 %v12288_v15, %v12211_v4  ;;  %7089 = vpow2.f32 %v4337_v60 }
 0x3d9   : > { %v4586_v29 = vadd.f32 %v7078_v51, %v4585_v58  ;;  %v4128_v48 = vsub.f32 %v12287_v39, %v11117_v47  ;;  %v7080_v38 = vpop.eup %7079  ;;  %v4341_v61 = vmul.f32 1.442695, %v4112_v5  ;;  %v4129_v0 = vsub.f32 %v12289_v12, %v11117_v47 }
 0x3da   : > { %v3818_v54 = vadd.f32 %v3817_v57, %v3656_v52  ;;  %v7082_v62 = vpop.eup %7081  ;;  %7091 = vpow2.f32 %v4367_v45  ;;  %v4371_v30 = vmul.f32 1.442695, %v4127_v1  ;;  %v4115_v40 = vsub.f32 %v12290_v59, %v12211_v4  ;;  %v12293_v45 = vld [vmem:[#allocation52_spill] sm:$0xff] }
 0x3db   : > { %v4587_v46 = vadd.f32 %v7080_v38, %v4586_v29  ;;  %v7084_v52 = vpop.eup %7083  ;;  %7093 = vpow2.f32 %v4339_v41  ;;  %v4343_v35 = vmul.f32 1.442695, %v4113_v55  ;;  %v4130_v19 = vsub.f32 %v12291_v8, %v11117_v47  ;;  %v12294_v55 = vld [vmem:[#allocation26_spill] sm:$0xff] }
 0x3dc   : > { %v3819_v33 = vadd.f32 %v3818_v54, %v3657_v37  ;;  %v7086_v13 = vpop.eup %7085  ;;  %7095 = vpow2.f32 %v4369_v31  ;;  %v4373_v5 = vmul.f32 1.442695, %v4128_v48  ;;  %v4116_v57 = vsub.f32 %v12292_v23, %v12211_v4  ;;  %v12295_v31 = vld [vmem:[#allocation30_spill] sm:$0xff] }
 0x3dd   : > { %v4588_v22 = vadd.f32 %v7082_v62, %v4587_v46  ;;  %v7088_v60 = vpop.eup %7087  ;;  %7097 = vpow2.f32 %v4341_v61  ;;  %v4345_v1 = vmul.f32 1.442695, %v4114_v6  ;;  %v4131_v51 = vsub.f32 %v12293_v45, %v11117_v47  ;;  %v12296_v61 = vld [vmem:[#allocation44_spill] sm:$0xff] }
 0x3de   : > { %3820 = vadd.xlane.f32.xlu1 %v3819_v33  ;;  %7099 = vpow2.f32 %v4371_v30  ;;  %v4375_v37 = vmul.f32 1.442695, %v4129_v0  ;;  %v7090_v14 = vpop.eup %7089  ;;  %v4117_v41 = vsub.f32 %v12294_v55, %v12211_v4  ;;  %v4347_v54 = vmul.f32 1.442695, %v4115_v40  ;;  %v12297_v30 = vld [vmem:[#allocation53_spill] sm:$0xff] }
 0x3df   : > { %v4589_v58 = vadd.f32 %v7088_v60, %v4588_v22  ;;  %7101 = vpow2.f32 %v4343_v35  ;;  %v4605_v29 = vadd.f32 %v7086_v13, %v7084_v52  ;;  %v4132_v38 = vsub.f32 %v12295_v31, %v11117_v47  ;;  %v12298_v35 = vld [vmem:[#allocation17_spill] sm:$0xff]  ;;  %v12299_v60 = vld [vmem:[#allocation54_spill] sm:$0xff] }
 0x3e0   : > { %v7092_v39 = vpop.eup %7091  ;;  %7103 = vpow2.f32 %v4373_v5  ;;  %v4377_v15 = vmul.f32 1.442695, %v4130_v19  ;;  %v4118_v12 = vsub.f32 %v12296_v61, %v12211_v4  ;;  %v4349_v0 = vmul.f32 1.442695, %v4116_v57 }
 0x3e1   : > { %v4590_v48 = vadd.f32 %v7090_v14, %v4589_v58  ;;  %v7094_v6 = vpop.eup %7093  ;;  %7105 = vpow2.f32 %v4345_v1  ;;  %v4606_v62 = vadd.f32 %v7092_v39, %v4605_v29  ;;  %v4133_v59 = vsub.f32 %v12297_v30, %v11117_v47  ;;  %v12300_v58 = vld [vmem:[#allocation15_spill] sm:$0xff] }
 0x3e2   : > { %v7096_v33 = vpop.eup %7095  ;;  %7107 = vpow2.f32 %v4375_v37  ;;  %v4379_v52 = vmul.f32 1.442695, %v4131_v51  ;;  %v4119_v13 = vsub.f32 %v12298_v35, %v12211_v4  ;;  %v4351_v22 = vmul.f32 1.442695, %v4117_v41 }
 0x3e3   : > { %v4591_v46 = vadd.f32 %v7094_v6, %v4590_v48  ;;  %v7098_v40 = vpop.eup %7097  ;;  %7109 = vpow2.f32 %v4347_v54  ;;  %v4607_v8 = vadd.f32 %v7096_v33, %v4606_v62  ;;  %v4134_v23 = vsub.f32 %v12299_v60, %v11117_v47  ;;  %v12301_v54 = vld [vmem:[#allocation22_spill] sm:$0xff]  ;;  %v12302_v48 = vld [vmem:[#allocation47_spill] sm:$0xff] }
 0x3e4   : > { %v7100_v19 = vpop.eup %7099  ;;  %7111 = vpow2.f32 %v4377_v15  ;;  %v4381_v57 = vmul.f32 1.442695, %v4132_v38  ;;  %v4120_v45 = vsub.f32 %v12300_v58, %v12211_v4  ;;  %v4353_v51 = vmul.f32 1.442695, %v4118_v12 }
 0x3e5   : > { %v4592_v5 = vadd.f32 %v7098_v40, %v4591_v46  ;;  %v7102_v1 = vpop.eup %7101  ;;  %7113 = vpow2.f32 %v4349_v0  ;;  %v4608_v37 = vadd.f32 %v7100_v19, %v4607_v8  ;;  %v4135_v41 = vsub.f32 %v12301_v54, %v11117_v47  ;;  %v12303_v0 = vld [vmem:[#allocation23_spill] sm:$0xff]  ;;  %v12307_v54 = vld [vmem:[#allocation66_spill] sm:$0xff] }
 0x3e6   : > { %v7104_v14 = vpop.eup %7103  ;;  %7115 = vpow2.f32 %v4379_v52  ;;  %v4383_v29 = vmul.f32 1.442695, %v4133_v59  ;;  %v4121_v31 = vsub.f32 %v12302_v48, %v12211_v4  ;;  %v4355_v38 = vmul.f32 1.442695, %v4119_v13  ;;  %v12304_v46 = vld [vmem:[#allocation51_spill] sm:$0xff]  ;;  %v11247_v48 = vpop.permute.xlu1 %4040 }
 0x3e7   : > { %v4593_v55 = vadd.f32 %v7102_v1, %v4592_v5  ;;  %v7106_v39 = vpop.eup %7105  ;;  %7117 = vpow2.f32 %v4351_v22  ;;  %v4609_v15 = vadd.f32 %v7104_v14, %v4608_v37  ;;  %v4136_v12 = vsub.f32 %v12303_v0, %v11117_v47  ;;  %v12305_v22 = vld [vmem:[#allocation55_spill] sm:$0xff]  ;;  %v12306_v1 = vld [vmem:[#allocation50_spill] sm:$0xff] }
 0x3e8   : > { %v7108_v6 = vpop.eup %7107  ;;  %7119 = vpow2.f32 %v4381_v57  ;;  %v4385_v62 = vmul.f32 1.442695, %v4134_v23  ;;  %v4122_v30 = vsub.f32 %v12304_v46, %v12211_v4  ;;  %v4357_v59 = vmul.f32 1.442695, %v4120_v45 }
 0x3e9   : > { %v4594_v61 = vadd.f32 %v7106_v39, %v4593_v55  ;;  %v7110_v33 = vpop.eup %7109  ;;  %7121 = vpow2.f32 %v4353_v51  ;;  %v4610_v52 = vadd.f32 %v7108_v6, %v4609_v15  ;;  %v4137_v13 = vsub.f32 %v12305_v22, %v11117_v47  ;;  %v12308_v6 = vld [vmem:[#allocation68_spill] sm:$0xff] }
 0x3ea   : > { %v7112_v40 = vpop.eup %7111  ;;  %7123 = vpow2.f32 %v4383_v29  ;;  %v4387_v8 = vmul.f32 1.442695, %v4135_v41  ;;  %v4359_v5 = vmul.f32 1.442695, %v4121_v31  ;;  %v4138_v58 = vsub.f32 %v12306_v1, %v11117_v47 }
 0x3eb   : > { %v4595_v35 = vadd.f32 %v7110_v33, %v4594_v61  ;;  %v7114_v19 = vpop.eup %7113  ;;  %7125 = vpow2.f32 %v4355_v38  ;;  %v4611_v60 = vadd.f32 %v7112_v40, %v4610_v52  ;;  %v4389_v4 = vmul.f32 1.442695, %v4136_v12  ;;  %v12309_v52 = vld [vmem:[#allocation56_spill] sm:$0xff] }
 0x3ec   : > { %v7116_v57 = vpop.eup %7115  ;;  %7127 = vpow2.f32 %v4385_v62  ;;  %v4361_v51 = vmul.f32 1.442695, %v4122_v30  ;;  %v4139_v41 = vsub.f32 %v12307_v54, %v11117_v47  ;;  %v4391_v29 = vmul.f32 1.442695, %v4137_v13  ;;  %v12310_v13 = vld [vmem:[#allocation57_spill] sm:$0xff]  ;;  %v12312_v54 = vld [vmem:[#allocation67_spill] sm:$0xff] }
 0x3ed   : > { %v4596_v23 = vadd.f32 %v7114_v19, %v4595_v35  ;;  %v7118_v45 = vpop.eup %7117  ;;  %7129 = vpow2.f32 %v4357_v59  ;;  %v4612_v37 = vadd.f32 %v7116_v57, %v4611_v60  ;;  %v4140_v61 = vsub.f32 %v12308_v6, %v11117_v47 }
 0x3ee   : > { %v7120_v14 = vpop.eup %7119  ;;  %7131 = vpow2.f32 %v4387_v8  ;;  %v4393_v0 = vmul.f32 1.442695, %v4138_v58  ;;  %v4141_v62 = vsub.f32 %v10607_v49, %v11117_v47  ;;  %v4395_v59 = vmul.f32 1.442695, %v4139_v41 }
 0x3ef   : > { %v4597_v55 = vadd.f32 %v7118_v45, %v4596_v23  ;;  %v7122_v39 = vpop.eup %7121  ;;  %7133 = vpow2.f32 %v4359_v5  ;;  %v4613_v31 = vadd.f32 %v7120_v14, %v4612_v37  ;;  %v4163_v40 = vsub.f32 %v12309_v52, %v11247_v48  ;;  %v12311_v45 = vld [vmem:[#allocation72_spill] sm:$0xff] }
 0x3f0   : > { %v7124_v38 = vpop.eup %7123  ;;  %7135 = vpow2.f32 %v4389_v4  ;;  %v4164_v8 = vsub.f32 %v12310_v13, %v11247_v48  ;;  %v4142_v60 = vsub.f32 %v10629_v56, %v11117_v47  ;;  %v4397_v49 = vmul.f32 1.442695, %v4140_v61  ;;  %v12314_v61 = vld [vmem:[#allocation69_spill] sm:$0xff] }
 0x3f1   : > { %v4598_v15 = vadd.f32 %v7122_v39, %v4597_v55  ;;  %v7126_v12 = vpop.eup %7125  ;;  %7137 = vpow2.f32 %v4361_v51  ;;  %v4614_v33 = vadd.f32 %v7124_v38, %v4613_v31  ;;  %v4399_v23 = vmul.f32 1.442695, %v4141_v62  ;;  %v12313_v31 = vld [vmem:[#allocation24_spill] sm:$0xff] }
 0x3f2   : > { %v7128_v46 = vpop.eup %7127  ;;  %7139 = vpow2.f32 %v4391_v29  ;;  %v4143_v51 = vsub.f32 %v12311_v45, %v11117_v47  ;;  %v4443_v37 = vmul.f32 1.442695, %v4163_v40  ;;  %v4165_v41 = vsub.f32 %v12312_v54, %v11247_v48  ;;  %v12315_v62 = vld [vmem:[#allocation76_spill] sm:$0xff]  ;;  %v12321_v54 = vld [vmem:[#allocation81_spill] sm:$0xff] }
 0x3f3   : > { %v4599_v30 = vadd.f32 %v7126_v12, %v4598_v15  ;;  %v7130_v35 = vpop.eup %7129  ;;  %v4615_v22 = vadd.f32 %v7128_v46, %v4614_v33  ;;  %7141 = vpow2.f32 %v4393_v0  ;;  %v4445_v29 = vmul.f32 1.442695, %v4164_v8 }
 0x3f4   : > { %v7132_v19 = vpop.eup %7131  ;;  %7143 = vpow2.f32 %v4395_v59  ;;  %v4144_v38 = vsub.f32 %v12313_v31, %v11117_v47  ;;  %v4401_v15 = vmul.f32 1.442695, %v4142_v60  ;;  %v4166_v0 = vsub.f32 %v12314_v61, %v11247_v48  ;;  %v12316_v59 = vld [vmem:[#allocation70_spill] sm:$0xff]  ;;  %v12322_v31 = vld [vmem:[#allocation75_spill] sm:$0xff] }
 0x3f5   : > { %v4600_v5 = vadd.f32 %v7130_v35, %v4599_v30  ;;  %v7134_v57 = vpop.eup %7133  ;;  %v4616_v1 = vadd.f32 %v7132_v19, %v4615_v22  ;;  %7145 = vpow2.f32 %v4397_v49  ;;  %v4145_v33 = vsub.f32 %v12315_v62, %v11117_v47  ;;  %v12317_v22 = vld [vmem:[#allocation78_spill] sm:$0xff] }
 0x3f6   : > { %v7136_v58 = vpop.eup %7135  ;;  %7147 = vpow2.f32 %v4399_v23  ;;  %v4403_v46 = vmul.f32 1.442695, %v4143_v51  ;;  %v4167_v52 = vsub.f32 %v12316_v59, %v11247_v48  ;;  %v4447_v40 = vmul.f32 1.442695, %v4165_v41  ;;  %v12319_v23 = vld [vmem:[#allocation79_spill] sm:$0xff]  ;;  %v12320_v51 = vld [vmem:[#allocation73_spill] sm:$0xff] }
 0x3f7   : > { %v4601_v4 = vadd.f32 %v7134_v57, %v4600_v5  ;;  %v7138_v14 = vpop.eup %7137  ;;  %v4617_v55 = vadd.f32 %v7136_v58, %v4616_v1  ;;  %7149 = vpow2.f32 %v4443_v37  ;;  %v4146_v13 = vsub.f32 %v12317_v22, %v11117_v47  ;;  %v12318_v5 = vld [vmem:[#allocation71_spill] sm:$0xff]  ;;  %v12323_v61 = vld [vmem:[#allocation82_spill] sm:$0xff] }
 0x3f8   : > { %v7140_v39 = vpop.eup %7139  ;;  %7151 = vpow2.f32 %v4445_v29  ;;  %v4405_v8 = vmul.f32 1.442695, %v4144_v38  ;;  %v4168_v60 = vsub.f32 %v12318_v5, %v11247_v48  ;;  %v4449_v49 = vmul.f32 1.442695, %v4166_v0 }
 0x3f9   : > { %v4602_v56 = vadd.f32 %v7138_v14, %v4601_v4  ;;  %v4618_v6 = vadd.f32 %v7140_v39, %v4617_v55  ;;  %v7142_v12 = vpop.eup %7141  ;;  %7153 = vpow2.f32 %v4401_v15  ;;  %v4147_v1 = vsub.f32 %v12319_v23, %v11117_v47 }
 0x3fa   : > { %v7144_v35 = vpop.eup %7143  ;;  %7155 = vpow2.f32 %v4403_v46  ;;  %v4407_v58 = vmul.f32 1.442695, %v4145_v33  ;;  %v4169_v37 = vsub.f32 %v12320_v51, %v11247_v48  ;;  %v4451_v14 = vmul.f32 1.442695, %v4167_v52  ;;  %v12324_v33 = vld [vmem:[#allocation77_spill] sm:$0xff]  ;;  %v12325_v52 = vld [vmem:[#allocation84_spill] sm:$0xff] }
 0x3fb   : > { %4603 = vadd.xlane.f32.xlu1 %v4602_v56  ;;  %v4619_v30 = vadd.f32 %v7142_v12, %v4618_v6  ;;  %v7146_v57 = vpop.eup %7145  ;;  %7157 = vpow2.f32 %v4447_v40  ;;  %v4148_v41 = vsub.f32 %v12321_v54, %v11117_v47  ;;  %v4409_v29 = vmul.f32 1.442695, %v4146_v13  ;;  %v12328_v51 = vld [vmem:[#allocation83_spill] sm:$0xff]  ;;  %v12329_v54 = vld [vmem:[#allocation86_spill] sm:$0xff] }
 0x3fc   : > { %v7148_v4 = vpop.eup %7147  ;;  %7159 = vpow2.f32 %v4405_v8  ;;  %v4170_v38 = vsub.f32 %v12322_v31, %v11247_v48  ;;  %v4453_v15 = vmul.f32 1.442695, %v4168_v60  ;;  %v4149_v0 = vsub.f32 %v12323_v61, %v11117_v47 }
 0x3fd   : > { %v4620_v19 = vadd.f32 %v7144_v35, %v4619_v30  ;;  %v7150_v55 = vpop.eup %7149  ;;  %7161 = vpow2.f32 %v4449_v49  ;;  %v4411_v12 = vmul.f32 1.442695, %v4147_v1  ;;  %v4171_v46 = vsub.f32 %v12324_v33, %v11247_v48 }
 0x3fe   : > { %v7152_v39 = vpop.eup %7151  ;;  %7163 = vpow2.f32 %v4407_v58  ;;  %v4455_v30 = vmul.f32 1.442695, %v4169_v37  ;;  %v4150_v40 = vsub.f32 %v12325_v52, %v11117_v47  ;;  %v4413_v35 = vmul.f32 1.442695, %v4148_v41 }
 0x3ff   : > { %v4621_v45 = vadd.f32 %v7146_v57, %v4620_v19  ;;  %v7154_v6 = vpop.eup %7153  ;;  %7165 = vpow2.f32 %v4451_v14  ;;  %v4646_v22 = vadd.f32 %v7152_v39, %v7150_v55  ;;  %v12326_v19 = vld [vmem:[#allocation80_spill] sm:$0xff]  ;;  %v4457_v60 = vmul.f32 1.442695, %v4170_v38  ;;  %v12327_v57 = vld [vmem:[#allocation85_spill] sm:$0xff] }
 0x400   : > { %v7156_v59 = vpop.eup %7155  ;;  %7167 = vpow2.f32 %v4409_v29  ;;  %v4172_v5 = vsub.f32 %v12326_v19, %v11247_v48  ;;  %v4151_v23 = vsub.f32 %v12327_v57, %v11117_v47  ;;  %v4415_v1 = vmul.f32 1.442695, %v4149_v0  ;;  %v12330_v38 = vld [vmem:[#allocation88_spill] sm:$0xff]  ;;  %v12331_v0 = vld [vmem:[#allocation87_spill] sm:$0xff] }
 0x401   : > { %v4622_v56 = vadd.f32 %v7148_v4, %v4621_v45  ;;  %v7158_v13 = vpop.eup %7157  ;;  %7169 = vpow2.f32 %v4453_v15  ;;  %v4173_v37 = vsub.f32 %v12328_v51, %v11247_v48  ;;  %v4459_v14 = vmul.f32 1.442695, %v4171_v46 }
 0x402   : > { %v7160_v49 = vpop.eup %7159  ;;  %7171 = vpow2.f32 %v4411_v12  ;;  %v4647_v58 = vadd.f32 %v7158_v13, %v4646_v22  ;;  %v4152_v41 = vsub.f32 %v12329_v54, %v11117_v47  ;;  %v4417_v29 = vmul.f32 1.442695, %v4150_v40 }
 0x403   : > { %v4623_v62 = vadd.f32 %v7154_v6, %v4622_v56  ;;  %v7162_v4 = vpop.eup %7161  ;;  %7173 = vpow2.f32 %v4455_v30  ;;  %v4174_v15 = vsub.f32 %v12330_v38, %v11247_v48  ;;  %v4461_v6 = vmul.f32 1.442695, %v4172_v5 }
 0x404   : > { %v7164_v55 = vpop.eup %7163  ;;  %7175 = vpow2.f32 %v4413_v35  ;;  %v4648_v39 = vadd.f32 %v7162_v4, %v4647_v58  ;;  %v4153_v12 = vsub.f32 %v12331_v0, %v11117_v47  ;;  %v4463_v52 = vmul.f32 1.442695, %v4173_v37  ;;  %v12332_v35 = vld [vmem:[#allocation89_spill] sm:$0xff]  ;;  %v12335_v37 = vld [vmem:[#allocation95_spill] sm:$0xff] }
 0x405   : > { %v4624_v8 = vadd.f32 %v7156_v59, %v4623_v62  ;;  %v7166_v56 = vpop.eup %7165  ;;  %7177 = vpow2.f32 %v4457_v60  ;;  %v4419_v62 = vmul.f32 1.442695, %v4151_v23  ;;  %v4175_v59 = vsub.f32 %v10821_v42, %v11247_v48  ;;  %v12333_v60 = vld [vmem:[#allocation93_spill] sm:$0xff] }
 0x406   : > { %v7168_v61 = vpop.eup %7167  ;;  %7179 = vpow2.f32 %v4415_v1  ;;  %v4649_v33 = vadd.f32 %v7166_v56, %v4648_v39  ;;  %v4154_v22 = vsub.f32 %v12332_v35, %v11117_v47  ;;  %v4421_v13 = vmul.f32 1.442695, %v4152_v41  ;;  %v12334_v1 = vld [vmem:[#allocation90_spill] sm:$0xff]  ;;  %v12336_v41 = vld [vmem:[#allocation91_spill] sm:$0xff] }
 0x407   : > { %v4625_v45 = vadd.f32 %v7160_v49, %v4624_v8  ;;  %v7170_v46 = vpop.eup %7169  ;;  %7181 = vpow2.f32 %v4459_v14  ;;  %v4176_v49 = vsub.f32 %v12333_v60, %v11247_v48  ;;  %v4465_v57 = vmul.f32 1.442695, %v4174_v15  ;;  %v12337_v15 = vld [vmem:[#allocation97_spill] sm:$0xff] }
 0x408   : > { %v7172_v40 = vpop.eup %7171  ;;  %7183 = vpow2.f32 %v4417_v29  ;;  %v4650_v8 = vadd.f32 %v7170_v46, %v4649_v33  ;;  %v4155_v42 = vsub.f32 %v12334_v1, %v11117_v47  ;;  %v4423_v58 = vmul.f32 1.442695, %v4153_v12  ;;  %v12338_v12 = vld [vmem:[#allocation92_spill] sm:$0xff] }
 0x409   : > { %v4626_v31 = vadd.f32 %v7164_v55, %v4625_v45  ;;  %v7174_v19 = vpop.eup %7173  ;;  %7185 = vpow2.f32 %v4461_v6  ;;  %v4177_v14 = vsub.f32 %v12335_v37, %v11247_v48  ;;  %v4467_v55 = vmul.f32 1.442695, %v4175_v59 }
 0x40a   : > { %v7176_v23 = vpop.eup %7175  ;;  %7187 = vpow2.f32 %v4419_v62  ;;  %v4651_v4 = vadd.f32 %v7174_v19, %v4650_v8  ;;  %v4156_v29 = vsub.f32 %v12336_v41, %v11117_v47  ;;  %v4425_v39 = vmul.f32 1.442695, %v4154_v22  ;;  %v7477_v41 = vld [vmem:[%s7771_s11 + $0x3a8] sm:$0xff] }
 0x40b   : > { %v4627_v30 = vadd.f32 %v7168_v61, %v4626_v31  ;;  %v7178_v45 = vpop.eup %7177  ;;  %7189 = vpow2.f32 %v4463_v52  ;;  %v4178_v6 = vsub.f32 %v12337_v15, %v11247_v48  ;;  %v4469_v61 = vmul.f32 1.442695, %v4176_v49  ;;  %v12339_v52 = vld [vmem:[#allocation98_spill] sm:$0xff] }
 0x40c   : > { %v7180_v54 = vpop.eup %7179  ;;  %7191 = vpow2.f32 %v4421_v13  ;;  %v4652_v56 = vadd.f32 %v7178_v45, %v4651_v4  ;;  %v4157_v62 = vsub.f32 %v12338_v12, %v11117_v47  ;;  %v4427_v33 = vmul.f32 1.442695, %v4155_v42  ;;  %v12340_v13 = vld [vmem:[#allocation94_spill] sm:$0xff]  ;;  %v12341_v42 = vld [vmem:[#allocation96_spill] sm:$0xff] }
 0x40d   : > { %v4628_v5 = vadd.f32 %v7172_v40, %v4627_v30  ;;  %v7182_v31 = vpop.eup %7181  ;;  %7193 = vpow2.f32 %v4465_v57  ;;  %v4179_v40 = vsub.f32 %v12339_v52, %v11247_v48  ;;  %v4471_v35 = vmul.f32 1.442695, %v4177_v14 }
 0x40e   : > { %v7184_v0 = vpop.eup %7183  ;;  %7195 = vpow2.f32 %v4423_v58  ;;  %v4653_v46 = vadd.f32 %v7182_v31, %v4652_v56  ;;  %v4158_v8 = vsub.f32 %v12340_v13, %v11117_v47  ;;  %v4429_v19 = vmul.f32 1.442695, %v4156_v29 }
 0x40f   : > { %v4629_v51 = vadd.f32 %v7176_v23, %v4628_v5  ;;  %v7186_v30 = vpop.eup %7185  ;;  %7197 = vpow2.f32 %v4467_v55  ;;  %v4180_v57 = vsub.f32 %v10937_v28, %v11247_v48  ;;  %v4473_v23 = vmul.f32 1.442695, %v4178_v6 }
 0x410   : > { %v7188_v22 = vpop.eup %7187  ;;  %7199 = vpow2.f32 %v4425_v39  ;;  %v4654_v5 = vadd.f32 %v7186_v30, %v4653_v46  ;;  %v4159_v58 = vsub.f32 %v12341_v42, %v11117_v47  ;;  %v4431_v4 = vmul.f32 1.442695, %v4157_v62 }
 0x411   : > { %v4630_v38 = vadd.f32 %v7180_v54, %v4629_v51  ;;  %v7190_v60 = vpop.eup %7189  ;;  %7201 = vpow2.f32 %v4469_v61  ;;  %v4181_v14 = vsub.f32 %v10951_v53, %v11247_v48  ;;  %v4475_v55 = vmul.f32 1.442695, %v4179_v40  ;;  %v7478_v61 = vld [vmem:[%s7771_s11 + $0x3b0] sm:$0xff] }
 0x412   : > { %v7192_v1 = vpop.eup %7191  ;;  %7203 = vpow2.f32 %v4427_v33  ;;  %v4655_v45 = vadd.f32 %v7190_v60, %v4654_v5  ;;  %v4160_v28 = vsub.f32 %v7477_v41, %v11117_v47  ;;  %v4433_v29 = vmul.f32 1.442695, %v4158_v8 }
 0x413   : > { %v4631_v59 = vadd.f32 %v7184_v0, %v4630_v38  ;;  %v7194_v51 = vpop.eup %7193  ;;  %7205 = vpow2.f32 %v4471_v35  ;;  %v4182_v38 = vsub.f32 %v10964_v18, %v11247_v48  ;;  %v4477_v15 = vmul.f32 1.442695, %v4180_v57 }
 0x414   : > { %v7196_v54 = vpop.eup %7195  ;;  %7207 = vpow2.f32 %v4429_v19  ;;  %v4656_v39 = vadd.f32 %v7194_v51, %v4655_v45  ;;  %v4161_v53 = vsub.f32 %v7478_v61, %v11117_v47  ;;  %v4435_v0 = vmul.f32 1.442695, %v4159_v58 }
 0x415   : > { %v4632_v49 = vadd.f32 %v7188_v22, %v4631_v59  ;;  %v7198_v56 = vpop.eup %7197  ;;  %7209 = vpow2.f32 %v4473_v23  ;;  %v4183_v46 = vsub.f32 %v10976_v44, %v11247_v48  ;;  %v4479_v30 = vmul.f32 1.442695, %v4181_v14 }
 0x416   : > { %v7200_v6 = vpop.eup %7199  ;;  %7211 = vpow2.f32 %v4431_v4  ;;  %v4657_v12 = vadd.f32 %v7198_v56, %v4656_v39  ;;  %v4162_v18 = vsub.f32 %v11022_v36, %v11117_v47  ;;  %v4437_v52 = vmul.f32 1.442695, %v4160_v28 }
 0x417   : > { %v4633_v37 = vadd.f32 %v7192_v1, %v4632_v49  ;;  %v7202_v62 = vpop.eup %7201  ;;  %7213 = vpow2.f32 %v4475_v55  ;;  %v4184_v13 = vsub.f32 %v10988_v20, %v11247_v48  ;;  %v4481_v8 = vmul.f32 1.442695, %v4182_v38 }
 0x418   : > { %v7204_v59 = vpop.eup %7203  ;;  %7215 = vpow2.f32 %v4433_v29  ;;  %v4658_v40 = vadd.f32 %v7202_v62, %v4657_v12  ;;  %v4439_v5 = vmul.f32 1.442695, %v4161_v53  ;;  %v4185_v57 = vsub.f32 %v11000_v25, %v11247_v48 }
 0x419   : > { %v4634_v31 = vadd.f32 %v7196_v54, %v4633_v37  ;;  %v7206_v35 = vpop.eup %7205  ;;  %7217 = vpow2.f32 %v4477_v15  ;;  %v4483_v36 = vmul.f32 1.442695, %v4183_v46  ;;  %v4441_v23 = vmul.f32 1.442695, %v4162_v18 }
 0x41a   : > { %v7208_v19 = vpop.eup %7207  ;;  %7219 = vpow2.f32 %v4435_v0  ;;  %v4659_v44 = vadd.f32 %v7206_v35, %v4658_v40  ;;  %v4186_v20 = vsub.f32 %v11012_v2, %v11247_v48  ;;  %v4485_v4 = vmul.f32 1.442695, %v4184_v13  ;;  %v12343_v40 = vld [vmem:[#allocation31_spill] sm:$0xff] }
 0x41b   : > { %v4635_v33 = vadd.f32 %v7200_v6, %v4634_v31  ;;  %v7210_v60 = vpop.eup %7209  ;;  %7221 = vpow2.f32 %v4479_v30  ;;  %v4187_v25 = vsub.f32 %v11029_v24, %v11247_v48  ;;  %v4487_v55 = vmul.f32 1.442695, %v4185_v57 }
 0x41c   : > { %v7212_v47 = vpop.eup %7211  ;;  %7223 = vpow2.f32 %v4437_v52  ;;  %v4660_v1 = vadd.f32 %v7210_v60, %v4659_v44  ;;  %v4188_v2 = vsub.f32 %v11041_v63, %v11247_v48  ;;  %v4489_v39 = vmul.f32 1.442695, %v4186_v20  ;;  %v12342_v52 = vld [vmem:[#allocation18_spill] sm:$0xff]  ;;  %v3739_v20 = vpop.xlane.xlu2 %3738 }
 0x41d   : > { %v4636_v22 = vadd.f32 %v7204_v59, %v4635_v33  ;;  %v7214_v42 = vpop.eup %7213  ;;  %7225 = vpow2.f32 %v4481_v8  ;;  %v4189_v6 = vsub.f32 %v11052_v17, %v11247_v48  ;;  %v4491_v24 = vmul.f32 1.442695, %v4187_v25 }
 0x41e   : > { %v7216_v45 = vpop.eup %7215  ;;  %7227 = vpow2.f32 %v4439_v5  ;;  %v4661_v51 = vadd.f32 %v7214_v42, %v4660_v1  ;;  %v4190_v62 = vsub.f32 %v11063_v11, %v11247_v48  ;;  %v4493_v63 = vmul.f32 1.442695, %v4188_v2  ;;  %v3322_v1 = vld [vmem:[#allocation4] sm:$0xff]  ;;  %v3698_v42 = vpop.xlane.xlu1 %3697 }
 0x41f   : > { %v4637_v49 = vadd.f32 %v7208_v19, %v4636_v22  ;;  %v7218_v37 = vpop.eup %7217  ;;  %7229 = vpow2.f32 %v4483_v36  ;;  %v4191_v18 = vsub.f32 %v11073_v26, %v11247_v48  ;;  %v4495_v17 = vmul.f32 1.442695, %v4189_v6 }
 0x420   : > { %v7220_v54 = vpop.eup %7219  ;;  %7231 = vpow2.f32 %v4441_v23  ;;  %v4662_v41 = vadd.f32 %v7218_v37, %v4661_v51  ;;  %v12344_v35 = vsub.f32 %v12342_v52, %v12343_v40  ;;  %v4192_v11 = vsub.f32 %v11083_v7, %v11247_v48 }
 0x421   : > { %v4638_v58 = vadd.f32 %v7212_v47, %v4637_v49  ;;  %v7222_v28 = vpop.eup %7221  ;;  %7233 = vpow2.f32 %v4485_v4  ;;  %v4497_v19 = vmul.f32 1.442695, %v4190_v62  ;;  %v4193_v60 = vsub.f32 %v11096_v16, %v11247_v48  ;;  %v3324_v4 = vld [vmem:[#allocation4 + $0x10] sm:$0xff] }
 0x422   : > { %v7224_v56 = vpop.eup %7223  ;;  %v4663_v31 = vadd.f32 %v7222_v28, %v4662_v41  ;;  %7235 = vpow2.f32 %v4487_v55  ;;  %v4011_v22 = vmul.f32 1.442695, %v12344_v35  ;;  %v4499_v26 = vmul.f32 1.442695, %v4191_v18 }
 0x423   : > { %v4639_v14 = vadd.f32 %v7216_v45, %v4638_v58  ;;  %v7226_v38 = vpop.eup %7225  ;;  %7237 = vpow2.f32 %v4489_v39  ;;  %v4194_v36 = vsub.f32 %v11109_v32, %v11247_v48  ;;  %v4501_v47 = vmul.f32 1.442695, %v4192_v11  ;;  %v3323_v58 = vld [vmem:[#allocation4 + $0x8] sm:$0xff] }
 0x424   : > { %v7228_v61 = vpop.eup %7227  ;;  %v4664_v53 = vadd.f32 %v7226_v38, %v4663_v31  ;;  %7239 = vpow2.f32 %v4491_v24  ;;  %v4195_v7 = vsub.f32 %v11124_v9, %v11247_v48  ;;  %v4503_v45 = vmul.f32 1.442695, %v4193_v60 }
 0x425   : > { %v4640_v29 = vadd.f32 %v7220_v54, %v4639_v14  ;;  %v7230_v0 = vpop.eup %7229  ;;  %7241 = vpow2.f32 %v4493_v63  ;;  %v3822_v51 = vadd.f32 %v3698_v42, %v3322_v1  ;;  %v3823_v37 = vadd.f32 %v3739_v20, %v3323_v58  ;;  %v12350_v1 = vld [vmem:[#allocation20_spill] sm:$0xff]  ;;  %v12351_v42 = vld [vmem:[#allocation33_spill] sm:$0xff] }
 0x426   : > { %v7232_v33 = vpop.eup %7231  ;;  %v4665_v46 = vadd.f32 %v7230_v0, %v4664_v53  ;;  %7243 = vpow2.f32 %v4495_v17  ;;  %v4196_v54 = vsub.f32 %v11137_v50, %v11247_v48  ;;  %v4505_v9 = vmul.f32 1.442695, %v4194_v36 }
 0x427   : > { %v4641_v15 = vadd.f32 %v7224_v56, %v4640_v29  ;;  %v7234_v30 = vpop.eup %7233  ;;  %7245 = vpow2.f32 %v4011_v22  ;;  %vm12345_vm6 = vcmask 7168   ;;  %v4003_v29 = vld [vmem:[#allocation3] sm:$0xff]  ;;  %v4197_v39 = vsub.f32 %v11146_v43, %v11247_v48 }
 0x428   : > { %v4666_v13 = vadd.f32 %v7234_v30, %v4665_v46  ;;  %v7236_v8 = vpop.eup %7235  ;;  %7247 = vpow2.f32 %v4497_v19  ;;  %3827 = vst.msk [vmem:[#allocation4] sm:$0xff] %vm12345_vm6, %v3822_v51  ;;  %vm12346_vm8 = vmmov %vm12345_vm6  ;;  %v4507_v56 = vmul.f32 1.442695, %v4195_v7  ;;  %v4198_v50 = vsub.f32 %v11155_v10, %v11247_v48 }
 0x429   : > { %v4642_v12 = vadd.f32 %v7228_v61, %v4641_v15  ;;  %v7238_v44 = vpop.eup %7237  ;;  %7249 = vpow2.f32 %v4499_v26  ;;  %3828 = vst.msk [vmem:[#allocation4 + $0x8] sm:$0xff] %vm12346_vm8, %v3823_v37  ;;  %vm12347_vm1 = vmmov %vm12345_vm6  ;;  %v4509_v15 = vmul.f32 1.442695, %v4196_v54  ;;  %v4563_v61 = vpop.xlane.xlu2 %4562  ;;  %v4199_v0 = vsub.f32 %v11164_v3, %v11247_v48 }
 0x42a   : > { %v4667_v5 = vadd.f32 %v7236_v8, %v4666_v13  ;;  %v7240_v57 = vpop.eup %7239  ;;  %7251 = vpow2.f32 %v4501_v47  ;;  %v4511_v43 = vmul.f32 1.442695, %v4197_v39  ;;  %v4513_v46 = vmul.f32 1.442695, %v4198_v50  ;;  %vm12348_vm9 = vmmov %vm12347_vm1  ;;  %v12359_v39 = vld [vmem:[#allocation39_spill] sm:$0xff] }
 0x42b   : > { %v4643_v59 = vadd.f32 %v7232_v33, %v4642_v12  ;;  %v7242_v16 = vpop.eup %7241  ;;  %7253 = vpow2.f32 %v4503_v45  ;;  %v4200_v33 = vsub.f32 %v11171_v34, %v11247_v48  ;;  %v4515_v18 = vmul.f32 1.442695, %v4199_v0  ;;  %vm12349_vm10 = vmmov %vm12347_vm1  ;;  %v4006_v50 = vld [vmem:[#allocation3 + $0x18] sm:$0xff] }
 0x42c   : > { %v4668_v49 = vadd.f32 %v7238_v44, %v4667_v5  ;;  %v7244_v32 = vpop.eup %7243  ;;  %7255 = vpow2.f32 %v4505_v9  ;;  %v4202_v52 = vsub.f32 %v11197_v27, %v11247_v48  ;;  %v12352_v58 = vsub.f32 %v12350_v1, %v12351_v42  ;;  %vm12353_vm12 = vmmov %vm12347_vm1  ;;  %v4005_v9 = vld [vmem:[#allocation3 + $0x10] sm:$0xff] }
 0x42d   : > { %4644 = vadd.xlane.f32.xlu2 %v4643_v59  ;;  %v7246_v41 = vpop.eup %7245  ;;  %7257 = vpow2.f32 %v4507_v56  ;;  %v4201_v59 = vsub.f32 %v11182_v21, %v11247_v48  ;;  %v4517_v40 = vmul.f32 1.442695, %v4200_v33  ;;  %v3325_v48 = vld [vmem:[#allocation4 + $0x18] sm:$0xff]  ;;  %vm12357_vm13 = vmmov %vm12347_vm1 }
 0x42e   : > { %v4669_v23 = vadd.f32 %v7240_v57, %v4668_v49  ;;  %v7248_v2 = vpop.eup %7247  ;;  %v4019_v6 = vmul.f32 %v7246_v41, %v4003_v29  ;;  %7259 = vpow2.f32 %v4509_v15  ;;  %v4521_v11 = vmul.f32 1.442695, %v4202_v52  ;;  %vm12361_vm14 = vmmov %vm12347_vm1 }
 0x42f   : > { %v7250_v38 = vpop.eup %7249  ;;  %7261 = vpow2.f32 %v4511_v43  ;;  %v4519_v22 = vmul.f32 1.442695, %v4201_v59  ;;  %v4013_v20 = vmul.f32 1.442695, %v12352_v58 }
 0x430   : > { %v4670_v25 = vadd.f32 %v7242_v16, %v4669_v23  ;;  %v7252_v53 = vpop.eup %7251  ;;  %v4687_v12 = vadd.f32 %v4563_v61, %v4019_v6  ;;  %7263 = vpow2.f32 %v4513_v46  ;;  %v4004_v16 = vld [vmem:[#allocation3 + $0x8] sm:$0xff] }
 0x431   : > { %v7254_v63 = vpop.eup %7253  ;;  %7265 = vpow2.f32 %v4515_v18 }
 0x432   : > { %v3780_v14 = vpop.xlane.xlu0 %3779  ;;  %v4671_v28 = vadd.f32 %v7244_v32, %v4670_v25  ;;  %4691 = vst.msk [vmem:[#allocation3] sm:$0xff] %vm12348_vm9, %v4687_v12  ;;  %v7256_v30 = vpop.eup %7255  ;;  %7267 = vpow2.f32 %v4517_v40  ;;  %v12355_v25 = vld [vmem:[#allocation37_spill] sm:$0xff] }
 0x433   : > { %v3824_v55 = vadd.f32 %v3780_v14, %v3324_v4  ;;  %v7258_v17 = vpop.eup %7257  ;;  %7269 = vpow2.f32 %v4519_v22  ;;  %v12354_v14 = vld [vmem:[#allocation19_spill] sm:$0xff] }
 0x434   : > { %v4672_v31 = vadd.f32 %v7248_v2, %v4671_v28  ;;  %v7260_v34 = vpop.eup %7259  ;;  %7271 = vpow2.f32 %v4521_v11  ;;  %v12358_v2 = vld [vmem:[#allocation21_spill] sm:$0xff] }
 0x435   : > { %3829 = vst.msk [vmem:[#allocation4 + $0x10] sm:$0xff] %vm12347_vm1, %v3824_v55  ;;  %v7262_v8 = vpop.eup %7261  ;;  %7273 = vpow2.f32 %v4013_v20  ;;  %v12356_v55 = vsub.f32 %v12354_v14, %v12355_v25  ;;  %v12360_v56 = vsub.f32 %v12358_v2, %v12359_v39 }
 0x436   : > { %v4673_v24 = vadd.f32 %v7250_v38, %v4672_v31  ;;  %v7264_v5 = vpop.eup %7263 }
 0x437   : > { %v7266_v44 = vpop.eup %7265  ;;  %v4015_v32 = vmul.f32 1.442695, %v12356_v55  ;;  %v4017_v31 = vmul.f32 1.442695, %v12360_v56 }
 0x438   : > { %v4674_v62 = vadd.f32 %v7252_v53, %v4673_v24  ;;  %v7268_v26 = vpop.eup %7267 }
 0x439   : > { %v7270_v27 = vpop.eup %7269  ;;  %7275 = vpow2.f32 %v4015_v32 }
 0x43a   : > { %v4675_v10 = vadd.f32 %v7254_v63, %v4674_v62  ;;  %v7272_v36 = vpop.eup %7271  ;;  %7277 = vpow2.f32 %v4017_v31 }
 0x43b   : > { %v7274_v4 = vpop.eup %7273 }
 0x43c   : > { %v4676_v3 = vadd.f32 %v7256_v30, %v4675_v10  ;;  %v4020_v45 = vmul.f32 %v7274_v4, %v4004_v16 }
 0x43e   : > { %v4677_v35 = vadd.f32 %v7258_v17, %v4676_v3 }
 0x43f   : > { %v7276_v54 = vpop.eup %7275 }
 0x440   : > { %v4678_v13 = vadd.f32 %v7260_v34, %v4677_v35  ;;  %v4021_v41 = vmul.f32 %v7276_v54, %v4005_v9  ;;  %v7278_v38 = vpop.eup %7277 }
 0x441   : > { %v4022_v15 = vmul.f32 %v7278_v38, %v4006_v50 }
 0x442   : > { %v4679_v19 = vadd.f32 %v7262_v8, %v4678_v13 }
 0x444   : > { %v4680_v21 = vadd.f32 %v7264_v5, %v4679_v19 }
 0x446   : > { %v4681_v60 = vadd.f32 %v7266_v44, %v4680_v21 }
 0x448   : > { %v4682_v49 = vadd.f32 %v7268_v26, %v4681_v60 }
 0x44a   : > { %v4683_v57 = vadd.f32 %v7270_v27, %v4682_v49 }
 0x44c   : > { %v4684_v7 = vadd.f32 %v7272_v36, %v4683_v57 }
 0x44e   : > { %4685 = vadd.xlane.f32.xlu0 %v4684_v7 }
 0x451   : > { %v3821_v47 = vpop.xlane.xlu1 %3820 }
 0x452   : > { %v3825_v23 = vadd.f32 %v3821_v47, %v3325_v48 }
 0x454   : > { %3830 = vst.msk [vmem:[#allocation4 + $0x18] sm:$0xff] %vm12349_vm10, %v3825_v23 }
 0x46e   : > { %v4604_v51 = vpop.xlane.xlu1 %4603 }
 0x46f   : > { %v4688_v37 = vadd.f32 %v4604_v51, %v4020_v45 }
 0x471   : > { %4692 = vst.msk [vmem:[#allocation3 + $0x8] sm:$0xff] %vm12353_vm12, %v4688_v37 }
 0x4a0   : > { %v4645_v28 = vpop.xlane.xlu2 %4644 }
 0x4a1   : > { %v4689_v29 = vadd.f32 %v4645_v28, %v4021_v41 }
 0x4a3   : > { %4693 = vst.msk [vmem:[#allocation3 + $0x10] sm:$0xff] %vm12357_vm13, %v4689_v29 }
 0x4c0   : > { %4702 = sbr.rel (%p6546_p7) target bundleno = 1482 (0x5ca), region = 52 }
 0x4c1   : > { %v4686_v6 = vpop.xlane.xlu0 %4685 }
 0x4c2   : > { %v4690_v24 = vadd.f32 %v4686_v6, %v4022_v15 }
 0x4c4   : > { %4694 = vst.msk [vmem:[#allocation3 + $0x18] sm:$0xff] %vm12361_vm14, %v4690_v24 }
 0x4c5   : > { %v4731_v61 = vld [vmem:[%s11769_s3] sm:$0xff]  ;;  %v4732_v53 = vld [vmem:[%s11769_s3 + $0x8] sm:$0xff]  ;;  %v4733_v0 = vld [vmem:[%s11769_s3 + $0x10] sm:$0xff]  ;;  %v7627_v12 = vmov 0.0   ;;  %vm12362_vm7 = vcmask 7168  }
 0x4c6   : > { %v4734_v43 = vld [vmem:[%s11769_s3 + $0x18] sm:$0xff]  ;;  %vm4735_vm0 = vcmp.ne.s32.totalorder %v4731_v61, 0  ;;  %vm4736_vm2 = vcmp.ne.s32.totalorder %v4732_v53, 0  ;;  %vm4737_vm3 = vcmp.ne.s32.totalorder %v4733_v0, 0  ;;  %vm12363_vm11 = vmmov %vm12362_vm7  ;;  %v4707_v18 = vld [vmem:[#allocation3] sm:$0xff] }
 0x4c7   : > { %vm4738_vm4 = vcmp.ne.s32.totalorder %v4734_v43, 0  ;;  %v6547_v62 = vsel %vm4735_vm0, 1.0, %v7627_v12  ;;  %v6548_v63 = vsel %vm4736_vm2, 1.0, %v7627_v12  ;;  %v6549_v33 = vsel %vm4737_vm3, 1.0, %v7627_v12  ;;  %vm12364_vm5 = vmmov %vm12362_vm7  ;;  %v4708_v3 = vld [vmem:[#allocation3 + $0x8] sm:$0xff]  ;;  %v4709_v52 = vld [vmem:[#allocation3 + $0x10] sm:$0xff] }
 0x4c8   : > { %v6550_v46 = vsel %vm4738_vm4, 1.0, %v7627_v12  ;;  %v4747_v10 = vsel %vm12362_vm7, %v6547_v62, 0.0  ;;  %v4748_v30 = vsel %vm12363_vm11, %v6548_v63, 0.0  ;;  %v4750_v59 = vsel %vm12364_vm5, %v6549_v33, 0.0  ;;  %vm12365_vm15 = vmmov %vm12364_vm5  ;;  %v4703_v8 = vld [vmem:[#allocation2] sm:$0xff]  ;;  %v4704_v19 = vld [vmem:[#allocation2 + $0x8] sm:$0xff] }
 0x4c9   : > { %v4749_v17 = vadd.f32 %v4748_v30, %v4747_v10  ;;  %7479 = vlog2.f32 %v4707_v18  ;;  %v4752_v35 = vsel %vm12365_vm15, %v6550_v46, 0.0  ;;  %v4705_v44 = vld [vmem:[#allocation2 + $0x10] sm:$0xff]  ;;  %v4723_v26 = vld [vmem:[#allocation4] sm:$0xff]  ;;  %v4706_v27 = vld [vmem:[#allocation2 + $0x18] sm:$0xff]  ;;  %vm4802_vm0 = vcmask 0  }
 0x4ca   : > { %7481 = vlog2.f32 %v4708_v3  ;;  %v4724_v36 = vld [vmem:[#allocation4 + $0x8] sm:$0xff]  ;;  %v4725_v23 = vld [vmem:[#allocation4 + $0x10] sm:$0xff]  ;;  %v4726_v42 = vld [vmem:[#allocation4 + $0x18] sm:$0xff] }
 0x4cb   : > { %v4710_v40 = vld [vmem:[#allocation3 + $0x18] sm:$0xff]  ;;  %v4751_v34 = vadd.f32 %v4750_v59, %v4749_v17  ;;  %7483 = vlog2.f32 %v4709_v52  ;;  %vm12366_vm6 = vmmov %vm12364_vm5 }
 0x4cc   : > { %7485 = vlog2.f32 %v4710_v40  ;;  %vm12367_vm8 = vmmov %vm12364_vm5 }
 0x4cd   : > { %v4753_v22 = vadd.f32 %v4752_v35, %v4751_v34  ;;  %vm12368_vm1 = vmmov %vm12364_vm5 }
 0x4ce   : > { %vm12369_vm9 = vmmov %vm12368_vm1 }
 0x4cf   : > { %v7480_v13 = vpop.eup %7479  ;;  %4754 = vadd.xlane.f32.xlu0 %v4753_v22 }
 0x4d0   : > { %v7482_v11 = vpop.eup %7481  ;;  %v4712_v5 = vmul.f32 0.6931472, %v7480_v13 }
 0x4d1   : > { %v7484_v21 = vpop.eup %7483  ;;  %v4714_v60 = vmul.f32 0.6931472, %v7482_v11 }
 0x4d2   : > { %v7486_v49 = vpop.eup %7485  ;;  %v4716_v48 = vmul.f32 0.6931472, %v7484_v21  ;;  %v4719_v57 = vadd.f32 %v4712_v5, %v4703_v8 }
 0x4d3   : > { %v4718_v47 = vmul.f32 0.6931472, %v7486_v49  ;;  %v4720_v7 = vadd.f32 %v4714_v60, %v4704_v19 }
 0x4d4   : > { %v4721_v1 = vadd.f32 %v4716_v48, %v4705_v44  ;;  %v4727_v58 = vsub.f32 %v4719_v57, %v4723_v26 }
 0x4d5   : > { %v4722_v20 = vadd.f32 %v4718_v47, %v4706_v27  ;;  %v4728_v4 = vsub.f32 %v4720_v7, %v4724_v36 }
 0x4d6   : > { %v4729_v16 = vsub.f32 %v4721_v1, %v4725_v23  ;;  %v4764_v45 = vmul.f32 %v6547_v62, %v4727_v58 }
 0x4d7   : > { %v4730_v51 = vsub.f32 %v4722_v20, %v4726_v42  ;;  %v4765_v37 = vmul.f32 %v6548_v63, %v4728_v4 }
 0x4d8   : > { %v4766_v14 = vmul.f32 %v6549_v33, %v4729_v16  ;;  %v4768_v25 = vsel %vm12366_vm6, %v4764_v45, 0.0 }
 0x4d9   : > { %v4767_v55 = vmul.f32 %v6550_v46, %v4730_v51  ;;  %v4769_v32 = vsel %vm12367_vm8, %v4765_v37, 0.0 }
 0x4da   : > { %v4770_v54 = vadd.f32 %v4769_v32, %v4768_v25  ;;  %v4771_v9 = vsel %vm12368_vm1, %v4766_v14, 0.0 }
 0x4db   : > { %v4773_v41 = vsel %vm12369_vm9, %v4767_v55, 0.0 }
 0x4dc   : > { %v4772_v28 = vadd.f32 %v4771_v9, %v4770_v54 }
 0x4de   : > { %v4774_v29 = vadd.f32 %v4773_v41, %v4772_v28 }
 0x4e0   : > { %4775 = vadd.xlane.f32.xlu0 %v4774_v29 }
 0x542   : > { %v4755_v2 = vpop.xlane.xlu0 %4754 }
 0x543   : > { %v4756_v39 = vrot.slane %v4755_v2, 4 }
 0x545   : > { %v4757_v56 = vadd.f32 %v4756_v39, %v4755_v2 }
 0x547   : > { %v4758_v31 = vrot.slane %v4757_v56, 2 }
 0x549   : > { %v4759_v38 = vadd.f32 %v4758_v31, %v4757_v56 }
 0x54b   : > { %v4760_v50 = vrot.slane %v4759_v38, 1 }
 0x54d   : > { %v4761_v15 = vadd.f32 %v4760_v50, %v4759_v38 }
 0x54f   : > { %6883 = vpush %v4761_v15 }
 0x553   : > { %v4776_v6 = vpop.xlane.xlu0 %4775 }
 0x554   : > { %v4777_v24 = vrot.slane %v4776_v6, 4 }
 0x556   : > { %v4778_v61 = vadd.f32 %v4777_v24, %v4776_v6 }
 0x558   : > { %v4779_v53 = vrot.slane %v4778_v61, 2 }
 0x55a   : > { %v4780_v0 = vadd.f32 %v4779_v53, %v4778_v61 }
 0x55c   : > { %v4781_v43 = vrot.slane %v4780_v0, 1 }
 0x55e   : > { %v4782_v12 = vadd.f32 %v4781_v43, %v4780_v0 }
 0x560   : > { %6885 = vpush %v4782_v12 }
 0x580   : > { %s6884_s14 = spop %6883 }
 0x581   : > { %s4763_s6 = smax.f32 %s7628_s21, %s6884_s14 }
 0x582   : > { %v4784_v62 = vstv %s4763_s6 }
 0x583   : > { %7487 = vrcp.f32 %v4784_v62  ;;  %v4796_v10 = vand.u32 2147483648, %v4784_v62  ;;  %v4794_v59 = vand.u32 2147483647, %v4784_v62  ;;  %vm4790_vm12 = vweird.f32 %v4784_v62 }
 0x585   : > { %v4797_v3 = vor.u32 1.1754944e-38, %v4796_v10  ;;  %vm4795_vm14 = vcmp.eq.f32.partialorder %v4794_v59, 8.507059e+37 }
 0x589   : > { %v7488_v63 = vpop.eup %7487 }
 0x58a   : > { %v4786_v33 = vmul.f32 %v7488_v63, %v4784_v62  ;;  %vm4791_vm10 = vweird.f32 %v7488_v63 }
 0x58b   : > { %vm4792_vm13 = vmor %vm4790_vm12, %vm4791_vm10 }
 0x58c   : > { %v4787_v46 = vsub.f32 1.0, %v4786_v33 }
 0x58e   : > { %v4788_v30 = vmul.f32 %v7488_v63, %v4787_v46 }
 0x590   : > { %v4789_v18 = vadd.f32 %v7488_v63, %v4788_v30 }
 0x591   : > { %s6886_s8 = spop %6885 }
 0x592   : > { %v4793_v17 = vsel %vm4792_vm13, %v7488_v63, %v4789_v18 }
 0x593   : > { %v4798_v52 = vsel %vm4795_vm14, %v4797_v3, %v4793_v17 }
 0x594   : > { %6887 = vpush %v4798_v52 }
 0x5c5   : > { %s6888_s9 = spop %6887 }
 0x5c6   : > { %s4800_s29 = smul.f32 %s6888_s9, %s6886_s8 }
 0x5c8   : > { %v4801_v40 = vstv %s4800_s29 }
 0x5c9   : > { %4803 = vst.msk [vmem:[#allocation11] sm:$0x1] %vm4802_vm0, %v4801_v40 }
 0x5ca PF: > { %4810 = sbr.rel (!%p7703_p9) target bundleno = 1646 (0x66e), region = 56  ;;  %v4826_v35 = vld [vmem:[%s7771_s11] sm:$0xff] (%p7703_p9)  ;;  %v4828_v34 = vld [vmem:[%s7771_s11 + $0x8] sm:$0xff] (%p7703_p9)  ;;  %v4830_v22 = vld [vmem:[%s7771_s11 + $0x10] sm:$0xff] (%p7703_p9) }
 0x5cb   : > { %s6877_s10 = smul.u32 (%p7703_p9), 320, %s7679_s22  ;;  %v4832_v13 = vld [vmem:[%s7771_s11 + $0x18] sm:$0xff] (%p7703_p9)  ;;  %v4834_v8 = vld [vmem:[%s7771_s11 + $0x20] sm:$0xff] (%p7703_p9)  ;;  %v4836_v11 = vld [vmem:[%s7771_s11 + $0x28] sm:$0xff] (%p7703_p9) }
 0x5cc   : > { %v4838_v19 = vld [vmem:[%s7771_s11 + $0x30] sm:$0xff] (%p7703_p9)  ;;  %v4840_v5 = vld [vmem:[%s7771_s11 + $0x38] sm:$0xff] (%p7703_p9)  ;;  %v4842_v21 = vld [vmem:[%s7771_s11 + $0x40] sm:$0xff] (%p7703_p9) }
 0x5cd   : > { %s11424_s17 = scalar_lea.vmem (%p7703_p9), %s11770_s4, %s6877_s10  ;;  %v4844_v44 = vld [vmem:[%s7771_s11 + $0x48] sm:$0xff] (%p7703_p9)  ;;  %v4846_v60 = vld [vmem:[%s7771_s11 + $0x50] sm:$0xff] (%p7703_p9)  ;;  %v4848_v26 = vld [vmem:[%s7771_s11 + $0x58] sm:$0xff] (%p7703_p9) }
 0x5ce   : > { %4827 = vst [vmem:[%s11424_s17] sm:$0xff] (%p7703_p9), %v4826_v35  ;;  %v4850_v49 = vld [vmem:[%s7771_s11 + $0x60] sm:$0xff] (%p7703_p9)  ;;  %v4852_v27 = vld [vmem:[%s7771_s11 + $0x68] sm:$0xff] (%p7703_p9)  ;;  %v4854_v48 = vld [vmem:[%s7771_s11 + $0x70] sm:$0xff] (%p7703_p9) }
 0x5cf   : > { %4829 = vst [vmem:[%s11424_s17 + $0x8] sm:$0xff] %v4828_v34  ;;  %v4856_v57 = vld [vmem:[%s7771_s11 + $0x78] sm:$0xff]  ;;  %v4858_v36 = vld [vmem:[%s7771_s11 + $0x80] sm:$0xff]  ;;  %v4860_v47 = vld [vmem:[%s7771_s11 + $0x88] sm:$0xff] }
 0x5d0   : > { %4831 = vst [vmem:[%s11424_s17 + $0x10] sm:$0xff] %v4830_v22  ;;  %v4862_v7 = vld [vmem:[%s7771_s11 + $0x90] sm:$0xff]  ;;  %v4864_v23 = vld [vmem:[%s7771_s11 + $0x98] sm:$0xff]  ;;  %v4866_v1 = vld [vmem:[%s7771_s11 + $0xa0] sm:$0xff] }
 0x5d1   : > { %4833 = vst [vmem:[%s11424_s17 + $0x18] sm:$0xff] %v4832_v13  ;;  %v4868_v42 = vld [vmem:[%s7771_s11 + $0xa8] sm:$0xff]  ;;  %v4870_v58 = vld [vmem:[%s7771_s11 + $0xb0] sm:$0xff]  ;;  %v4872_v20 = vld [vmem:[%s7771_s11 + $0xb8] sm:$0xff] }
 0x5d2   : > { %4835 = vst [vmem:[%s11424_s17 + $0x20] sm:$0xff] %v4834_v8  ;;  %v4874_v4 = vld [vmem:[%s7771_s11 + $0xc0] sm:$0xff]  ;;  %v4876_v16 = vld [vmem:[%s7771_s11 + $0xc8] sm:$0xff]  ;;  %v4878_v45 = vld [vmem:[%s7771_s11 + $0xd0] sm:$0xff] }
 0x5d3   : > { %4837 = vst [vmem:[%s11424_s17 + $0x28] sm:$0xff] %v4836_v11  ;;  %v4880_v51 = vld [vmem:[%s7771_s11 + $0xd8] sm:$0xff]  ;;  %v4882_v37 = vld [vmem:[%s7771_s11 + $0xe0] sm:$0xff]  ;;  %v4884_v14 = vld [vmem:[%s7771_s11 + $0xe8] sm:$0xff] }
 0x5d4   : > { %4839 = vst [vmem:[%s11424_s17 + $0x30] sm:$0xff] %v4838_v19  ;;  %v4886_v25 = vld [vmem:[%s7771_s11 + $0xf0] sm:$0xff]  ;;  %v4888_v55 = vld [vmem:[%s7771_s11 + $0xf8] sm:$0xff]  ;;  %v4890_v32 = vld [vmem:[%s7771_s11 + $0x100] sm:$0xff] }
 0x5d5   : > { %4841 = vst [vmem:[%s11424_s17 + $0x38] sm:$0xff] %v4840_v5  ;;  %v4892_v54 = vld [vmem:[%s7771_s11 + $0x108] sm:$0xff]  ;;  %v4894_v9 = vld [vmem:[%s7771_s11 + $0x110] sm:$0xff]  ;;  %v4896_v41 = vld [vmem:[%s7771_s11 + $0x118] sm:$0xff] }
 0x5d6   : > { %4843 = vst [vmem:[%s11424_s17 + $0x40] sm:$0xff] %v4842_v21  ;;  %v4898_v28 = vld [vmem:[%s7771_s11 + $0x120] sm:$0xff]  ;;  %v4900_v29 = vld [vmem:[%s7771_s11 + $0x128] sm:$0xff]  ;;  %v4902_v2 = vld [vmem:[%s7771_s11 + $0x130] sm:$0xff] }
 0x5d7   : > { %4845 = vst [vmem:[%s11424_s17 + $0x48] sm:$0xff] %v4844_v44  ;;  %v4904_v39 = vld [vmem:[%s7771_s11 + $0x138] sm:$0xff]  ;;  %v4906_v56 = vld [vmem:[%s7771_s11 + $0x140] sm:$0xff]  ;;  %v4908_v31 = vld [vmem:[%s7771_s11 + $0x148] sm:$0xff] }
 0x5d8   : > { %4847 = vst [vmem:[%s11424_s17 + $0x50] sm:$0xff] %v4846_v60  ;;  %v4910_v38 = vld [vmem:[%s7771_s11 + $0x150] sm:$0xff]  ;;  %v4912_v50 = vld [vmem:[%s7771_s11 + $0x158] sm:$0xff]  ;;  %v4914_v15 = vld [vmem:[%s7771_s11 + $0x160] sm:$0xff] }
 0x5d9   : > { %4849 = vst [vmem:[%s11424_s17 + $0x58] sm:$0xff] %v4848_v26  ;;  %v4916_v6 = vld [vmem:[%s7771_s11 + $0x168] sm:$0xff]  ;;  %v4918_v24 = vld [vmem:[%s7771_s11 + $0x170] sm:$0xff]  ;;  %v4920_v61 = vld [vmem:[%s7771_s11 + $0x178] sm:$0xff] }
 0x5da   : > { %4851 = vst [vmem:[%s11424_s17 + $0x60] sm:$0xff] %v4850_v49  ;;  %v4922_v53 = vld [vmem:[%s7771_s11 + $0x180] sm:$0xff]  ;;  %v4924_v0 = vld [vmem:[%s7771_s11 + $0x188] sm:$0xff]  ;;  %v4926_v43 = vld [vmem:[%s7771_s11 + $0x190] sm:$0xff] }
 0x5db   : > { %4853 = vst [vmem:[%s11424_s17 + $0x68] sm:$0xff] %v4852_v27  ;;  %v4928_v12 = vld [vmem:[%s7771_s11 + $0x198] sm:$0xff]  ;;  %v4930_v62 = vld [vmem:[%s7771_s11 + $0x1a0] sm:$0xff]  ;;  %v4932_v63 = vld [vmem:[%s7771_s11 + $0x1a8] sm:$0xff] }
 0x5dc   : > { %4855 = vst [vmem:[%s11424_s17 + $0x70] sm:$0xff] %v4854_v48  ;;  %v4934_v33 = vld [vmem:[%s7771_s11 + $0x1b0] sm:$0xff]  ;;  %v4936_v46 = vld [vmem:[%s7771_s11 + $0x1b8] sm:$0xff]  ;;  %v4938_v10 = vld [vmem:[%s7771_s11 + $0x1c0] sm:$0xff] }
 0x5dd   : > { %4857 = vst [vmem:[%s11424_s17 + $0x78] sm:$0xff] %v4856_v57  ;;  %v4940_v30 = vld [vmem:[%s7771_s11 + $0x1c8] sm:$0xff]  ;;  %v4942_v59 = vld [vmem:[%s7771_s11 + $0x1d0] sm:$0xff]  ;;  %v4944_v18 = vld [vmem:[%s7771_s11 + $0x1d8] sm:$0xff] }
 0x5de   : > { %4859 = vst [vmem:[%s11424_s17 + $0x80] sm:$0xff] %v4858_v36  ;;  %v4946_v3 = vld [vmem:[%s7771_s11 + $0x1e0] sm:$0xff]  ;;  %v4948_v17 = vld [vmem:[%s7771_s11 + $0x1e8] sm:$0xff]  ;;  %v4950_v52 = vld [vmem:[%s7771_s11 + $0x1f0] sm:$0xff] }
 0x5df   : > { %4861 = vst [vmem:[%s11424_s17 + $0x88] sm:$0xff] %v4860_v47  ;;  %v4952_v40 = vld [vmem:[%s7771_s11 + $0x1f8] sm:$0xff]  ;;  %v4954_v35 = vld [vmem:[%s7771_s11 + $0x200] sm:$0xff]  ;;  %v4956_v34 = vld [vmem:[%s7771_s11 + $0x208] sm:$0xff] }
 0x5e0   : > { %4863 = vst [vmem:[%s11424_s17 + $0x90] sm:$0xff] %v4862_v7  ;;  %v4958_v22 = vld [vmem:[%s7771_s11 + $0x210] sm:$0xff]  ;;  %v4960_v13 = vld [vmem:[%s7771_s11 + $0x218] sm:$0xff]  ;;  %v4962_v8 = vld [vmem:[%s7771_s11 + $0x220] sm:$0xff] }
 0x5e1   : > { %4865 = vst [vmem:[%s11424_s17 + $0x98] sm:$0xff] %v4864_v23  ;;  %v4964_v11 = vld [vmem:[%s7771_s11 + $0x228] sm:$0xff]  ;;  %v4966_v19 = vld [vmem:[%s7771_s11 + $0x230] sm:$0xff]  ;;  %v4968_v5 = vld [vmem:[%s7771_s11 + $0x238] sm:$0xff] }
 0x5e2   : > { %4867 = vst [vmem:[%s11424_s17 + $0xa0] sm:$0xff] %v4866_v1  ;;  %v4970_v21 = vld [vmem:[%s7771_s11 + $0x240] sm:$0xff]  ;;  %v4972_v44 = vld [vmem:[%s7771_s11 + $0x248] sm:$0xff]  ;;  %v4974_v60 = vld [vmem:[%s7771_s11 + $0x250] sm:$0xff] }
 0x5e3   : > { %4869 = vst [vmem:[%s11424_s17 + $0xa8] sm:$0xff] %v4868_v42  ;;  %v4976_v26 = vld [vmem:[%s7771_s11 + $0x258] sm:$0xff]  ;;  %v4978_v49 = vld [vmem:[%s7771_s11 + $0x260] sm:$0xff]  ;;  %v4980_v27 = vld [vmem:[%s7771_s11 + $0x268] sm:$0xff] }
 0x5e4   : > { %4871 = vst [vmem:[%s11424_s17 + $0xb0] sm:$0xff] %v4870_v58  ;;  %v4982_v48 = vld [vmem:[%s7771_s11 + $0x270] sm:$0xff]  ;;  %v4984_v57 = vld [vmem:[%s7771_s11 + $0x278] sm:$0xff]  ;;  %v4986_v36 = vld [vmem:[%s7771_s11 + $0x280] sm:$0xff] }
 0x5e5   : > { %4873 = vst [vmem:[%s11424_s17 + $0xb8] sm:$0xff] %v4872_v20  ;;  %v4988_v47 = vld [vmem:[%s7771_s11 + $0x288] sm:$0xff]  ;;  %v4990_v7 = vld [vmem:[%s7771_s11 + $0x290] sm:$0xff]  ;;  %v4992_v23 = vld [vmem:[%s7771_s11 + $0x298] sm:$0xff] }
 0x5e6   : > { %4875 = vst [vmem:[%s11424_s17 + $0xc0] sm:$0xff] %v4874_v4  ;;  %v4994_v1 = vld [vmem:[%s7771_s11 + $0x2a0] sm:$0xff]  ;;  %v4996_v42 = vld [vmem:[%s7771_s11 + $0x2a8] sm:$0xff]  ;;  %v4998_v58 = vld [vmem:[%s7771_s11 + $0x2b0] sm:$0xff] }
 0x5e7   : > { %4877 = vst [vmem:[%s11424_s17 + $0xc8] sm:$0xff] %v4876_v16  ;;  %v5000_v20 = vld [vmem:[%s7771_s11 + $0x2b8] sm:$0xff]  ;;  %v5002_v4 = vld [vmem:[%s7771_s11 + $0x2c0] sm:$0xff]  ;;  %v5004_v16 = vld [vmem:[%s7771_s11 + $0x2c8] sm:$0xff] }
 0x5e8   : > { %4879 = vst [vmem:[%s11424_s17 + $0xd0] sm:$0xff] %v4878_v45  ;;  %v5006_v45 = vld [vmem:[%s7771_s11 + $0x2d0] sm:$0xff] }
 0x5e9   : > { %4881 = vst [vmem:[%s11424_s17 + $0xd8] sm:$0xff] %v4880_v51  ;;  %v5008_v51 = vld [vmem:[%s7771_s11 + $0x2d8] sm:$0xff] }
 0x5ea   : > { %4883 = vst [vmem:[%s11424_s17 + $0xe0] sm:$0xff] %v4882_v37  ;;  %v5010_v37 = vld [vmem:[%s7771_s11 + $0x2e0] sm:$0xff] }
 0x5eb   : > { %4885 = vst [vmem:[%s11424_s17 + $0xe8] sm:$0xff] %v4884_v14  ;;  %v5012_v14 = vld [vmem:[%s7771_s11 + $0x2e8] sm:$0xff] }
 0x5ec   : > { %4887 = vst [vmem:[%s11424_s17 + $0xf0] sm:$0xff] %v4886_v25  ;;  %v5014_v25 = vld [vmem:[%s7771_s11 + $0x2f0] sm:$0xff] }
 0x5ed   : > { %4889 = vst [vmem:[%s11424_s17 + $0xf8] sm:$0xff] %v4888_v55  ;;  %v5016_v55 = vld [vmem:[%s7771_s11 + $0x2f8] sm:$0xff] }
 0x5ee   : > { %4891 = vst [vmem:[%s11424_s17 + $0x100] sm:$0xff] %v4890_v32  ;;  %v5018_v32 = vld [vmem:[%s7771_s11 + $0x300] sm:$0xff] }
 0x5ef   : > { %4893 = vst [vmem:[%s11424_s17 + $0x108] sm:$0xff] %v4892_v54  ;;  %v5020_v54 = vld [vmem:[%s7771_s11 + $0x308] sm:$0xff] }
 0x5f0   : > { %4895 = vst [vmem:[%s11424_s17 + $0x110] sm:$0xff] %v4894_v9  ;;  %v5022_v9 = vld [vmem:[%s7771_s11 + $0x310] sm:$0xff] }
 0x5f1   : > { %4897 = vst [vmem:[%s11424_s17 + $0x118] sm:$0xff] %v4896_v41  ;;  %v5024_v41 = vld [vmem:[%s7771_s11 + $0x318] sm:$0xff] }
 0x5f2   : > { %4899 = vst [vmem:[%s11424_s17 + $0x120] sm:$0xff] %v4898_v28  ;;  %v5026_v28 = vld [vmem:[%s7771_s11 + $0x320] sm:$0xff] }
 0x5f3   : > { %4901 = vst [vmem:[%s11424_s17 + $0x128] sm:$0xff] %v4900_v29  ;;  %v5028_v29 = vld [vmem:[%s7771_s11 + $0x328] sm:$0xff] }
 0x5f4   : > { %4903 = vst [vmem:[%s11424_s17 + $0x130] sm:$0xff] %v4902_v2  ;;  %v5030_v2 = vld [vmem:[%s7771_s11 + $0x330] sm:$0xff] }
 0x5f5   : > { %4905 = vst [vmem:[%s11424_s17 + $0x138] sm:$0xff] %v4904_v39  ;;  %v5032_v39 = vld [vmem:[%s7771_s11 + $0x338] sm:$0xff] }
 0x5f6   : > { %4907 = vst [vmem:[%s11424_s17 + $0x780] sm:$0xff] %v4906_v56  ;;  %v5034_v56 = vld [vmem:[%s7771_s11 + $0x340] sm:$0xff] }
 0x5f7   : > { %4909 = vst [vmem:[%s11424_s17 + $0x788] sm:$0xff] %v4908_v31  ;;  %v5036_v31 = vld [vmem:[%s7771_s11 + $0x348] sm:$0xff] }
 0x5f8   : > { %4911 = vst [vmem:[%s11424_s17 + $0x790] sm:$0xff] %v4910_v38  ;;  %v5038_v38 = vld [vmem:[%s7771_s11 + $0x350] sm:$0xff] }
 0x5f9   : > { %4913 = vst [vmem:[%s11424_s17 + $0x798] sm:$0xff] %v4912_v50  ;;  %v5040_v50 = vld [vmem:[%s7771_s11 + $0x358] sm:$0xff] }
 0x5fa   : > { %4915 = vst [vmem:[%s11424_s17 + $0x7a0] sm:$0xff] %v4914_v15  ;;  %v5042_v15 = vld [vmem:[%s7771_s11 + $0x360] sm:$0xff] }
 0x5fb   : > { %4917 = vst [vmem:[%s11424_s17 + $0x7a8] sm:$0xff] %v4916_v6  ;;  %v5044_v6 = vld [vmem:[%s7771_s11 + $0x368] sm:$0xff] }
 0x5fc   : > { %4919 = vst [vmem:[%s11424_s17 + $0x7b0] sm:$0xff] %v4918_v24  ;;  %v5046_v24 = vld [vmem:[%s7771_s11 + $0x370] sm:$0xff] }
 0x5fd   : > { %4921 = vst [vmem:[%s11424_s17 + $0x7b8] sm:$0xff] %v4920_v61  ;;  %v5048_v61 = vld [vmem:[%s7771_s11 + $0x378] sm:$0xff] }
 0x5fe   : > { %4923 = vst [vmem:[%s11424_s17 + $0x7c0] sm:$0xff] %v4922_v53  ;;  %v5050_v53 = vld [vmem:[%s7771_s11 + $0x380] sm:$0xff] }
 0x5ff   : > { %4925 = vst [vmem:[%s11424_s17 + $0x7c8] sm:$0xff] %v4924_v0  ;;  %v5052_v0 = vld [vmem:[%s7771_s11 + $0x388] sm:$0xff] }
 0x600   : > { %4927 = vst [vmem:[%s11424_s17 + $0x7d0] sm:$0xff] %v4926_v43  ;;  %v5054_v43 = vld [vmem:[%s7771_s11 + $0x390] sm:$0xff] }
 0x601   : > { %4929 = vst [vmem:[%s11424_s17 + $0x7d8] sm:$0xff] %v4928_v12  ;;  %v5056_v12 = vld [vmem:[%s7771_s11 + $0x398] sm:$0xff] }
 0x602   : > { %4931 = vst [vmem:[%s11424_s17 + $0x7e0] sm:$0xff] %v4930_v62  ;;  %v5058_v62 = vld [vmem:[%s7771_s11 + $0x3a0] sm:$0xff] }
 0x603   : > { %4933 = vst [vmem:[%s11424_s17 + $0x7e8] sm:$0xff] %v4932_v63  ;;  %v5060_v63 = vld [vmem:[%s7771_s11 + $0x3a8] sm:$0xff] }
 0x604   : > { %4935 = vst [vmem:[%s11424_s17 + $0x7f0] sm:$0xff] %v4934_v33  ;;  %v5062_v33 = vld [vmem:[%s7771_s11 + $0x3b0] sm:$0xff] }
 0x605   : > { %4937 = vst [vmem:[%s11424_s17 + $0x7f8] sm:$0xff] %v4936_v46  ;;  %v5064_v46 = vld [vmem:[%s7771_s11 + $0x3b8] sm:$0xff] }
 0x606   : > { %4939 = vst [vmem:[%s11424_s17 + $0x800] sm:$0xff] %v4938_v10  ;;  %v5066_v10 = vld [vmem:[%s7771_s11 + $0x3c0] sm:$0xff] }
 0x607   : > { %4941 = vst [vmem:[%s11424_s17 + $0x808] sm:$0xff] %v4940_v30  ;;  %v5068_v30 = vld [vmem:[%s7771_s11 + $0x3c8] sm:$0xff] }
 0x608   : > { %4943 = vst [vmem:[%s11424_s17 + $0x810] sm:$0xff] %v4942_v59  ;;  %v5070_v59 = vld [vmem:[%s7771_s11 + $0x3d0] sm:$0xff] }
 0x609   : > { %4945 = vst [vmem:[%s11424_s17 + $0x818] sm:$0xff] %v4944_v18  ;;  %v5072_v18 = vld [vmem:[%s7771_s11 + $0x3d8] sm:$0xff] }
 0x60a   : > { %4947 = vst [vmem:[%s11424_s17 + $0x820] sm:$0xff] %v4946_v3  ;;  %v5074_v3 = vld [vmem:[%s7771_s11 + $0x3e0] sm:$0xff] }
 0x60b   : > { %4949 = vst [vmem:[%s11424_s17 + $0x828] sm:$0xff] %v4948_v17  ;;  %v5076_v17 = vld [vmem:[%s7771_s11 + $0x3e8] sm:$0xff] }
 0x60c   : > { %4951 = vst [vmem:[%s11424_s17 + $0x830] sm:$0xff] %v4950_v52  ;;  %v5078_v52 = vld [vmem:[%s7771_s11 + $0x3f0] sm:$0xff] }
 0x60d   : > { %4953 = vst [vmem:[%s11424_s17 + $0x838] sm:$0xff] %v4952_v40  ;;  %v5080_v40 = vld [vmem:[%s7771_s11 + $0x3f8] sm:$0xff] }
 0x60e   : > { %4955 = vst [vmem:[%s11424_s17 + $0x840] sm:$0xff] %v4954_v35  ;;  %v5082_v35 = vld [vmem:[%s7771_s11 + $0x400] sm:$0xff] }
 0x60f   : > { %4957 = vst [vmem:[%s11424_s17 + $0x848] sm:$0xff] %v4956_v34  ;;  %v5084_v34 = vld [vmem:[%s7771_s11 + $0x408] sm:$0xff] }
 0x610   : > { %4959 = vst [vmem:[%s11424_s17 + $0x850] sm:$0xff] %v4958_v22  ;;  %v5086_v22 = vld [vmem:[%s7771_s11 + $0x410] sm:$0xff] }
 0x611   : > { %4961 = vst [vmem:[%s11424_s17 + $0x858] sm:$0xff] %v4960_v13  ;;  %v5088_v13 = vld [vmem:[%s7771_s11 + $0x418] sm:$0xff] }
 0x612   : > { %4963 = vst [vmem:[%s11424_s17 + $0x860] sm:$0xff] %v4962_v8  ;;  %v5090_v8 = vld [vmem:[%s7771_s11 + $0x420] sm:$0xff] }
 0x613   : > { %4965 = vst [vmem:[%s11424_s17 + $0x868] sm:$0xff] %v4964_v11  ;;  %v5092_v11 = vld [vmem:[%s7771_s11 + $0x428] sm:$0xff] }
 0x614   : > { %4967 = vst [vmem:[%s11424_s17 + $0x870] sm:$0xff] %v4966_v19  ;;  %v5094_v19 = vld [vmem:[%s7771_s11 + $0x430] sm:$0xff] }
 0x615   : > { %4969 = vst [vmem:[%s11424_s17 + $0x878] sm:$0xff] %v4968_v5  ;;  %v5096_v5 = vld [vmem:[%s7771_s11 + $0x438] sm:$0xff] }
 0x616   : > { %4971 = vst [vmem:[%s11424_s17 + $0x880] sm:$0xff] %v4970_v21  ;;  %v5098_v21 = vld [vmem:[%s7771_s11 + $0x440] sm:$0xff] }
 0x617   : > { %4973 = vst [vmem:[%s11424_s17 + $0x888] sm:$0xff] %v4972_v44  ;;  %v5100_v44 = vld [vmem:[%s7771_s11 + $0x448] sm:$0xff] }
 0x618   : > { %4975 = vst [vmem:[%s11424_s17 + $0x890] sm:$0xff] %v4974_v60  ;;  %v5102_v60 = vld [vmem:[%s7771_s11 + $0x450] sm:$0xff] }
 0x619   : > { %4977 = vst [vmem:[%s11424_s17 + $0x898] sm:$0xff] %v4976_v26  ;;  %v5104_v26 = vld [vmem:[%s7771_s11 + $0x458] sm:$0xff] }
 0x61a   : > { %4979 = vst [vmem:[%s11424_s17 + $0x8a0] sm:$0xff] %v4978_v49  ;;  %v5106_v49 = vld [vmem:[%s7771_s11 + $0x460] sm:$0xff] }
 0x61b   : > { %4981 = vst [vmem:[%s11424_s17 + $0x8a8] sm:$0xff] %v4980_v27  ;;  %v5108_v27 = vld [vmem:[%s7771_s11 + $0x468] sm:$0xff] }
 0x61c   : > { %4983 = vst [vmem:[%s11424_s17 + $0x8b0] sm:$0xff] %v4982_v48  ;;  %v5110_v48 = vld [vmem:[%s7771_s11 + $0x470] sm:$0xff] }
 0x61d   : > { %4985 = vst [vmem:[%s11424_s17 + $0x8b8] sm:$0xff] %v4984_v57  ;;  %v5112_v57 = vld [vmem:[%s7771_s11 + $0x478] sm:$0xff] }
 0x61e   : > { %4987 = vst [vmem:[%s11424_s17 + $0xf00] sm:$0xff] %v4986_v36  ;;  %v5114_v36 = vld [vmem:[%s7771_s11 + $0x480] sm:$0xff] }
 0x61f   : > { %4989 = vst [vmem:[%s11424_s17 + $0xf08] sm:$0xff] %v4988_v47  ;;  %v5116_v47 = vld [vmem:[%s7771_s11 + $0x488] sm:$0xff] }
 0x620   : > { %4991 = vst [vmem:[%s11424_s17 + $0xf10] sm:$0xff] %v4990_v7  ;;  %v5118_v7 = vld [vmem:[%s7771_s11 + $0x490] sm:$0xff] }
 0x621   : > { %4993 = vst [vmem:[%s11424_s17 + $0xf18] sm:$0xff] %v4992_v23  ;;  %v5120_v23 = vld [vmem:[%s7771_s11 + $0x498] sm:$0xff] }
 0x622   : > { %4995 = vst [vmem:[%s11424_s17 + $0xf20] sm:$0xff] %v4994_v1  ;;  %v5122_v1 = vld [vmem:[%s7771_s11 + $0x4a0] sm:$0xff] }
 0x623   : > { %4997 = vst [vmem:[%s11424_s17 + $0xf28] sm:$0xff] %v4996_v42  ;;  %v5124_v42 = vld [vmem:[%s7771_s11 + $0x4a8] sm:$0xff] }
 0x624   : > { %4999 = vst [vmem:[%s11424_s17 + $0xf30] sm:$0xff] %v4998_v58  ;;  %v5126_v58 = vld [vmem:[%s7771_s11 + $0x4b0] sm:$0xff] }
 0x625   : > { %5001 = vst [vmem:[%s11424_s17 + $0xf38] sm:$0xff] %v5000_v20  ;;  %v5128_v20 = vld [vmem:[%s7771_s11 + $0x4b8] sm:$0xff] }
 0x626   : > { %5003 = vst [vmem:[%s11424_s17 + $0xf40] sm:$0xff] %v5002_v4  ;;  %v5130_v4 = vld [vmem:[%s7771_s11 + $0x4c0] sm:$0xff] }
 0x627   : > { %5005 = vst [vmem:[%s11424_s17 + $0xf48] sm:$0xff] %v5004_v16  ;;  %v5132_v16 = vld [vmem:[%s7771_s11 + $0x4c8] sm:$0xff] }
 0x628   : > { %5007 = vst [vmem:[%s11424_s17 + $0xf50] sm:$0xff] %v5006_v45  ;;  %v5134_v45 = vld [vmem:[%s7771_s11 + $0x4d0] sm:$0xff] }
 0x629   : > { %5009 = vst [vmem:[%s11424_s17 + $0xf58] sm:$0xff] %v5008_v51  ;;  %v5136_v51 = vld [vmem:[%s7771_s11 + $0x4d8] sm:$0xff] }
 0x62a   : > { %5011 = vst [vmem:[%s11424_s17 + $0xf60] sm:$0xff] %v5010_v37  ;;  %v5138_v37 = vld [vmem:[%s7771_s11 + $0x4e0] sm:$0xff] }
 0x62b   : > { %5013 = vst [vmem:[%s11424_s17 + $0xf68] sm:$0xff] %v5012_v14  ;;  %v5140_v14 = vld [vmem:[%s7771_s11 + $0x4e8] sm:$0xff] }
 0x62c   : > { %5015 = vst [vmem:[%s11424_s17 + $0xf70] sm:$0xff] %v5014_v25  ;;  %v5142_v25 = vld [vmem:[%s7771_s11 + $0x4f0] sm:$0xff] }
 0x62d   : > { %5017 = vst [vmem:[%s11424_s17 + $0xf78] sm:$0xff] %v5016_v55  ;;  %v5144_v55 = vld [vmem:[%s7771_s11 + $0x4f8] sm:$0xff] }
 0x62e   : > { %5019 = vst [vmem:[%s11424_s17 + $0xf80] sm:$0xff] %v5018_v32 }
 0x62f   : > { %5021 = vst [vmem:[%s11424_s17 + $0xf88] sm:$0xff] %v5020_v54 }
 0x630   : > { %5023 = vst [vmem:[%s11424_s17 + $0xf90] sm:$0xff] %v5022_v9 }
 0x631   : > { %5025 = vst [vmem:[%s11424_s17 + $0xf98] sm:$0xff] %v5024_v41 }
 0x632   : > { %5027 = vst [vmem:[%s11424_s17 + $0xfa0] sm:$0xff] %v5026_v28 }
 0x633   : > { %5029 = vst [vmem:[%s11424_s17 + $0xfa8] sm:$0xff] %v5028_v29 }
 0x634   : > { %5031 = vst [vmem:[%s11424_s17 + $0xfb0] sm:$0xff] %v5030_v2 }
 0x635   : > { %5033 = vst [vmem:[%s11424_s17 + $0xfb8] sm:$0xff] %v5032_v39 }
 0x636   : > { %5035 = vst [vmem:[%s11424_s17 + $0xfc0] sm:$0xff] %v5034_v56 }
 0x637   : > { %5037 = vst [vmem:[%s11424_s17 + $0xfc8] sm:$0xff] %v5036_v31 }
 0x638   : > { %5039 = vst [vmem:[%s11424_s17 + $0xfd0] sm:$0xff] %v5038_v38 }
 0x639   : > { %5041 = vst [vmem:[%s11424_s17 + $0xfd8] sm:$0xff] %v5040_v50 }
 0x63a   : > { %5043 = vst [vmem:[%s11424_s17 + $0xfe0] sm:$0xff] %v5042_v15 }
 0x63b   : > { %5045 = vst [vmem:[%s11424_s17 + $0xfe8] sm:$0xff] %v5044_v6 }
 0x63c   : > { %5047 = vst [vmem:[%s11424_s17 + $0xff0] sm:$0xff] %v5046_v24 }
 0x63d   : > { %5049 = vst [vmem:[%s11424_s17 + $0xff8] sm:$0xff] %v5048_v61 }
 0x63e   : > { %5051 = vst [vmem:[%s11424_s17 + $0x1000] sm:$0xff] %v5050_v53 }
 0x63f   : > { %5053 = vst [vmem:[%s11424_s17 + $0x1008] sm:$0xff] %v5052_v0 }
 0x640   : > { %5055 = vst [vmem:[%s11424_s17 + $0x1010] sm:$0xff] %v5054_v43 }
 0x641   : > { %5057 = vst [vmem:[%s11424_s17 + $0x1018] sm:$0xff] %v5056_v12 }
 0x642   : > { %5059 = vst [vmem:[%s11424_s17 + $0x1020] sm:$0xff] %v5058_v62 }
 0x643   : > { %5061 = vst [vmem:[%s11424_s17 + $0x1028] sm:$0xff] %v5060_v63 }
 0x644   : > { %5063 = vst [vmem:[%s11424_s17 + $0x1030] sm:$0xff] %v5062_v33 }
 0x645   : > { %5065 = vst [vmem:[%s11424_s17 + $0x1038] sm:$0xff] %v5064_v46 }
 0x646   : > { %5067 = vst [vmem:[%s11424_s17 + $0x1680] sm:$0xff] %v5066_v10 }
 0x647   : > { %5069 = vst [vmem:[%s11424_s17 + $0x1688] sm:$0xff] %v5068_v30 }
 0x648   : > { %5071 = vst [vmem:[%s11424_s17 + $0x1690] sm:$0xff] %v5070_v59 }
 0x649   : > { %5073 = vst [vmem:[%s11424_s17 + $0x1698] sm:$0xff] %v5072_v18 }
 0x64a   : > { %5075 = vst [vmem:[%s11424_s17 + $0x16a0] sm:$0xff] %v5074_v3 }
 0x64b   : > { %5077 = vst [vmem:[%s11424_s17 + $0x16a8] sm:$0xff] %v5076_v17 }
 0x64c   : > { %5079 = vst [vmem:[%s11424_s17 + $0x16b0] sm:$0xff] %v5078_v52 }
 0x64d   : > { %5081 = vst [vmem:[%s11424_s17 + $0x16b8] sm:$0xff] %v5080_v40 }
 0x64e   : > { %5083 = vst [vmem:[%s11424_s17 + $0x16c0] sm:$0xff] %v5082_v35 }
 0x64f   : > { %5085 = vst [vmem:[%s11424_s17 + $0x16c8] sm:$0xff] %v5084_v34 }
 0x650   : > { %5087 = vst [vmem:[%s11424_s17 + $0x16d0] sm:$0xff] %v5086_v22 }
 0x651   : > { %5089 = vst [vmem:[%s11424_s17 + $0x16d8] sm:$0xff] %v5088_v13 }
 0x652   : > { %5091 = vst [vmem:[%s11424_s17 + $0x16e0] sm:$0xff] %v5090_v8 }
 0x653   : > { %5093 = vst [vmem:[%s11424_s17 + $0x16e8] sm:$0xff] %v5092_v11 }
 0x654   : > { %5095 = vst [vmem:[%s11424_s17 + $0x16f0] sm:$0xff] %v5094_v19 }
 0x655   : > { %5097 = vst [vmem:[%s11424_s17 + $0x16f8] sm:$0xff] %v5096_v5 }
 0x656   : > { %5099 = vst [vmem:[%s11424_s17 + $0x1700] sm:$0xff] %v5098_v21 }
 0x657   : > { %5101 = vst [vmem:[%s11424_s17 + $0x1708] sm:$0xff] %v5100_v44 }
 0x658   : > { %5103 = vst [vmem:[%s11424_s17 + $0x1710] sm:$0xff] %v5102_v60 }
 0x659   : > { %5105 = vst [vmem:[%s11424_s17 + $0x1718] sm:$0xff] %v5104_v26 }
 0x65a   : > { %5107 = vst [vmem:[%s11424_s17 + $0x1720] sm:$0xff] %v5106_v49 }
 0x65b   : > { %5109 = vst [vmem:[%s11424_s17 + $0x1728] sm:$0xff] %v5108_v27 }
 0x65c   : > { %5111 = vst [vmem:[%s11424_s17 + $0x1730] sm:$0xff] %v5110_v48 }
 0x65d   : > { %5113 = vst [vmem:[%s11424_s17 + $0x1738] sm:$0xff] %v5112_v57 }
 0x65e   : > { %5115 = vst [vmem:[%s11424_s17 + $0x1740] sm:$0xff] %v5114_v36 }
 0x65f   : > { %5117 = vst [vmem:[%s11424_s17 + $0x1748] sm:$0xff] %v5116_v47 }
 0x660   : > { %5119 = vst [vmem:[%s11424_s17 + $0x1750] sm:$0xff] %v5118_v7 }
 0x661   : > { %5121 = vst [vmem:[%s11424_s17 + $0x1758] sm:$0xff] %v5120_v23 }
 0x662   : > { %5123 = vst [vmem:[%s11424_s17 + $0x1760] sm:$0xff] %v5122_v1 }
 0x663   : > { %5125 = vst [vmem:[%s11424_s17 + $0x1768] sm:$0xff] %v5124_v42 }
 0x664   : > { %5127 = vst [vmem:[%s11424_s17 + $0x1770] sm:$0xff] %v5126_v58 }
 0x665   : > { %5129 = vst [vmem:[%s11424_s17 + $0x1778] sm:$0xff] %v5128_v20 }
 0x666   : > { %5131 = vst [vmem:[%s11424_s17 + $0x1780] sm:$0xff] %v5130_v4 }
 0x667   : > { %5133 = vst [vmem:[%s11424_s17 + $0x1788] sm:$0xff] %v5132_v16 }
 0x668   : > { %5135 = vst [vmem:[%s11424_s17 + $0x1790] sm:$0xff] %v5134_v45 }
 0x669   : > { %5137 = vst [vmem:[%s11424_s17 + $0x1798] sm:$0xff] %v5136_v51 }
 0x66a   : > { %5139 = vst [vmem:[%s11424_s17 + $0x17a0] sm:$0xff] %v5138_v37 }
 0x66b   : > { %5141 = vst [vmem:[%s11424_s17 + $0x17a8] sm:$0xff] %v5140_v14 }
 0x66c   : > { %5143 = vst [vmem:[%s11424_s17 + $0x17b0] sm:$0xff] %v5142_v25 }
 0x66d   : > { %5145 = vst [vmem:[%s11424_s17 + $0x17b8] sm:$0xff] %v5144_v55 }
 0x66e PF: > { %s5157_s7 = sshll.u32 %s11771_s5, 4  ;;  %s7629_s1 = smov [#allocation11]   ;;  %s5158_s7 = int_to_ptr.hbm [resolvable:$true] %s5157_s7 }
 0x66f   : > { %s5155_s27 = sshll.u32 %s7629_s1, 4  ;;  %s5156_s27 = int_to_ptr.vmem [resolvable:$true] %s5155_s27 }
 0x670   : > { %6894 = dma.vmem_to_hbm [thread:$0]  (%p135_p6), %s5156_s27, 16, %s5158_s7, [#allocation7]  }
 0x671   : > { %7602 = dma.done.wait (%p135_p6), [#allocation7], 16  }
 0x672   : > { %7604 = vsyncadd (%p135_p6), [#allocation7], 4294967280 }
 0x673 PF: > { %p20_p9 = scmp.ge.s32.totalorder %s7682_s23, 8   ;;  %s12370_s18 = smov %s7611_s19 }
 0x674   : > { %s12371_s19 = smov %s7615_s20  ;;  %s12372_s20 = smov %s7692_s26 }
 0x675   : > { %s12373_s21 = smov %s7682_s23  ;;  %22 = sbr.rel (!%p20_p9) target bundleno = 8 (0x8), region = 129 }
 0x67a   :  { %5178 = vsyncpa [#allocation6], 1 }
 0x67b   :  { %5180 = vsyncpa [#allocation6 + $0x1], 1 }
 0x67c   :  { %5181 = vsyncpa [#allocation9], 1 }
 0x67d   :  { %5183 = vsyncpa [#allocation9 + $0x1], 1 }
 0x67e   :  { %5184 = vsyncpa [#allocation7], 1 }
 0x67f   :  { %5186 = vsyncpa [#allocation7 + $0x1], 1 }

</bundles_post_ra>
